<compile_context>
chip_gen: v7x
topology: tpu7x:2x2x1
jax: 0.10.0
libtpu: 0.0.40
codegen_flags: <defaults>
</compile_context>

<pallas_src>
import functools

import jax
import jax.numpy as jnp
import numpy as np
from jax.experimental import pallas as pl
from jax.experimental.pallas import tpu as pltpu


# ----------------------------------------------------------------------------
# Fused TwoCnn forward kernel: one batch tile (TB samples) per grid step.
# ----------------------------------------------------------------------------
def _two_cnn_kernel(spec_ref, xe_ref, xo_ref,
                    wse1_ref, sse1_ref, wse2_ref, sse2_ref,
                    wsa1_ref, ssa1_ref, wsa2_ref, ssa2_ref,
                    fc1se_ref, fc1sa_ref, b1_ref, fc2_ref, b2_ref,
                    out_ref):
    f32 = jnp.float32
    tb = spec_ref.shape[0]
    sew = wse1_ref.shape[1]                 # 20 * bands

    # -------- SeBranch ------------------------------------------------------
    # conv1 + folded BN + ReLU as one matmul (pad/im2col folded into wse1).
    z1 = jnp.dot(spec_ref[...], wse1_ref[...], preferred_element_type=f32)
    z1 = jnp.maximum(z1 + sse1_ref[...], 0.0)                 # (TB, 20*bands)

    # MaxPool1d(5,5) as a shifted-window max; valid pooled values live at
    # lanes c*bands + 5q and are the only rows with nonzero weight in wse2.
    z1p = jnp.concatenate([z1, jnp.zeros((tb, 4), f32)], axis=1)
    mm = z1
    for r in range(1, 5):
        mm = jnp.maximum(mm, z1p[:, r:r + sew])

    # pool-select + F.pad([8,7]) + conv2 + BN + ReLU as one matmul.
    se = jnp.dot(mm, wse2_ref[...], preferred_element_type=f32)
    se = jnp.maximum(se + sse2_ref[...], 0.0)                 # (TB, 20*L1)

    # -------- SaBranch ------------------------------------------------------
    # conv1 + BN + ReLU: one matmul row per (pooled row h, sample b).  The 4
    # input row-slabs are leading-dim slices of the even/odd padded-row views.
    xe = xe_ref[...]                                          # (11, TB, 22)
    xo = xo_ref[...]                                          # (11, TB, 22)
    a1 = jnp.concatenate([xe[0:10], xo[0:10], xe[1:11], xo[1:11]],
                         axis=-1)                             # (10, TB, 88)
    a1 = a1.reshape(10 * tb, 88)                              # rows: h*TB + b
    z = jnp.dot(a1, wsa1_ref[...], preferred_element_type=f32)
    z = jnp.maximum(z + ssa1_ref[...], 0.0)                   # (10*TB, 1200)

    # MaxPool2d(2,2): the 4 window elements are 4 contiguous 300-lane blocks.
    p1 = jnp.maximum(jnp.maximum(z[:, 0:300], z[:, 300:600]),
                     jnp.maximum(z[:, 600:900], z[:, 900:1200]))  # (10*TB, 300)

    # conv2 im2col rows: [pooled row i-1 | i | i+1], each zero col-padded to 12
    # cols.  Row order i*TB + b makes the +-1-row neighbours aligned +-TB row
    # shifts whose zero fill is exactly the i==0 / i==9 boundary.
    zc = jnp.zeros((10 * tb, 30), f32)
    p1p = jnp.concatenate([zc, p1, zc], axis=1)               # (10*TB, 360)
    zb = jnp.zeros((tb, 360), f32)
    prv = jnp.concatenate([zb, p1p[0:9 * tb, :]], axis=0)     # pooled row i-1
    nxt = jnp.concatenate([p1p[tb:10 * tb, :], zb], axis=0)   # pooled row i+1
    a2 = jnp.concatenate([prv, p1p, nxt], axis=1)             # (10*TB, 1080)

    z2 = jnp.dot(a2, wsa2_ref[...], preferred_element_type=f32)
    z2 = jnp.maximum(z2 + ssa2_ref[...], 0.0)                 # (10*TB, 300)

    # Per-sample flatten (i, j, c) -> lanes via 10 aligned contiguous slices.
    sa = jnp.concatenate([z2[i * tb:(i + 1) * tb, :] for i in range(10)],
                         axis=1)                              # (TB, 3000)

    # -------- fusion + classifier (fc1 pre-split & pre-permuted offline) ----
    h = (jnp.dot(se, fc1se_ref[...], preferred_element_type=f32)
         + jnp.dot(sa, fc1sa_ref[...], preferred_element_type=f32)
         + b1_ref[...])
    h = jnp.maximum(h, 0.0)
    out = jnp.dot(h, fc2_ref[...], preferred_element_type=f32) + b2_ref[...]
    out_ref[...] = out.astype(out_ref.dtype)


@functools.partial(jax.jit, static_argnames=("tb",))
def two_cnn_forward(spectra, neighbor_region, kp, tb=8):
    assert tb % 8 == 0
    B = spectra.shape[0]
    bands = spectra.shape[-1]
    nc = kp["fc2"].shape[1]

    spec = spectra.reshape(B, bands)
    reg = neighbor_region.reshape(B, 21, 21)
    # SaBranch conv1 only needs top/left zero padding for the 20x20 region the
    # floor-mode 2x2 pool consumes; split padded rows into even/odd views so
    # the kernel's row-pair im2col is plain leading-dim slicing.
    xp = jnp.pad(reg, ((0, 0), (1, 0), (1, 0)))               # (B, 22, 22)
    xe = jnp.transpose(xp[:, 0::2, :], (1, 0, 2))             # (11, B, 22)
    xo = jnp.transpose(xp[:, 1::2, :], (1, 0, 2))             # (11, B, 22)

    bp = ((B + tb - 1) // tb) * tb
    if bp != B:
        spec = jnp.pad(spec, ((0, bp - B), (0, 0)))
        xe = jnp.pad(xe, ((0, 0), (0, bp - B), (0, 0)))
        xo = jnp.pad(xo, ((0, 0), (0, bp - B), (0, 0)))

    wkeys = ("wse1", "sse1", "wse2", "sse2", "wsa1", "ssa1", "wsa2", "ssa2",
             "fc1se", "fc1sa", "b1", "fc2", "b2")
    w_specs = [pl.BlockSpec(kp[k].shape, lambda t: (0, 0)) for k in wkeys]

    logits = pl.pallas_call(
        _two_cnn_kernel,
        out_shape=jax.ShapeDtypeStruct((bp, nc), jnp.float32),
        grid=(bp // tb,),
        in_specs=[
            pl.BlockSpec((tb, bands), lambda t: (t, 0)),
            pl.BlockSpec((11, tb, 22), lambda t: (0, t, 0)),
            pl.BlockSpec((11, tb, 22), lambda t: (0, t, 0)),
        ] + w_specs,
        out_specs=pl.BlockSpec((tb, nc), lambda t: (t, 0)),
        compiler_params=pltpu.CompilerParams(
            dimension_semantics=("parallel",),
            vmem_limit_bytes=48 * 1024 * 1024),
    )(spec, xe, xo, *[kp[k] for k in wkeys])
    return logits[:B]


# ----------------------------------------------------------------------------
# Parameters (deterministic, PyTorch layout) + one-time offline folding.
# ----------------------------------------------------------------------------
def _bn_params(n, off):
    gamma = 1.0 + 0.05 * jnp.arange(n, dtype=jnp.float32) / n
    beta = 0.02 * (jnp.arange(n, dtype=jnp.float32) - n / 2) / n
    mean = 0.01 * jnp.arange(n, dtype=jnp.float32) / n + off
    var = 1.0 + 0.1 * jnp.arange(n, dtype=jnp.float32) / n
    return gamma, beta, mean, var


def init_params(key, bands, nc):
    ks = jax.random.split(key, 12)
    nrm = lambda k, shape, s=0.1: s * jax.random.normal(k, shape, jnp.float32)
    fusion_size = bands // 5 * 20 + (21 // 2) ** 2 * 30
    p = {}
    p["se_w1"], p["se_b1"] = nrm(ks[0], (20, 1, 16)), nrm(ks[1], (20,))
    p["se_bn1_g"], p["se_bn1_b"], p["se_bn1_m"], p["se_bn1_v"] = _bn_params(20, 0.01)
    p["se_w2"], p["se_b2"] = nrm(ks[2], (20, 20, 16)), nrm(ks[3], (20,))
    p["se_bn2_g"], p["se_bn2_b"], p["se_bn2_m"], p["se_bn2_v"] = _bn_params(20, -0.01)
    p["sa_w1"], p["sa_b1"] = nrm(ks[4], (30, 1, 3, 3)), nrm(ks[5], (30,))
    p["sa_bn1_g"], p["sa_bn1_b"], p["sa_bn1_m"], p["sa_bn1_v"] = _bn_params(30, 0.02)
    p["sa_w2"], p["sa_b2"] = nrm(ks[6], (30, 30, 3, 3)), nrm(ks[7], (30,))
    p["sa_bn2_g"], p["sa_bn2_b"], p["sa_bn2_m"], p["sa_bn2_v"] = _bn_params(30, -0.02)
    p["fc1_w"], p["fc1_b"] = nrm(ks[8], (400, fusion_size), 0.02), nrm(ks[9], (400,))
    p["fc2_w"], p["fc2_b"] = nrm(ks[10], (nc, 400), 0.05), nrm(ks[11], (nc,))
    return p


def _fold_bn(bias, gamma, beta, mean, var, eps=1e-5):
    scale = gamma / np.sqrt(var + eps)
    shift = beta + (bias - mean) * scale
    return scale, shift


def prepare_params(p, bands):
    """Fold BN + conv structure (pad / im2col / pool-select) into dense matmul
    operands, on the host, once."""
    P = {k: np.asarray(v, dtype=np.float32) for k, v in p.items()}
    L1 = bands // 5
    sew = 20 * bands          # SE conv1 flat width (lane index c*bands + l)
    seo = 20 * L1             # SE branch feature count

    # ---- SE conv1 + BN  ->  (bands, 20*bands) ----
    s1, t1 = _fold_bn(P["se_b1"], P["se_bn1_g"], P["se_bn1_b"],
                      P["se_bn1_m"], P["se_bn1_v"])
    w1 = P["se_w1"]                                       # (20, 1, 16)
    wse1 = np.zeros((bands, sew), np.float32)
    for c in range(20):
        for l in range(bands):
            for k in range(16):
                i = l + k - 8                              # F.pad([8, 7]) geometry
                if 0 <= i < bands:
                    wse1[i, c * bands + l] += s1[c] * w1[c, 0, k]
    sse1 = np.repeat(t1, bands).reshape(1, sew)

    # ---- SE pool-select + pad + conv2 + BN  ->  (20*bands, 20*L1) ----
    s2, t2 = _fold_bn(P["se_b2"], P["se_bn2_g"], P["se_bn2_b"],
                      P["se_bn2_m"], P["se_bn2_v"])
    w2 = P["se_w2"]                                       # (20, 20, 16)
    wse2 = np.zeros((sew, seo), np.float32)
    for co in range(20):
        for pp in range(L1):
            for ci in range(20):
                for q in range(L1):
                    k = q - pp + 8
                    if 0 <= k < 16:
                        wse2[ci * bands + 5 * q, co * L1 + pp] += s2[co] * w2[co, ci, k]
    sse2 = np.repeat(t2, L1).reshape(1, seo)

    # ---- SA conv1 + BN, two conv rows (= one pooled row) per matmul row ----
    # in: 4 padded input rows x 22 cols; out: (window elem w, pooled col q, ch c)
    s1a, t1a = _fold_bn(P["sa_b1"], P["sa_bn1_g"], P["sa_bn1_b"],
                        P["sa_bn1_m"], P["sa_bn1_v"])
    wa1 = P["sa_w1"][:, 0] * s1a[:, None, None]           # (30, 3, 3)
    wsa1 = np.zeros((88, 1200), np.float32)
    for wr in range(2):
        for ws in range(2):
            w = 2 * wr + ws
            for di in range(3):
                for dj in range(3):
                    for q in range(10):
                        f = (wr + di) * 22 + (2 * q + ws + dj)
                        o0 = w * 300 + q * 30
                        wsa1[f, o0:o0 + 30] += wa1[:, di, dj]
    ssa1 = np.tile(t1a, 40).reshape(1, 1200)

    # ---- SA conv2 + BN, one output row per matmul row ----
    # in: 3 padded pooled rows x 12 cols x 30 ch; out: (col j, channel co)
    s2a, t2a = _fold_bn(P["sa_b2"], P["sa_bn2_g"], P["sa_bn2_b"],
                        P["sa_bn2_m"], P["sa_bn2_v"])
    wa2 = P["sa_w2"] * s2a[:, None, None, None]           # (30, 30, 3, 3)
    wsa2 = np.zeros((1080, 300), np.float32)
    for di in range(3):
        for dj in range(3):
            blk = wa2[:, :, di, dj].T                     # (ci, co)
            for j in range(10):
                g0 = di * 360 + (j + dj) * 30
                wsa2[g0:g0 + 30, j * 30:j * 30 + 30] += blk
    ssa2 = np.tile(t2a, 10).reshape(1, 300)

    # ---- classifier: split fc1, pre-permute the SA block to the kernel's
    #      (row i, col j, channel co) feature order ----
    fc1t = P["fc1_w"].T                                   # (fusion, 400)
    fc1se = np.ascontiguousarray(fc1t[:seo, :])
    fc1sa_t = fc1t[seo:, :]                               # torch order co*100 + i*10 + j
    perm = np.empty((3000,), np.int64)
    for i in range(10):
        for j in range(10):
            for co in range(30):
                perm[i * 300 + j * 30 + co] = co * 100 + i * 10 + j
    fc1sa = np.ascontiguousarray(fc1sa_t[perm, :])

    kp = dict(wse1=wse1, sse1=sse1, wse2=wse2, sse2=sse2,
              wsa1=wsa1, ssa1=ssa1, wsa2=wsa2, ssa2=ssa2,
              fc1se=fc1se, fc1sa=fc1sa,
              b1=P["fc1_b"].reshape(1, -1),
              fc2=np.ascontiguousarray(P["fc2_w"].T),
              b2=P["fc2_b"].reshape(1, -1))
    return {k: jnp.asarray(v) for k, v in kp.items()}


# ----------------------------------------------------------------------------
if __name__ == "__main__":
    bands, nc, B = 40, 9, 2                     # bands divisible by 5; region 21x21
    key = jax.random.PRNGKey(0)
    k_spec, k_reg, k_par = jax.random.split(key, 3)
    spectra = jax.random.normal(k_spec, (B, 1, bands), jnp.float32)
    neighbor_region = jax.random.normal(k_reg, (B, 1, 21, 21), jnp.float32)
    params = prepare_params(init_params(k_par, bands, nc), bands)

    logits = jax.block_until_ready(two_cnn_forward(spectra, neighbor_region, params))
    assert logits.shape == (B, nc) and logits.dtype == jnp.float32
    print("KERNEL_OK")
</pallas_src>

<mosaic_0001>
module attributes {stable_mosaic.version = 11 : i64} {
  func.func @_two_cnn_kernel(%arg0: i32, %arg1: memref<8x40xf32, #tpu.memory_space<vmem>>, %arg2: memref<11x8x22xf32, #tpu.memory_space<vmem>>, %arg3: memref<11x8x22xf32, #tpu.memory_space<vmem>>, %arg4: memref<40x800xf32, #tpu.memory_space<vmem>>, %arg5: memref<1x800xf32, #tpu.memory_space<vmem>>, %arg6: memref<800x160xf32, #tpu.memory_space<vmem>>, %arg7: memref<1x160xf32, #tpu.memory_space<vmem>>, %arg8: memref<88x1200xf32, #tpu.memory_space<vmem>>, %arg9: memref<1x1200xf32, #tpu.memory_space<vmem>>, %arg10: memref<1080x300xf32, #tpu.memory_space<vmem>>, %arg11: memref<1x300xf32, #tpu.memory_space<vmem>>, %arg12: memref<160x400xf32, #tpu.memory_space<vmem>>, %arg13: memref<3000x400xf32, #tpu.memory_space<vmem>>, %arg14: memref<1x400xf32, #tpu.memory_space<vmem>>, %arg15: memref<400x9xf32, #tpu.memory_space<vmem>>, %arg16: memref<1x9xf32, #tpu.memory_space<vmem>>, %arg17: memref<8x9xf32, #tpu.memory_space<vmem>>) attributes {dimension_semantics = [#tpu.dimension_semantics<parallel>], iteration_bounds = array<i64: 1>, scalar_prefetch = 0 : i64, scratch_operands = 0 : i64, tpu.core_type = #tpu.core_type<tc>, window_params = [{transform_indices = @transform_0, window_bounds = array<i64: 8, 40>}, {transform_indices = @transform_1, window_bounds = array<i64: 11, 8, 22>}, {transform_indices = @transform_2, window_bounds = array<i64: 11, 8, 22>}, {pipeline_mode = #tpu.pipeline_mode<synchronous>, transform_indices = @transform_3, window_bounds = array<i64: 40, 800>}, {pipeline_mode = #tpu.pipeline_mode<synchronous>, transform_indices = @transform_4, window_bounds = array<i64: 1, 800>}, {pipeline_mode = #tpu.pipeline_mode<synchronous>, transform_indices = @transform_5, window_bounds = array<i64: 800, 160>}, {pipeline_mode = #tpu.pipeline_mode<synchronous>, transform_indices = @transform_6, window_bounds = array<i64: 1, 160>}, {pipeline_mode = #tpu.pipeline_mode<synchronous>, transform_indices = @transform_7, window_bounds = array<i64: 88, 1200>}, {pipeline_mode = #tpu.pipeline_mode<synchronous>, transform_indices = @transform_8, window_bounds = array<i64: 1, 1200>}, {pipeline_mode = #tpu.pipeline_mode<synchronous>, transform_indices = @transform_9, window_bounds = array<i64: 1080, 300>}, {pipeline_mode = #tpu.pipeline_mode<synchronous>, transform_indices = @transform_10, window_bounds = array<i64: 1, 300>}, {pipeline_mode = #tpu.pipeline_mode<synchronous>, transform_indices = @transform_11, window_bounds = array<i64: 160, 400>}, {pipeline_mode = #tpu.pipeline_mode<synchronous>, transform_indices = @transform_12, window_bounds = array<i64: 3000, 400>}, {pipeline_mode = #tpu.pipeline_mode<synchronous>, transform_indices = @transform_13, window_bounds = array<i64: 1, 400>}, {pipeline_mode = #tpu.pipeline_mode<synchronous>, transform_indices = @transform_14, window_bounds = array<i64: 400, 9>}, {pipeline_mode = #tpu.pipeline_mode<synchronous>, transform_indices = @transform_15, window_bounds = array<i64: 1, 9>}, {transform_indices = @transform_16, window_bounds = array<i64: 8, 9>}]} {
    %c0 = arith.constant 0 : index
    %c0_0 = arith.constant 0 : index
    %0 = vector.load %arg1[%c0, %c0_0] : memref<8x40xf32, #tpu.memory_space<vmem>>, vector<8x40xf32>
    %c0_1 = arith.constant 0 : index
    %c0_2 = arith.constant 0 : index
    %1 = vector.load %arg4[%c0_1, %c0_2] : memref<40x800xf32, #tpu.memory_space<vmem>>, vector<40x800xf32>
    %cst = arith.constant dense<0.000000e+00> : vector<8x800xf32>
    %2 = tpu.matmul %0, %1, %cst {dimension_numbers = #tpu.dot_dimension_numbers<[1], [0], [0], [1], [0, 0, 1, 1], [], []>} : vector<8x40xf32>, vector<40x800xf32>, vector<8x800xf32> -> vector<8x800xf32>
    %c0_3 = arith.constant 0 : index
    %c0_4 = arith.constant 0 : index
    %3 = vector.load %arg5[%c0_3, %c0_4] : memref<1x800xf32, #tpu.memory_space<vmem>>, vector<1x800xf32>
    %4 = vector.broadcast %3 : vector<1x800xf32> to vector<8x800xf32>
    %5 = arith.addf %2, %4 : vector<8x800xf32>
    %cst_5 = arith.constant 0.000000e+00 : f32
    %6 = vector.broadcast %cst_5 : f32 to vector<8x800xf32>
    %7 = arith.maximumf %5, %6 : vector<8x800xf32>
    %cst_6 = arith.constant 0.000000e+00 : f32
    %8 = vector.broadcast %cst_6 : f32 to vector<8x4xf32>
    %9 = tpu.concatenate %7, %8 in 1 : vector<8x800xf32>, vector<8x4xf32> -> vector<8x804xf32>
    %10 = vector.extract_strided_slice %9 {offsets = [0, 1], sizes = [8, 800], strides = [1, 1]} : vector<8x804xf32> to vector<8x800xf32>
    %11 = arith.maximumf %7, %10 : vector<8x800xf32>
    %12 = vector.extract_strided_slice %9 {offsets = [0, 2], sizes = [8, 800], strides = [1, 1]} : vector<8x804xf32> to vector<8x800xf32>
    %13 = arith.maximumf %11, %12 : vector<8x800xf32>
    %14 = vector.extract_strided_slice %9 {offsets = [0, 3], sizes = [8, 800], strides = [1, 1]} : vector<8x804xf32> to vector<8x800xf32>
    %15 = arith.maximumf %13, %14 : vector<8x800xf32>
    %16 = vector.extract_strided_slice %9 {offsets = [0, 4], sizes = [8, 800], strides = [1, 1]} : vector<8x804xf32> to vector<8x800xf32>
    %17 = arith.maximumf %15, %16 : vector<8x800xf32>
    %c0_7 = arith.constant 0 : index
    %c0_8 = arith.constant 0 : index
    %18 = vector.load %arg6[%c0_7, %c0_8] : memref<800x160xf32, #tpu.memory_space<vmem>>, vector<800x160xf32>
    %cst_9 = arith.constant dense<0.000000e+00> : vector<8x160xf32>
    %19 = tpu.matmul %17, %18, %cst_9 {dimension_numbers = #tpu.dot_dimension_numbers<[1], [0], [0], [1], [0, 0, 1, 1], [], []>} : vector<8x800xf32>, vector<800x160xf32>, vector<8x160xf32> -> vector<8x160xf32>
    %c0_10 = arith.constant 0 : index
    %c0_11 = arith.constant 0 : index
    %20 = vector.load %arg7[%c0_10, %c0_11] : memref<1x160xf32, #tpu.memory_space<vmem>>, vector<1x160xf32>
    %21 = vector.broadcast %20 : vector<1x160xf32> to vector<8x160xf32>
    %22 = arith.addf %19, %21 : vector<8x160xf32>
    %cst_12 = arith.constant 0.000000e+00 : f32
    %23 = vector.broadcast %cst_12 : f32 to vector<8x160xf32>
    %24 = arith.maximumf %22, %23 : vector<8x160xf32>
    %c0_13 = arith.constant 0 : index
    %c0_14 = arith.constant 0 : index
    %c0_15 = arith.constant 0 : index
    %25 = vector.load %arg2[%c0_13, %c0_14, %c0_15] : memref<11x8x22xf32, #tpu.memory_space<vmem>>, vector<11x8x22xf32>
    %c0_16 = arith.constant 0 : index
    %c0_17 = arith.constant 0 : index
    %c0_18 = arith.constant 0 : index
    %26 = vector.load %arg3[%c0_16, %c0_17, %c0_18] : memref<11x8x22xf32, #tpu.memory_space<vmem>>, vector<11x8x22xf32>
    %27 = vector.extract_strided_slice %25 {offsets = [0, 0, 0], sizes = [10, 8, 22], strides = [1, 1, 1]} : vector<11x8x22xf32> to vector<10x8x22xf32>
    %28 = vector.extract_strided_slice %26 {offsets = [0, 0, 0], sizes = [10, 8, 22], strides = [1, 1, 1]} : vector<11x8x22xf32> to vector<10x8x22xf32>
    %29 = vector.extract_strided_slice %25 {offsets = [1, 0, 0], sizes = [10, 8, 22], strides = [1, 1, 1]} : vector<11x8x22xf32> to vector<10x8x22xf32>
    %30 = vector.extract_strided_slice %26 {offsets = [1, 0, 0], sizes = [10, 8, 22], strides = [1, 1, 1]} : vector<11x8x22xf32> to vector<10x8x22xf32>
    %31 = tpu.concatenate %27, %28, %29, %30 in 2 : vector<10x8x22xf32>, vector<10x8x22xf32>, vector<10x8x22xf32>, vector<10x8x22xf32> -> vector<10x8x88xf32>
    %32 = vector.shape_cast %31 : vector<10x8x88xf32> to vector<80x88xf32>
    %c0_19 = arith.constant 0 : index
    %c0_20 = arith.constant 0 : index
    %33 = vector.load %arg8[%c0_19, %c0_20] : memref<88x1200xf32, #tpu.memory_space<vmem>>, vector<88x1200xf32>
    %cst_21 = arith.constant dense<0.000000e+00> : vector<80x1200xf32>
    %34 = tpu.matmul %32, %33, %cst_21 {dimension_numbers = #tpu.dot_dimension_numbers<[1], [0], [0], [1], [0, 0, 1, 1], [], []>} : vector<80x88xf32>, vector<88x1200xf32>, vector<80x1200xf32> -> vector<80x1200xf32>
    %c0_22 = arith.constant 0 : index
    %c0_23 = arith.constant 0 : index
    %35 = vector.load %arg9[%c0_22, %c0_23] : memref<1x1200xf32, #tpu.memory_space<vmem>>, vector<1x1200xf32>
    %36 = vector.broadcast %35 : vector<1x1200xf32> to vector<80x1200xf32>
    %37 = arith.addf %34, %36 : vector<80x1200xf32>
    %cst_24 = arith.constant 0.000000e+00 : f32
    %38 = vector.broadcast %cst_24 : f32 to vector<80x1200xf32>
    %39 = arith.maximumf %37, %38 : vector<80x1200xf32>
    %40 = vector.extract_strided_slice %39 {offsets = [0, 0], sizes = [80, 300], strides = [1, 1]} : vector<80x1200xf32> to vector<80x300xf32>
    %41 = vector.extract_strided_slice %39 {offsets = [0, 300], sizes = [80, 300], strides = [1, 1]} : vector<80x1200xf32> to vector<80x300xf32>
    %42 = arith.maximumf %40, %41 : vector<80x300xf32>
    %43 = vector.extract_strided_slice %39 {offsets = [0, 600], sizes = [80, 300], strides = [1, 1]} : vector<80x1200xf32> to vector<80x300xf32>
    %44 = vector.extract_strided_slice %39 {offsets = [0, 900], sizes = [80, 300], strides = [1, 1]} : vector<80x1200xf32> to vector<80x300xf32>
    %45 = arith.maximumf %43, %44 : vector<80x300xf32>
    %46 = arith.maximumf %42, %45 : vector<80x300xf32>
    %cst_25 = arith.constant 0.000000e+00 : f32
    %47 = vector.broadcast %cst_25 : f32 to vector<80x30xf32>
    %48 = tpu.concatenate %47, %46, %47 in 1 : vector<80x30xf32>, vector<80x300xf32>, vector<80x30xf32> -> vector<80x360xf32>
    %cst_26 = arith.constant 0.000000e+00 : f32
    %49 = vector.broadcast %cst_26 : f32 to vector<8x360xf32>
    %50 = vector.extract_strided_slice %48 {offsets = [0, 0], sizes = [72, 360], strides = [1, 1]} : vector<80x360xf32> to vector<72x360xf32>
    %51 = tpu.concatenate %49, %50 in 0 : vector<8x360xf32>, vector<72x360xf32> -> vector<80x360xf32>
    %52 = vector.extract_strided_slice %48 {offsets = [8, 0], sizes = [72, 360], strides = [1, 1]} : vector<80x360xf32> to vector<72x360xf32>
    %53 = tpu.concatenate %52, %49 in 0 : vector<72x360xf32>, vector<8x360xf32> -> vector<80x360xf32>
    %54 = tpu.concatenate %51, %48, %53 in 1 : vector<80x360xf32>, vector<80x360xf32>, vector<80x360xf32> -> vector<80x1080xf32>
    %c0_27 = arith.constant 0 : index
    %c0_28 = arith.constant 0 : index
    %55 = vector.load %arg10[%c0_27, %c0_28] : memref<1080x300xf32, #tpu.memory_space<vmem>>, vector<1080x300xf32>
    %cst_29 = arith.constant dense<0.000000e+00> : vector<80x300xf32>
    %56 = tpu.matmul %54, %55, %cst_29 {dimension_numbers = #tpu.dot_dimension_numbers<[1], [0], [0], [1], [0, 0, 1, 1], [], []>} : vector<80x1080xf32>, vector<1080x300xf32>, vector<80x300xf32> -> vector<80x300xf32>
    %c0_30 = arith.constant 0 : index
    %c0_31 = arith.constant 0 : index
    %57 = vector.load %arg11[%c0_30, %c0_31] : memref<1x300xf32, #tpu.memory_space<vmem>>, vector<1x300xf32>
    %58 = vector.broadcast %57 : vector<1x300xf32> to vector<80x300xf32>
    %59 = arith.addf %56, %58 : vector<80x300xf32>
    %cst_32 = arith.constant 0.000000e+00 : f32
    %60 = vector.broadcast %cst_32 : f32 to vector<80x300xf32>
    %61 = arith.maximumf %59, %60 : vector<80x300xf32>
    %62 = vector.extract_strided_slice %61 {offsets = [0, 0], sizes = [8, 300], strides = [1, 1]} : vector<80x300xf32> to vector<8x300xf32>
    %63 = vector.extract_strided_slice %61 {offsets = [8, 0], sizes = [8, 300], strides = [1, 1]} : vector<80x300xf32> to vector<8x300xf32>
    %64 = vector.extract_strided_slice %61 {offsets = [16, 0], sizes = [8, 300], strides = [1, 1]} : vector<80x300xf32> to vector<8x300xf32>
    %65 = vector.extract_strided_slice %61 {offsets = [24, 0], sizes = [8, 300], strides = [1, 1]} : vector<80x300xf32> to vector<8x300xf32>
    %66 = vector.extract_strided_slice %61 {offsets = [32, 0], sizes = [8, 300], strides = [1, 1]} : vector<80x300xf32> to vector<8x300xf32>
    %67 = vector.extract_strided_slice %61 {offsets = [40, 0], sizes = [8, 300], strides = [1, 1]} : vector<80x300xf32> to vector<8x300xf32>
    %68 = vector.extract_strided_slice %61 {offsets = [48, 0], sizes = [8, 300], strides = [1, 1]} : vector<80x300xf32> to vector<8x300xf32>
    %69 = vector.extract_strided_slice %61 {offsets = [56, 0], sizes = [8, 300], strides = [1, 1]} : vector<80x300xf32> to vector<8x300xf32>
    %70 = vector.extract_strided_slice %61 {offsets = [64, 0], sizes = [8, 300], strides = [1, 1]} : vector<80x300xf32> to vector<8x300xf32>
    %71 = vector.extract_strided_slice %61 {offsets = [72, 0], sizes = [8, 300], strides = [1, 1]} : vector<80x300xf32> to vector<8x300xf32>
    %72 = tpu.concatenate %62, %63, %64, %65, %66, %67, %68, %69, %70, %71 in 1 : vector<8x300xf32>, vector<8x300xf32>, vector<8x300xf32>, vector<8x300xf32>, vector<8x300xf32>, vector<8x300xf32>, vector<8x300xf32>, vector<8x300xf32>, vector<8x300xf32>, vector<8x300xf32> -> vector<8x3000xf32>
    %c0_33 = arith.constant 0 : index
    %c0_34 = arith.constant 0 : index
    %73 = vector.load %arg12[%c0_33, %c0_34] : memref<160x400xf32, #tpu.memory_space<vmem>>, vector<160x400xf32>
    %cst_35 = arith.constant dense<0.000000e+00> : vector<8x400xf32>
    %74 = tpu.matmul %24, %73, %cst_35 {dimension_numbers = #tpu.dot_dimension_numbers<[1], [0], [0], [1], [0, 0, 1, 1], [], []>} : vector<8x160xf32>, vector<160x400xf32>, vector<8x400xf32> -> vector<8x400xf32>
    %c0_36 = arith.constant 0 : index
    %c0_37 = arith.constant 0 : index
    %75 = vector.load %arg13[%c0_36, %c0_37] : memref<3000x400xf32, #tpu.memory_space<vmem>>, vector<3000x400xf32>
    %cst_38 = arith.constant dense<0.000000e+00> : vector<8x400xf32>
    %76 = tpu.matmul %72, %75, %cst_38 {dimension_numbers = #tpu.dot_dimension_numbers<[1], [0], [0], [1], [0, 0, 1, 1], [], []>} : vector<8x3000xf32>, vector<3000x400xf32>, vector<8x400xf32> -> vector<8x400xf32>
    %77 = arith.addf %74, %76 : vector<8x400xf32>
    %c0_39 = arith.constant 0 : index
    %c0_40 = arith.constant 0 : index
    %78 = vector.load %arg14[%c0_39, %c0_40] : memref<1x400xf32, #tpu.memory_space<vmem>>, vector<1x400xf32>
    %79 = vector.broadcast %78 : vector<1x400xf32> to vector<8x400xf32>
    %80 = arith.addf %77, %79 : vector<8x400xf32>
    %cst_41 = arith.constant 0.000000e+00 : f32
    %81 = vector.broadcast %cst_41 : f32 to vector<8x400xf32>
    %82 = arith.maximumf %80, %81 : vector<8x400xf32>
    %c0_42 = arith.constant 0 : index
    %c0_43 = arith.constant 0 : index
    %83 = vector.load %arg15[%c0_42, %c0_43] : memref<400x9xf32, #tpu.memory_space<vmem>>, vector<400x9xf32>
    %cst_44 = arith.constant dense<0.000000e+00> : vector<8x9xf32>
    %84 = tpu.matmul %82, %83, %cst_44 {dimension_numbers = #tpu.dot_dimension_numbers<[1], [0], [0], [1], [0, 0, 1, 1], [], []>} : vector<8x400xf32>, vector<400x9xf32>, vector<8x9xf32> -> vector<8x9xf32>
    %c0_45 = arith.constant 0 : index
    %c0_46 = arith.constant 0 : index
    %85 = vector.load %arg16[%c0_45, %c0_46] : memref<1x9xf32, #tpu.memory_space<vmem>>, vector<1x9xf32>
    %86 = vector.broadcast %85 : vector<1x9xf32> to vector<8x9xf32>
    %87 = arith.addf %84, %86 : vector<8x9xf32>
    %c0_47 = arith.constant 0 : index
    %c0_48 = arith.constant 0 : index
    %88 = vector.load %arg17[%c0_47, %c0_48] : memref<8x9xf32, #tpu.memory_space<vmem>>, vector<8x9xf32>
    tpu.vector_store %arg17[%c0_47, %c0_48], %87 {strides = array<i32>} : memref<8x9xf32, #tpu.memory_space<vmem>>, vector<8x9xf32>,
    return
  }
  func.func @transform_0(%arg0: i32) -> (i32, i32) {
    %c0_i32 = arith.constant 0 : i32
    %c0_i32_0 = arith.constant 0 : i32
    return %arg0, %c0_i32 : i32, i32
  }
  func.func @transform_1(%arg0: i32) -> (i32, i32, i32) {
    %c0_i32 = arith.constant 0 : i32
    %c0_i32_0 = arith.constant 0 : i32
    %c0_i32_1 = arith.constant 0 : i32
    return %c0_i32, %arg0, %c0_i32_0 : i32, i32, i32
  }
  func.func @transform_2(%arg0: i32) -> (i32, i32, i32) {
    %c0_i32 = arith.constant 0 : i32
    %c0_i32_0 = arith.constant 0 : i32
    %c0_i32_1 = arith.constant 0 : i32
    return %c0_i32, %arg0, %c0_i32_0 : i32, i32, i32
  }
  func.func @transform_3(%arg0: i32) -> (i32, i32) {
    %c0_i32 = arith.constant 0 : i32
    %c0_i32_0 = arith.constant 0 : i32
    %c0_i32_1 = arith.constant 0 : i32
    return %c0_i32, %c0_i32_0 : i32, i32
  }
  func.func @transform_4(%arg0: i32) -> (i32, i32) {
    %c0_i32 = arith.constant 0 : i32
    %c0_i32_0 = arith.constant 0 : i32
    %c0_i32_1 = arith.constant 0 : i32
    return %c0_i32, %c0_i32_0 : i32, i32
  }
  func.func @transform_5(%arg0: i32) -> (i32, i32) {
    %c0_i32 = arith.constant 0 : i32
    %c0_i32_0 = arith.constant 0 : i32
    %c0_i32_1 = arith.constant 0 : i32
    return %c0_i32, %c0_i32_0 : i32, i32
  }
  func.func @transform_6(%arg0: i32) -> (i32, i32) {
    %c0_i32 = arith.constant 0 : i32
    %c0_i32_0 = arith.constant 0 : i32
    %c0_i32_1 = arith.constant 0 : i32
    return %c0_i32, %c0_i32_0 : i32, i32
  }
  func.func @transform_7(%arg0: i32) -> (i32, i32) {
    %c0_i32 = arith.constant 0 : i32
    %c0_i32_0 = arith.constant 0 : i32
    %c0_i32_1 = arith.constant 0 : i32
    return %c0_i32, %c0_i32_0 : i32, i32
  }
  func.func @transform_8(%arg0: i32) -> (i32, i32) {
    %c0_i32 = arith.constant 0 : i32
    %c0_i32_0 = arith.constant 0 : i32
    %c0_i32_1 = arith.constant 0 : i32
    return %c0_i32, %c0_i32_0 : i32, i32
  }
  func.func @transform_9(%arg0: i32) -> (i32, i32) {
    %c0_i32 = arith.constant 0 : i32
    %c0_i32_0 = arith.constant 0 : i32
    %c0_i32_1 = arith.constant 0 : i32
    return %c0_i32, %c0_i32_0 : i32, i32
  }
  func.func @transform_10(%arg0: i32) -> (i32, i32) {
    %c0_i32 = arith.constant 0 : i32
    %c0_i32_0 = arith.constant 0 : i32
    %c0_i32_1 = arith.constant 0 : i32
    return %c0_i32, %c0_i32_0 : i32, i32
  }
  func.func @transform_11(%arg0: i32) -> (i32, i32) {
    %c0_i32 = arith.constant 0 : i32
    %c0_i32_0 = arith.constant 0 : i32
    %c0_i32_1 = arith.constant 0 : i32
    return %c0_i32, %c0_i32_0 : i32, i32
  }
  func.func @transform_12(%arg0: i32) -> (i32, i32) {
    %c0_i32 = arith.constant 0 : i32
    %c0_i32_0 = arith.constant 0 : i32
    %c0_i32_1 = arith.constant 0 : i32
    return %c0_i32, %c0_i32_0 : i32, i32
  }
  func.func @transform_13(%arg0: i32) -> (i32, i32) {
    %c0_i32 = arith.constant 0 : i32
    %c0_i32_0 = arith.constant 0 : i32
    %c0_i32_1 = arith.constant 0 : i32
    return %c0_i32, %c0_i32_0 : i32, i32
  }
  func.func @transform_14(%arg0: i32) -> (i32, i32) {
    %c0_i32 = arith.constant 0 : i32
    %c0_i32_0 = arith.constant 0 : i32
    %c0_i32_1 = arith.constant 0 : i32
    return %c0_i32, %c0_i32_0 : i32, i32
  }
  func.func @transform_15(%arg0: i32) -> (i32, i32) {
    %c0_i32 = arith.constant 0 : i32
    %c0_i32_0 = arith.constant 0 : i32
    %c0_i32_1 = arith.constant 0 : i32
    return %c0_i32, %c0_i32_0 : i32, i32
  }
  func.func @transform_16(%arg0: i32) -> (i32, i32) {
    %c0_i32 = arith.constant 0 : i32
    %c0_i32_0 = arith.constant 0 : i32
    return %arg0, %c0_i32 : i32, i32
  }
}

</mosaic_0001>

<bundles_post_ra>
// kernel: two_cnn_forward.1
= control target key start
LH: loop header
LB: loop body
LE: loop exit
PB: predicated region body
PF: predicated region fallthrough
CT: control target
= control target key end

     0   :  { %v21739_v2 = vmov 0.0   ;;  %v21726_v3 = vmov 0.0|0.0   ;;  %s11803_s26 = smov 22   ;;  %s11804_s27 = smov 66   ;;  %vm11805_vm0 = vmmov 0   ;;  %vm126_vm1 = vcmask 326656   ;;  %s21706_s2 = inlined_call_operand.vmem [shape: f32[11,8,22], index: 2, kind: input, shape index: {}]   ;;  %s21707_s1 = inlined_call_operand.vmem [shape: f32[11,8,22], index: 1, kind: input, shape index: {}]   ;;  %s21708_s3 = inlined_call_operand.vmem [shape: f32[40,800], index: 3, kind: input, shape index: {}]   ;;  %s21709_s0 = inlined_call_operand.vmem [shape: f32[8,40], index: 0, kind: input, shape index: {}]   ;;  %s21710_s7 = inlined_call_operand.vmem [shape: f32[88,1200], index: 7, kind: input, shape index: {}]   ;;  %s21711_s4 = inlined_call_operand.vmem [shape: f32[1,800], index: 4, kind: input, shape index: {}]   ;;  %s21712_s5 = inlined_call_operand.vmem [shape: f32[800,160], index: 5, kind: input, shape index: {}]   ;;  %s21713_s8 = inlined_call_operand.vmem [shape: f32[1,1200], index: 8, kind: input, shape index: {}]   ;;  %s21714_s9 = inlined_call_operand.vmem [shape: f32[1080,300], index: 9, kind: input, shape index: {}]   ;;  %s21715_s12 = inlined_call_operand.vmem [shape: f32[3000,400], index: 12, kind: input, shape index: {}]   ;;  %s21716_s10 = inlined_call_operand.vmem [shape: f32[1,300], index: 10, kind: input, shape index: {}]   ;;  %s21717_s6 = inlined_call_operand.vmem [shape: f32[1,160], index: 6, kind: input, shape index: {}]   ;;  %s21718_s11 = inlined_call_operand.vmem [shape: f32[160,400], index: 11, kind: input, shape index: {}]   ;;  %s21719_s14 = inlined_call_operand.vmem [shape: f32[400,9], index: 14, kind: input, shape index: {}]   ;;  %s21720_s13 = inlined_call_operand.vmem [shape: f32[1,400], index: 13, kind: input, shape index: {}]   ;;  %s21721_s15 = inlined_call_operand.vmem [shape: f32[1,9], index: 15, kind: input, shape index: {}]   ;;  %s21722_s16 = inlined_call_operand.vmem [shape: f32[8,9], index: 16, kind: output, shape index: {}]  }
   0x1   :  { %21828 = sst [smem:[#allocation65_spill]] %s21706_s2  ;;  %194 = vmatprep.mubr.f32.mxu0 %v21739_v2  ;;  %9131 = vmatprep.subr.bf16.mxu1 %v21726_v3  ;;  %v11922_v4 = vld [vmem:[%s21707_s1 + $0x8] sm:$0xff]  ;;  %s21724_s30 = smov 44   ;;  %v11931_v5 = vld [vmem:[%s21707_s1 + $0x10] sm:$0xff]  ;;  %v62_v8 = vld [vmem:[%s21708_s3 + $0x40] sm:$0xff]  ;;  %vm1203_vm2 = vcmask 179200  }
   0x2   :  { %s21829_s23 = sld [smem:[#allocation65_spill]]  ;;  %9075 = vmatprep.mubr.msk.f32.mxu1 %vm11805_vm0, %v21739_v2  ;;  %v55_v7 = vld [vmem:[%s21708_s3 + $0x8] sm:$0xff]  ;;  %v54_v9 = vld [vmem:[%s21708_s3] sm:$0xff]  ;;  %v61_v10 = vld [vmem:[%s21708_s3 + $0x38] sm:$0xff]  ;;  %s21830_s2 = smov 44   ;;  %vm1214_vm3 = vcmask 359424  }
   0x3   :  { %v9107_v11 = vpack.c.bf16 %v62_v8, %v55_v7  ;;  %v9109_v12 = vpack.c.bf16 %v61_v10, %v54_v9  ;;  %v69_v13 = vld [vmem:[%s21708_s3 + $0x78] sm:$0xff]  ;;  %v76_v14 = vld [vmem:[%s21708_s3 + $0xb0] sm:$0xff]  ;;  %v75_v18 = vld [vmem:[%s21708_s3 + $0xa8] sm:$0xff]  ;;  %vm1225_vm4 = vcmask 539648   ;;  %vm1400_vm5 = vcmask 719872   ;;  %s11808_s17 = smov 126  }
   0x4   :  { %v11960_v15 = vld [vmem:[%s21707_s1 + $0x18] sm:$0xff]  ;;  %v9111_v16 = vpack.c.bf16 %v76_v14, %v69_v13  ;;  %v68_v17 = vld [vmem:[%s21708_s3 + $0x70] sm:$0xff]  ;;  %v83_v21 = vld [vmem:[%s21708_s3 + $0xe8] sm:$0xff]  ;;  %s11809_s25 = smov 125   ;;  %s11810_s22 = smov 124   ;;  %vm443_vm6 = vcmask 1039360  }
   0x5   :  { %9108 = vmatprep.subr.bf16.mxu0 %v9107_v11  ;;  %v9113_v19 = vpack.c.bf16 %v75_v18, %v68_v17  ;;  %v57_v22 = vld [vmem:[%s21708_s3 + $0x18] sm:$0xff]  ;;  %v64_v23 = vld [vmem:[%s21708_s3 + $0x50] sm:$0xff]  ;;  %v82_v24 = vld [vmem:[%s21708_s3 + $0xe0] sm:$0xff]  ;;  %vm478_vm7 = vcmask 1031168   ;;  %vm513_vm8 = vcmask 1022976   ;;  %vm548_vm9 = vcmask 1014784  }
   0x6   :  { %9110 = vmatpush1.bf16.msra.mxu0 %v9109_v12  ;;  %v56_v25 = vld [vmem:[%s21708_s3 + $0x10] sm:$0xff]  ;;  %v67_v27 = vld [vmem:[%s21708_s3 + $0x68] sm:$0xff]  ;;  %v78_v30 = vld [vmem:[%s21708_s3 + $0xc0] sm:$0xff]  ;;  %v9115_v36 = vpack.c.bf16 %v64_v23, %v57_v22  ;;  %s11811_s21 = smov 84   ;;  %vm2246_vm10 = vcmask 687104   ;;  %vm2817_vm11 = vcmask 244736  }
   0x7   :  { %9112 = vmatprep.subr.bf16.mxu0 %v9111_v16  ;;  %v60_v26 = vld [vmem:[%s21708_s3 + $0x30] sm:$0xff]  ;;  %v63_v28 = vld [vmem:[%s21708_s3 + $0x48] sm:$0xff]  ;;  %v74_v32 = vld [vmem:[%s21708_s3 + $0xa0] sm:$0xff]  ;;  %s11814_s20 = smov 104   ;;  %vm420_vm12 = vcmask 261120   ;;  %vm2968_vm14 = vcmask 850944  }
   0x8   :  { %v1081_v0 = vld [vmem:[%s21829_s23] sm:$0xff]  ;;  %v1082_v1 = vld [vmem:[%s21829_s23 + $0x8] sm:$0xff]  ;;  %v1083_v6 = vld [vmem:[%s21829_s23 + $0x10] sm:$0xff]  ;;  %v9132_v31 = vpack.c.bf16 %v67_v27, %v60_v26  ;;  %v9117_v38 = vpack.c.bf16 %v63_v28, %v56_v25  ;;  %vm2877_vm0 = vcmask 605184   ;;  %s11818_s24 = smov 48   ;;  %s11819_s19 = smov 92  }
   0x9   :  { %1102 = vrot.lane.b32.xlu0 %v1081_v0, %s11803_s26  ;;  %1173 = vrot.lane.b32.xlu1 %v1082_v1, %s11804_s27  ;;  %v1084_v20 = vld [vmem:[%s21829_s23 + $0x18] sm:$0xff]  ;;  %v71_v29 = vld [vmem:[%s21708_s3 + $0x88] sm:$0xff]  ;;  %vm14513_vm13 = vmneg %vm2817_vm11 }
   0xa   :  { %9114 = vmatpush1.bf16.msra.mxu0 %v9113_v19  ;;  %v81_v33 = vld [vmem:[%s21708_s3 + $0xd8] sm:$0xff]  ;;  %v12015_v34 = vld [vmem:[%s21707_s1 + $0x20] sm:$0xff]  ;;  %9133 = vmatpush3.bf16.msra.mxu1 %v9132_v31  ;;  %v9119_v39 = vpack.c.bf16 %v78_v30, %v71_v29  ;;  %v12038_v43 = vld [vmem:[%s21707_s1 + $0x28] sm:$0xff] }
   0xb   :  { %v1085_v35 = vld [vmem:[%s21829_s23 + $0x20] sm:$0xff]  ;;  %138 = vmatprep.subr.mxu0 %v83_v21  ;;  %9134 = vmatprep.subr.bf16.mxu1 %v21726_v3  ;;  %v77_v41 = vld [vmem:[%s21708_s3 + $0xb8] sm:$0xff]  ;;  %v9135_v42 = vpack.c.bf16 %v81_v33, %v74_v32  ;;  %v1237_v46 = vld [vmem:[%s21710_s7 + $0x8] sm:$0xff] }
   0xc   :  { %v12023_v37 = vld [vmem:[%s21709_s0] sm:$0xff]  ;;  %v85_v45 = vld [vmem:[%s21708_s3 + $0xf8] sm:$0xff]  ;;  %v88_v48 = vld [vmem:[%s21708_s3 + $0x110] sm:$0xff]  ;;  %s11820_s0 = smov 8  }
   0xd   :  { %1142 = vrot.lane.b32.xlu0 %v11922_v4, %s21724_s30  ;;  %1104 = vrot.lane.b32.xlu1 %v1082_v1, %s11803_s26  ;;  %v70_v40 = vld [vmem:[%s21708_s3 + $0x80] sm:$0xff]  ;;  %v1247_v47 = vld [vmem:[%s21710_s7 + $0x58] sm:$0xff]  ;;  %vm15019_vm15 = vmneg %vm2968_vm14 }
   0xe   :  { %139 = vmatpush1.msra.mxu0 %v82_v24  ;;  %v9121_v44 = vpack.c.bf16 %v77_v41, %v70_v40  ;;  %9136 = vmatpush3.bf16.msra.mxu1 %v9135_v42  ;;  %v1236_v49 = vld [vmem:[%s21710_s7] sm:$0xff]  ;;  %v1246_v50 = vld [vmem:[%s21710_s7 + $0x50] sm:$0xff]  ;;  %v1257_v51 = vld [vmem:[%s21710_s7 + $0xa8] sm:$0xff]  ;;  %v9337_v54 = vpack.c.bf16 %v1247_v47, %v1237_v46 }
   0xf   :  { %9116 = vmatprep.subr.bf16.mxu0 %v9115_v36  ;;  %8638 = vmatmul.mubr.msk.f32.vlgmr.msra.gmra.mrb[0].mxu0 %vm126_vm1, %v12023_v37  ;;  %v1267_v52 = vld [vmem:[%s21710_s7 + $0xf8] sm:$0xff]  ;;  %v1086_v53 = vld [vmem:[%s21829_s23 + $0x28] sm:$0xff]  ;;  %v9339_v55 = vpack.c.bf16 %v1246_v50, %v1236_v49  ;;  %v84_v56 = vld [vmem:[%s21708_s3 + $0xf0] sm:$0xff] }
  0x10   :  { %9118 = vmatpush1.bf16.msra.mxu0 %v9117_v38  ;;  %265 = vmatprep.mubr.f32.mxu0 %v21739_v2  ;;  %v9341_v57 = vpack.c.bf16 %v1267_v52, %v1257_v51  ;;  %v1256_v58 = vld [vmem:[%s21710_s7 + $0xa0] sm:$0xff]  ;;  %v1266_v59 = vld [vmem:[%s21710_s7 + $0xf0] sm:$0xff]  ;;  %v1277_v60 = vld [vmem:[%s21710_s7 + $0x148] sm:$0xff] }
  0x11   :  { %1144 = vrot.lane.b32.xlu0 %v11931_v5, %s21724_s30  ;;  %1175 = vrot.lane.b32.xlu1 %v1083_v6, %s11804_s27  ;;  %v1287_v61 = vld [vmem:[%s21710_s7 + $0x198] sm:$0xff]  ;;  %v12094_v62 = vld [vmem:[%s21707_s1 + $0x30] sm:$0xff]  ;;  %v9343_v0 = vpack.c.bf16 %v1266_v59, %v1256_v58 }
  0x12   :  { %9120 = vmatprep.subr.bf16.mxu0 %v9119_v39  ;;  %9073 = vmatprep.subr.mxu1 %v21739_v2  ;;  %v1087_v63 = vld [vmem:[%s21829_s23 + $0x30] sm:$0xff]  ;;  %v9345_v1 = vpack.c.bf16 %v1287_v61, %v1277_v60  ;;  %v1297_v8 = vld [vmem:[%s21710_s7 + $0x1e8] sm:$0xff]  ;;  %v1307_v9 = vld [vmem:[%s21710_s7 + $0x238] sm:$0xff] }
  0x13   :  { %9074 = vmatpush3.msra.mxu1 %v88_v48  ;;  %v1286_v7 = vld [vmem:[%s21710_s7 + $0x190] sm:$0xff]  ;;  %v12121_v10 = vld [vmem:[%s21707_s1 + $0x38] sm:$0xff]  ;;  %v9349_v12 = vpack.c.bf16 %v1307_v9, %v1297_v8  ;;  %v1296_v13 = vld [vmem:[%s21710_s7 + $0x1e0] sm:$0xff] }
  0x14   :  { %9122 = vmatpush1.bf16.msra.mxu0 %v9121_v44  ;;  %9338 = vmatprep.subr.bf16.mxu1 %v9337_v54  ;;  %v1306_v14 = vld [vmem:[%s21710_s7 + $0x230] sm:$0xff]  ;;  %v1317_v16 = vld [vmem:[%s21710_s7 + $0x288] sm:$0xff]  ;;  %v1327_v17 = vld [vmem:[%s21710_s7 + $0x2d8] sm:$0xff] }
  0x15   :  { %1106 = vrot.lane.b32.xlu0 %v1083_v6, %s11803_s26  ;;  %1146 = vrot.lane.b32.xlu1 %v11960_v15, %s21724_s30  ;;  %v1276_v6 = vld [vmem:[%s21710_s7 + $0x140] sm:$0xff]  ;;  %v1088_v18 = vld [vmem:[%s21829_s23 + $0x38] sm:$0xff]  ;;  %v9351_v19 = vpack.c.bf16 %v1306_v14, %v1296_v13  ;;  %s11807_s30 = smov 127  }
  0x16   :  { %209 = vmatprep.subr.mxu0 %v85_v45  ;;  %9076 = vmatmul.mubr.msk.f32.vlgmr.msra.gmra.mrb[0].mxu1 %vm126_vm1, %v12023_v37  ;;  %v9347_v11 = vpack.c.bf16 %v1286_v7, %v1276_v6  ;;  %v1316_v21 = vld [vmem:[%s21710_s7 + $0x280] sm:$0xff]  ;;  %v1326_v22 = vld [vmem:[%s21710_s7 + $0x2d0] sm:$0xff]  ;;  %v1337_v26 = vld [vmem:[%s21710_s7 + $0x328] sm:$0xff] }
  0x17   :  { %9340 = vmatpush1.bf16.msra.mxu1 %v9339_v55  ;;  %1495 = vmatprep.mubr.f32.mxu1 %v21739_v2  ;;  %v12154_v23 = vld [vmem:[%s21707_s1 + $0x40] sm:$0xff]  ;;  %v9355_v25 = vpack.c.bf16 %v1326_v22, %v1316_v21  ;;  %v1239_v27 = vld [vmem:[%s21710_s7 + $0x18] sm:$0xff]  ;;  %v1249_v28 = vld [vmem:[%s21710_s7 + $0x68] sm:$0xff] }
  0x18   :  { %210 = vmatpush1.msra.mxu0 %v84_v56  ;;  %9342 = vmatprep.subr.bf16.mxu1 %v9341_v57  ;;  %v1089_v24 = vld [vmem:[%s21829_s23 + $0x40] sm:$0xff]  ;;  %v12174_v29 = vld [vmem:[%s21707_s1 + $0x48] sm:$0xff]  ;;  %v9357_v31 = vpack.c.bf16 %v1249_v28, %v1239_v27  ;;  %v1080_v33 = vld [vmem:[%s21707_s1 + $0x50] sm:$0xff] }
  0x19   :  { %1177 = vrot.lane.b32.xlu0 %v1084_v20, %s11804_s27  ;;  %1108 = vrot.lane.b32.xlu1 %v1084_v20, %s11803_s26  ;;  %v9353_v20 = vpack.c.bf16 %v1327_v17, %v1317_v16  ;;  %v1336_v30 = vld [vmem:[%s21710_s7 + $0x320] sm:$0xff]  ;;  %v1090_v32 = vld [vmem:[%s21829_s23 + $0x48] sm:$0xff] }
  0x1a   :  { %8639 = vmatmul.mubr.msk.f32.vlgmr.msra.gmra.mrb[2].mxu0 %vm126_vm1, %v12023_v37  ;;  %v59_v36 = vld [vmem:[%s21708_s3 + $0x28] sm:$0xff]  ;;  %v66_v38 = vld [vmem:[%s21708_s3 + $0x60] sm:$0xff]  ;;  %v65_v41 = vld [vmem:[%s21708_s3 + $0x58] sm:$0xff] }
  0x1b   :  { %336 = vmatprep.mubr.f32.mxu0 %v21739_v2  ;;  %9344 = vmatpush1.bf16.msra.mxu1 %v9343_v0  ;;  %v9123_v39 = vpack.c.bf16 %v66_v38, %v59_v36  ;;  %v58_v40 = vld [vmem:[%s21708_s3 + $0x20] sm:$0xff]  ;;  %v73_v44 = vld [vmem:[%s21708_s3 + $0x98] sm:$0xff]  ;;  %v80_v45 = vld [vmem:[%s21708_s3 + $0xd0] sm:$0xff] }
  0x1c   :  { %9346 = vmatprep.subr.bf16.mxu1 %v9345_v1  ;;  %v9125_v42 = vpack.c.bf16 %v65_v41, %v58_v40  ;;  %v9127_v46 = vpack.c.bf16 %v80_v45, %v73_v44  ;;  %v72_v47 = vld [vmem:[%s21708_s3 + $0x90] sm:$0xff]  ;;  %v79_v48 = vld [vmem:[%s21708_s3 + $0xc8] sm:$0xff]  ;;  %v86_v51 = vld [vmem:[%s21708_s3 + $0x100] sm:$0xff] }
  0x1d   :  { %1148 = vrot.lane.b32.xlu0 %v12015_v34, %s21830_s2  ;;  %1179 = vrot.lane.b32.xlu1 %v1085_v35, %s11804_s27  ;;  %v9129_v49 = vpack.c.bf16 %v79_v48, %v72_v47  ;;  %v87_v50 = vld [vmem:[%s21708_s3 + $0x108] sm:$0xff]  ;;  %v1070_v54 = vld [vmem:[%s21707_s1] sm:$0xff]  ;;  %s11813_s3 = smov 30  }
  0x1e   :  { %9124 = vmatprep.subr.bf16.mxu0 %v9123_v39  ;;  %v1238_v55 = vld [vmem:[%s21710_s7 + $0x10] sm:$0xff]  ;;  %v1248_v56 = vld [vmem:[%s21710_s7 + $0x60] sm:$0xff]  ;;  %v1269_v57 = vld [vmem:[%s21710_s7 + $0x108] sm:$0xff] }
  0x1f   :  { %9348 = vmatpush1.bf16.msra.mxu1 %v9347_v11  ;;  %9126 = vmatpush1.bf16.msra.mxu0 %v9125_v42  ;;  %v9359_v61 = vpack.c.bf16 %v1248_v56, %v1238_v55  ;;  %v1258_v1 = vld [vmem:[%s21710_s7 + $0xb0] sm:$0xff]  ;;  %v1268_v6 = vld [vmem:[%s21710_s7 + $0x100] sm:$0xff]  ;;  %v1279_v8 = vld [vmem:[%s21710_s7 + $0x158] sm:$0xff] }
  0x20   :  { %9350 = vmatprep.subr.bf16.mxu1 %v9349_v12  ;;  %9128 = vmatprep.subr.bf16.mxu0 %v9127_v46  ;;  %v1289_v9 = vld [vmem:[%s21710_s7 + $0x1a8] sm:$0xff]  ;;  %v9363_v14 = vpack.c.bf16 %v1268_v6, %v1258_v1  ;;  %v1298_v28 = vld [vmem:[%s21710_s7 + $0x1f0] sm:$0xff]  ;;  %v1328_v41 = vld [vmem:[%s21710_s7 + $0x2e0] sm:$0xff] }
  0x21   :  { %1110 = vrot.lane.b32.xlu0 %v1085_v35, %s11803_s26  ;;  %1150 = vrot.lane.b32.xlu1 %v12038_v43, %s21830_s2  ;;  %v1091_v35 = vld [vmem:[%s21829_s23 + $0x50] sm:$0xff]  ;;  %v9365_v17 = vpack.c.bf16 %v1289_v9, %v1279_v8  ;;  %v1309_v21 = vld [vmem:[%s21710_s7 + $0x248] sm:$0xff]  ;;  %s11816_s23 = smov 88  }
  0x22   :  { %v1318_v40 = vld [vmem:[%s21710_s7 + $0x290] sm:$0xff] }
  0x23   :  { %9352 = vmatpush1.bf16.msra.mxu1 %v9351_v19  ;;  %9130 = vmatpush1.bf16.msra.mxu0 %v9129_v49  ;;  %v1288_v19 = vld [vmem:[%s21710_s7 + $0x1a0] sm:$0xff]  ;;  %v9375_v46 = vpack.c.bf16 %v1328_v41, %v1318_v40  ;;  %v1339_v49 = vld [vmem:[%s21710_s7 + $0x338] sm:$0xff] }
  0x24   :  { %9354 = vmatprep.subr.bf16.mxu1 %v9353_v20  ;;  %280 = vmatprep.subr.mxu0 %v87_v50  ;;  %v1299_v20 = vld [vmem:[%s21710_s7 + $0x1f8] sm:$0xff]  ;;  %v1241_v50 = vld [vmem:[%s21710_s7 + $0x28] sm:$0xff] }
  0x25   :  { %1181 = vrot.lane.b32.xlu0 %v1086_v53, %s11804_s27  ;;  %1112 = vrot.lane.b32.xlu1 %v1086_v53, %s11803_s26  ;;  %v9369_v27 = vpack.c.bf16 %v1309_v21, %v1299_v20 }
  0x27   :  { %9356 = vmatpush1.bf16.msra.mxu1 %v9355_v25  ;;  %281 = vmatpush1.msra.mxu0 %v86_v51 }
  0x28   :  { %1451 = vmatprep.subr.mxu1 %v1337_v26  ;;  %8640 = vmatmul.mubr.msk.f32.vlgmr.msra.gmra.mrb[4].mxu0 %vm126_vm1, %v12023_v37  ;;  %v1259_v37 = vld [vmem:[%s21710_s7 + $0xb8] sm:$0xff] }
  0x29   :  { %1152 = vrot.lane.b32.xlu0 %v12094_v62, %s21830_s2  ;;  %1183 = vrot.lane.b32.xlu1 %v1087_v63, %s11804_s27  ;;  %v9361_v0 = vpack.c.bf16 %v1269_v57, %v1259_v37 }
  0x2b   :  { %1452 = vmatpush1.msra.mxu1 %v1336_v30  ;;  %v1308_v30 = vld [vmem:[%s21710_s7 + $0x240] sm:$0xff] }
  0x2c   :  { %9358 = vmatprep.subr.bf16.mxu1 %v9357_v31  ;;  %v1319_v31 = vld [vmem:[%s21710_s7 + $0x298] sm:$0xff]  ;;  %v9371_v36 = vpack.c.bf16 %v1308_v30, %v1298_v28  ;;  %v1250_v28 = vld [vmem:[%s21710_s7 + $0x70] sm:$0xff] }
  0x2d   :  { %1114 = vrot.lane.b32.xlu0 %v1087_v63, %s11803_s26  ;;  %1154 = vrot.lane.b32.xlu1 %v12121_v10, %s21830_s2 }
  0x31   :  { %1185 = vrot.lane.b32.xlu0 %v1088_v18, %s11804_s27  ;;  %1116 = vrot.lane.b32.xlu1 %v1088_v18, %s11803_s26  ;;  %v1278_v18 = vld [vmem:[%s21710_s7 + $0x150] sm:$0xff] }
  0x32   :  { %v9367_v25 = vpack.c.bf16 %v1288_v19, %v1278_v18 }
  0x35   :  { %1156 = vrot.lane.b32.xlu0 %v12154_v23, %s21830_s2  ;;  %1187 = vrot.lane.b32.xlu1 %v1089_v24, %s11804_s27 }
  0x39   :  { %1118 = vrot.lane.b32.xlu0 %v1089_v24, %s11803_s26  ;;  %1158 = vrot.lane.b32.xlu1 %v12174_v29, %s21830_s2 }
  0x3d   :  { %1189 = vrot.lane.b32.xlu0 %v1090_v32, %s11804_s27  ;;  %1120 = vrot.lane.b32.xlu1 %v1090_v32, %s11803_s26  ;;  %v1329_v32 = vld [vmem:[%s21710_s7 + $0x2e8] sm:$0xff] }
  0x3e   :  { %v9373_v39 = vpack.c.bf16 %v1329_v32, %v1319_v31  ;;  %v1261_v31 = vld [vmem:[%s21710_s7 + $0xc8] sm:$0xff] }
  0x41   :  { %1160 = vrot.lane.b32.xlu0 %v1080_v33, %s21830_s2  ;;  %1191 = vrot.lane.b32.xlu1 %v1091_v35, %s11804_s27  ;;  %s11815_s27 = smov 80  }
  0x7b   :  { %v1103_v52 = vpop.permute.xlu0 %1102  ;;  %v1174_v53 = vpop.permute.xlu1 %1173 }
  0x7c   :  { %v1204_v58 = vsel %vm1203_vm2, %v1070_v54, %v1103_v52  ;;  %v1338_v54 = vld [vmem:[%s21710_s7 + $0x330] sm:$0xff] }
  0x7f   :  { %v1143_v59 = vpop.permute.xlu0 %1142  ;;  %v1105_v60 = vpop.permute.xlu1 %1104 }
  0x80   :  { %v1215_v63 = vsel %vm1214_vm3, %v1204_v58, %v1143_v59  ;;  %v1205_v11 = vsel %vm1203_vm2, %v11922_v4, %v1105_v60 }
  0x81   :  { %v12251_v7 = vsel %vm1225_vm4, %v1215_v63, %v1174_v53 }
  0x82   :  { %8643 = vmatmul.mubr.msk.f32.vlgmr.msra.gmra.mrb[2].mxu1 %vm1400_vm5, %v12251_v7 }
  0x83   :  { %v1145_v12 = vpop.permute.xlu0 %1144  ;;  %v1176_v13 = vpop.permute.xlu1 %1175  ;;  %1501 = vmatprep.mubr.f32.mxu1 %v21739_v2  ;;  %9360 = vmatpush1.bf16.msra.mxu1 %v9359_v61 }
  0x84   :  { %v1216_v16 = vsel %vm1214_vm3, %v1205_v11, %v1145_v12  ;;  %9362 = vmatprep.subr.bf16.mxu1 %v9361_v0 }
  0x85   :  { %v12272_v4 = vsel %vm1225_vm4, %v1216_v16, %v1176_v13 }
  0x86   :  { %8644 = vmatmul.mubr.msk.f32.gmra.mrb[4].mxu1 %vm1400_vm5, %v12272_v4 }
  0x87   :  { %v1107_v22 = vpop.permute.xlu0 %1106  ;;  %v1147_v24 = vpop.permute.xlu1 %1146  ;;  %1507 = vmatprep.mubr.f32.mxu1 %v21739_v2  ;;  %9364 = vmatpush1.bf16.msra.mxu1 %v9363_v14 }
  0x88   :  { %v1206_v26 = vsel %vm1203_vm2, %v11931_v5, %v1107_v22  ;;  %9366 = vmatprep.subr.bf16.mxu1 %v9365_v17 }
  0x89   :  { %v1217_v5 = vsel %vm1214_vm3, %v1206_v26, %v1147_v24 }
  0x8b   :  { %v1178_v33 = vpop.permute.xlu0 %1177  ;;  %v1109_v35 = vpop.permute.xlu1 %1108  ;;  %9368 = vmatpush1.bf16.msra.mxu1 %v9367_v25 }
  0x8c   :  { %v12299_v38 = vsel %vm1225_vm4, %v1217_v5, %v1178_v33  ;;  %9370 = vmatprep.subr.bf16.mxu1 %v9369_v27  ;;  %v1207_v42 = vsel %vm1203_vm2, %v11960_v15, %v1109_v35  ;;  %v1251_v15 = vld [vmem:[%s21710_s7 + $0x78] sm:$0xff]  ;;  %v1260_v33 = vld [vmem:[%s21710_s7 + $0xc0] sm:$0xff]  ;;  %v1270_v35 = vld [vmem:[%s21710_s7 + $0x110] sm:$0xff] }
  0x8d   :  { %8645 = vmatmul.mubr.msk.f32.gmra.mrb[6].mxu1 %vm1400_vm5, %v12299_v38  ;;  %v9377_v55 = vpack.c.bf16 %v1251_v15, %v1241_v50  ;;  %v9383_v40 = vpack.c.bf16 %v1270_v35, %v1260_v33  ;;  %v1300_v50 = vld [vmem:[%s21710_s7 + $0x200] sm:$0xff]  ;;  %v1310_v15 = vld [vmem:[%s21710_s7 + $0x250] sm:$0xff] }
  0x8e   :  { %1513 = vmatprep.mubr.f32.mxu1 %v21739_v2  ;;  %v1322_v35 = vld [vmem:[%s21710_s7 + $0x2b0] sm:$0xff] }
  0x8f   :  { %v1149_v44 = vpop.permute.xlu0 %1148  ;;  %v1180_v45 = vpop.permute.xlu1 %1179  ;;  %9372 = vmatpush1.bf16.msra.mxu1 %v9371_v36  ;;  %v1281_v36 = vld [vmem:[%s21710_s7 + $0x168] sm:$0xff] }
  0x90   :  { %v1218_v47 = vsel %vm1214_vm3, %v1207_v42, %v1149_v44  ;;  %9374 = vmatprep.subr.bf16.mxu1 %v9373_v39  ;;  %v1291_v39 = vld [vmem:[%s21710_s7 + $0x1b8] sm:$0xff]  ;;  %v1280_v42 = vld [vmem:[%s21710_s7 + $0x160] sm:$0xff]  ;;  %v1290_v44 = vld [vmem:[%s21710_s7 + $0x1b0] sm:$0xff] }
  0x91   :  { %v12314_v48 = vsel %vm1225_vm4, %v1218_v47, %v1180_v45  ;;  %v9385_v41 = vpack.c.bf16 %v1291_v39, %v1281_v36  ;;  %v1301_v45 = vld [vmem:[%s21710_s7 + $0x208] sm:$0xff]  ;;  %v9387_v47 = vpack.c.bf16 %v1290_v44, %v1280_v42  ;;  %v1332_v36 = vld [vmem:[%s21710_s7 + $0x300] sm:$0xff]  ;;  %v1343_v44 = vld [vmem:[%s21710_s7 + $0x358] sm:$0xff] }
  0x92   :  { %8646 = vmatmul.mubr.msk.f32.gmra.mrb[8].mxu1 %vm1400_vm5, %v12314_v48  ;;  %v12552_v39 = vld [vmem:[%s21711_s4] sm:$0x7f] }
  0x93   :  { %v1111_v51 = vpop.permute.xlu0 %1110  ;;  %v1151_v52 = vpop.permute.xlu1 %1150  ;;  %1519 = vmatprep.mubr.f32.mxu1 %v21739_v2  ;;  %9376 = vmatpush1.bf16.msra.mxu1 %v9375_v46  ;;  %v1311_v46 = vld [vmem:[%s21710_s7 + $0x258] sm:$0xff] }
  0x94   :  { %v1208_v53 = vsel %vm1203_vm2, %v12015_v34, %v1111_v51  ;;  %1576 = vmatprep.subr.mxu1 %v1339_v49  ;;  %v9389_v49 = vpack.c.bf16 %v1311_v46, %v1301_v45  ;;  %v1321_v51 = vld [vmem:[%s21710_s7 + $0x2a8] sm:$0xff]  ;;  %v1255_v46 = vld [vmem:[%s21710_s7 + $0x98] sm:$0xff] }
  0x95   :  { %v1219_v56 = vsel %vm1214_vm3, %v1208_v53, %v1151_v52  ;;  %v1331_v52 = vld [vmem:[%s21710_s7 + $0x2f8] sm:$0xff]  ;;  %v9391_v53 = vpack.c.bf16 %v1310_v15, %v1300_v50  ;;  %v1245_v45 = vld [vmem:[%s21710_s7 + $0x48] sm:$0xff] }
  0x97   :  { %v1182_v37 = vpop.permute.xlu0 %1181  ;;  %v1113_v57 = vpop.permute.xlu1 %1112  ;;  %1577 = vmatpush1.msra.mxu1 %v1338_v54  ;;  %v9393_v54 = vpack.c.bf16 %v1331_v52, %v1321_v51  ;;  %v1342_v51 = vld [vmem:[%s21710_s7 + $0x350] sm:$0xff]  ;;  %v9417_v52 = vpack.c.bf16 %v1255_v46, %v1245_v45 }
  0x98   :  { %v12335_v58 = vsel %vm1225_vm4, %v1219_v56, %v1182_v37  ;;  %9378 = vmatprep.subr.bf16.mxu1 %v9377_v55  ;;  %v1209_v34 = vsel %vm1203_vm2, %v12038_v43, %v1113_v57  ;;  %v1320_v55 = vld [vmem:[%s21710_s7 + $0x2a0] sm:$0xff]  ;;  %v1330_v56 = vld [vmem:[%s21710_s7 + $0x2f0] sm:$0xff]  ;;  %v1341_v57 = vld [vmem:[%s21710_s7 + $0x348] sm:$0xff] }
  0x99   :  { %8647 = vmatmul.mubr.msk.f32.gmra.mrb[10].mxu1 %vm1400_vm5, %v12335_v58  ;;  %v9395_v37 = vpack.c.bf16 %v1330_v56, %v1320_v55  ;;  %v583_v45 = vld [vmem:[%s21712_s5 + $0x70] sm:$0xff] }
  0x9a   :  { %1525 = vmatprep.mubr.f32.mxu1 %v21739_v2 }
  0x9b   :  { %v1153_v59 = vpop.permute.xlu0 %1152  ;;  %v1184_v60 = vpop.permute.xlu1 %1183 }
  0x9c   :  { %v1220_v61 = vsel %vm1214_vm3, %v1209_v34, %v1153_v59  ;;  %v1243_v34 = vld [vmem:[%s21710_s7 + $0x38] sm:$0xff]  ;;  %v1253_v59 = vld [vmem:[%s21710_s7 + $0x88] sm:$0xff] }
  0x9d   :  { %v12344_v63 = vsel %vm1225_vm4, %v1220_v61, %v1184_v60  ;;  %v1340_v60 = vld [vmem:[%s21710_s7 + $0x340] sm:$0xff]  ;;  %v9397_v61 = vpack.c.bf16 %v1253_v59, %v1243_v34  ;;  %v570_v59 = vld [vmem:[%s21712_s5 + $0x8] sm:$0xff] }
  0x9e   :  { %8648 = vmatmul.mubr.msk.f32.gmra.mrb[12].mxu1 %vm1400_vm5, %v12344_v63 }
  0x9f   :  { %v1115_v0 = vpop.permute.xlu0 %1114  ;;  %v1155_v1 = vpop.permute.xlu1 %1154  ;;  %1531 = vmatprep.mubr.f32.mxu1 %v21739_v2 }
  0xa0   :  { %v1210_v6 = vsel %vm1203_vm2, %v12094_v62, %v1115_v0  ;;  %v1242_v0 = vld [vmem:[%s21710_s7 + $0x30] sm:$0xff] }
  0xa1   :  { %v1221_v8 = vsel %vm1214_vm3, %v1210_v6, %v1155_v1  ;;  %v1252_v1 = vld [vmem:[%s21710_s7 + $0x80] sm:$0xff]  ;;  %v1263_v6 = vld [vmem:[%s21710_s7 + $0xd8] sm:$0xff] }
  0xa3   :  { %v1186_v43 = vpop.permute.xlu0 %1185  ;;  %v1117_v9 = vpop.permute.xlu1 %1116 }
  0xa4   :  { %v12353_v11 = vsel %vm1225_vm4, %v1221_v8, %v1186_v43  ;;  %v1211_v12 = vsel %vm1203_vm2, %v12121_v10, %v1117_v9  ;;  %v1273_v8 = vld [vmem:[%s21710_s7 + $0x128] sm:$0xff]  ;;  %v9399_v43 = vpack.c.bf16 %v1252_v1, %v1242_v0 }
  0xa5   :  { %8649 = vmatmul.mubr.msk.f32.gmra.mrb[14].mxu1 %vm1400_vm5, %v12353_v11  ;;  %v9401_v9 = vpack.c.bf16 %v1273_v8, %v1263_v6  ;;  %v569_v6 = vld [vmem:[%s21712_s5] sm:$0xff]  ;;  %v571_v8 = vld [vmem:[%s21712_s5 + $0x10] sm:$0xff] }
  0xa6   :  { %1537 = vmatprep.mubr.f32.mxu1 %v21739_v2 }
  0xa7   :  { %v1157_v13 = vpop.permute.xlu0 %1156  ;;  %v1188_v14 = vpop.permute.xlu1 %1187 }
  0xa8   :  { %v1222_v16 = vsel %vm1214_vm3, %v1211_v12, %v1157_v13  ;;  %v1262_v12 = vld [vmem:[%s21710_s7 + $0xd0] sm:$0xff]  ;;  %v1272_v13 = vld [vmem:[%s21710_s7 + $0x120] sm:$0xff] }
  0xa9   :  { %v12362_v62 = vsel %vm1225_vm4, %v1222_v16, %v1188_v14  ;;  %v1283_v14 = vld [vmem:[%s21710_s7 + $0x178] sm:$0xff]  ;;  %v1293_v16 = vld [vmem:[%s21710_s7 + $0x1c8] sm:$0xff] }
  0xaa   :  { %8650 = vmatmul.mubr.msk.f32.gmra.mrb[16].mxu1 %vm1400_vm5, %v12362_v62 }
  0xab   :  { %v1119_v17 = vpop.permute.xlu0 %1118  ;;  %v1159_v18 = vpop.permute.xlu1 %1158  ;;  %1543 = vmatprep.mubr.f32.mxu1 %v21739_v2 }
  0xac   :  { %v1212_v19 = vsel %vm1203_vm2, %v12154_v23, %v1119_v17  ;;  %v1240_v23 = vld [vmem:[%s21710_s7 + $0x20] sm:$0xff]  ;;  %v9403_v17 = vpack.c.bf16 %v1272_v13, %v1262_v12 }
  0xad   :  { %v1223_v20 = vsel %vm1214_vm3, %v1212_v19, %v1159_v18  ;;  %v9379_v32 = vpack.c.bf16 %v1250_v28, %v1240_v23  ;;  %v9405_v18 = vpack.c.bf16 %v1293_v16, %v1283_v14  ;;  %v1282_v19 = vld [vmem:[%s21710_s7 + $0x170] sm:$0xff]  ;;  %v1312_v23 = vld [vmem:[%s21710_s7 + $0x260] sm:$0xff]  ;;  %v574_v14 = vld [vmem:[%s21712_s5 + $0x28] sm:$0xff] }
  0xae   :  { %v576_v16 = vld [vmem:[%s21712_s5 + $0x38] sm:$0xff] }
  0xaf   :  { %v1190_v10 = vpop.permute.xlu0 %1189  ;;  %v1121_v21 = vpop.permute.xlu1 %1120 }
  0xb0   :  { %v12371_v22 = vsel %vm1225_vm4, %v1223_v20, %v1190_v10  ;;  %v1213_v24 = vsel %vm1203_vm2, %v12174_v29, %v1121_v21  ;;  %v1271_v29 = vld [vmem:[%s21710_s7 + $0x118] sm:$0xff]  ;;  %v1292_v20 = vld [vmem:[%s21710_s7 + $0x1c0] sm:$0xff]  ;;  %v91_v10 = vlaneseq  ;;  %vm3575_vm2 = vcmask 457728  }
  0xb1   :  { %8651 = vmatmul.mubr.msk.f32.gmra.mrb[18].mxu1 %vm1400_vm5, %v12371_v22  ;;  %v9381_v5 = vpack.c.bf16 %v1271_v29, %v1261_v31  ;;  %v1303_v21 = vld [vmem:[%s21710_s7 + $0x218] sm:$0xff]  ;;  %v1333_v29 = vld [vmem:[%s21710_s7 + $0x308] sm:$0xff] }
  0xb2   :  { %1549 = vmatprep.mubr.f32.mxu1 %v21739_v2  ;;  %v12529_v28 = vshrl.u32 %v91_v10, 7  ;;  %v1323_v31 = vld [vmem:[%s21710_s7 + $0x2b8] sm:$0xff] }
  0xb3   :  { %v1161_v25 = vpop.permute.xlu0 %1160  ;;  %v1192_v26 = vpop.permute.xlu1 %1191  ;;  %v9413_v33 = vpack.c.bf16 %v1333_v29, %v1323_v31  ;;  %v1244_v29 = vld [vmem:[%s21710_s7 + $0x40] sm:$0xff] }
  0xb4   :  { %v1224_v27 = vsel %vm1214_vm3, %v1213_v24, %v1161_v25  ;;  %v1313_v24 = vld [vmem:[%s21710_s7 + $0x268] sm:$0xff]  ;;  %v9407_v25 = vpack.c.bf16 %v1292_v20, %v1282_v19  ;;  %21831 = vst [vmem:[#allocation2_spill] sm:$0xff] %v12529_v28  ;;  %v12560_v42 = vsub.s32 1, %v12529_v28  ;;  %v21741_v15 = vsub.s32 6, %v12529_v28  ;;  %v573_v19 = vld [vmem:[%s21712_s5 + $0x20] sm:$0xff]  ;;  %v575_v20 = vld [vmem:[%s21712_s5 + $0x30] sm:$0xff] }
  0xb5   :  { %v12386_v30 = vsel %vm1225_vm4, %v1224_v27, %v1192_v26  ;;  %v9409_v26 = vpack.c.bf16 %v1313_v24, %v1303_v21  ;;  %v1302_v27 = vld [vmem:[%s21710_s7 + $0x210] sm:$0xff]  ;;  %v12583_v55 = vsub.s32 2, %v12529_v28  ;;  %v9143_v10 = vpack.c.bf16 %v575_v20, %v573_v19  ;;  %v578_v24 = vld [vmem:[%s21712_s5 + $0x48] sm:$0xff]  ;;  %v589_v20 = vld [vmem:[%s21712_s5 + $0xa0] sm:$0xff] }
  0xb6   :  { %8652 = vmatmul.mubr.msk.f32.gmra.mrb[20].mxu1 %vm1400_vm5, %v12386_v30  ;;  %21833 = vst [vmem:[#allocation4_spill] sm:$0xff] %v12560_v42  ;;  %v118_v56 = vrot.slane %v12552_v39, %v21741_v15  ;;  %vm4864_vm4 = vcmask 31744  }
  0xb7   :  { %1620 = vmatprep.mubr.f32.mxu1 %v21739_v2  ;;  %21834 = vst [vmem:[#allocation5_spill] sm:$0xff] %v12583_v55 }
  0xba   :  { %8653 = vmatmul.mubr.msk.f32.vlgmr.msra.gmra.mrb[22].mxu1 %vm1400_vm5, %v12251_v7 }
  0xbb   :  { %9380 = vmatpush1.bf16.msra.mxu1 %v9379_v32  ;;  %1626 = vmatprep.mubr.f32.mxu1 %v21739_v2  ;;  %v12540_v32 = vsub.s32 0, %v12529_v28 }
  0xbc   :  { %9382 = vmatprep.subr.bf16.mxu1 %v9381_v5  ;;  %v9411_v5 = vpack.c.bf16 %v1312_v23, %v1302_v27  ;;  %v577_v27 = vld [vmem:[%s21712_s5 + $0x40] sm:$0xff]  ;;  %v579_v23 = vld [vmem:[%s21712_s5 + $0x50] sm:$0xff] }
  0xbd   :  { %21832 = vst [vmem:[#allocation3_spill] sm:$0xff] %v12540_v32  ;;  %v9147_v31 = vpack.c.bf16 %v579_v23, %v577_v27  ;;  %v1314_v27 = vld [vmem:[%s21710_s7 + $0x270] sm:$0xff]  ;;  %v1325_v23 = vld [vmem:[%s21710_s7 + $0x2c8] sm:$0xff] }
  0xbe   :  { %8654 = vmatmul.mubr.msk.f32.gmra.mrb[24].mxu1 %vm1400_vm5, %v12272_v4 }
  0xbf   :  { %1632 = vmatprep.mubr.f32.mxu1 %v21739_v2  ;;  %9384 = vmatpush1.bf16.msra.mxu1 %v9383_v40  ;;  %v94_v40 = vrot.slane %v12552_v39, %v12540_v32 }
  0xc0   :  { %9386 = vmatprep.subr.bf16.mxu1 %v9385_v41  ;;  %v9415_v41 = vpack.c.bf16 %v1332_v36, %v1322_v35  ;;  %v1275_v35 = vld [vmem:[%s21710_s7 + $0x138] sm:$0xff]  ;;  %v582_v36 = vld [vmem:[%s21712_s5 + $0x68] sm:$0xff] }
  0xc2   :  { %8655 = vmatmul.mubr.msk.f32.gmra.mrb[26].mxu1 %vm1400_vm5, %v12299_v38 }
  0xc3   :  { %1638 = vmatprep.mubr.f32.mxu1 %v21739_v2  ;;  %9388 = vmatpush1.bf16.msra.mxu1 %v9387_v47 }
  0xc4   :  { %9390 = vmatprep.subr.bf16.mxu1 %v9389_v49 }
  0xc6   :  { %8656 = vmatmul.mubr.msk.f32.gmra.mrb[28].mxu1 %vm1400_vm5, %v12314_v48 }
  0xc7   :  { %1644 = vmatprep.mubr.f32.mxu1 %v21739_v2  ;;  %9392 = vmatpush1.bf16.msra.mxu1 %v9391_v53 }
  0xc8   :  { %9394 = vmatprep.subr.bf16.mxu1 %v9393_v54  ;;  %v98_v54 = vrot.slane %v12552_v39, %v12560_v42 }
  0xca   :  { %8657 = vmatmul.mubr.msk.f32.gmra.mrb[30].mxu1 %vm1400_vm5, %v12335_v58 }
  0xcb   :  { %1650 = vmatprep.mubr.f32.mxu1 %v21739_v2  ;;  %9396 = vmatpush1.bf16.msra.mxu1 %v9395_v37 }
  0xcc   :  { %1701 = vmatprep.subr.mxu1 %v1341_v57  ;;  %v102_v57 = vrot.slane %v12552_v39, %v12583_v55 }
  0xce   :  { %8658 = vmatmul.mubr.msk.f32.gmra.mrb[32].mxu1 %vm1400_vm5, %v12344_v63 }
  0xcf   :  { %1656 = vmatprep.mubr.f32.mxu1 %v21739_v2  ;;  %1702 = vmatpush1.msra.mxu1 %v1340_v60  ;;  %v572_v60 = vld [vmem:[%s21712_s5 + $0x18] sm:$0xff] }
  0xd0   :  { %9398 = vmatprep.subr.bf16.mxu1 %v9397_v61  ;;  %v9137_v1 = vpack.c.bf16 %v572_v60, %v570_v59  ;;  %v585_v59 = vld [vmem:[%s21712_s5 + $0x80] sm:$0xff]  ;;  %v587_v60 = vld [vmem:[%s21712_s5 + $0x90] sm:$0xff] }
  0xd2   :  { %8659 = vmatmul.mubr.msk.f32.gmra.mrb[34].mxu1 %vm1400_vm5, %v12353_v11  ;;  %9138 = vmatprep.subr.bf16.mxu0 %v9137_v1  ;;  %v9155_v1 = vpack.c.bf16 %v587_v60, %v585_v59  ;;  %v604_v59 = vld [vmem:[%s21712_s5 + $0x118] sm:$0xff] }
  0xd3   :  { %1662 = vmatprep.mubr.f32.mxu1 %v21739_v2 }
  0xd6   :  { %8660 = vmatmul.mubr.msk.f32.gmra.mrb[36].mxu1 %vm1400_vm5, %v12362_v62 }
  0xd7   :  { %1668 = vmatprep.mubr.f32.mxu1 %v21739_v2 }
  0xda   :  { %8661 = vmatmul.mubr.msk.f32.gmra.mrb[38].mxu1 %vm1400_vm5, %v12371_v22 }
  0xdb   :  { %1674 = vmatprep.mubr.f32.mxu1 %v21739_v2 }
  0xde   :  { %8662 = vmatmul.mubr.msk.f32.gmra.mrb[40].mxu1 %vm1400_vm5, %v12386_v30 }
  0xdf   :  { %1745 = vmatprep.mubr.f32.mxu1 %v21739_v2 }
  0xe2   :  { %8663 = vmatmul.mubr.msk.f32.vlgmr.msra.gmra.mrb[42].mxu1 %vm1400_vm5, %v12251_v7  ;;  %v196_v47 = vpop.f32.mrb[0].mxu0 }
  0xe3   :  { %9400 = vmatpush1.bf16.msra.mxu1 %v9399_v43  ;;  %1751 = vmatprep.mubr.f32.mxu1 %v21739_v2  ;;  %v197_v49 = vadd.f32 %v196_v47, %v94_v40  ;;  %v198_v50 = vpop.f32.mrb[1].mxu0  ;;  %v584_v40 = vld [vmem:[%s21712_s5 + $0x78] sm:$0xff] }
  0xe4   :  { %9402 = vmatprep.subr.bf16.mxu1 %v9401_v9  ;;  %v12593_v37 = vadd.f32 %v198_v50, %v98_v54  ;;  %v9139_v9 = vpack.c.bf16 %v571_v8, %v569_v6  ;;  %v1264_v50 = vld [vmem:[%s21710_s7 + $0xe0] sm:$0xff]  ;;  %v1295_v54 = vld [vmem:[%s21710_s7 + $0x1d8] sm:$0xff] }
  0xe5   :  { %v12578_v53 = vmax.f32 %v197_v49, 0.0  ;;  %v1284_v8 = vld [vmem:[%s21710_s7 + $0x180] sm:$0xff] }
  0xe6   :  { %8664 = vmatmul.mubr.msk.f32.gmra.mrb[44].mxu1 %vm1400_vm5, %v12272_v4  ;;  %v414_v12 = vmax.f32 %v12593_v37, 0.0  ;;  %9140 = vmatpush1.bf16.msra.mxu0 %v9139_v9  ;;  %v1305_v9 = vld [vmem:[%s21710_s7 + $0x228] sm:$0xff] }
  0xe7   :  { %1757 = vmatprep.mubr.f32.mxu1 %v21739_v2  ;;  %9404 = vmatpush1.bf16.msra.mxu1 %v9403_v17 }
  0xe8   :  { %9406 = vmatprep.subr.bf16.mxu1 %v9405_v18  ;;  %429 = vrot.lane.b32.xlu0 %v12578_v53, %s11807_s30  ;;  %v9141_v18 = vpack.c.bf16 %v576_v16, %v574_v14  ;;  %v1315_v14 = vld [vmem:[%s21710_s7 + $0x278] sm:$0xff]  ;;  %v590_v16 = vld [vmem:[%s21712_s5 + $0xa8] sm:$0xff] }
  0xe9   :  { %v409_v34 = vpop.f32.mrb[0].mxu1 }
  0xea   :  { %8665 = vmatmul.mubr.msk.f32.gmra.mrb[46].mxu1 %vm1400_vm5, %v12299_v38  ;;  %v12607_v61 = vadd.f32 %v409_v34, %v118_v56  ;;  %v9077_v0 = vpop.f32.mrb[1].mxu1  ;;  %9142 = vmatprep.subr.bf16.mxu0 %v9141_v18  ;;  %v586_v56 = vld [vmem:[%s21712_s5 + $0x88] sm:$0xff]  ;;  %v592_v18 = vld [vmem:[%s21712_s5 + $0xb8] sm:$0xff] }
  0xeb   :  { %1763 = vmatprep.mubr.f32.mxu1 %v21739_v2  ;;  %9408 = vmatpush1.bf16.msra.mxu1 %v9407_v25  ;;  %v580_v25 = vld [vmem:[%s21712_s5 + $0x58] sm:$0xff]  ;;  %v9157_v19 = vpack.c.bf16 %v592_v18, %v590_v16  ;;  %v605_v16 = vld [vmem:[%s21712_s5 + $0x120] sm:$0xff]  ;;  %v607_v18 = vld [vmem:[%s21712_s5 + $0x130] sm:$0xff] }
  0xec   :  { %9410 = vmatprep.subr.bf16.mxu1 %v9409_v26  ;;  %464 = vrot.lane.b32.xlu0 %v12578_v53, %s11808_s17  ;;  %21835 = vst [vmem:[#allocation6_spill] sm:$0xff] %v12607_v61  ;;  %v9145_v26 = vpack.c.bf16 %v580_v25, %v578_v24 }
  0xed   :  { %v267_v43 = vpop.f32.mrb[2].mxu0  ;;  %9144 = vmatpush1.bf16.msra.mxu0 %v9143_v10  ;;  %v591_v10 = vld [vmem:[%s21712_s5 + $0xb0] sm:$0xff] }
  0xee   :  { %8666 = vmatmul.mubr.msk.f32.gmra.mrb[48].mxu1 %vm1400_vm5, %v12314_v48  ;;  %v12617_v13 = vadd.f32 %v267_v43, %v102_v57  ;;  %9146 = vmatprep.subr.bf16.mxu0 %v9145_v26  ;;  %v588_v57 = vld [vmem:[%s21712_s5 + $0x98] sm:$0xff]  ;;  %v1294_v43 = vld [vmem:[%s21710_s7 + $0x1d0] sm:$0xff]  ;;  %v9159_v25 = vpack.c.bf16 %v591_v10, %v589_v20  ;;  %v9429_v26 = vpack.c.bf16 %v1315_v14, %v1305_v9  ;;  %v610_v20 = vld [vmem:[%s21712_s5 + $0x148] sm:$0xff] }
  0xef   :  { %1769 = vmatprep.mubr.f32.mxu1 %v21739_v2  ;;  %9412 = vmatpush1.bf16.msra.mxu1 %v9411_v5  ;;  %v1254_v5 = vld [vmem:[%s21710_s7 + $0x90] sm:$0xff]  ;;  %v9153_v34 = vpack.c.bf16 %v588_v57, %v586_v56  ;;  %v9427_v24 = vpack.c.bf16 %v1294_v43, %v1284_v8  ;;  %v1345_v57 = vld [vmem:[%s21710_s7 + $0x368] sm:$0xff]  ;;  %v1344_v8 = vld [vmem:[%s21710_s7 + $0x360] sm:$0xff] }
  0xf0   :  { %9414 = vmatprep.subr.bf16.mxu1 %v9413_v33  ;;  %21836 = vst [vmem:[#allocation7_spill] sm:$0xff] %v12617_v13  ;;  %v21735_v17 = vmax.f32 %v12617_v13, 0.0  ;;  %499 = vrot.lane.b32.xlu0 %v12578_v53, %s11809_s25  ;;  %v1265_v33 = vld [vmem:[%s21710_s7 + $0xe8] sm:$0xff]  ;;  %v9419_v46 = vpack.c.bf16 %v1254_v5, %v1244_v29  ;;  %v596_v5 = vld [vmem:[%s21712_s5 + $0xd8] sm:$0xff] }
  0xf1   :  { %9148 = vmatpush1.bf16.msra.mxu0 %v9147_v31  ;;  %v9421_v49 = vpack.c.bf16 %v1275_v35, %v1265_v33  ;;  %v1335_v31 = vld [vmem:[%s21710_s7 + $0x318] sm:$0xff]  ;;  %v594_v29 = vld [vmem:[%s21712_s5 + $0xc8] sm:$0xff]  ;;  %v593_v35 = vld [vmem:[%s21712_s5 + $0xc0] sm:$0xff] }
  0xf2   :  { %8667 = vmatmul.mubr.msk.f32.gmra.mrb[50].mxu1 %vm1400_vm5, %v12335_v58  ;;  %v11659_v21 = vpack.i.bf16 %v21735_v17, %v414_v12  ;;  %v9161_v33 = vpack.c.bf16 %v596_v5, %v594_v29  ;;  %v606_v43 = vld [vmem:[%s21712_s5 + $0x128] sm:$0xff]  ;;  %v608_v9 = vld [vmem:[%s21712_s5 + $0x138] sm:$0xff]  ;;  %v613_v29 = vld [vmem:[%s21712_s5 + $0x160] sm:$0xff] }
  0xf3   :  { %1775 = vmatprep.mubr.f32.mxu1 %v21739_v2  ;;  %9416 = vmatpush1.bf16.msra.mxu1 %v9415_v41  ;;  %v9149_v41 = vpack.c.bf16 %v584_v40, %v582_v36  ;;  %v595_v36 = vld [vmem:[%s21712_s5 + $0xd0] sm:$0xff]  ;;  %v9173_v14 = vpack.c.bf16 %v608_v9, %v606_v43  ;;  %v612_v10 = vld [vmem:[%s21712_s5 + $0x158] sm:$0xff]  ;;  %v12918_v9 = vpop.f32.mrb[3].mxu0 }
  0xf4   :  { %1826 = vmatprep.subr.mxu1 %v1343_v44  ;;  %11660 = vrot.lane.b32.xlu1 %v11659_v21, %s11807_s30  ;;  %v581_v44 = vld [vmem:[%s21712_s5 + $0x60] sm:$0xff]  ;;  %v615_v5 = vld [vmem:[%s21712_s5 + $0x170] sm:$0xff] }
  0xf5   :  { %534 = vrot.lane.b32.xlu0 %v12578_v53, %s11810_s22  ;;  %v9151_v47 = vpack.c.bf16 %v583_v45, %v581_v44  ;;  %9150 = vmatprep.subr.bf16.mxu0 %v9149_v41  ;;  %v9163_v41 = vpack.c.bf16 %v595_v36, %v593_v35  ;;  %v9433_v44 = vpack.c.bf16 %v1335_v31, %v1325_v23  ;;  %v1324_v45 = vld [vmem:[%s21710_s7 + $0x2c0] sm:$0xff]  ;;  %v616_v23 = vld [vmem:[%s21712_s5 + $0x178] sm:$0xff]  ;;  %v618_v35 = vld [vmem:[%s21712_s5 + $0x188] sm:$0xff] }
  0xf6   :  { %8668 = vmatmul.mubr.msk.f32.gmra.mrb[52].mxu1 %vm1400_vm5, %v12344_v63  ;;  %v620_v36 = vld [vmem:[%s21712_s5 + $0x198] sm:$0xff]  ;;  %v631_v43 = vld [vmem:[%s21712_s5 + $0x1f0] sm:$0xff] }
  0xf7   :  { %1781 = vmatprep.mubr.f32.mxu1 %v21739_v2  ;;  %1827 = vmatpush1.msra.mxu1 %v1342_v51  ;;  %v1274_v51 = vld [vmem:[%s21710_s7 + $0x130] sm:$0xff] }
  0xf8   :  { %9418 = vmatprep.subr.bf16.mxu1 %v9417_v52  ;;  %11665 = vrot.lane.b32.xlu1 %v11659_v21, %s11808_s17  ;;  %v1285_v52 = vld [vmem:[%s21710_s7 + $0x188] sm:$0xff]  ;;  %v9423_v0 = vpack.c.bf16 %v1274_v51, %v1264_v50  ;;  %v597_v51 = vld [vmem:[%s21712_s5 + $0xe0] sm:$0xff] }
  0xf9   :  { %9152 = vmatpush1.bf16.msra.mxu0 %v9151_v47  ;;  %v9425_v6 = vpack.c.bf16 %v1295_v54, %v1285_v52  ;;  %v598_v47 = vld [vmem:[%s21712_s5 + $0xe8] sm:$0xff]  ;;  %v599_v52 = vld [vmem:[%s21712_s5 + $0xf0] sm:$0xff] }
  0xfa   :  { %8669 = vmatmul.mubr.msk.f32.gmra.mrb[54].mxu1 %vm1400_vm5, %v12353_v11  ;;  %9154 = vmatprep.subr.bf16.mxu0 %v9153_v34  ;;  %v9167_v56 = vpack.c.bf16 %v599_v52, %v597_v51  ;;  %v602_v34 = vld [vmem:[%s21712_s5 + $0x108] sm:$0xff]  ;;  %v623_v51 = vld [vmem:[%s21712_s5 + $0x1b0] sm:$0xff] }
  0xfb   :  { %1787 = vmatprep.mubr.f32.mxu1 %v21739_v2  ;;  %v9169_v60 = vpack.c.bf16 %v604_v59, %v602_v34  ;;  %v625_v34 = vld [vmem:[%s21712_s5 + $0x1c0] sm:$0xff]  ;;  %v627_v59 = vld [vmem:[%s21712_s5 + $0x1d0] sm:$0xff] }
  0xfc   :  { %11670 = vrot.lane.b32.xlu1 %v11659_v21, %s11809_s25 }
  0xfd   :  { %9156 = vmatpush1.bf16.msra.mxu0 %v9155_v1  ;;  %v603_v1 = vld [vmem:[%s21712_s5 + $0x110] sm:$0xff] }
  0xfe   :  { %8670 = vmatmul.mubr.msk.f32.gmra.mrb[56].mxu1 %vm1400_vm5, %v12362_v62  ;;  %9158 = vmatprep.subr.bf16.mxu0 %v9157_v19  ;;  %v9175_v19 = vpack.c.bf16 %v607_v18, %v605_v16  ;;  %v338_v18 = vpop.f32.mrb[4].mxu0 }
  0xff   :  { %1793 = vmatprep.mubr.f32.mxu1 %v21739_v2 }
 0x100   :  { %11675 = vrot.lane.b32.xlu1 %v11659_v21, %s11810_s22  ;;  %v1304_v21 = vld [vmem:[%s21710_s7 + $0x220] sm:$0xff] }
 0x101   :  { %9160 = vmatpush1.bf16.msra.mxu0 %v9159_v25  ;;  %v9431_v40 = vpack.c.bf16 %v1314_v27, %v1304_v21  ;;  %v609_v25 = vld [vmem:[%s21712_s5 + $0x140] sm:$0xff]  ;;  %v614_v27 = vld [vmem:[%s21712_s5 + $0x168] sm:$0xff] }
 0x102   :  { %8671 = vmatmul.mubr.msk.f32.gmra.mrb[58].mxu1 %vm1400_vm5, %v12371_v22  ;;  %9162 = vmatprep.subr.bf16.mxu0 %v9161_v33  ;;  %v9181_v31 = vpack.c.bf16 %v616_v23, %v614_v27  ;;  %v9183_v33 = vpack.c.bf16 %v615_v5, %v613_v29 }
 0x103   :  { %1799 = vmatprep.mubr.f32.mxu1 %v21739_v2 }
 0x105   :  { %9164 = vmatpush1.bf16.msra.mxu0 %v9163_v41  ;;  %v617_v41 = vld [vmem:[%s21712_s5 + $0x180] sm:$0xff] }
 0x106   :  { %8672 = vmatmul.mubr.msk.f32.gmra.mrb[60].mxu1 %vm1400_vm5, %v12386_v30 }
 0x107   :  { %1870 = vmatprep.mubr.f32.mxu1 %v21739_v2 }
 0x10a   :  { %8673 = vmatmul.mubr.msk.f32.vlgmr.msra.gmra.mrb[62].mxu1 %vm1400_vm5, %v12251_v7 }
 0x10b   :  { %9420 = vmatpush1.bf16.msra.mxu1 %v9419_v46  ;;  %1876 = vmatprep.mubr.f32.mxu1 %v21739_v2  ;;  %v1334_v46 = vld [vmem:[%s21710_s7 + $0x310] sm:$0xff] }
 0x10c   :  { %9422 = vmatprep.subr.bf16.mxu1 %v9421_v49  ;;  %v600_v49 = vld [vmem:[%s21712_s5 + $0xf8] sm:$0xff]  ;;  %v9435_v54 = vpack.c.bf16 %v1334_v46, %v1324_v45  ;;  %v622_v46 = vld [vmem:[%s21712_s5 + $0x1a8] sm:$0xff] }
 0x10d   :  { %v9165_v50 = vpack.c.bf16 %v600_v49, %v598_v47  ;;  %v624_v47 = vld [vmem:[%s21712_s5 + $0x1b8] sm:$0xff] }
 0x10e   :  { %8674 = vmatmul.mubr.msk.f32.gmra.mrb[64].mxu1 %vm1400_vm5, %v12272_v4  ;;  %v9189_v49 = vpack.c.bf16 %v624_v47, %v622_v46 }
 0x10f   :  { %1882 = vmatprep.mubr.f32.mxu1 %v21739_v2  ;;  %9424 = vmatpush1.bf16.msra.mxu1 %v9423_v0  ;;  %v601_v0 = vld [vmem:[%s21712_s5 + $0x100] sm:$0xff] }
 0x110   :  { %9426 = vmatprep.subr.bf16.mxu1 %v9425_v6  ;;  %9166 = vmatprep.subr.bf16.mxu0 %v9165_v50  ;;  %v9171_v6 = vpack.c.bf16 %v603_v1, %v601_v0  ;;  %v621_v50 = vld [vmem:[%s21712_s5 + $0x1a0] sm:$0xff]  ;;  %v109_v0 = vsub.s32 4, %v12529_v28  ;;  %v632_v1 = vld [vmem:[%s21712_s5 + $0x1f8] sm:$0xff] }
 0x111   :  { %9168 = vmatpush1.bf16.msra.mxu0 %v9167_v56  ;;  %v9191_v52 = vpack.c.bf16 %v623_v51, %v621_v50  ;;  %v628_v56 = vld [vmem:[%s21712_s5 + $0x1d8] sm:$0xff] }
 0x112   :  { %8675 = vmatmul.mubr.msk.f32.gmra.mrb[66].mxu1 %vm1400_vm5, %v12299_v38  ;;  %9170 = vmatprep.subr.bf16.mxu0 %v9169_v60  ;;  %v9195_v60 = vpack.c.bf16 %v627_v59, %v625_v34 }
 0x113   :  { %1888 = vmatprep.mubr.f32.mxu1 %v21739_v2  ;;  %9428 = vmatpush1.bf16.msra.mxu1 %v9427_v24  ;;  %v9177_v24 = vpack.c.bf16 %v612_v10, %v610_v20 }
 0x114   :  { %9430 = vmatprep.subr.bf16.mxu1 %v9429_v26  ;;  %v611_v26 = vld [vmem:[%s21712_s5 + $0x150] sm:$0xff] }
 0x115   :  { %9172 = vmatpush1.bf16.msra.mxu0 %v9171_v6  ;;  %v9179_v21 = vpack.c.bf16 %v611_v26, %v609_v25 }
 0x116   :  { %8676 = vmatmul.mubr.msk.f32.gmra.mrb[68].mxu1 %vm1400_vm5, %v12314_v48  ;;  %9174 = vmatprep.subr.bf16.mxu0 %v9173_v14  ;;  %v110_v14 = vrot.slane %v12552_v39, %v109_v0 }
 0x117   :  { %1894 = vmatprep.mubr.f32.mxu1 %v21739_v2  ;;  %9432 = vmatpush1.bf16.msra.mxu1 %v9431_v40  ;;  %v9185_v40 = vpack.c.bf16 %v620_v36, %v618_v35 }
 0x118   :  { %9434 = vmatprep.subr.bf16.mxu1 %v9433_v44  ;;  %v619_v44 = vld [vmem:[%s21712_s5 + $0x190] sm:$0xff] }
 0x119   :  { %9176 = vmatpush1.bf16.msra.mxu0 %v9175_v19  ;;  %v9187_v45 = vpack.c.bf16 %v619_v44, %v617_v41 }
 0x11a   :  { %8677 = vmatmul.mubr.msk.f32.gmra.mrb[70].mxu1 %vm1400_vm5, %v12335_v58  ;;  %9178 = vmatprep.subr.bf16.mxu0 %v9177_v24 }
 0x11b   :  { %1900 = vmatprep.mubr.f32.mxu1 %v21739_v2  ;;  %9436 = vmatpush1.bf16.msra.mxu1 %v9435_v54  ;;  %v626_v54 = vld [vmem:[%s21712_s5 + $0x1c8] sm:$0xff] }
 0x11c   :  { %1951 = vmatprep.subr.mxu1 %v1345_v57  ;;  %v9193_v57 = vpack.c.bf16 %v628_v56, %v626_v54 }
 0x11d   :  { %9180 = vmatpush1.bf16.msra.mxu0 %v9179_v21 }
 0x11e   :  { %8678 = vmatmul.mubr.msk.f32.gmra.mrb[72].mxu1 %vm1400_vm5, %v12344_v63  ;;  %9182 = vmatprep.subr.bf16.mxu0 %v9181_v31 }
 0x11f   :  { %1906 = vmatprep.mubr.f32.mxu1 %v21739_v2  ;;  %1952 = vmatpush1.msra.mxu1 %v1344_v8  ;;  %v629_v8 = vld [vmem:[%s21712_s5 + $0x1e0] sm:$0xff] }
 0x120   :  { %v9199_v16 = vpack.c.bf16 %v631_v43, %v629_v8 }
 0x121   :  { %9184 = vmatpush1.bf16.msra.mxu0 %v9183_v33 }
 0x122   :  { %8679 = vmatmul.mubr.msk.f32.gmra.mrb[74].mxu1 %vm1400_vm5, %v12353_v11  ;;  %9186 = vmatprep.subr.bf16.mxu0 %v9185_v40 }
 0x123   :  { %1912 = vmatprep.mubr.f32.mxu1 %v21739_v2 }
 0x125   :  { %9188 = vmatpush1.bf16.msra.mxu0 %v9187_v45 }
 0x126   :  { %8680 = vmatmul.mubr.msk.f32.gmra.mrb[76].mxu1 %vm1400_vm5, %v12362_v62  ;;  %9190 = vmatprep.subr.bf16.mxu0 %v9189_v49 }
 0x127   :  { %1918 = vmatprep.mubr.f32.mxu1 %v21739_v2 }
 0x129   :  { %9192 = vmatpush1.bf16.msra.mxu0 %v9191_v52 }
 0x12a   :  { %8681 = vmatmul.mubr.msk.f32.gmra.mrb[78].mxu1 %vm1400_vm5, %v12371_v22  ;;  %9194 = vmatprep.subr.bf16.mxu0 %v9193_v57 }
 0x12b   :  { %1924 = vmatprep.mubr.f32.mxu1 %v21739_v2 }
 0x12d   :  { %9196 = vmatpush1.bf16.msra.mxu0 %v9195_v60 }
 0x12e   :  { %8682 = vmatmul.mubr.msk.f32.gmra.mrb[80].mxu1 %vm1400_vm5, %v12386_v30 }
 0x12f   :  { %1995 = vmatprep.mubr.f32.mxu1 %v21739_v2 }
 0x132   :  { %8683 = vmatmul.mubr.msk.f32.vlgmr.msra.gmra.mrb[82].mxu1 %vm1400_vm5, %v12251_v7  ;;  %v630_v7 = vld [vmem:[%s21712_s5 + $0x1e8] sm:$0xff] }
 0x133   :  { %2001 = vmatprep.mubr.f32.mxu1 %v21739_v2  ;;  %v9197_v6 = vpack.c.bf16 %v632_v1, %v630_v7 }
 0x135   :  { %9198 = vmatprep.subr.bf16.mxu0 %v9197_v6 }
 0x136   :  { %8684 = vmatmul.mubr.msk.f32.gmra.mrb[84].mxu1 %vm1400_vm5, %v12272_v4  ;;  %v12923_v4 = vadd.f32 %v338_v18, %v110_v14  ;;  %9200 = vmatpush1.bf16.msra.mxu0 %v9199_v16  ;;  %v13021_v16 = vld [vmem:[%s21713_s8] sm:$0xff] }
 0x137   :  { %2007 = vmatprep.mubr.f32.mxu1 %v21739_v2 }
 0x13a   :  { %8685 = vmatmul.mubr.msk.f32.gmra.mrb[86].mxu1 %vm1400_vm5, %v12299_v38 }
 0x13b   :  { %2013 = vmatprep.mubr.f32.mxu1 %v21739_v2 }
 0x13e   :  { %8686 = vmatmul.mubr.msk.f32.gmra.mrb[88].mxu1 %vm1400_vm5, %v12314_v48 }
 0x13f   :  { %2019 = vmatprep.mubr.f32.mxu1 %v21739_v2 }
 0x142   :  { %8687 = vmatmul.mubr.msk.f32.gmra.mrb[90].mxu1 %vm1400_vm5, %v12335_v58 }
 0x143   :  { %2025 = vmatprep.mubr.f32.mxu1 %v21739_v2 }
 0x146   :  { %8688 = vmatmul.mubr.msk.f32.gmra.mrb[92].mxu1 %vm1400_vm5, %v12344_v63 }
 0x147   :  { %2031 = vmatprep.mubr.f32.mxu1 %v21739_v2 }
 0x14a   :  { %8689 = vmatmul.mubr.msk.f32.gmra.mrb[94].mxu1 %vm1400_vm5, %v12353_v11 }
 0x14b   :  { %2037 = vmatprep.mubr.f32.mxu1 %v21739_v2 }
 0x14e   :  { %8690 = vmatmul.mubr.msk.f32.gmra.mrb[96].mxu1 %vm1400_vm5, %v12362_v62 }
 0x14f   :  { %2043 = vmatprep.mubr.f32.mxu1 %v21739_v2 }
 0x152   :  { %8691 = vmatmul.mubr.msk.f32.gmra.mrb[98].mxu1 %vm1400_vm5, %v12371_v22 }
 0x153   :  { %2049 = vmatprep.mubr.f32.mxu1 %v21739_v2 }
 0x155   :  { %v12946_v38 = vpop.f32.mrb[2].mxu1 }
 0x156   :  { %21837 = vst [vmem:[#allocation8_spill] sm:$0xff] %v12946_v38  ;;  %v12948_v48 = vpop.f32.mrb[3].mxu1  ;;  %8692 = vmatmul.mubr.msk.f32.gmra.mrb[100].mxu1 %vm1400_vm5, %v12386_v30 }
 0x157   :  { %21838 = vst [vmem:[#allocation9_spill] sm:$0xff] %v12948_v48  ;;  %3660 = vmatprep.mubr.f32.mxu1 %v21739_v2 }
 0x159   :  { %v12953_v58 = vpop.f32.mrb[4].mxu1 }
 0x15a   :  { %21839 = vst [vmem:[#allocation10_spill] sm:$0xff] %v12953_v58  ;;  %v12955_v63 = vpop.f32.mrb[5].mxu1  ;;  %v430_v10 = vpop.permute.xlu0 %429 }
 0x15b   :  { %21840 = vst [vmem:[#allocation11_spill] sm:$0xff] %v12955_v63 }
 0x15e   :  { %v465_v26 = vpop.permute.xlu0 %464 }
 0x160   :  { %v12957_v11 = vpop.f32.mrb[6].mxu1 }
 0x161   :  { %21841 = vst [vmem:[#allocation12_spill] sm:$0xff] %v12957_v11  ;;  %v12959_v62 = vpop.f32.mrb[7].mxu1 }
 0x162   :  { %21842 = vst [vmem:[#allocation13_spill] sm:$0xff] %v12959_v62  ;;  %v500_v44 = vpop.permute.xlu0 %499 }
 0x165   :  { %v12961_v22 = vpop.f32.mrb[8].mxu1 }
 0x166   :  { %21843 = vst [vmem:[#allocation14_spill] sm:$0xff] %v12961_v22  ;;  %v12963_v39 = vpop.f32.mrb[9].mxu1  ;;  %v12973_v25 = vpop.permute.xlu1 %11660 }
 0x167   :  { %21844 = vst [vmem:[#allocation15_spill] sm:$0xff] %v12963_v39  ;;  %21849 = vst [vmem:[#allocation20_spill] sm:$0xff] %v12973_v25  ;;  %v21737_v21 = vunpack.i.h.bf16 %v12973_v25  ;;  %v11662_v27 = vunpack.i.l.bf16 %v12973_v25  ;;  %v535_v34 = vpop.permute.xlu0 %534 }
 0x169   :  { %v445_v23 = vsel %vm443_vm6, %v11662_v27, %v21737_v21  ;;  %v444_v31 = vsel %vm443_vm6, %v430_v10, %v11662_v27  ;;  %v13026_v10 = vsub.s32 3, %v12529_v28  ;;  %v13034_v27 = vrot.slane %v13021_v16, %v12560_v42 }
 0x16a   :  { %v458_v5 = vmax.f32 %v414_v12, %v445_v23  ;;  %v457_v33 = vmax.f32 %v12578_v53, %v444_v31  ;;  %v12986_v35 = vpop.permute.xlu1 %11665  ;;  %v13038_v31 = vrot.slane %v13021_v16, %v12583_v55 }
 0x16b   :  { %21851 = vst [vmem:[#allocation22_spill] sm:$0xff] %v12986_v35  ;;  %v21736_v40 = vunpack.i.h.bf16 %v12986_v35  ;;  %v11667_v41 = vunpack.i.l.bf16 %v12986_v35  ;;  %21859 = vst [vmem:[#allocation30_spill] sm:$0xff] %v13026_v10  ;;  %v1380_v35 = vsub.s32 7, %v12529_v28 }
 0x16c   :  { %v12965_v19 = vpop.f32.mrb[10].mxu1  ;;  %21860 = vst [vmem:[#allocation31_spill] sm:$0xff] %v13034_v27 }
 0x16d   :  { %21845 = vst [vmem:[#allocation16_spill] sm:$0xff] %v12965_v19  ;;  %v12967_v20 = vpop.f32.mrb[11].mxu1  ;;  %v480_v45 = vsel %vm478_vm7, %v11667_v41, %v21736_v40  ;;  %v479_v46 = vsel %vm478_vm7, %v465_v26, %v11667_v41  ;;  %v13030_v26 = vrot.slane %v13021_v16, %v12540_v32 }
 0x16e   :  { %21846 = vst [vmem:[#allocation17_spill] sm:$0xff] %v12967_v20  ;;  %v492_v37 = vmax.f32 %v457_v33, %v479_v46  ;;  %v12996_v12 = vpop.permute.xlu1 %11670  ;;  %v493_v53 = vmax.f32 %v458_v5, %v480_v45 }
 0x16f   :  { %21853 = vst [vmem:[#allocation24_spill] sm:$0xff] %v12996_v12  ;;  %v21734_v49 = vunpack.i.h.bf16 %v12996_v12  ;;  %v11672_v50 = vunpack.i.l.bf16 %v12996_v12 }
 0x171   :  { %v12969_v30 = vpop.f32.mrb[12].mxu1  ;;  %v514_v52 = vsel %vm513_vm8, %v500_v44, %v11672_v50  ;;  %v515_v54 = vsel %vm513_vm8, %v11672_v50, %v21734_v49  ;;  %v13048_v44 = vrot.slane %v13021_v16, %v13026_v10 }
 0x172   :  { %21847 = vst [vmem:[#allocation18_spill] sm:$0xff] %v12969_v30  ;;  %v12971_v24 = vpop.f32.mrb[13].mxu1  ;;  %v527_v56 = vmax.f32 %v492_v37, %v514_v52  ;;  %v13008_v57 = vpop.permute.xlu1 %11675  ;;  %v528_v59 = vmax.f32 %v493_v53, %v515_v54 }
 0x173   :  { %21848 = vst [vmem:[#allocation19_spill] sm:$0xff] %v12971_v24  ;;  %21856 = vst [vmem:[#allocation27_spill] sm:$0xff] %v13008_v57  ;;  %v21732_v60 = vunpack.i.h.bf16 %v13008_v57  ;;  %v11677_v7 = vunpack.i.l.bf16 %v13008_v57 }
 0x175   :  { %v549_v1 = vsel %vm548_vm9, %v535_v34, %v11677_v7  ;;  %v550_v6 = vsel %vm548_vm9, %v11677_v7, %v21732_v60 }
 0x176   :  { %v562_v43 = vmax.f32 %v527_v56, %v549_v1  ;;  %v563_v14 = vmax.f32 %v528_v59, %v550_v6 }
 0x178   :  { %v12981_v29 = vpop.f32.mrb[14].mxu1  ;;  %848 = vmatprep.mubr.f32.mxu0 %v563_v14 }
 0x179   :  { %21850 = vst [vmem:[#allocation21_spill] sm:$0xff] %v12981_v29  ;;  %v12988_v36 = vpop.f32.mrb[15].mxu1  ;;  %849 = vmatmul.mubr.f32.vlgmr.msra.gmra.mrb[6].mxu0 %v562_v43 }
 0x17a   :  { %21852 = vst [vmem:[#allocation23_spill] sm:$0xff] %v12988_v36 }
 0x17d   :  { %v12998_v47 = vpop.f32.mrb[16].mxu1 }
 0x17e   :  { %21854 = vst [vmem:[#allocation25_spill] sm:$0xff] %v12998_v47  ;;  %v13002_v51 = vpop.f32.mrb[17].mxu1 }
 0x17f   :  { %21855 = vst [vmem:[#allocation26_spill] sm:$0xff] %v13002_v51 }
 0x184   :  { %v13016_v8 = vpop.f32.mrb[18].mxu1 }
 0x185   :  { %21857 = vst [vmem:[#allocation28_spill] sm:$0xff] %v13016_v8  ;;  %v13023_v18 = vpop.f32.mrb[19].mxu1 }
 0x186   :  { %21858 = vst [vmem:[#allocation29_spill] sm:$0xff] %v13023_v18 }
 0x189   :  { %v1551_v23 = vpop.f32.mrb[20].mxu1 }
 0x18a   :  { %v13041_v5 = vadd.f32 %v1551_v23, %v13030_v26  ;;  %v1553_v33 = vpop.f32.mrb[21].mxu1 }
 0x18b   :  { %v13044_v41 = vadd.f32 %v1553_v33, %v13034_v27 }
 0x18c   :  { %21861 = vst [vmem:[#allocation32_spill] sm:$0xff] %v13041_v5 }
 0x18d   :  { %21862 = vst [vmem:[#allocation33_spill] sm:$0xff] %v13044_v41  ;;  %v1622_v45 = vpop.f32.mrb[22].mxu1 }
 0x18e   :  { %v13051_v46 = vadd.f32 %v1622_v45, %v13038_v31  ;;  %v1624_v37 = vpop.f32.mrb[23].mxu1 }
 0x18f   :  { %v1625_v53 = vadd.f32 %v1624_v37, %v13048_v44 }
 0x190   :  { %21863 = vst [vmem:[#allocation34_spill] sm:$0xff] %v13051_v46  ;;  %v21738_v50 = vmax.f32 %v13051_v46, 0.0 }
 0x191   :  { %v2059_v52 = vmax.f32 %v1625_v53, 0.0  ;;  %v1628_v54 = vpop.f32.mrb[24].mxu1 }
 0x192   :  { %v13056_v56 = vadd.f32 %v1628_v54, %v13038_v31  ;;  %v1630_v34 = vpop.f32.mrb[25].mxu1  ;;  %2186 = vrot.lane.b32.xlu1 %v21738_v50, %s11811_s21 }
 0x193   :  { %v1631_v59 = vadd.f32 %v1630_v34, %v13048_v44  ;;  %2188 = vrot.lane.b32.xlu0 %v2059_v52, %s11811_s21 }
 0x194   :  { %21864 = vst [vmem:[#allocation35_spill] sm:$0xff] %v13056_v56  ;;  %v21731_v7 = vmax.f32 %v13056_v56, 0.0 }
 0x195   :  { %v2069_v1 = vmax.f32 %v1631_v59, 0.0  ;;  %v1634_v6 = vpop.f32.mrb[26].mxu1 }
 0x196   :  { %v13065_v43 = vadd.f32 %v1634_v6, %v13038_v31  ;;  %v1636_v14 = vpop.f32.mrb[27].mxu1  ;;  %2192 = vrot.lane.b32.xlu1 %v21731_v7, %s11811_s21 }
 0x197   :  { %v1637_v23 = vadd.f32 %v1636_v14, %v13048_v44  ;;  %2194 = vrot.lane.b32.xlu0 %v2069_v1, %s11811_s21 }
 0x198   :  { %21865 = vst [vmem:[#allocation36_spill] sm:$0xff] %v13065_v43  ;;  %v21729_v33 = vmax.f32 %v13065_v43, 0.0 }
 0x199   :  { %v2079_v45 = vmax.f32 %v1637_v23, 0.0  ;;  %v1640_v37 = vpop.f32.mrb[28].mxu1 }
 0x19a   :  { %v13074_v53 = vadd.f32 %v1640_v37, %v13038_v31  ;;  %v1642_v52 = vpop.f32.mrb[29].mxu1  ;;  %2198 = vrot.lane.b32.xlu1 %v21729_v33, %s11811_s21 }
 0x19b   :  { %v1643_v54 = vadd.f32 %v1642_v52, %v13048_v44  ;;  %2200 = vrot.lane.b32.xlu0 %v2079_v45, %s11811_s21 }
 0x19c   :  { %21866 = vst [vmem:[#allocation37_spill] sm:$0xff] %v13074_v53  ;;  %v21728_v34 = vmax.f32 %v13074_v53, 0.0 }
 0x19d   :  { %v2089_v59 = vmax.f32 %v1643_v54, 0.0  ;;  %v1646_v1 = vpop.f32.mrb[30].mxu1 }
 0x19e   :  { %v13083_v6 = vadd.f32 %v1646_v1, %v13038_v31  ;;  %v1648_v14 = vpop.f32.mrb[31].mxu1  ;;  %2204 = vrot.lane.b32.xlu1 %v21728_v34, %s11811_s21 }
 0x19f   :  { %v1649_v23 = vadd.f32 %v1648_v14, %v13048_v44  ;;  %2206 = vrot.lane.b32.xlu0 %v2089_v59, %s11811_s21 }
 0x1a0   :  { %21867 = vst [vmem:[#allocation38_spill] sm:$0xff] %v13083_v6  ;;  %v21730_v37 = vmax.f32 %v13083_v6, 0.0 }
 0x1a1   :  { %v2099_v52 = vmax.f32 %v1649_v23, 0.0  ;;  %v1652_v45 = vpop.f32.mrb[32].mxu1 }
 0x1a2   :  { %v13092_v3 = vadd.f32 %v1652_v45, %v13038_v31  ;;  %v1654_v54 = vpop.f32.mrb[33].mxu1  ;;  %2210 = vrot.lane.b32.xlu1 %v21730_v37, %s11811_s21 }
 0x1a3   :  { %v1655_v1 = vadd.f32 %v1654_v54, %v13048_v44  ;;  %2212 = vrot.lane.b32.xlu0 %v2099_v52, %s11811_s21 }
 0x1a4   :  { %21868 = vst [vmem:[#allocation39_spill] sm:$0xff] %v13092_v3  ;;  %v21733_v14 = vmax.f32 %v13092_v3, 0.0 }
 0x1a5   :  { %v2109_v34 = vmax.f32 %v1655_v1, 0.0  ;;  %v1658_v59 = vpop.f32.mrb[34].mxu1 }
 0x1a6   :  { %v13101_v33 = vadd.f32 %v1658_v59, %v13038_v31  ;;  %v1660_v23 = vpop.f32.mrb[35].mxu1  ;;  %2216 = vrot.lane.b32.xlu1 %v21733_v14, %s11811_s21 }
 0x1a7   :  { %v13107_v45 = vadd.f32 %v1660_v23, %v13048_v44  ;;  %2218 = vrot.lane.b32.xlu0 %v2109_v34, %s11811_s21 }
 0x1a8   :  { %21869 = vst [vmem:[#allocation40_spill] sm:$0xff] %v13101_v33 }
 0x1a9   :  { %v1664_v54 = vpop.f32.mrb[36].mxu1 }
 0x1aa   :  { %v13111_v52 = vadd.f32 %v1664_v54, %v13038_v31  ;;  %v1666_v37 = vpop.f32.mrb[37].mxu1  ;;  %v1369_v54 = vrot.slane %v13021_v16, %v109_v0 }
 0x1ab   :  { %v13114_v1 = vadd.f32 %v1666_v37, %v13048_v44 }
 0x1ac   :  { %21870 = vst [vmem:[#allocation41_spill] sm:$0xff] %v13111_v52 }
 0x1ad   :  { %v1670_v59 = vpop.f32.mrb[38].mxu1 }
 0x1ae   :  { %v13117_v7 = vadd.f32 %v1670_v59, %v13038_v31  ;;  %v1672_v60 = vpop.f32.mrb[39].mxu1 }
 0x1af   :  { %v13120_v14 = vadd.f32 %v1672_v60, %v13048_v44 }
 0x1b0   :  { %21871 = vst [vmem:[#allocation42_spill] sm:$0xff] %v13117_v7 }
 0x1b1   :  { %v1676_v23 = vpop.f32.mrb[40].mxu1 }
 0x1b2   :  { %v13123_v49 = vadd.f32 %v1676_v23, %v13038_v31  ;;  %v1678_v34 = vpop.f32.mrb[41].mxu1 }
 0x1b3   :  { %v13129_v37 = vadd.f32 %v1678_v34, %v13048_v44 }
 0x1b4   :  { %21872 = vst [vmem:[#allocation43_spill] sm:$0xff] %v13123_v49 }
 0x1b5   :  { %v1747_v17 = vpop.f32.mrb[42].mxu1 }
 0x1b6   :  { %v13131_v40 = vadd.f32 %v1747_v17, %v1369_v54  ;;  %v13133_v59 = vpop.f32.mrb[43].mxu1 }
 0x1b9   :  { %v1753_v21 = vpop.f32.mrb[44].mxu1 }
 0x1ba   :  { %v13135_v60 = vadd.f32 %v1753_v21, %v1369_v54  ;;  %v13137_v50 = vpop.f32.mrb[45].mxu1 }
 0x1bc   :  { %v21745_v31 = vmax.f32 %v13135_v60, 0.0 }
 0x1bd   :  { %v1759_v23 = vpop.f32.mrb[46].mxu1 }
 0x1be   :  { %v13140_v2 = vadd.f32 %v1759_v23, %v1369_v54  ;;  %v13142_v15 = vpop.f32.mrb[47].mxu1  ;;  %2196 = vrot.lane.b32.xlu1 %v21745_v31, %s11811_s21 }
 0x1c0   :  { %v21748_v17 = vmax.f32 %v13140_v2, 0.0 }
 0x1c1   :  { %v1765_v0 = vpop.f32.mrb[48].mxu1 }
 0x1c2   :  { %v13148_v44 = vadd.f32 %v1765_v0, %v1369_v54  ;;  %v13150_v21 = vpop.f32.mrb[49].mxu1  ;;  %2202 = vrot.lane.b32.xlu1 %v21748_v17, %s11811_s21 }
 0x1c4   :  { %v21752_v34 = vmax.f32 %v13148_v44, 0.0 }
 0x1c5   :  { %v1771_v23 = vpop.f32.mrb[50].mxu1 }
 0x1c6   :  { %v13156_v55 = vadd.f32 %v1771_v23, %v1369_v54  ;;  %v13158_v3 = vpop.f32.mrb[51].mxu1  ;;  %2208 = vrot.lane.b32.xlu1 %v21752_v34, %s11811_s21 }
 0x1c8   :  { %v21757_v0 = vmax.f32 %v13156_v55, 0.0 }
 0x1c9   :  { %v1777_v31 = vpop.f32.mrb[52].mxu1 }
 0x1ca   :  { %v13164_v6 = vadd.f32 %v1777_v31, %v1369_v54  ;;  %v13166_v53 = vpop.f32.mrb[53].mxu1  ;;  %2214 = vrot.lane.b32.xlu1 %v21757_v0, %s11811_s21 }
 0x1cd   :  { %v1783_v17 = vpop.f32.mrb[54].mxu1 }
 0x1ce   :  { %v13171_v23 = vadd.f32 %v1783_v17, %v1369_v54  ;;  %v13173_v43 = vpop.f32.mrb[55].mxu1  ;;  %v1381_v17 = vrot.slane %v13021_v16, %v1380_v35 }
 0x1d1   :  { %v1789_v56 = vpop.f32.mrb[56].mxu1 }
 0x1d2   :  { %v13175_v57 = vadd.f32 %v1789_v56, %v1369_v54  ;;  %v13177_v34 = vpop.f32.mrb[57].mxu1 }
 0x1d5   :  { %v1795_v12 = vpop.f32.mrb[58].mxu1 }
 0x1d6   :  { %v13179_v13 = vadd.f32 %v1795_v12, %v1369_v54  ;;  %v13181_v31 = vpop.f32.mrb[59].mxu1 }
 0x1d9   :  { %v1801_v41 = vpop.f32.mrb[60].mxu1 }
 0x1da   :  { %v13184_v25 = vadd.f32 %v1801_v41, %v1369_v54  ;;  %v13186_v0 = vpop.f32.mrb[61].mxu1 }
 0x1dd   :  { %v13189_v61 = vpop.f32.mrb[62].mxu1 }
 0x1de   :  { %v1874_v56 = vpop.f32.mrb[63].mxu1 }
 0x1df   :  { %v13191_v46 = vadd.f32 %v1874_v56, %v1381_v17 }
 0x1e1   :  { %v21760_v5 = vmax.f32 %v13191_v46, 0.0  ;;  %v13194_v12 = vpop.f32.mrb[64].mxu1 }
 0x1e2   :  { %v1880_v18 = vpop.f32.mrb[65].mxu1 }
 0x1e3   :  { %v13196_v8 = vadd.f32 %v1880_v18, %v1381_v17  ;;  %2357 = vrot.lane.b32.xlu0 %v21760_v5, %s11811_s21 }
 0x1e5   :  { %21873 = vst [vmem:[#allocation44_spill] sm:$0xff] %v13196_v8  ;;  %v21761_v41 = vmax.f32 %v13196_v8, 0.0  ;;  %v13202_v54 = vpop.f32.mrb[66].mxu1 }
 0x1e6   :  { %v1886_v35 = vpop.f32.mrb[67].mxu1 }
 0x1e7   :  { %v13204_v51 = vadd.f32 %v1886_v35, %v1381_v17  ;;  %2363 = vrot.lane.b32.xlu1 %v21761_v41, %s11811_s21 }
 0x1e9   :  { %21874 = vst [vmem:[#allocation45_spill] sm:$0xff] %v13204_v51  ;;  %v21762_v56 = vmax.f32 %v13204_v51, 0.0  ;;  %v13210_v47 = vpop.f32.mrb[68].mxu1 }
 0x1ea   :  { %v1892_v18 = vpop.f32.mrb[69].mxu1 }
 0x1eb   :  { %v13212_v36 = vadd.f32 %v1892_v18, %v1381_v17  ;;  %2369 = vrot.lane.b32.xlu0 %v21762_v56, %s11811_s21 }
 0x1ed   :  { %21875 = vst [vmem:[#allocation46_spill] sm:$0xff] %v13212_v36  ;;  %v21763_v5 = vmax.f32 %v13212_v36, 0.0  ;;  %v13218_v29 = vpop.f32.mrb[70].mxu1 }
 0x1ee   :  { %v1898_v35 = vpop.f32.mrb[71].mxu1 }
 0x1ef   :  { %v13220_v24 = vadd.f32 %v1898_v35, %v1381_v17  ;;  %2375 = vrot.lane.b32.xlu1 %v21763_v5, %s11811_s21 }
 0x1f1   :  { %21876 = vst [vmem:[#allocation47_spill] sm:$0xff] %v13220_v24  ;;  %v21764_v41 = vmax.f32 %v13220_v24, 0.0  ;;  %v13226_v30 = vpop.f32.mrb[72].mxu1 }
 0x1f2   :  { %v1904_v18 = vpop.f32.mrb[73].mxu1 }
 0x1f3   :  { %v13228_v20 = vadd.f32 %v1904_v18, %v1381_v17  ;;  %2381 = vrot.lane.b32.xlu0 %v21764_v41, %s11811_s21 }
 0x1f5   :  { %21877 = vst [vmem:[#allocation48_spill] sm:$0xff] %v13228_v20  ;;  %v21765_v56 = vmax.f32 %v13228_v20, 0.0  ;;  %v13234_v19 = vpop.f32.mrb[74].mxu1 }
 0x1f6   :  { %v1910_v35 = vpop.f32.mrb[75].mxu1 }
 0x1f7   :  { %v13236_v39 = vadd.f32 %v1910_v35, %v1381_v17  ;;  %2387 = vrot.lane.b32.xlu1 %v21765_v56, %s11811_s21  ;;  %v1347_v56 = vld [vmem:[%s21713_s8 + $0x8] sm:$0x3]  ;;  %s11812_s8 = smov 40  }
 0x1f8   :  { %v13267_v20 = vrot.slane %v1347_v56, %v12560_v42 }
 0x1f9   :  { %21878 = vst [vmem:[#allocation49_spill] sm:$0xff] %v13236_v39  ;;  %v21767_v5 = vmax.f32 %v13236_v39, 0.0  ;;  %v13242_v22 = vpop.f32.mrb[76].mxu1 }
 0x1fa   :  { %v1916_v18 = vpop.f32.mrb[77].mxu1 }
 0x1fb   :  { %v13244_v62 = vadd.f32 %v1916_v18, %v1381_v17  ;;  %2393 = vrot.lane.b32.xlu0 %v21767_v5, %s11811_s21  ;;  %v13264_v5 = vrot.slane %v1347_v56, %v12540_v32 }
 0x1fd   :  { %21879 = vst [vmem:[#allocation50_spill] sm:$0xff] %v13244_v62  ;;  %v21770_v41 = vmax.f32 %v13244_v62, 0.0  ;;  %v13250_v11 = vpop.f32.mrb[78].mxu1 }
 0x1fe   :  { %v1922_v35 = vpop.f32.mrb[79].mxu1 }
 0x1ff   :  { %v13255_v63 = vadd.f32 %v1922_v35, %v1381_v17  ;;  %2399 = vrot.lane.b32.xlu1 %v21770_v41, %s11811_s21  ;;  %v2119_v35 = vmax.f32 %v13107_v45, 0.0 }
 0x201   :  { %21880 = vst [vmem:[#allocation51_spill] sm:$0xff] %v13255_v63  ;;  %v21776_v18 = vmax.f32 %v13255_v63, 0.0  ;;  %v13261_v24 = vpop.f32.mrb[80].mxu1  ;;  %v21783_v63 = vmax.f32 %v13131_v40, 0.0 }
 0x202   :  { %v1928_v39 = vpop.f32.mrb[81].mxu1 }
 0x203   :  { %v13269_v58 = vadd.f32 %v1928_v39, %v1381_v17  ;;  %2405 = vrot.lane.b32.xlu0 %v21776_v18, %s11811_s21  ;;  %v2129_v17 = vmax.f32 %v13114_v1, 0.0 }
 0x205   :  { %21881 = vst [vmem:[#allocation52_spill] sm:$0xff] %v13269_v58  ;;  %v21780_v41 = vmax.f32 %v13269_v58, 0.0  ;;  %v1997_v62 = vpop.f32.mrb[82].mxu1 }
 0x206   :  { %v1998_v51 = vadd.f32 %v1997_v62, %v13264_v5  ;;  %v1999_v36 = vpop.f32.mrb[83].mxu1 }
 0x207   :  { %v2000_v32 = vadd.f32 %v1999_v36, %v13267_v20  ;;  %2411 = vrot.lane.b32.xlu1 %v21780_v41, %s11811_s21  ;;  %2224 = vrot.lane.b32.xlu0 %v2119_v35, %s11811_s21  ;;  %v21782_v36 = vmax.f32 %v13164_v6, 0.0 }
 0x208   :  { %v2064_v39 = vmax.f32 %v1998_v51, 0.0 }
 0x209   :  { %v2065_v56 = vmax.f32 %v2000_v32, 0.0  ;;  %v2003_v18 = vpop.f32.mrb[84].mxu1 }
 0x20a   :  { %v2004_v45 = vadd.f32 %v2003_v18, %v13264_v5  ;;  %v2005_v42 = vpop.f32.mrb[85].mxu1 }
 0x20b   :  { %v2006_v62 = vadd.f32 %v2005_v42, %v13267_v20  ;;  %2359 = vrot.lane.b32.xlu1 %v2064_v39, %s11811_s21  ;;  %2230 = vrot.lane.b32.xlu0 %v2129_v17, %s11811_s21  ;;  %v11679_v51 = vpack.i.bf16 %v21783_v63, %v2065_v56  ;;  %v21784_v42 = vmax.f32 %v13101_v33, 0.0 }
 0x20c   :  { %v2074_v39 = vmax.f32 %v2004_v45, 0.0 }
 0x20d   :  { %v2009_v35 = vpop.f32.mrb[86].mxu1 }
 0x20e   :  { %v2010_v32 = vadd.f32 %v2009_v35, %v13264_v5  ;;  %v2011_v1 = vpop.f32.mrb[87].mxu1  ;;  %v21786_v35 = vmax.f32 %v13171_v23, 0.0 }
 0x20f   :  { %v2012_v18 = vadd.f32 %v2011_v1, %v13267_v20  ;;  %2220 = vrot.lane.b32.xlu1 %v21782_v36, %s11811_s21  ;;  %11680 = vrot.lane.b32.xlu0 %v11679_v51, %s11811_s21 }
 0x211   :  { %v2015_v17 = vpop.f32.mrb[88].mxu1  ;;  %v2085_v1 = vmax.f32 %v2012_v18, 0.0 }
 0x212   :  { %v2016_v41 = vadd.f32 %v2015_v17, %v13264_v5  ;;  %v2017_v58 = vpop.f32.mrb[89].mxu1 }
 0x213   :  { %v2018_v56 = vadd.f32 %v2017_v58, %v13267_v20  ;;  %2222 = vrot.lane.b32.xlu1 %v21784_v42, %s11811_s21  ;;  %2365 = vrot.lane.b32.xlu0 %v2074_v39, %s11811_s21  ;;  %v21788_v58 = vmax.f32 %v13111_v52, 0.0 }
 0x214   :  { %v2094_v17 = vmax.f32 %v2016_v41, 0.0 }
 0x215   :  { %v2021_v36 = vpop.f32.mrb[90].mxu1 }
 0x216   :  { %v2022_v51 = vadd.f32 %v2021_v36, %v13264_v5  ;;  %v2023_v63 = vpop.f32.mrb[91].mxu1 }
 0x217   :  { %v2024_v45 = vadd.f32 %v2023_v63, %v13267_v20  ;;  %2226 = vrot.lane.b32.xlu1 %v21786_v35, %s11811_s21  ;;  %2373 = vrot.lane.b32.xlu0 %v2085_v1, %s11811_s21  ;;  %v21792_v63 = vmax.f32 %v13175_v57, 0.0 }
 0x219   :  { %v2027_v42 = vpop.f32.mrb[92].mxu1  ;;  %v2105_v36 = vmax.f32 %v2024_v45, 0.0 }
 0x21a   :  { %v2028_v39 = vadd.f32 %v2027_v42, %v13264_v5  ;;  %v2029_v33 = vpop.f32.mrb[93].mxu1  ;;  %v2075_v42 = vmax.f32 %v2006_v62, 0.0 }
 0x21b   :  { %v2030_v18 = vadd.f32 %v2029_v33, %v13267_v20  ;;  %2228 = vrot.lane.b32.xlu1 %v21788_v58, %s11811_s21  ;;  %2377 = vrot.lane.b32.xlu0 %v2094_v17, %s11811_s21  ;;  %v13325_v33 = vpop.permute.xlu1 %2186 }
 0x21c   :  { %v2114_v58 = vmax.f32 %v2028_v39, 0.0  ;;  %v2095_v39 = vmax.f32 %v2018_v56, 0.0 }
 0x21d   :  { %v2033_v35 = vpop.f32.mrb[94].mxu1  ;;  %v2115_v56 = vmax.f32 %v2030_v18, 0.0 }
 0x21e   :  { %v2034_v1 = vadd.f32 %v2033_v35, %v13264_v5  ;;  %v2035_v8 = vpop.f32.mrb[95].mxu1 }
 0x21f   :  { %v2036_v41 = vadd.f32 %v2035_v8, %v13267_v20  ;;  %2232 = vrot.lane.b32.xlu1 %v21792_v63, %s11811_s21  ;;  %2385 = vrot.lane.b32.xlu0 %v2105_v36, %s11811_s21  ;;  %v2084_v8 = vmax.f32 %v2010_v32, 0.0  ;;  %v13332_v38 = vpop.permute.xlu1 %2192 }
 0x221   :  { %v2039_v17 = vpop.f32.mrb[96].mxu1  ;;  %v2125_v35 = vmax.f32 %v2036_v41, 0.0  ;;  %v2104_v41 = vmax.f32 %v2022_v51, 0.0 }
 0x222   :  { %v2040_v52 = vadd.f32 %v2039_v17, %v13264_v5  ;;  %v2041_v45 = vpop.f32.mrb[97].mxu1 }
 0x223   :  { %v2042_v48 = vadd.f32 %v2041_v45, %v13267_v20  ;;  %2367 = vrot.lane.b32.xlu1 %v2075_v42, %s11811_s21  ;;  %2389 = vrot.lane.b32.xlu0 %v2114_v58, %s11811_s21 }
 0x224   :  { %v2134_v17 = vmax.f32 %v2040_v52, 0.0 }
 0x225   :  { %v2045_v27 = vpop.f32.mrb[98].mxu1 }
 0x226   :  { %v2046_v63 = vadd.f32 %v2045_v27, %v13264_v5  ;;  %v2047_v36 = vpop.f32.mrb[99].mxu1  ;;  %v13341_v27 = vpop.permute.xlu1 %2198 }
 0x227   :  { %v2048_v62 = vadd.f32 %v2047_v36, %v13267_v20  ;;  %2371 = vrot.lane.b32.xlu1 %v2084_v8, %s11811_s21  ;;  %2397 = vrot.lane.b32.xlu0 %v2125_v35, %s11811_s21  ;;  %v13345_v8 = vpop.permute.xlu0 %2188 }
 0x228   :  { %v2144_v18 = vmax.f32 %v2046_v63, 0.0 }
 0x229   :  { %v2051_v45 = vpop.f32.mrb[100].mxu1  ;;  %v2145_v36 = vmax.f32 %v2048_v62, 0.0  ;;  %v2135_v62 = vmax.f32 %v2042_v48, 0.0 }
 0x22a   :  { %v2052_v42 = vadd.f32 %v2051_v45, %v13264_v5  ;;  %v2053_v58 = vpop.f32.mrb[101].mxu1  ;;  %v13347_v5 = vpop.permute.xlu1 %2204 }
 0x22b   :  { %v2054_v32 = vadd.f32 %v2053_v58, %v13267_v20  ;;  %2379 = vrot.lane.b32.xlu1 %v2095_v39, %s11811_s21  ;;  %2401 = vrot.lane.b32.xlu0 %v2134_v17, %s11811_s21  ;;  %21882 = vst [vmem:[#allocation53_spill] sm:$0xff] %v13347_v5  ;;  %v2124_v20 = vmax.f32 %v2034_v1, 0.0  ;;  %v13352_v35 = vpop.permute.xlu0 %2194  ;;  %v13365_v1 = vpop.f32.mrb[5].mxu0 }
 0x22c   :  { %v2154_v52 = vmax.f32 %v2052_v42, 0.0  ;;  %21885 = vst [vmem:[#allocation56_spill] sm:$0xff] %v13365_v1 }
 0x22d   :  { %v2155_v45 = vmax.f32 %v2054_v32, 0.0  ;;  %v21890_v32 = vmax.f32 %v13131_v40, 0.0 }
 0x22e   :  { %v13354_v51 = vpop.permute.xlu1 %2210 }
 0x22f   :  { %2383 = vrot.lane.b32.xlu1 %v2104_v41, %s11811_s21  ;;  %2409 = vrot.lane.b32.xlu0 %v2145_v36, %s11811_s21  ;;  %21883 = vst [vmem:[#allocation54_spill] sm:$0xff] %v13354_v51  ;;  %v13357_v39 = vpop.permute.xlu0 %2200 }
 0x232   :  { %v13359_v17 = vpop.permute.xlu1 %2216 }
 0x233   :  { %2391 = vrot.lane.b32.xlu1 %v2115_v56, %s11811_s21  ;;  %2413 = vrot.lane.b32.xlu0 %v2154_v52, %s11811_s21  ;;  %21884 = vst [vmem:[#allocation55_spill] sm:$0xff] %v13359_v17  ;;  %v13367_v58 = vpop.permute.xlu0 %2206  ;;  %v21892_v17 = vmax.f32 %v13140_v2, 0.0 }
 0x236   :  { %v13362_v42 = vpop.permute.xlu1 %2196 }
 0x237   :  { %2395 = vrot.lane.b32.xlu1 %v2124_v20, %s11811_s21  ;;  %v13371_v48 = vpop.permute.xlu0 %2212 }
 0x238   :  { %21886 = vst [vmem:[#allocation57_spill] sm:$0xff] %v13371_v48 }
 0x23a   :  { %v13369_v41 = vpop.permute.xlu1 %2202 }
 0x23b   :  { %2403 = vrot.lane.b32.xlu1 %v2135_v62, %s11811_s21  ;;  %v13375_v36 = vpop.permute.xlu0 %2218 }
 0x23c   :  { %21888 = vst [vmem:[#allocation59_spill] sm:$0xff] %v13375_v36 }
 0x23e   :  { %v13373_v63 = vpop.permute.xlu1 %2208 }
 0x23f   :  { %2407 = vrot.lane.b32.xlu1 %v2144_v18, %s11811_s21  ;;  %21887 = vst [vmem:[#allocation58_spill] sm:$0xff] %v13373_v63  ;;  %v21891_v18 = vmax.f32 %v13135_v60, 0.0 }
 0x242   :  { %v13377_v56 = vpop.permute.xlu1 %2214 }
 0x243   :  { %2415 = vrot.lane.b32.xlu1 %v2155_v45, %s11811_s21  ;;  %21889 = vst [vmem:[#allocation60_spill] sm:$0xff] %v13377_v56 }
 0x255   :  { %v2358_v52 = vpop.permute.xlu0 %2357 }
 0x256   :  { %v2477_v20 = vmax.f32 %v21890_v32, %v2358_v52  ;;  %v21893_v32 = vmax.f32 %v13148_v44, 0.0 }
 0x258   :  { %2557 = vrot.lane.b32.xlu0 %v2477_v20, %s11812_s8 }
 0x259   :  { %v13382_v62 = vpop.permute.xlu1 %2363 }
 0x25a   :  { %v2481_v45 = vmax.f32 %v21891_v18, %v13382_v62  ;;  %v21894_v18 = vmax.f32 %v13156_v55, 0.0  ;;  %v21795_v55 = vsub.s32 5, %v12529_v28 }
 0x25c   :  { %2565 = vrot.lane.b32.xlu0 %v2481_v45, %s11812_s8 }
 0x25d   :  { %v13388_v1 = vpop.permute.xlu0 %2369 }
 0x25e   :  { %v2485_v36 = vmax.f32 %v21892_v17, %v13388_v1  ;;  %v21895_v17 = vmax.f32 %v13164_v6, 0.0 }
 0x260   :  { %2573 = vrot.lane.b32.xlu0 %v2485_v36, %s11812_s8 }
 0x261   :  { %v13394_v40 = vpop.permute.xlu1 %2375 }
 0x262   :  { %v2489_v20 = vmax.f32 %v21893_v32, %v13394_v40  ;;  %v21896_v32 = vmax.f32 %v13171_v23, 0.0 }
 0x264   :  { %2581 = vrot.lane.b32.xlu0 %v2489_v20, %s11812_s8 }
 0x265   :  { %v13400_v60 = vpop.permute.xlu0 %2381 }
 0x266   :  { %v2493_v45 = vmax.f32 %v21894_v18, %v13400_v60  ;;  %v13422_v18 = vrot.slane %v13021_v16, %v21795_v55 }
 0x268   :  { %2589 = vrot.lane.b32.xlu0 %v2493_v45, %s11812_s8 }
 0x269   :  { %v13406_v2 = vpop.permute.xlu1 %2387 }
 0x26a   :  { %v2497_v36 = vmax.f32 %v21895_v17, %v13406_v2  ;;  %v1750_v17 = vadd.f32 %v13133_v59, %v13422_v18 }
 0x26c   :  { %2597 = vrot.lane.b32.xlu0 %v2497_v36, %s11812_s8  ;;  %v2061_v56 = vmax.f32 %v1750_v17, 0.0  ;;  %v21801_v17 = vmax.f32 %v13117_v7, 0.0 }
 0x26d   :  { %v13412_v44 = vpop.permute.xlu0 %2393 }
 0x26e   :  { %v2501_v20 = vmax.f32 %v21896_v32, %v13412_v44  ;;  %v21898_v32 = vsub.s32 6, %v12529_v28 }
 0x270   :  { %2605 = vrot.lane.b32.xlu0 %v2501_v20, %s11812_s8  ;;  %v13437_v20 = vrot.slane %v13021_v16, %v21898_v32 }
 0x271   :  { %v13424_v45 = vpop.permute.xlu1 %2399 }
 0x272   :  { %v1873_v63 = vadd.f32 %v13189_v61, %v13437_v20 }
 0x274   :  { %v2062_v32 = vmax.f32 %v1873_v63, 0.0  ;;  %v21901_v63 = vmax.f32 %v13175_v57, 0.0 }
 0x275   :  { %v13426_v6 = vpop.permute.xlu0 %2405 }
 0x279   :  { %v13430_v36 = vpop.permute.xlu1 %2411  ;;  %v13432_v23 = vpop.permute.xlu0 %2224 }
 0x27a   :  { %21897 = vst [vmem:[#allocation61_spill] sm:$0xff] %v13432_v23 }
 0x27d   :  { %v2360_v55 = vpop.permute.xlu1 %2359  ;;  %v13439_v51 = vpop.permute.xlu0 %2230 }
 0x27e   :  { %21899 = vst [vmem:[#allocation62_spill] sm:$0xff] %v13439_v51  ;;  %v2417_v48 = vsel %vm2246_vm10, %v2358_v52, %v2360_v55 }
 0x27f   :  { %v2478_v59 = vmax.f32 %v2061_v56, %v2417_v48  ;;  %v11799_v56 = vld [vmem:[%s21711_s4] sm:$0x7f] }
 0x280   :  { %v106_v52 = vrot.slane %v11799_v56, %v13026_v10  ;;  %v2150_v10 = vmax.f32 %v13184_v25, 0.0 }
 0x281   :  { %v13444_v5 = vpop.permute.xlu1 %2220  ;;  %2559 = vrot.lane.b32.xlu1 %v2478_v59, %s11812_s8  ;;  %v13447_v23 = vpop.permute.xlu0 %11680  ;;  %v2140_v59 = vmax.f32 %v13179_v13, 0.0  ;;  %v2139_v13 = vmax.f32 %v13120_v14, 0.0 }
 0x282   :  { %v11682_v16 = vunpack.i.l.bf16 %v13447_v23 }
 0x283   :  { %v2509_v14 = vmax.f32 %v2140_v59, %v13426_v6 }
 0x284   :  { %v2418_v28 = vsel %vm2246_vm10, %v2360_v55, %v11682_v16  ;;  %v2505_v55 = vmax.f32 %v21901_v63, %v13424_v45  ;;  %v21807_v63 = vmax.f32 %v12923_v4, 0.0 }
 0x285   :  { %v13452_v51 = vpop.permute.xlu1 %2222  ;;  %2234 = vrot.lane.b32.xlu1 %v21801_v17, %s11811_s21  ;;  %v2366_v61 = vpop.permute.xlu0 %2365  ;;  %v2479_v48 = vmax.f32 %v2062_v32, %v2418_v28  ;;  %v21803_v28 = vmax.f32 %v13123_v49, 0.0  ;;  %v13473_v32 = vadd.f32 %v12918_v9, %v106_v52  ;;  %v1756_v9 = vadd.f32 %v13137_v50, %v13422_v18 }
 0x286   :  { %21900 = vst [vmem:[#allocation63_spill] sm:$0xff] %v13452_v51  ;;  %v2149_v50 = vmax.f32 %v13129_v37, 0.0  ;;  %v21903_v49 = vmax.f32 %v13191_v46, 0.0  ;;  %v1768_v37 = vadd.f32 %v13150_v21, %v13422_v18  ;;  %v1774_v21 = vadd.f32 %v13158_v3, %v13422_v18 }
 0x287   :  { %2561 = vrot.lane.b32.xlu0 %v2479_v48, %s11812_s8  ;;  %v416_v56 = vmax.f32 %v13473_v32, 0.0  ;;  %v1780_v3 = vadd.f32 %v13166_v53, %v13422_v18 }
 0x288   :  { %v2480_v7 = vmax.f32 %v21903_v49, %v11682_v16  ;;  %v1879_v16 = vadd.f32 %v13194_v12, %v13437_v20  ;;  %v1885_v12 = vadd.f32 %v13202_v54, %v13437_v20 }
 0x289   :  { %v13466_v51 = vpop.permute.xlu1 %2226  ;;  %2238 = vrot.lane.b32.xlu1 %v2140_v59, %s11811_s21  ;;  %v13469_v17 = vpop.permute.xlu0 %2373  ;;  %v13499_v25 = vpack.i.bf16 %v21807_v63, %v416_v56  ;;  %v2071_v59 = vmax.f32 %v1756_v9, 0.0 }
 0x28b   :  { %2613 = vrot.lane.b32.xlu0 %v2505_v55, %s11812_s8 }
 0x28d   :  { %v13477_v48 = vpop.permute.xlu1 %2228  ;;  %2240 = vrot.lane.b32.xlu1 %v21803_v28, %s11811_s21  ;;  %v2378_v57 = vpop.permute.xlu0 %2377  ;;  %v1762_v28 = vadd.f32 %v13142_v15, %v13422_v18 }
 0x28f   :  { %2236 = vrot.lane.b32.xlu0 %v2139_v13, %s11811_s21  ;;  %v2419_v13 = vsel %vm2246_vm10, %v13382_v62, %v2366_v61  ;;  %v2081_v62 = vmax.f32 %v1762_v28, 0.0  ;;  %v2423_v28 = vsel %vm2246_vm10, %v13394_v40, %v2378_v57  ;;  %v2101_v40 = vmax.f32 %v1774_v21, 0.0 }
 0x290   :  { %v2482_v63 = vmax.f32 %v2071_v59, %v2419_v13  ;;  %v2091_v13 = vmax.f32 %v1768_v37, 0.0  ;;  %v2082_v37 = vmax.f32 %v1885_v12, 0.0  ;;  %v1897_v21 = vadd.f32 %v13218_v29, %v13437_v20 }
 0x291   :  { %v13489_v52 = vpop.permute.xlu1 %2232  ;;  %2244 = vrot.lane.b32.xlu1 %v2150_v10, %s11811_s21  ;;  %v13492_v55 = vpop.permute.xlu0 %2385  ;;  %v1903_v29 = vadd.f32 %v13226_v30, %v13437_v20  ;;  %v3153_v30 = vld [vmem:[%s21714_s9] sm:$0xff] }
 0x292   :  { %21902 = vst [vmem:[#allocation64_spill] sm:$0xff] %v13489_v52 }
 0x293   :  { %2621 = vrot.lane.b32.xlu0 %v2509_v14, %s11812_s8  ;;  %v2513_v14 = vmax.f32 %v2150_v10, %v13430_v36 }
 0x295   :  { %v13508_v52 = vpop.permute.xlu1 %2367  ;;  %11690 = vrot.lane.b32.xlu1 %v13499_v25, %s11807_s30  ;;  %v13516_v9 = vpop.permute.xlu0 %2389  ;;  %v11684_v49 = vpack.i.bf16 %v2480_v7, %v2513_v14 }
 0x296   :  { %v2420_v7 = vsel %vm2246_vm10, %v2366_v61, %v13508_v52  ;;  %v2427_v53 = vsel %vm2246_vm10, %v13406_v2, %v13516_v9 }
 0x297   :  { %2242 = vrot.lane.b32.xlu0 %v2149_v50, %s11811_s21  ;;  %s11822_s21 = smov 96  }
 0x299   :  { %v2372_v15 = vpop.permute.xlu1 %2371  ;;  %2567 = vrot.lane.b32.xlu1 %v2482_v63, %s11812_s8  ;;  %v2490_v63 = vmax.f32 %v2091_v13, %v2423_v28  ;;  %v13535_v59 = vpop.permute.xlu0 %2397 }
 0x29a   :  { %v2421_v46 = vsel %vm2246_vm10, %v13388_v1, %v2372_v15  ;;  %v2072_v1 = vmax.f32 %v1879_v16, 0.0  ;;  %v2422_v61 = vsel %vm2246_vm10, %v2372_v15, %v13469_v17  ;;  %v2111_v16 = vmax.f32 %v1780_v3, 0.0 }
 0x29b   :  { %v2486_v10 = vmax.f32 %v2081_v62, %v2421_v46  ;;  %11685 = vrot.lane.b32.xlu0 %v11684_v49, %s11812_s8  ;;  %v1891_v49 = vadd.f32 %v13210_v47, %v13437_v20  ;;  %v2487_v28 = vmax.f32 %v2082_v37, %v2422_v61 }
 0x29c   :  { %v2483_v14 = vmax.f32 %v2072_v1, %v2420_v7  ;;  %v2498_v7 = vmax.f32 %v2111_v16, %v2427_v53 }
 0x29d   :  { %v13528_v50 = vpop.permute.xlu1 %2379  ;;  %2575 = vrot.lane.b32.xlu1 %v2486_v10, %s11812_s8  ;;  %v1786_v10 = vadd.f32 %v13173_v43, %v13422_v18  ;;  %v13554_v15 = vpop.permute.xlu0 %2401  ;;  %v1792_v43 = vadd.f32 %v13177_v34, %v13422_v18  ;;  %v3154_v34 = vld [vmem:[%s21714_s9 + $0x8] sm:$0xff] }
 0x29e   :  { %v2424_v47 = vsel %vm2246_vm10, %v2378_v57, %v13528_v50 }
 0x29f   :  { %11695 = vrot.lane.b32.xlu0 %v13499_v25, %s11808_s17  ;;  %v2121_v2 = vmax.f32 %v1786_v10, 0.0  ;;  %v2131_v37 = vmax.f32 %v1792_v43, 0.0  ;;  %v2112_v10 = vmax.f32 %v1903_v29, 0.0 }
 0x2a1   :  { %v2384_v62 = vpop.permute.xlu1 %2383  ;;  %2583 = vrot.lane.b32.xlu1 %v2490_v63, %s11812_s8  ;;  %v13573_v3 = vpop.permute.xlu0 %2409 }
 0x2a2   :  { %v2425_v54 = vsel %vm2246_vm10, %v13400_v60, %v2384_v62  ;;  %v2092_v60 = vmax.f32 %v1891_v49, 0.0  ;;  %v2426_v63 = vsel %vm2246_vm10, %v2384_v62, %v13492_v55  ;;  %v3157_v62 = vld [vmem:[%s21714_s9 + $0x20] sm:$0xff]  ;;  %v1798_v49 = vadd.f32 %v13181_v31, %v13422_v18  ;;  %v3160_v31 = vld [vmem:[%s21714_s9 + $0x38] sm:$0xff] }
 0x2a3   :  { %v2494_v46 = vmax.f32 %v2101_v40, %v2425_v54  ;;  %2569 = vrot.lane.b32.xlu0 %v2483_v14, %s11812_s8  ;;  %v2102_v40 = vmax.f32 %v1897_v21, 0.0  ;;  %v9437_v61 = vpack.c.bf16 %v3157_v62, %v3154_v34  ;;  %v3156_v54 = vld [vmem:[%s21714_s9 + $0x18] sm:$0xff]  ;;  %v1915_v34 = vadd.f32 %v13242_v22, %v13437_v20  ;;  %v3165_v22 = vld [vmem:[%s21714_s9 + $0x60] sm:$0xff] }
 0x2a4   :  { %v2491_v1 = vmax.f32 %v2092_v60, %v2424_v47  ;;  %v9439_v16 = vpack.c.bf16 %v3156_v54, %v3153_v30  ;;  %v3163_v60 = vld [vmem:[%s21714_s9 + $0x50] sm:$0xff] }
 0x2a5   :  { %v13556_v13 = vpop.permute.xlu1 %2391  ;;  %2591 = vrot.lane.b32.xlu1 %v2494_v46, %s11812_s8  ;;  %v2495_v46 = vmax.f32 %v2102_v40, %v2426_v63  ;;  %9438 = vmatprep.subr.bf16.mxu1 %v9437_v61  ;;  %v9441_v21 = vpack.c.bf16 %v3163_v60, %v3160_v31 }
 0x2a6   :  { %9440 = vmatpush1.bf16.msra.mxu1 %v9439_v16  ;;  %v634_v16 = vld [vmem:[%s21712_s5 + $0x208] sm:$0xff] }
 0x2a7   :  { %2577 = vrot.lane.b32.xlu0 %v2487_v28, %s11812_s8  ;;  %v1909_v28 = vadd.f32 %v13234_v19, %v13437_v20  ;;  %v3162_v19 = vld [vmem:[%s21714_s9 + $0x48] sm:$0xff]  ;;  %9442 = vmatprep.subr.bf16.mxu1 %v9441_v21 }
 0x2a9   :  { %v2396_v12 = vpop.permute.xlu1 %2395  ;;  %2599 = vrot.lane.b32.xlu1 %v2498_v7, %s11812_s8  ;;  %v2141_v7 = vmax.f32 %v1798_v49, 0.0  ;;  %v1921_v49 = vadd.f32 %v13250_v11, %v13437_v20  ;;  %v3175_v11 = vld [vmem:[%s21714_s9 + $0xb0] sm:$0xff] }
 0x2aa   :  { %v2429_v57 = vsel %vm2246_vm10, %v13412_v44, %v2396_v12  ;;  %v2431_v44 = vsel %vm2246_vm10, %v13424_v45, %v13554_v15  ;;  %v2428_v45 = vsel %vm2246_vm10, %v13516_v9, %v13556_v13  ;;  %v3159_v9 = vld [vmem:[%s21714_s9 + $0x30] sm:$0xff]  ;;  %v2430_v40 = vsel %vm2246_vm10, %v2396_v12, %v13535_v59 }
 0x2ab   :  { %v2502_v14 = vmax.f32 %v2121_v2, %v2429_v57  ;;  %2585 = vrot.lane.b32.xlu0 %v2491_v1, %s11812_s8  ;;  %v2506_v47 = vmax.f32 %v2131_v37, %v2431_v44  ;;  %v1804_v2 = vadd.f32 %v13186_v0, %v13422_v18  ;;  %v2499_v43 = vmax.f32 %v2112_v10, %v2428_v45  ;;  %v13616_v1 = vpop.permute.xlu0 %2413  ;;  %v3166_v0 = vld [vmem:[%s21714_s9 + $0x68] sm:$0xff]  ;;  %v3169_v18 = vld [vmem:[%s21714_s9 + $0x80] sm:$0xff]  ;;  %v3168_v44 = vld [vmem:[%s21714_s9 + $0x78] sm:$0xff] }
 0x2ac   :  { %v9443_v57 = vpack.c.bf16 %v3162_v19, %v3159_v9  ;;  %v9445_v12 = vpack.c.bf16 %v3169_v18, %v3166_v0  ;;  %v9447_v54 = vpack.c.bf16 %v3168_v44, %v3165_v22  ;;  %v636_v45 = vld [vmem:[%s21712_s5 + $0x218] sm:$0xff]  ;;  %v3171_v9 = vld [vmem:[%s21714_s9 + $0x90] sm:$0xff]  ;;  %v3174_v19 = vld [vmem:[%s21714_s9 + $0xa8] sm:$0xff] }
 0x2ad   :  { %v13593_v53 = vpop.permute.xlu1 %2403  ;;  %2607 = vrot.lane.b32.xlu1 %v2502_v14, %s11812_s8  ;;  %v2122_v14 = vmax.f32 %v1909_v28, 0.0  ;;  %v2151_v61 = vmax.f32 %v1804_v2, 0.0  ;;  %v9201_v10 = vpack.c.bf16 %v636_v45, %v634_v16  ;;  %v633_v28 = vld [vmem:[%s21712_s5 + $0x200] sm:$0xff]  ;;  %v642_v22 = vld [vmem:[%s21712_s5 + $0x248] sm:$0xff]  ;;  %v644_v44 = vld [vmem:[%s21712_s5 + $0x258] sm:$0xff] }
 0x2ae   :  { %9444 = vmatpush1.bf16.msra.mxu1 %v9443_v57  ;;  %v2432_v37 = vsel %vm2246_vm10, %v13554_v15, %v13593_v53  ;;  %v3172_v15 = vld [vmem:[%s21714_s9 + $0x98] sm:$0xff]  ;;  %v637_v18 = vld [vmem:[%s21712_s5 + $0x220] sm:$0xff]  ;;  %v643_v45 = vld [vmem:[%s21712_s5 + $0x250] sm:$0xff] }
 0x2af   :  { %2593 = vrot.lane.b32.xlu0 %v2495_v46, %s11812_s8  ;;  %v2503_v30 = vmax.f32 %v2122_v14, %v2430_v40  ;;  %9446 = vmatprep.subr.bf16.mxu1 %v9445_v12  ;;  %v9449_v60 = vpack.c.bf16 %v3175_v11, %v3172_v15  ;;  %v640_v57 = vld [vmem:[%s21712_s5 + $0x238] sm:$0xff]  ;;  %v3178_v40 = vld [vmem:[%s21714_s9 + $0xc8] sm:$0xff]  ;;  %v2142_v14 = vmax.f32 %v1921_v49, 0.0  ;;  %v3177_v12 = vld [vmem:[%s21714_s9 + $0xc0] sm:$0xff] }
 0x2b0   :  { %9202 = vmatprep.subr.bf16.mxu0 %v9201_v10  ;;  %v641_v49 = vld [vmem:[%s21712_s5 + $0x240] sm:$0xff]  ;;  %v3183_v15 = vld [vmem:[%s21714_s9 + $0xf0] sm:$0xff]  ;;  %v3186_v10 = vld [vmem:[%s21714_s9 + $0x108] sm:$0xff] }
 0x2b1   :  { %v2408_v63 = vpop.permute.xlu1 %2407  ;;  %2615 = vrot.lane.b32.xlu1 %v2506_v47, %s11812_s8  ;;  %v635_v47 = vld [vmem:[%s21712_s5 + $0x210] sm:$0xff] }
 0x2b2   :  { %v2433_v29 = vsel %vm2246_vm10, %v13426_v6, %v2408_v63  ;;  %v2435_v6 = vsel %vm2246_vm10, %v13430_v36, %v13616_v1  ;;  %v2132_v36 = vmax.f32 %v1915_v34, 0.0  ;;  %9448 = vmatpush1.bf16.msra.mxu1 %v9447_v54  ;;  %v9203_v21 = vpack.c.bf16 %v635_v47, %v633_v28  ;;  %v648_v28 = vld [vmem:[%s21712_s5 + $0x278] sm:$0xff]  ;;  %v3190_v47 = vld [vmem:[%s21714_s9 + $0x128] sm:$0xff] }
 0x2b3   :  { %v2510_v62 = vmax.f32 %v2141_v7, %v2433_v29  ;;  %2601 = vrot.lane.b32.xlu0 %v2499_v43, %s11812_s8  ;;  %v2514_v46 = vmax.f32 %v2151_v61, %v2435_v6  ;;  %v638_v7 = vld [vmem:[%s21712_s5 + $0x228] sm:$0xff]  ;;  %v2434_v2 = vsel %vm2246_vm10, %v2408_v63, %v13573_v3  ;;  %v9451_v43 = vpack.c.bf16 %v3174_v19, %v3171_v9  ;;  %v3181_v29 = vld [vmem:[%s21714_s9 + $0xe0] sm:$0xff]  ;;  %v639_v6 = vld [vmem:[%s21712_s5 + $0x230] sm:$0xff] }
 0x2b4   :  { %v2507_v31 = vmax.f32 %v2132_v36, %v2432_v37  ;;  %v1927_v34 = vadd.f32 %v13261_v24, %v13437_v20  ;;  %9450 = vmatprep.subr.bf16.mxu1 %v9449_v60  ;;  %v9205_v63 = vpack.c.bf16 %v640_v57, %v638_v7  ;;  %v9453_v0 = vpack.c.bf16 %v3181_v29, %v3178_v40  ;;  %v3180_v20 = vld [vmem:[%s21714_s9 + $0xd8] sm:$0xff]  ;;  %v3187_v36 = vld [vmem:[%s21714_s9 + $0x110] sm:$0xff]  ;;  %v645_v9 = vld [vmem:[%s21712_s5 + $0x260] sm:$0xff] }
 0x2b5   :  { %2623 = vrot.lane.b32.xlu1 %v2510_v62, %s11812_s8  ;;  %v13689_v62 = vpop.permute.xlu1 %2415  ;;  %9204 = vmatpush1.bf16.msra.mxu0 %v9203_v21  ;;  %v9207_v24 = vpack.c.bf16 %v639_v6, %v637_v18  ;;  %v2511_v61 = vmax.f32 %v2142_v14, %v2434_v2  ;;  %v9209_v54 = vpack.c.bf16 %v644_v44, %v642_v22  ;;  %v3184_v37 = vld [vmem:[%s21714_s9 + $0xf8] sm:$0xff]  ;;  %v3193_v21 = vld [vmem:[%s21714_s9 + $0x140] sm:$0xff]  ;;  %v647_v19 = vld [vmem:[%s21712_s5 + $0x270] sm:$0xff] }
 0x2b6   :  { %9452 = vmatpush1.bf16.msra.mxu1 %v9451_v43  ;;  %9206 = vmatprep.subr.bf16.mxu0 %v9205_v63  ;;  %v9457_v16 = vpack.c.bf16 %v3187_v36, %v3184_v37  ;;  %v2152_v11 = vmax.f32 %v1927_v34, 0.0  ;;  %v9459_v60 = vpack.c.bf16 %v3186_v10, %v3183_v15  ;;  %v9461_v43 = vpack.c.bf16 %v3193_v21, %v3190_v47  ;;  %v3189_v57 = vld [vmem:[%s21714_s9 + $0x120] sm:$0xff]  ;;  %v3192_v40 = vld [vmem:[%s21714_s9 + $0x138] sm:$0xff]  ;;  %v650_v29 = vld [vmem:[%s21712_s5 + $0x288] sm:$0xff] }
 0x2b7   :  { %2609 = vrot.lane.b32.xlu0 %v2503_v30, %s11812_s8  ;;  %9454 = vmatprep.subr.bf16.mxu1 %v9453_v0  ;;  %v9455_v30 = vpack.c.bf16 %v3180_v20, %v3177_v12  ;;  %v652_v14 = vld [vmem:[%s21712_s5 + $0x298] sm:$0xff]  ;;  %v3199_v63 = vld [vmem:[%s21714_s9 + $0x170] sm:$0xff]  ;;  %v9215_v0 = vpack.c.bf16 %v647_v19, %v645_v9  ;;  %v9463_v18 = vpack.c.bf16 %v3192_v40, %v3189_v57  ;;  %v649_v6 = vld [vmem:[%s21712_s5 + $0x280] sm:$0xff] }
 0x2b8   :  { %v3196_v34 = vld [vmem:[%s21714_s9 + $0x158] sm:$0xff]  ;;  %v651_v12 = vld [vmem:[%s21712_s5 + $0x290] sm:$0xff]  ;;  %v3198_v44 = vld [vmem:[%s21714_s9 + $0x168] sm:$0xff] }
 0x2b9   :  { %2631 = vrot.lane.b32.xlu1 %v2514_v46, %s11812_s8  ;;  %v2436_v46 = vsel %vm2246_vm10, %v13616_v1, %v13689_v62  ;;  %v646_v1 = vld [vmem:[%s21712_s5 + $0x268] sm:$0xff]  ;;  %9208 = vmatpush1.bf16.msra.mxu0 %v9207_v24  ;;  %v9217_v24 = vpack.c.bf16 %v652_v14, %v650_v29  ;;  %v9465_v20 = vpack.c.bf16 %v3199_v63, %v3196_v34  ;;  %v3195_v22 = vld [vmem:[%s21714_s9 + $0x150] sm:$0xff]  ;;  %v3205_v37 = vld [vmem:[%s21714_s9 + $0x1a0] sm:$0xff] }
 0x2ba   :  { %9456 = vmatpush1.bf16.msra.mxu1 %v9455_v30  ;;  %v2515_v7 = vmax.f32 %v2152_v11, %v2436_v46  ;;  %9210 = vmatprep.subr.bf16.mxu0 %v9209_v54  ;;  %v9213_v2 = vpack.c.bf16 %v648_v28, %v646_v1  ;;  %v656_v30 = vld [vmem:[%s21712_s5 + $0x2b8] sm:$0xff]  ;;  %v3202_v54 = vld [vmem:[%s21714_s9 + $0x188] sm:$0xff]  ;;  %v9219_v36 = vpack.c.bf16 %v651_v12, %v649_v6  ;;  %v653_v46 = vld [vmem:[%s21712_s5 + $0x2a0] sm:$0xff] }
 0x2bb   :  { %2617 = vrot.lane.b32.xlu0 %v2507_v31, %s11812_s8  ;;  %v9211_v31 = vpack.c.bf16 %v643_v45, %v641_v49  ;;  %9458 = vmatprep.subr.bf16.mxu1 %v9457_v16  ;;  %v9467_v49 = vpack.c.bf16 %v3198_v44, %v3195_v22  ;;  %v655_v16 = vld [vmem:[%s21712_s5 + $0x2b0] sm:$0xff]  ;;  %v9469_v15 = vpack.c.bf16 %v3205_v37, %v3202_v54  ;;  %v3201_v10 = vld [vmem:[%s21714_s9 + $0x180] sm:$0xff]  ;;  %v3204_v11 = vld [vmem:[%s21714_s9 + $0x198] sm:$0xff] }
 0x2bc   :  { %v658_v1 = vld [vmem:[%s21712_s5 + $0x2c8] sm:$0xff]  ;;  %v660_v28 = vld [vmem:[%s21712_s5 + $0x2d8] sm:$0xff]  ;;  %v9471_v21 = vpack.c.bf16 %v3204_v11, %v3201_v10  ;;  %v657_v9 = vld [vmem:[%s21712_s5 + $0x2c0] sm:$0xff] }
 0x2bd   :  { %9212 = vmatpush1.bf16.msra.mxu0 %v9211_v31  ;;  %v3208_v47 = vld [vmem:[%s21714_s9 + $0x1b8] sm:$0xff]  ;;  %v3211_v31 = vld [vmem:[%s21714_s9 + $0x1d0] sm:$0xff]  ;;  %v3210_v57 = vld [vmem:[%s21714_s9 + $0x1c8] sm:$0xff] }
 0x2be   :  { %9460 = vmatpush1.bf16.msra.mxu1 %v9459_v60  ;;  %9214 = vmatprep.subr.bf16.mxu0 %v9213_v2  ;;  %v9223_v60 = vpack.c.bf16 %v655_v16, %v653_v46  ;;  %v659_v19 = vld [vmem:[%s21712_s5 + $0x2d0] sm:$0xff]  ;;  %v9473_v2 = vpack.c.bf16 %v3211_v31, %v3208_v47  ;;  %v662_v40 = vld [vmem:[%s21712_s5 + $0x2e8] sm:$0xff]  ;;  %v664_v29 = vld [vmem:[%s21712_s5 + $0x2f8] sm:$0xff] }
 0x2bf   :  { %2625 = vrot.lane.b32.xlu0 %v2511_v61, %s11812_s8  ;;  %9462 = vmatprep.subr.bf16.mxu1 %v9461_v43  ;;  %v654_v61 = vld [vmem:[%s21712_s5 + $0x2a8] sm:$0xff]  ;;  %v3207_v43 = vld [vmem:[%s21714_s9 + $0x1b0] sm:$0xff]  ;;  %v3217_v34 = vld [vmem:[%s21714_s9 + $0x200] sm:$0xff]  ;;  %v9227_v63 = vpack.c.bf16 %v659_v19, %v657_v9 }
 0x2c0   :  { %v9221_v45 = vpack.c.bf16 %v656_v30, %v654_v61  ;;  %v3214_v14 = vld [vmem:[%s21714_s9 + $0x1e8] sm:$0xff]  ;;  %v663_v6 = vld [vmem:[%s21712_s5 + $0x2f0] sm:$0xff]  ;;  %v3213_v22 = vld [vmem:[%s21714_s9 + $0x1e0] sm:$0xff] }
 0x2c1   :  { %9216 = vmatpush1.bf16.msra.mxu0 %v9215_v0  ;;  %v9475_v0 = vpack.c.bf16 %v3210_v57, %v3207_v43  ;;  %v3216_v44 = vld [vmem:[%s21714_s9 + $0x1f8] sm:$0xff]  ;;  %v666_v61 = vld [vmem:[%s21712_s5 + $0x308] sm:$0xff]  ;;  %v3223_v37 = vld [vmem:[%s21714_s9 + $0x230] sm:$0xff] }
 0x2c2   :  { %9464 = vmatpush1.bf16.msra.mxu1 %v9463_v18  ;;  %9218 = vmatprep.subr.bf16.mxu0 %v9217_v24  ;;  %v661_v18 = vld [vmem:[%s21712_s5 + $0x2e0] sm:$0xff]  ;;  %v9229_v24 = vpack.c.bf16 %v664_v29, %v662_v40  ;;  %v668_v30 = vld [vmem:[%s21712_s5 + $0x318] sm:$0xff]  ;;  %v667_v16 = vld [vmem:[%s21712_s5 + $0x310] sm:$0xff] }
 0x2c3   :  { %2633 = vrot.lane.b32.xlu0 %v2515_v7, %s11812_s8  ;;  %9466 = vmatprep.subr.bf16.mxu1 %v9465_v20  ;;  %v9225_v7 = vpack.c.bf16 %v660_v28, %v658_v1  ;;  %v9477_v20 = vpack.c.bf16 %v3217_v34, %v3214_v14  ;;  %v3220_v54 = vld [vmem:[%s21714_s9 + $0x218] sm:$0xff]  ;;  %v665_v46 = vld [vmem:[%s21712_s5 + $0x300] sm:$0xff]  ;;  %v3219_v10 = vld [vmem:[%s21714_s9 + $0x210] sm:$0xff] }
 0x2c4   :  { %v3222_v11 = vld [vmem:[%s21714_s9 + $0x228] sm:$0xff]  ;;  %v672_v28 = vld [vmem:[%s21712_s5 + $0x338] sm:$0xff]  ;;  %v3229_v31 = vld [vmem:[%s21714_s9 + $0x260] sm:$0xff] }
 0x2c5   :  { %9220 = vmatpush1.bf16.msra.mxu0 %v9219_v36  ;;  %v9231_v36 = vpack.c.bf16 %v663_v6, %v661_v18  ;;  %v670_v1 = vld [vmem:[%s21712_s5 + $0x328] sm:$0xff]  ;;  %v9483_v9 = vpack.c.bf16 %v3222_v11, %v3219_v10  ;;  %v669_v19 = vld [vmem:[%s21712_s5 + $0x320] sm:$0xff]  ;;  %v3228_v40 = vld [vmem:[%s21714_s9 + $0x258] sm:$0xff] }
 0x2c6   :  { %9468 = vmatpush1.bf16.msra.mxu1 %v9467_v49  ;;  %9222 = vmatprep.subr.bf16.mxu0 %v9221_v45  ;;  %v9479_v49 = vpack.c.bf16 %v3216_v44, %v3213_v22  ;;  %v9233_v45 = vpack.c.bf16 %v668_v30, %v666_v61  ;;  %v3226_v47 = vld [vmem:[%s21714_s9 + $0x248] sm:$0xff]  ;;  %v3225_v57 = vld [vmem:[%s21714_s9 + $0x240] sm:$0xff]  ;;  %v676_v14 = vld [vmem:[%s21712_s5 + $0x358] sm:$0xff] }
 0x2c7   :  { %9470 = vmatprep.subr.bf16.mxu1 %v9469_v15  ;;  %v9481_v15 = vpack.c.bf16 %v3223_v37, %v3220_v54  ;;  %v9485_v43 = vpack.c.bf16 %v3229_v31, %v3226_v47  ;;  %v674_v29 = vld [vmem:[%s21712_s5 + $0x348] sm:$0xff]  ;;  %v3232_v34 = vld [vmem:[%s21714_s9 + $0x278] sm:$0xff]  ;;  %v9487_v18 = vpack.c.bf16 %v3228_v40, %v3225_v57  ;;  %v673_v6 = vld [vmem:[%s21712_s5 + $0x340] sm:$0xff] }
 0x2c8   :  { %v9241_v22 = vpack.c.bf16 %v676_v14, %v674_v29  ;;  %v3231_v61 = vld [vmem:[%s21714_s9 + $0x270] sm:$0xff]  ;;  %v3234_v30 = vld [vmem:[%s21714_s9 + $0x288] sm:$0xff]  ;;  %v680_v37 = vld [vmem:[%s21712_s5 + $0x378] sm:$0xff] }
 0x2c9   :  { %9224 = vmatpush1.bf16.msra.mxu0 %v9223_v60  ;;  %v678_v54 = vld [vmem:[%s21712_s5 + $0x368] sm:$0xff]  ;;  %v679_v11 = vld [vmem:[%s21712_s5 + $0x370] sm:$0xff]  ;;  %v681_v57 = vld [vmem:[%s21712_s5 + $0x380] sm:$0xff] }
 0x2ca   :  { %9472 = vmatpush1.bf16.msra.mxu1 %v9471_v21  ;;  %v13847_v12 = vpop.permute.xlu0 %2557  ;;  %9226 = vmatprep.subr.bf16.mxu0 %v9225_v7  ;;  %v9235_v21 = vpack.c.bf16 %v667_v16, %v665_v46  ;;  %v671_v7 = vld [vmem:[%s21712_s5 + $0x330] sm:$0xff]  ;;  %v9491_v16 = vpack.c.bf16 %v3234_v30, %v3231_v61 }
 0x2cb   :  { %9474 = vmatprep.subr.bf16.mxu1 %v9473_v2  ;;  %v9237_v2 = vpack.c.bf16 %v672_v28, %v670_v1  ;;  %v3237_v1 = vld [vmem:[%s21714_s9 + $0x2a0] sm:$0xff]  ;;  %v3240_v28 = vld [vmem:[%s21714_s9 + $0x2b8] sm:$0xff]  ;;  %v683_v40 = vld [vmem:[%s21712_s5 + $0x390] sm:$0xff] }
 0x2cc   :  { %v687_v61 = vld [vmem:[%s21712_s5 + $0x3b0] sm:$0xff] }
 0x2cd   :  { %9228 = vmatpush1.bf16.msra.mxu0 %v9227_v63  ;;  %v3235_v63 = vld [vmem:[%s21714_s9 + $0x290] sm:$0xff] }
 0x2ce   :  { %9476 = vmatpush1.bf16.msra.mxu1 %v9475_v0  ;;  %9230 = vmatprep.subr.bf16.mxu0 %v9229_v24  ;;  %v13891_v60 = vpop.permute.xlu0 %2565  ;;  %v9239_v0 = vpack.c.bf16 %v671_v7, %v669_v19  ;;  %v675_v24 = vld [vmem:[%s21712_s5 + $0x350] sm:$0xff]  ;;  %v9489_v44 = vpack.c.bf16 %v3235_v63, %v3232_v34  ;;  %v684_v19 = vld [vmem:[%s21712_s5 + $0x398] sm:$0xff]  ;;  %v9251_v34 = vpack.c.bf16 %v683_v40, %v681_v57 }
 0x2cf   :  { %9478 = vmatprep.subr.bf16.mxu1 %v9477_v20  ;;  %v9243_v46 = vpack.c.bf16 %v675_v24, %v673_v6  ;;  %v3244_v7 = vld [vmem:[%s21714_s9 + $0x2d8] sm:$0xff]  ;;  %v3243_v63 = vld [vmem:[%s21714_s9 + $0x2d0] sm:$0xff]  ;;  %v686_v6 = vld [vmem:[%s21712_s5 + $0x3a8] sm:$0xff] }
 0x2d0   :  { %v688_v24 = vld [vmem:[%s21712_s5 + $0x3b8] sm:$0xff]  ;;  %v21904_v30 = vld [vmem:[#allocation8_spill] sm:$0xff] }
 0x2d1   :  { %9232 = vmatpush1.bf16.msra.mxu0 %v9231_v36  ;;  %v3238_v36 = vld [vmem:[%s21714_s9 + $0x2a8] sm:$0xff] }
 0x2d2   :  { %9480 = vmatpush1.bf16.msra.mxu1 %v9479_v49  ;;  %9234 = vmatprep.subr.bf16.mxu0 %v9233_v45  ;;  %v13923_v20 = vpop.permute.xlu0 %2573  ;;  %v3241_v49 = vld [vmem:[%s21714_s9 + $0x2c0] sm:$0xff] }
 0x2d3   :  { %9482 = vmatprep.subr.bf16.mxu1 %v9481_v15  ;;  %v677_v45 = vld [vmem:[%s21712_s5 + $0x360] sm:$0xff]  ;;  %v9245_v15 = vpack.c.bf16 %v680_v37, %v678_v54  ;;  %v9493_v10 = vpack.c.bf16 %v3241_v49, %v3238_v36  ;;  %v1498_v54 = vadd.f32 %v21904_v30, %v13030_v26  ;;  %v21905_v49 = vmov 0.0  }
 0x2d4   :  { %v9247_v31 = vpack.c.bf16 %v679_v11, %v677_v45  ;;  %v2247_v45 = vsel %vm2246_vm10, %v13325_v33, %v13345_v8  ;;  %v691_v11 = vld [vmem:[%s21712_s5 + $0x3d0] sm:$0xff] }
 0x2d5   :  { %9236 = vmatpush1.bf16.msra.mxu0 %v9235_v21  ;;  %v9495_v21 = vpack.c.bf16 %v3240_v28, %v3237_v1  ;;  %v2056_v1 = vmax.f32 %v1498_v54, 0.0 }
 0x2d6   :  { %9484 = vmatpush1.bf16.msra.mxu1 %v9483_v9  ;;  %9238 = vmatprep.subr.bf16.mxu0 %v9237_v2  ;;  %v13955_v47 = vpop.permute.xlu0 %2581  ;;  %v682_v9 = vld [vmem:[%s21712_s5 + $0x388] sm:$0xff] }
 0x2d7   :  { %9486 = vmatprep.subr.bf16.mxu1 %v9485_v43  ;;  %v9249_v2 = vpack.c.bf16 %v684_v19, %v682_v9  ;;  %v3247_v43 = vld [vmem:[%s21714_s9 + $0x2f0] sm:$0xff]  ;;  %v21907_v9 = vld [vmem:[#allocation9_spill] sm:$0xff] }
 0x2d8   :  { %v9497_v14 = vpack.c.bf16 %v3247_v43, %v3244_v7  ;;  %v2297_v7 = vmax.f32 %v2056_v1, %v2247_v45  ;;  %v696_v43 = vld [vmem:[%s21712_s5 + $0x3f8] sm:$0xff] }
 0x2d9   :  { %9240 = vmatpush1.bf16.msra.mxu0 %v9239_v0  ;;  %v3246_v0 = vld [vmem:[%s21714_s9 + $0x2e8] sm:$0xff] }
 0x2da   :  { %9488 = vmatpush1.bf16.msra.mxu1 %v9487_v18  ;;  %9242 = vmatprep.subr.bf16.mxu0 %v9241_v22  ;;  %v13975_v29 = vpop.permute.xlu0 %2589  ;;  %v9499_v18 = vpack.c.bf16 %v3246_v0, %v3243_v63  ;;  %v9253_v22 = vpack.c.bf16 %v688_v24, %v686_v6 }
 0x2db   :  { %9490 = vmatprep.subr.bf16.mxu1 %v9489_v44  ;;  %v685_v44 = vld [vmem:[%s21712_s5 + $0x3a0] sm:$0xff] }
 0x2dc   :  { %v9255_v37 = vpack.c.bf16 %v687_v61, %v685_v44 }
 0x2dd   :  { %9244 = vmatpush1.bf16.msra.mxu0 %v9243_v46  ;;  %v690_v46 = vld [vmem:[%s21712_s5 + $0x3c8] sm:$0xff] }
 0x2de   :  { %9492 = vmatpush1.bf16.msra.mxu1 %v9491_v16  ;;  %9246 = vmatprep.subr.bf16.mxu0 %v9245_v15  ;;  %v13997_v36 = vpop.permute.xlu0 %2597  ;;  %v692_v16 = vld [vmem:[%s21712_s5 + $0x3d8] sm:$0xff] }
 0x2df   :  { %9494 = vmatprep.subr.bf16.mxu1 %v9493_v10  ;;  %v9257_v15 = vpack.c.bf16 %v692_v16, %v690_v46  ;;  %v689_v10 = vld [vmem:[%s21712_s5 + $0x3c0] sm:$0xff] }
 0x2e0   :  { %v9259_v28 = vpack.c.bf16 %v691_v11, %v689_v10 }
 0x2e1   :  { %9248 = vmatpush1.bf16.msra.mxu0 %v9247_v31  ;;  %v11683_v31 = vunpack.i.h.bf16 %v13447_v23  ;;  %v3279_v23 = vld [vmem:[%s21714_s9 + $0x3f0] sm:$0xff] }
 0x2e2   :  { %9496 = vmatpush1.bf16.msra.mxu1 %v9495_v21  ;;  %9250 = vmatprep.subr.bf16.mxu0 %v9249_v2  ;;  %v21906_v21 = vld [vmem:[#allocation31_spill] sm:$0xff]  ;;  %v14032_v63 = vpop.permute.xlu0 %2605 }
 0x2e3   :  { %9498 = vmatprep.subr.bf16.mxu1 %v9497_v14  ;;  %v1500_v19 = vadd.f32 %v21907_v9, %v21906_v21  ;;  %v694_v2 = vld [vmem:[%s21712_s5 + $0x3e8] sm:$0xff]  ;;  %v693_v14 = vld [vmem:[%s21712_s5 + $0x3e0] sm:$0xff]  ;;  %v2248_v6 = vsel %vm2246_vm10, %v13345_v8, %v11683_v31  ;;  %v21908_v8 = vld [vmem:[#allocation44_spill] sm:$0xff] }
 0x2e4   :  { %v9261_v40 = vpack.c.bf16 %v696_v43, %v694_v2  ;;  %v21915_v2 = vld [vmem:[#allocation48_spill] sm:$0xff] }
 0x2e5   :  { %9252 = vmatpush1.bf16.msra.mxu0 %v9251_v34  ;;  %v695_v34 = vld [vmem:[%s21712_s5 + $0x3f0] sm:$0xff]  ;;  %v21916_v43 = vmax.f32 %v21915_v2, 0.0  ;;  %v21927_v2 = vld [vmem:[#allocation13_spill] sm:$0xff] }
 0x2e6   :  { %9500 = vmatpush1.bf16.msra.mxu1 %v9499_v18  ;;  %9254 = vmatprep.subr.bf16.mxu0 %v9253_v22  ;;  %v9263_v18 = vpack.c.bf16 %v695_v34, %v693_v14  ;;  %v2249_v34 = vsel %vm2246_vm10, %v13332_v38, %v13352_v35 }
 0x2e9   :  { %3661 = vmatmul.mubr.f32.vlgmr.msra.gmra.mrb[102].mxu1 %v21905_v49  ;;  %9256 = vmatpush1.bf16.msra.mxu0 %v9255_v37  ;;  %v21909_v37 = vmax.f32 %v21908_v8, 0.0 }
 0x2ea   :  { %9258 = vmatprep.subr.bf16.mxu0 %v9257_v15  ;;  %v21910_v15 = vld [vmem:[#allocation46_spill] sm:$0xff] }
 0x2eb   :  { %v2484_v46 = vmax.f32 %v21909_v37, %v13508_v52  ;;  %v21911_v10 = vmax.f32 %v21910_v15, 0.0 }
 0x2ed   :  { %9260 = vmatpush1.bf16.msra.mxu0 %v9259_v28  ;;  %v2492_v11 = vmax.f32 %v21911_v10, %v13528_v50  ;;  %v21912_v28 = vld [vmem:[#allocation45_spill] sm:$0xff]  ;;  %v2500_v50 = vmax.f32 %v21916_v43, %v13556_v13  ;;  %v21924_v10 = vld [vmem:[#allocation51_spill] sm:$0xff]  ;;  %v1512_v43 = vadd.f32 %v21927_v2, %v21906_v21 }
 0x2ee   :  { %9262 = vmatprep.subr.bf16.mxu0 %v9261_v40  ;;  %v21913_v52 = vmax.f32 %v21912_v28, 0.0 }
 0x2f0   :  { %v2488_v9 = vmax.f32 %v21913_v52, %v13469_v17 }
 0x2f1   :  { %9264 = vmatpush1.bf16.msra.mxu0 %v9263_v18  ;;  %v21919_v18 = vld [vmem:[#allocation50_spill] sm:$0xff] }
 0x2f2   :  { %v21920_v13 = vmax.f32 %v21919_v18, 0.0 }
 0x2f3   :  { %v2560_v33 = vpop.permute.xlu1 %2559 }
 0x2f4   :  { %v2637_v57 = vsel %vm126_vm1, %v13847_v12, %v2560_v33  ;;  %v2057_v12 = vmax.f32 %v1500_v19, 0.0 }
 0x2f5   :  { %v2697_v0 = vmax.f32 %v2297_v7, %v2637_v57  ;;  %v21914_v7 = vld [vmem:[#allocation10_spill] sm:$0xff]  ;;  %v21917_v57 = vld [vmem:[#allocation47_spill] sm:$0xff] }
 0x2f6   :  { %v2298_v22 = vmax.f32 %v2057_v12, %v2248_v6  ;;  %v21918_v40 = vmax.f32 %v21917_v57, 0.0  ;;  %v2508_v6 = vmax.f32 %v21920_v13, %v13593_v53  ;;  %v21923_v53 = vld [vmem:[#allocation11_spill] sm:$0xff]  ;;  %v2077_v13 = vmax.f32 %v1512_v43, 0.0 }
 0x2f7   :  { %v14038_v24 = vpop.permute.xlu1 %2234  ;;  %2757 = vrot.lane.b32.xlu1 %v2697_v0, %s11813_s3  ;;  %v1506_v15 = vadd.f32 %v21923_v53, %v21906_v21 }
 0x2f8   :  { %v2496_v14 = vmax.f32 %v21918_v40, %v13492_v55  ;;  %v21921_v55 = vld [vmem:[#allocation49_spill] sm:$0xff]  ;;  %v21928_v40 = vld [vmem:[#allocation14_spill] sm:$0xff] }
 0x2f9   :  { %v14041_v44 = vpop.permute.xlu0 %2561 }
 0x2fa   :  { %v2638_v61 = vsel %vm126_vm1, %v2560_v33, %v14041_v44  ;;  %v1504_v33 = vadd.f32 %v21914_v7, %v13030_v26  ;;  %v21926_v7 = vld [vmem:[#allocation12_spill] sm:$0xff] }
 0x2fb   :  { %v2698_v30 = vmax.f32 %v2298_v22, %v2638_v61  ;;  %v14045_v54 = vpop.permute.xlu1 %2238  ;;  %11700 = vrot.lane.b32.xlu1 %v13499_v25, %s11809_s25  ;;  %v21922_v61 = vmax.f32 %v21921_v55, 0.0 }
 0x2fc   :  { %v2066_v0 = vmax.f32 %v1504_v33, 0.0  ;;  %v1510_v33 = vadd.f32 %v21926_v7, %v13030_v26 }
 0x2fd   :  { %2759 = vrot.lane.b32.xlu0 %v2698_v30, %s11813_s3  ;;  %v14053_v16 = vpop.permute.xlu0 %2613  ;;  %v2504_v30 = vmax.f32 %v21922_v61, %v13535_v59 }
 0x2fe   :  { %v2300_v22 = vmax.f32 %v2066_v0, %v2249_v34  ;;  %v2251_v34 = vsel %vm2246_vm10, %v13341_v27, %v13357_v39  ;;  %v2076_v18 = vmax.f32 %v1510_v33, 0.0 }
 0x2ff   :  { %v14055_v45 = vpop.permute.xlu1 %2240  ;;  %2571 = vrot.lane.b32.xlu1 %v2484_v46, %s11812_s8 }
 0x301   :  { %11705 = vrot.lane.b32.xlu0 %v13499_v25, %s11810_s22  ;;  %v14063_v1 = vpop.permute.xlu0 %2236 }
 0x303   :  { %v14068_v19 = vpop.permute.xlu1 %2244  ;;  %2587 = vrot.lane.b32.xlu1 %v2492_v11, %s11812_s8  ;;  %v21925_v11 = vmax.f32 %v21924_v10, 0.0 }
 0x305   :  { %2579 = vrot.lane.b32.xlu0 %v2488_v9, %s11812_s8  ;;  %v14077_v25 = vpop.permute.xlu0 %2621  ;;  %v2512_v28 = vmax.f32 %v21925_v11, %v13573_v3  ;;  %v2067_v9 = vmax.f32 %v1506_v15, 0.0  ;;  %v21931_v15 = vld [vmem:[#allocation53_spill] sm:$0xff]  ;;  %v21932_v11 = vld [vmem:[#allocation58_spill] sm:$0xff] }
 0x306   :  { %v2253_v10 = vsel %vm2246_vm10, %v21931_v15, %v13367_v58 }
 0x307   :  { %v14082_v17 = vpop.permute.xlu1 %11690  ;;  %2603 = vrot.lane.b32.xlu1 %v2500_v50, %s11812_s8 }
 0x309   :  { %2595 = vrot.lane.b32.xlu0 %v2496_v14, %s11812_s8  ;;  %v14092_v12 = vpop.permute.xlu0 %2242  ;;  %v1516_v14 = vadd.f32 %v21928_v40, %v13030_v26 }
 0x30b   :  { %v2568_v8 = vpop.permute.xlu1 %2567  ;;  %2619 = vrot.lane.b32.xlu1 %v2508_v6, %s11812_s8  ;;  %v21929_v6 = vld [vmem:[#allocation15_spill] sm:$0xff] }
 0x30c   :  { %v2640_v38 = vsel %vm126_vm1, %v13891_v60, %v2568_v8  ;;  %v2250_v60 = vsel %vm2246_vm10, %v13352_v35, %v13362_v42  ;;  %v2252_v35 = vsel %vm2246_vm10, %v13357_v39, %v13369_v41 }
 0x30d   :  { %v2700_v37 = vmax.f32 %v2300_v22, %v2640_v38  ;;  %2611 = vrot.lane.b32.xlu0 %v2504_v30, %s11812_s8  ;;  %v14101_v46 = vpop.permute.xlu0 %11685  ;;  %v2301_v3 = vmax.f32 %v2067_v9, %v2250_v60  ;;  %v1518_v22 = vadd.f32 %v21929_v6, %v21906_v21  ;;  %v21930_v38 = vld [vmem:[#allocation16_spill] sm:$0xff]  ;;  %v2304_v53 = vmax.f32 %v2077_v13, %v2252_v35  ;;  %v21933_v9 = vld [vmem:[#allocation17_spill] sm:$0xff] }
 0x30e   :  { %v1522_v27 = vadd.f32 %v21930_v38, %v13030_v26  ;;  %v1524_v7 = vadd.f32 %v21933_v9, %v21906_v21  ;;  %v21937_v6 = vld [vmem:[#allocation60_spill] sm:$0xff] }
 0x30f   :  { %v2576_v52 = vpop.permute.xlu1 %2575  ;;  %2763 = vrot.lane.b32.xlu1 %v2700_v37, %s11813_s3  ;;  %v2303_v37 = vmax.f32 %v2076_v18, %v2251_v34  ;;  %v2087_v60 = vmax.f32 %v1518_v22, 0.0  ;;  %v21936_v18 = vld [vmem:[#allocation54_spill] sm:$0xff] }
 0x310   :  { %v2643_v30 = vsel %vm126_vm1, %v13923_v20, %v2576_v52  ;;  %v2096_v40 = vmax.f32 %v1522_v27, 0.0 }
 0x311   :  { %2627 = vrot.lane.b32.xlu0 %v2512_v28, %s11812_s8  ;;  %v14110_v59 = vpop.permute.xlu0 %11695  ;;  %v2254_v28 = vsel %vm2246_vm10, %v13367_v58, %v21932_v11  ;;  %v2703_v33 = vmax.f32 %v2303_v37, %v2643_v30  ;;  %v21938_v30 = vld [vmem:[#allocation19_spill] sm:$0xff] }
 0x312   :  { %v2307_v34 = vmax.f32 %v2087_v60, %v2254_v28  ;;  %v1530_v38 = vadd.f32 %v21938_v30, %v21906_v21  ;;  %v21941_v60 = vld [vmem:[#allocation55_spill] sm:$0xff]  ;;  %v3249_v30 = vld [vmem:[%s21714_s9 + $0x300] sm:$0xff] }
 0x313   :  { %v2584_v50 = vpop.permute.xlu1 %2583 }
 0x315   :  { %v14119_v57 = vpop.permute.xlu0 %2569 }
 0x316   :  { %v2641_v0 = vsel %vm126_vm1, %v2568_v8, %v14119_v57  ;;  %v2086_v8 = vmax.f32 %v1516_v14, 0.0 }
 0x317   :  { %v2701_v55 = vmax.f32 %v2301_v3, %v2641_v0  ;;  %v2592_v61 = vpop.permute.xlu1 %2591  ;;  %v2646_v3 = vsel %vm126_vm1, %v13955_v47, %v2584_v50  ;;  %v21935_v0 = vld [vmem:[#allocation57_spill] sm:$0xff] }
 0x318   :  { %v2306_v14 = vmax.f32 %v2086_v8, %v2253_v10  ;;  %v2255_v13 = vsel %vm2246_vm10, %v21936_v18, %v21935_v0  ;;  %v2256_v47 = vsel %vm2246_vm10, %v21935_v0, %v21937_v6  ;;  %v21939_v8 = vld [vmem:[#allocation21_spill] sm:$0xff]  ;;  %v2649_v10 = vsel %vm126_vm1, %v13975_v29, %v2592_v61  ;;  %v3250_v18 = vld [vmem:[%s21714_s9 + $0x308] sm:$0xff] }
 0x319   :  { %2765 = vrot.lane.b32.xlu0 %v2701_v55, %s11813_s3  ;;  %v14138_v39 = vpop.permute.xlu0 %2577  ;;  %v2097_v55 = vmax.f32 %v1524_v7, 0.0  ;;  %v1534_v15 = vadd.f32 %v21939_v8, %v13030_v26  ;;  %v2309_v28 = vmax.f32 %v2096_v40, %v2255_v13  ;;  %v21942_v40 = vld [vmem:[#allocation23_spill] sm:$0xff]  ;;  %v21943_v13 = vld [vmem:[#allocation25_spill] sm:$0xff] }
 0x31a   :  { %v2644_v20 = vsel %vm126_vm1, %v2576_v52, %v14138_v39  ;;  %v21934_v52 = vld [vmem:[#allocation18_spill] sm:$0xff]  ;;  %v2706_v27 = vmax.f32 %v2306_v14, %v2646_v3  ;;  %v2107_v3 = vmax.f32 %v1530_v38, 0.0  ;;  %v1536_v14 = vadd.f32 %v21942_v40, %v21906_v21  ;;  %v3252_v38 = vld [vmem:[%s21714_s9 + $0x318] sm:$0xff] }
 0x31b   :  { %v2704_v2 = vmax.f32 %v2304_v53, %v2644_v20  ;;  %v2600_v43 = vpop.permute.xlu1 %2599  ;;  %v1528_v35 = vadd.f32 %v21934_v52, %v13030_v26  ;;  %v21940_v20 = vld [vmem:[#allocation59_spill] sm:$0xff]  ;;  %v21944_v8 = vld [vmem:[#allocation61_spill] sm:$0xff] }
 0x31c   :  { %v2257_v9 = vsel %vm2246_vm10, %v21941_v60, %v21940_v20  ;;  %v21946_v60 = vld [vmem:[#allocation26_spill] sm:$0xff] }
 0x31d   :  { %2769 = vrot.lane.b32.xlu0 %v2703_v33, %s11813_s3  ;;  %2771 = vrot.lane.b32.xlu1 %v2704_v2, %s11813_s3  ;;  %v14154_v58 = vpop.permute.xlu0 %2585  ;;  %v2310_v33 = vmax.f32 %v2097_v55, %v2256_v47  ;;  %v2106_v7 = vmax.f32 %v1528_v35, 0.0  ;;  %v2258_v2 = vsel %vm2246_vm10, %v21940_v20, %v13444_v5  ;;  %v3253_v35 = vld [vmem:[%s21714_s9 + $0x320] sm:$0xff]  ;;  %v1540_v47 = vadd.f32 %v21943_v13, %v13030_v26 }
 0x31e   :  { %v2647_v22 = vsel %vm126_vm1, %v2584_v50, %v14154_v58  ;;  %v9501_v55 = vpack.c.bf16 %v3253_v35, %v3250_v18  ;;  %v9503_v20 = vpack.c.bf16 %v3252_v38, %v3249_v30  ;;  %v3259_v35 = vld [vmem:[%s21714_s9 + $0x350] sm:$0xff]  ;;  %v21949_v13 = vld [vmem:[#allocation62_spill] sm:$0xff] }
 0x31f   :  { %v2707_v37 = vmax.f32 %v2307_v34, %v2647_v22  ;;  %v2608_v53 = vpop.permute.xlu1 %2607  ;;  %v2709_v34 = vmax.f32 %v2309_v28, %v2649_v10  ;;  %v2652_v22 = vsel %vm126_vm1, %v13997_v36, %v2600_v43  ;;  %v21945_v10 = vld [vmem:[#allocation63_spill] sm:$0xff]  ;;  %v2126_v30 = vmax.f32 %v1540_v47, 0.0 }
 0x320   :  { %v2259_v28 = vsel %vm2246_vm10, %v21945_v10, %v21944_v8  ;;  %9502 = vmatprep.subr.bf16.mxu1 %v9501_v55  ;;  %v3258_v55 = vld [vmem:[%s21714_s9 + $0x348] sm:$0xff] }
 0x321   :  { %2775 = vrot.lane.b32.xlu1 %v2706_v27, %s11813_s3  ;;  %2777 = vrot.lane.b32.xlu0 %v2707_v37, %s11813_s3  ;;  %v14177_v50 = vpop.permute.xlu0 %2593  ;;  %v2116_v27 = vmax.f32 %v1534_v15, 0.0  ;;  %v2313_v37 = vmax.f32 %v2107_v3, %v2258_v2  ;;  %v2260_v15 = vsel %vm2246_vm10, %v21944_v8, %v13466_v51  ;;  %v21948_v3 = vld [vmem:[#allocation29_spill] sm:$0xff] }
 0x322   :  { %v2650_v29 = vsel %vm126_vm1, %v2592_v61, %v14177_v50  ;;  %v2312_v61 = vmax.f32 %v2106_v7, %v2257_v9  ;;  %v1542_v9 = vadd.f32 %v21946_v60, %v21906_v21  ;;  %v14224_v40 = vadd.f32 %v21948_v3, %v21906_v21  ;;  %9504 = vmatpush1.bf16.msra.mxu1 %v9503_v20  ;;  %v3261_v3 = vld [vmem:[%s21714_s9 + $0x360] sm:$0xff] }
 0x323   :  { %v2710_v52 = vmax.f32 %v2310_v33, %v2650_v29  ;;  %v14186_v0 = vpop.permute.xlu1 %2615  ;;  %v21947_v33 = vld [vmem:[#allocation28_spill] sm:$0xff]  ;;  %v2117_v29 = vmax.f32 %v1536_v14, 0.0  ;;  %v2261_v14 = vsel %vm2246_vm10, %v13477_v48, %v21949_v13  ;;  %v2655_v21 = vsel %vm126_vm1, %v14032_v63, %v2608_v53 }
 0x324   :  { %v14215_v7 = vadd.f32 %v21947_v33, %v13030_v26  ;;  %v3256_v26 = vld [vmem:[%s21714_s9 + $0x338] sm:$0xff]  ;;  %v2127_v8 = vmax.f32 %v1542_v9, 0.0  ;;  %v2137_v47 = vmax.f32 %v14224_v40, 0.0  ;;  %v2318_v20 = vmax.f32 %v2126_v30, %v2261_v14  ;;  %v3265_v9 = vld [vmem:[%s21714_s9 + $0x380] sm:$0xff]  ;;  %v3271_v14 = vld [vmem:[%s21714_s9 + $0x3b0] sm:$0xff] }
 0x325   :  { %2781 = vrot.lane.b32.xlu0 %v2709_v34, %s11813_s3  ;;  %2783 = vrot.lane.b32.xlu1 %v2710_v52, %s11813_s3  ;;  %v14209_v36 = vpop.permute.xlu0 %2601  ;;  %v2712_v34 = vmax.f32 %v2312_v61, %v2652_v22  ;;  %v9505_v61 = vpack.c.bf16 %v3259_v35, %v3256_v26  ;;  %v3255_v22 = vld [vmem:[%s21714_s9 + $0x330] sm:$0xff]  ;;  %v2316_v38 = vmax.f32 %v2117_v29, %v2260_v15  ;;  %v3262_v15 = vld [vmem:[%s21714_s9 + $0x368] sm:$0xff] }
 0x326   :  { %v2653_v2 = vsel %vm126_vm1, %v2600_v43, %v14209_v36  ;;  %v2315_v43 = vmax.f32 %v2116_v27, %v2259_v28  ;;  %v9507_v63 = vpack.c.bf16 %v3258_v55, %v3255_v22  ;;  %v2136_v10 = vmax.f32 %v14215_v7, 0.0  ;;  %v3264_v40 = vld [vmem:[%s21714_s9 + $0x378] sm:$0xff]  ;;  %v3270_v55 = vld [vmem:[%s21714_s9 + $0x3a8] sm:$0xff] }
 0x327   :  { %v2713_v52 = vmax.f32 %v2313_v37, %v2653_v2  ;;  %v14226_v18 = vpop.permute.xlu1 %2623  ;;  %v21950_v37 = vld [vmem:[#allocation64_spill] sm:$0xff]  ;;  %9506 = vmatprep.subr.bf16.mxu1 %v9505_v61  ;;  %v2658_v7 = vsel %vm126_vm1, %v14053_v16, %v14186_v0  ;;  %v9509_v29 = vpack.c.bf16 %v3265_v9, %v3262_v15  ;;  %v2265_v16 = vsel %vm2246_vm10, %v14055_v45, %v14092_v12  ;;  %v3274_v30 = vld [vmem:[%s21714_s9 + $0x3c8] sm:$0xff]  ;;  %v700_v15 = vld [vmem:[%s21712_s5 + $0x418] sm:$0xff] }
 0x328   :  { %v2262_v27 = vsel %vm2246_vm10, %v21949_v13, %v21950_v37  ;;  %v2715_v60 = vmax.f32 %v2315_v43, %v2655_v21  ;;  %9508 = vmatpush1.bf16.msra.mxu1 %v9507_v63  ;;  %v9511_v13 = vpack.c.bf16 %v3264_v40, %v3261_v3  ;;  %v11688_v21 = vunpack.i.h.bf16 %v14101_v46  ;;  %v21952_v3 = vld [vmem:[#allocation34_spill] sm:$0xff] }
 0x329   :  { %2787 = vrot.lane.b32.xlu1 %v2712_v34, %s11813_s3  ;;  %2789 = vrot.lane.b32.xlu0 %v2713_v52, %s11813_s3  ;;  %v14250_v48 = vpop.permute.xlu0 %2609  ;;  %v2319_v2 = vmax.f32 %v2127_v8, %v2262_v27  ;;  %v3268_v34 = vld [vmem:[%s21714_s9 + $0x398] sm:$0xff]  ;;  %v21951_v52 = vld [vmem:[#allocation32_spill] sm:$0xff]  ;;  %v11687_v45 = vunpack.i.l.bf16 %v14101_v46  ;;  %v2718_v27 = vmax.f32 %v2318_v20, %v2658_v7  ;;  %v2661_v46 = vsel %vm126_vm1, %v14077_v25, %v14226_v18  ;;  %v3273_v8 = vld [vmem:[%s21714_s9 + $0x3c0] sm:$0xff] }
 0x32a   :  { %v2656_v28 = vsel %vm126_vm1, %v2608_v53, %v14250_v48  ;;  %v2263_v53 = vsel %vm2246_vm10, %v14038_v24, %v14063_v1  ;;  %v2146_v26 = vmax.f32 %v21951_v52, 0.0  ;;  %v2264_v24 = vsel %vm2246_vm10, %v14063_v1, %v14045_v54  ;;  %v3267_v1 = vld [vmem:[%s21714_s9 + $0x390] sm:$0xff]  ;;  %9510 = vmatprep.subr.bf16.mxu1 %v9509_v29  ;;  %v3276_v20 = vld [vmem:[%s21714_s9 + $0x3d8] sm:$0xff]  ;;  %v698_v25 = vld [vmem:[%s21712_s5 + $0x408] sm:$0xff] }
 0x32b   :  { %v2716_v33 = vmax.f32 %v2316_v38, %v2656_v28  ;;  %v14284_v35 = vpop.permute.xlu1 %2631  ;;  %v9513_v22 = vpack.c.bf16 %v3271_v14, %v3268_v34  ;;  %v3277_v38 = vld [vmem:[%s21714_s9 + $0x3e0] sm:$0xff]  ;;  %v9515_v63 = vpack.c.bf16 %v3270_v55, %v3267_v1  ;;  %v2321_v28 = vmax.f32 %v2136_v10, %v2263_v53  ;;  %v3280_v53 = vld [vmem:[%s21714_s9 + $0x3f8] sm:$0xff]  ;;  %v3283_v7 = vld [vmem:[%s21714_s9 + $0x410] sm:$0xff] }
 0x32c   :  { %9512 = vmatpush1.bf16.msra.mxu1 %v9511_v13  ;;  %v2322_v9 = vmax.f32 %v2137_v47, %v2264_v24  ;;  %v9265_v29 = vpack.c.bf16 %v700_v15, %v698_v25  ;;  %v21953_v47 = vmax.f32 %v21952_v3, 0.0  ;;  %v2639_v34 = vsel %vm126_vm1, %v14041_v44, %v11688_v21  ;;  %v3289_v1 = vld [vmem:[%s21714_s9 + $0x440] sm:$0xff]  ;;  %v3288_v55 = vld [vmem:[%s21714_s9 + $0x438] sm:$0xff]  ;;  %v3310_v3 = vld [vmem:[%s21714_s9 + $0x4e8] sm:$0xff] }
 0x32d   :  { %2793 = vrot.lane.b32.xlu0 %v2715_v60, %s11813_s3  ;;  %2795 = vrot.lane.b32.xlu1 %v2716_v33, %s11813_s3  ;;  %v14288_v43 = vpop.permute.xlu0 %2617  ;;  %v2664_v60 = vsel %vm126_vm1, %v11687_v45, %v14284_v35  ;;  %v9517_v33 = vpack.c.bf16 %v3277_v38, %v3274_v30  ;;  %v2721_v52 = vmax.f32 %v2321_v28, %v2661_v46  ;;  %v3292_v30 = vld [vmem:[%s21714_s9 + $0x458] sm:$0xff]  ;;  %v3295_v38 = vld [vmem:[%s21714_s9 + $0x470] sm:$0xff] }
 0x32e   :  { %v2659_v61 = vsel %vm126_vm1, %v14186_v0, %v14288_v43  ;;  %9514 = vmatprep.subr.bf16.mxu1 %v9513_v22  ;;  %v2299_v40 = vmax.f32 %v21953_v47, %v11683_v31  ;;  %v9519_v13 = vpack.c.bf16 %v3276_v20, %v3273_v8  ;;  %9266 = vmatprep.subr.bf16.mxu0 %v9265_v29  ;;  %v3282_v31 = vld [vmem:[%s21714_s9 + $0x408] sm:$0xff]  ;;  %v3285_v22 = vld [vmem:[%s21714_s9 + $0x420] sm:$0xff]  ;;  %v3300_v25 = vld [vmem:[%s21714_s9 + $0x498] sm:$0xff] }
 0x32f   :  { %v2719_v0 = vmax.f32 %v2319_v2, %v2659_v61  ;;  %v2324_v2 = vmax.f32 %v2146_v26, %v2265_v16  ;;  %v9521_v14 = vpack.c.bf16 %v3283_v7, %v3280_v53  ;;  %v9523_v45 = vpack.c.bf16 %v3282_v31, %v3279_v23  ;;  %v3298_v8 = vld [vmem:[%s21714_s9 + $0x488] sm:$0xff]  ;;  %v3301_v28 = vld [vmem:[%s21714_s9 + $0x4a0] sm:$0xff]  ;;  %v3304_v15 = vld [vmem:[%s21714_s9 + $0x4b8] sm:$0xff] }
 0x330   :  { %9516 = vmatpush1.bf16.msra.mxu1 %v9515_v63  ;;  %v2699_v44 = vmax.f32 %v2299_v40, %v2639_v34  ;;  %v9529_v46 = vpack.c.bf16 %v3295_v38, %v3292_v30  ;;  %v3294_v63 = vld [vmem:[%s21714_s9 + $0x468] sm:$0xff]  ;;  %v3297_v20 = vld [vmem:[%s21714_s9 + $0x480] sm:$0xff]  ;;  %v3303_v7 = vld [vmem:[%s21714_s9 + $0x4b0] sm:$0xff] }
 0x331   :  { %2799 = vrot.lane.b32.xlu1 %v2718_v27, %s11813_s3  ;;  %2801 = vrot.lane.b32.xlu0 %v2719_v0, %s11813_s3  ;;  %v14329_v10 = vpop.permute.xlu0 %2625  ;;  %v2724_v24 = vmax.f32 %v2324_v2, %v2664_v60  ;;  %v9527_v27 = vpack.c.bf16 %v3288_v55, %v3285_v22  ;;  %v3291_v0 = vld [vmem:[%s21714_s9 + $0x450] sm:$0xff]  ;;  %v9535_v2 = vpack.c.bf16 %v3300_v25, %v3297_v20  ;;  %v3306_v29 = vld [vmem:[%s21714_s9 + $0x4c8] sm:$0xff] }
 0x332   :  { %v2662_v26 = vsel %vm126_vm1, %v14226_v18, %v14329_v10  ;;  %9518 = vmatprep.subr.bf16.mxu1 %v9517_v33  ;;  %v3286_v18 = vld [vmem:[%s21714_s9 + $0x428] sm:$0xff]  ;;  %v9531_v60 = vpack.c.bf16 %v3294_v63, %v3291_v0  ;;  %v9533_v33 = vpack.c.bf16 %v3301_v28, %v3298_v8  ;;  %v3313_v47 = vld [vmem:[%s21714_s9 + $0x500] sm:$0xff]  ;;  %v9539_v40 = vpack.c.bf16 %v3306_v29, %v3303_v7  ;;  %v3315_v23 = vld [vmem:[%s21714_s9 + $0x510] sm:$0xff] }
 0x333   :  { %v2722_v16 = vmax.f32 %v2322_v9, %v2662_v26  ;;  %v11709_v21 = vpack.i.bf16 %v2699_v44, %v2724_v24  ;;  %v9525_v61 = vpack.c.bf16 %v3289_v1, %v3286_v18  ;;  %v3307_v9 = vld [vmem:[%s21714_s9 + $0x4d0] sm:$0xff]  ;;  %v9541_v34 = vpack.c.bf16 %v3313_v47, %v3310_v3  ;;  %v3312_v26 = vld [vmem:[%s21714_s9 + $0x4f8] sm:$0xff]  ;;  %v3318_v31 = vld [vmem:[%s21714_s9 + $0x528] sm:$0xff] }
 0x334   :  { %9520 = vmatpush1.bf16.msra.mxu1 %v9519_v13  ;;  %v9537_v53 = vpack.c.bf16 %v3307_v9, %v3304_v15  ;;  %v3316_v24 = vld [vmem:[%s21714_s9 + $0x518] sm:$0xff]  ;;  %v3322_v44 = vld [vmem:[%s21714_s9 + $0x548] sm:$0xff]  ;;  %v3325_v18 = vld [vmem:[%s21714_s9 + $0x560] sm:$0xff]  ;;  %v9547_v1 = vpack.c.bf16 %v3318_v31, %v3315_v23  ;;  %v11692_v29 = vunpack.i.l.bf16 %v14082_v17  ;;  %v21812_v47 = vunpack.i.h.bf16 %v14082_v17 }
 0x335   :  { %2805 = vrot.lane.b32.xlu0 %v2721_v52, %s11813_s3  ;;  %2807 = vrot.lane.b32.xlu1 %v2722_v16, %s11813_s3  ;;  %v3309_v52 = vld [vmem:[%s21714_s9 + $0x4e0] sm:$0xff]  ;;  %v3319_v16 = vld [vmem:[%s21714_s9 + $0x530] sm:$0xff] }
 0x336   :  { %9522 = vmatprep.subr.bf16.mxu1 %v9521_v14  ;;  %v9543_v13 = vpack.c.bf16 %v3312_v26, %v3309_v52  ;;  %v9545_v14 = vpack.c.bf16 %v3319_v16, %v3316_v24  ;;  %v3328_v22 = vld [vmem:[%s21714_s9 + $0x578] sm:$0xff]  ;;  %v3331_v55 = vld [vmem:[%s21714_s9 + $0x590] sm:$0xff]  ;;  %v3334_v63 = vld [vmem:[%s21714_s9 + $0x5a8] sm:$0xff]  ;;  %v21811_v52 = vunpack.i.h.bf16 %v14110_v59  ;;  %v11697_v26 = vunpack.i.l.bf16 %v14110_v59 }
 0x337   :  { %v9553_v38 = vpack.c.bf16 %v3331_v55, %v3328_v22  ;;  %v3337_v8 = vld [vmem:[%s21714_s9 + $0x5c0] sm:$0xff]  ;;  %v3340_v25 = vld [vmem:[%s21714_s9 + $0x5d8] sm:$0xff]  ;;  %v3343_v15 = vld [vmem:[%s21714_s9 + $0x5f0] sm:$0xff] }
 0x338   :  { %9524 = vmatpush1.bf16.msra.mxu1 %v9523_v45  ;;  %v3321_v45 = vld [vmem:[%s21714_s9 + $0x540] sm:$0xff]  ;;  %v9557_v28 = vpack.c.bf16 %v3337_v8, %v3334_v63  ;;  %v9561_v9 = vpack.c.bf16 %v3343_v15, %v3340_v25  ;;  %v21957_v31 = vld [vmem:[#allocation20_spill] sm:$0xff]  ;;  %v21966_v25 = vld [vmem:[#allocation7_spill] sm:$0xff] }
 0x339   :  { %11710 = vrot.lane.b32.xlu1 %v11709_v21, %s11813_s3  ;;  %9526 = vmatprep.subr.bf16.mxu1 %v9525_v61  ;;  %v9549_v21 = vpack.c.bf16 %v3325_v18, %v3322_v44  ;;  %v3324_v61 = vld [vmem:[%s21714_s9 + $0x558] sm:$0xff]  ;;  %v21954_v24 = vld [vmem:[#allocation6_spill] sm:$0xff]  ;;  %v21958_v44 = vunpack.i.h.bf16 %v21957_v31  ;;  %v21967_v15 = vmax.f32 %v21966_v25, 0.0 }
 0x33a   :  { %v9551_v30 = vpack.c.bf16 %v3324_v61, %v3321_v45  ;;  %v21808_v16 = vmax.f32 %v21954_v24, 0.0  ;;  %v2266_v45 = vsel %vm2246_vm10, %v14092_v12, %v14068_v19  ;;  %v21964_v63 = vld [vmem:[#allocation22_spill] sm:$0xff]  ;;  %v3410_v12 = vld [vmem:[%s21714_s9 + $0x808] sm:$0xff]  ;;  %vm4940_vm10 = vcmask 785408  }
 0x33b   :  { %v446_v18 = vsel %vm443_vm6, %v21958_v44, %v11692_v29  ;;  %v21965_v8 = vunpack.i.h.bf16 %v21964_v63 }
 0x33c   :  { %9528 = vmatpush1.bf16.msra.mxu1 %v9527_v27  ;;  %v3327_v27 = vld [vmem:[%s21714_s9 + $0x570] sm:$0xff] }
 0x33d   :  { %9530 = vmatprep.subr.bf16.mxu1 %v9529_v46  ;;  %v3330_v46 = vld [vmem:[%s21714_s9 + $0x588] sm:$0xff] }
 0x33e   :  { %v9555_v0 = vpack.c.bf16 %v3330_v46, %v3327_v27 }
 0x340   :  { %9532 = vmatpush1.bf16.msra.mxu1 %v9531_v60  ;;  %v3333_v60 = vld [vmem:[%s21714_s9 + $0x5a0] sm:$0xff] }
 0x341   :  { %9534 = vmatprep.subr.bf16.mxu1 %v9533_v33  ;;  %v3336_v33 = vld [vmem:[%s21714_s9 + $0x5b8] sm:$0xff] }
 0x342   :  { %v9559_v20 = vpack.c.bf16 %v3336_v33, %v3333_v60  ;;  %v482_v60 = vsel %vm478_vm7, %v11697_v26, %v21811_v52 }
 0x344   :  { %9536 = vmatpush1.bf16.msra.mxu1 %v9535_v2  ;;  %v3339_v2 = vld [vmem:[%s21714_s9 + $0x5d0] sm:$0xff] }
 0x345   :  { %9538 = vmatprep.subr.bf16.mxu1 %v9537_v53  ;;  %v3342_v53 = vld [vmem:[%s21714_s9 + $0x5e8] sm:$0xff] }
 0x346   :  { %v9563_v7 = vpack.c.bf16 %v3342_v53, %v3339_v2 }
 0x348   :  { %9540 = vmatpush1.bf16.msra.mxu1 %v9539_v40 }
 0x349   :  { %9542 = vmatprep.subr.bf16.mxu1 %v9541_v34  ;;  %v14481_v34 = vpop.permute.xlu0 %2633 }
 0x34a   :  { %v2665_v33 = vsel %vm126_vm1, %v14284_v35, %v14481_v34  ;;  %v14541_v35 = vsel %vm420_vm12, %v21808_v16, 0.0  ;;  %v21994_v16 = vmov 0 }
 0x34b   :  { %v21995_v16 = vsel %vm15019_vm15, 4294967295, %v21994_v16 }
 0x34c   :  { %9544 = vmatpush1.bf16.msra.mxu1 %v9543_v13  ;;  %v21955_v13 = vld [vmem:[#allocation52_spill] sm:$0xff]  ;;  %21996 = vst [vmem:[#allocation44_spill] sm:$0xff] %v21995_v16 }
 0x34d   :  { %9546 = vmatprep.subr.bf16.mxu1 %v9545_v14  ;;  %v21956_v14 = vmax.f32 %v21955_v13, 0.0 }
 0x34f   :  { %v2516_v23 = vmax.f32 %v21956_v14, %v13689_v62  ;;  %v21959_v62 = vld [vmem:[#allocation33_spill] sm:$0xff] }
 0x350   :  { %9548 = vmatpush1.bf16.msra.mxu1 %v9547_v1  ;;  %v2147_v55 = vmax.f32 %v21959_v62, 0.0 }
 0x351   :  { %9550 = vmatprep.subr.bf16.mxu1 %v9549_v21  ;;  %v447_v21 = vsel %vm443_vm6, %v11692_v29, %v21812_v47  ;;  %v21968_v29 = vld [vmem:[#allocation24_spill] sm:$0xff]  ;;  %v3357_v47 = vld [vmem:[%s21714_s9 + $0x660] sm:$0xff] }
 0x352   :  { %v460_v2 = vmax.f32 %v416_v56, %v447_v21  ;;  %v2325_v53 = vmax.f32 %v2147_v55, %v2266_v45  ;;  %v21970_v56 = vld [vmem:[#allocation56_spill] sm:$0xff]  ;;  %v697_v45 = vld [vmem:[%s21712_s5 + $0x400] sm:$0xff] }
 0x354   :  { %9552 = vmatpush1.bf16.msra.mxu1 %v9551_v30  ;;  %v11800_v30 = vld [vmem:[%s21711_s4] sm:$0x7f]  ;;  %v495_v44 = vmax.f32 %v460_v2, %v482_v60 }
 0x355   :  { %9554 = vmatprep.subr.bf16.mxu1 %v9553_v38  ;;  %v21960_v38 = vld [vmem:[#allocation2_spill] sm:$0xff] }
 0x356   :  { %v21961_v27 = vsub.s32 5, %v21960_v38  ;;  %v704_v38 = vld [vmem:[%s21712_s5 + $0x438] sm:$0xff] }
 0x358   :  { %9556 = vmatpush1.bf16.msra.mxu1 %v9555_v0  ;;  %v114_v46 = vrot.slane %v11800_v30, %v21961_v27  ;;  %v702_v30 = vld [vmem:[%s21712_s5 + $0x428] sm:$0xff] }
 0x359   :  { %9558 = vmatprep.subr.bf16.mxu1 %v9557_v28  ;;  %v481_v28 = vsel %vm478_vm7, %v21965_v8, %v11697_v26  ;;  %v21971_v27 = vld [vmem:[#allocation27_spill] sm:$0xff]  ;;  %v9269_v2 = vpack.c.bf16 %v704_v38, %v702_v30 }
 0x35a   :  { %v341_v13 = vadd.f32 %v21970_v56, %v114_v46  ;;  %v21972_v46 = vunpack.i.h.bf16 %v21971_v27 }
 0x35c   :  { %9560 = vmatpush1.bf16.msra.mxu1 %v9559_v20 }
 0x35d   :  { %9562 = vmatprep.subr.bf16.mxu1 %v9561_v9  ;;  %v459_v9 = vmax.f32 %v21967_v15, %v446_v18 }
 0x35f   :  { %v494_v14 = vmax.f32 %v459_v9, %v481_v28  ;;  %v14578_v28 = vmax.f32 %v341_v13, 0.0 }
 0x360   :  { %9564 = vmatpush1.bf16.msra.mxu1 %v9563_v7 }
 0x369   :  { %v14476_v3 = vpop.permute.xlu1 %2757 }
 0x36a   :  { %v2867_v40 = vsel %vm2817_vm11, 0.0, %v14476_v3 }
 0x36b   :  { %2908 = vrot.lane.b32.xlu1 %v2867_v40, %s11814_s20  ;;  %v21969_v40 = vunpack.i.h.bf16 %v21968_v29  ;;  %v703_v29 = vld [vmem:[%s21712_s5 + $0x430] sm:$0xff] }
 0x36d   :  { %v14493_v1 = vpop.permute.xlu1 %11700 }
 0x36e   :  { %v21810_v61 = vunpack.i.h.bf16 %v14493_v1  ;;  %v11702_v22 = vunpack.i.l.bf16 %v14493_v1  ;;  %v22003_v16 = vunpack.i.h.bf16 %v14493_v1 }
 0x36f   :  { %v14509_v0 = vpop.permute.xlu0 %2759  ;;  %2635 = vrot.lane.b32.xlu1 %v2516_v23, %s11812_s8  ;;  %v2725_v23 = vmax.f32 %v2325_v53, %v2665_v33  ;;  %v701_v53 = vld [vmem:[%s21712_s5 + $0x420] sm:$0xff] }
 0x370   :  { %v14529_v20 = vsel %vm2817_vm11, %v14476_v3, %v14509_v0  ;;  %v516_v26 = vsel %vm513_vm8, %v21969_v40, %v11702_v22  ;;  %v517_v32 = vsel %vm513_vm8, %v11702_v22, %v21810_v61  ;;  %v699_v22 = vld [vmem:[%s21712_s5 + $0x410] sm:$0xff]  ;;  %v706_v40 = vld [vmem:[%s21712_s5 + $0x448] sm:$0xff]  ;;  %v9271_v56 = vpack.c.bf16 %v703_v29, %v701_v53 }
 0x371   :  { %v2572_v7 = vpop.permute.xlu1 %2571  ;;  %2910 = vrot.lane.b32.xlu0 %v14529_v20, %s11814_s20  ;;  %3666 = vmatprep.mubr.f32.mxu1 %v14529_v20  ;;  %v529_v62 = vmax.f32 %v494_v14, %v516_v26  ;;  %v530_v55 = vmax.f32 %v495_v44, %v517_v32  ;;  %v9267_v9 = vpack.c.bf16 %v699_v22, %v697_v45  ;;  %v708_v26 = vld [vmem:[%s21712_s5 + $0x458] sm:$0xff]  ;;  %v705_v14 = vld [vmem:[%s21712_s5 + $0x440] sm:$0xff] }
 0x372   :  { %8694 = vmatmul.mubr.msk.f32.gmra.mrb[104].mxu1 %vm14513_vm13, %v14476_v3  ;;  %v9273_v13 = vpack.c.bf16 %v708_v26, %v706_v40  ;;  %v712_v45 = vld [vmem:[%s21712_s5 + $0x478] sm:$0xff]  ;;  %v2642_v22 = vsel %vm126_vm1, %v14119_v57, %v2572_v7  ;;  %v713_v26 = vld [vmem:[%s21712_s5 + $0x480] sm:$0xff] }
 0x373   :  { %v14553_v31 = vpop.permute.xlu0 %11705  ;;  %441 = vrot.lane.b32.xlu1 %v14541_v35, %s11807_s30 }
 0x374   :  { %v21809_v18 = vunpack.i.h.bf16 %v14553_v31  ;;  %v11707_v21 = vunpack.i.l.bf16 %v14553_v31 }
 0x375   :  { %2813 = vrot.lane.b32.xlu0 %v2725_v23, %s11813_s3  ;;  %v2588_v60 = vpop.permute.xlu1 %2587  ;;  %v707_v23 = vld [vmem:[%s21712_s5 + $0x450] sm:$0xff] }
 0x376   :  { %v551_v63 = vsel %vm548_vm9, %v21972_v46, %v11707_v21  ;;  %v552_v8 = vsel %vm548_vm9, %v11707_v21, %v21809_v18  ;;  %v710_v21 = vld [vmem:[%s21712_s5 + $0x468] sm:$0xff]  ;;  %v9275_v38 = vpack.c.bf16 %v707_v23, %v705_v14  ;;  %v709_v46 = vld [vmem:[%s21712_s5 + $0x460] sm:$0xff]  ;;  %v21977_v14 = vld [vmem:[#allocation37_spill] sm:$0xff] }
 0x377   :  { %v2580_v33 = vpop.permute.xlu0 %2579  ;;  %476 = vrot.lane.b32.xlu1 %v14541_v35, %s11808_s17  ;;  %v565_v25 = vmax.f32 %v530_v55, %v552_v8  ;;  %v564_v15 = vmax.f32 %v529_v62, %v551_v63  ;;  %v21973_v62 = vld [vmem:[#allocation35_spill] sm:$0xff]  ;;  %v9277_v27 = vpack.c.bf16 %v712_v45, %v710_v21  ;;  %v711_v63 = vld [vmem:[%s21712_s5 + $0x470] sm:$0xff]  ;;  %v716_v8 = vld [vmem:[%s21712_s5 + $0x498] sm:$0xff]  ;;  %v21978_v23 = vmax.f32 %v21977_v14, 0.0 }
 0x378   :  { %v21974_v55 = vmax.f32 %v21973_v62, 0.0  ;;  %v9279_v29 = vpack.c.bf16 %v711_v63, %v709_v46 }
 0x379   :  { %439 = vrot.lane.b32.xlu0 %v14578_v28, %s11807_s30  ;;  %919 = vmatprep.mubr.f32.mxu0 %v565_v25  ;;  %v2604_v44 = vpop.permute.xlu1 %2603  ;;  %v2645_v25 = vsel %vm126_vm1, %v14138_v39, %v2580_v33  ;;  %v715_v39 = vld [vmem:[%s21712_s5 + $0x490] sm:$0xff]  ;;  %v2308_v21 = vmax.f32 %v21978_v23, %v21932_v11 }
 0x37a   :  { %920 = vmatmul.mubr.f32.vlgmr.msra.gmra.mrb[6].mxu0 %v564_v15  ;;  %v2302_v30 = vmax.f32 %v21974_v55, %v13362_v42  ;;  %v714_v42 = vld [vmem:[%s21712_s5 + $0x488] sm:$0xff]  ;;  %v21975_v15 = vld [vmem:[#allocation36_spill] sm:$0xff] }
 0x37b   :  { %v2596_v32 = vpop.permute.xlu0 %2595  ;;  %511 = vrot.lane.b32.xlu1 %v14541_v35, %s11809_s25  ;;  %9268 = vmatpush1.bf16.msra.mxu0 %v9267_v9  ;;  %v21976_v9 = vmax.f32 %v21975_v15, 0.0  ;;  %v9281_v40 = vpack.c.bf16 %v716_v8, %v714_v42  ;;  %v721_v15 = vld [vmem:[%s21712_s5 + $0x4c0] sm:$0xff] }
 0x37c   :  { %9270 = vmatprep.subr.bf16.mxu0 %v9269_v2  ;;  %v2702_v57 = vmax.f32 %v2302_v30, %v2642_v22  ;;  %v717_v30 = vld [vmem:[%s21712_s5 + $0x4a0] sm:$0xff]  ;;  %v2651_v11 = vsel %vm126_vm1, %v14177_v50, %v2596_v32 }
 0x37d   :  { %474 = vrot.lane.b32.xlu0 %v14578_v28, %s11808_s17  ;;  %v2305_v2 = vmax.f32 %v21976_v9, %v13369_v41  ;;  %v14640_v53 = vpop.permute.xlu1 %2619  ;;  %v718_v41 = vld [vmem:[%s21712_s5 + $0x4a8] sm:$0xff]  ;;  %v723_v9 = vld [vmem:[%s21712_s5 + $0x4d0] sm:$0xff] }
 0x37f   :  { %544 = vrot.lane.b32.xlu1 %v14578_v28, %s11810_s22  ;;  %9272 = vmatpush1.bf16.msra.mxu0 %v9271_v56  ;;  %v14625_v7 = vpop.permute.xlu0 %2611  ;;  %v2705_v33 = vmax.f32 %v2305_v2, %v2645_v25  ;;  %v720_v56 = vld [vmem:[%s21712_s5 + $0x4b8] sm:$0xff]  ;;  %v2654_v2 = vsel %vm126_vm1, %v14209_v36, %v2604_v44 }
 0x380   :  { %9274 = vmatprep.subr.bf16.mxu0 %v9273_v13  ;;  %v2648_v13 = vsel %vm126_vm1, %v14154_v58, %v2588_v60  ;;  %v9285_v22 = vpack.c.bf16 %v720_v56, %v718_v41  ;;  %v719_v58 = vld [vmem:[%s21712_s5 + $0x4b0] sm:$0xff]  ;;  %v722_v60 = vld [vmem:[%s21712_s5 + $0x4c8] sm:$0xff] }
 0x381   :  { %509 = vrot.lane.b32.xlu0 %v14578_v28, %s11809_s25  ;;  %v2708_v62 = vmax.f32 %v2308_v21, %v2648_v13  ;;  %v14665_v55 = vpop.permute.xlu1 %2763  ;;  %v9287_v42 = vpack.c.bf16 %v719_v58, %v717_v30  ;;  %v9291_v13 = vpack.c.bf16 %v723_v9, %v721_v15  ;;  %v725_v21 = vld [vmem:[%s21712_s5 + $0x4e0] sm:$0xff]  ;;  %v732_v30 = vld [vmem:[%s21712_s5 + $0x518] sm:$0xff]  ;;  %v21983_v58 = vld [vmem:[#allocation40_spill] sm:$0xff] }
 0x382   :  { %v14694_v32 = vsel %vm2817_vm11, 0.0, %v14665_v55  ;;  %v734_v15 = vld [vmem:[%s21712_s5 + $0x528] sm:$0xff]  ;;  %v736_v9 = vld [vmem:[%s21712_s5 + $0x538] sm:$0xff] }
 0x383   :  { %2767 = vrot.lane.b32.xlu1 %v2702_v57, %s11813_s3  ;;  %9276 = vmatpush1.bf16.msra.mxu0 %v9275_v38  ;;  %v14662_v45 = vpop.permute.xlu0 %2627  ;;  %v724_v38 = vld [vmem:[%s21712_s5 + $0x4d8] sm:$0xff] }
 0x384   :  { %9278 = vmatprep.subr.bf16.mxu0 %v9277_v27  ;;  %v21979_v27 = vld [vmem:[#allocation38_spill] sm:$0xff]  ;;  %v9289_v25 = vpack.c.bf16 %v724_v38, %v722_v60 }
 0x385   :  { %546 = vrot.lane.b32.xlu0 %v14541_v35, %s11810_s22  ;;  %v9283_v35 = vpack.c.bf16 %v715_v39, %v713_v26  ;;  %v21980_v46 = vmax.f32 %v21979_v27, 0.0  ;;  %v21981_v26 = vld [vmem:[#allocation39_spill] sm:$0xff]  ;;  %s11823_s22 = smov 12  }
 0x386   :  { %v21982_v39 = vmax.f32 %v21981_v26, 0.0 }
 0x387   :  { %2773 = vrot.lane.b32.xlu1 %v2705_v33, %s11813_s3  ;;  %9280 = vmatpush1.bf16.msra.mxu0 %v9279_v29  ;;  %v2311_v63 = vmax.f32 %v21980_v46, %v21937_v6  ;;  %v726_v29 = vld [vmem:[%s21712_s5 + $0x4e8] sm:$0xff] }
 0x388   :  { %9282 = vmatprep.subr.bf16.mxu0 %v9281_v40  ;;  %v728_v40 = vld [vmem:[%s21712_s5 + $0x4f8] sm:$0xff]  ;;  %v2314_v33 = vmax.f32 %v21982_v39, %v13444_v5 }
 0x389   :  { %v2711_v8 = vmax.f32 %v2311_v63, %v2651_v11  ;;  %v9293_v23 = vpack.c.bf16 %v728_v40, %v726_v29  ;;  %v21984_v11 = vmax.f32 %v21983_v58, 0.0 }
 0x38a   :  { %v2714_v5 = vmax.f32 %v2314_v33, %v2654_v2  ;;  %v21985_v2 = vld [vmem:[#allocation41_spill] sm:$0xff] }
 0x38b   :  { %v14684_v57 = vpop.permute.xlu0 %2765  ;;  %2779 = vrot.lane.b32.xlu1 %v2708_v62, %s11813_s3  ;;  %9284 = vmatpush1.bf16.msra.mxu0 %v9283_v35  ;;  %v727_v35 = vld [vmem:[%s21712_s5 + $0x4f0] sm:$0xff]  ;;  %v730_v62 = vld [vmem:[%s21712_s5 + $0x508] sm:$0xff]  ;;  %v2317_v60 = vmax.f32 %v21984_v11, %v13466_v51  ;;  %v21986_v29 = vmax.f32 %v21985_v2, 0.0 }
 0x38c   :  { %v14690_v50 = vsel %vm2817_vm11, %v14665_v55, %v14684_v57  ;;  %9286 = vmatprep.subr.bf16.mxu0 %v9285_v22  ;;  %v2657_v22 = vsel %vm126_vm1, %v14250_v48, %v14625_v7  ;;  %v9295_v46 = vpack.c.bf16 %v727_v35, %v725_v21  ;;  %v2663_v21 = vsel %vm126_vm1, %v14329_v10, %v14662_v45  ;;  %v738_v35 = vld [vmem:[%s21712_s5 + $0x548] sm:$0xff] }
 0x38d   :  { %3672 = vmatprep.mubr.f32.mxu1 %v14690_v50  ;;  %v11714_v6 = vpack.i.bf16 %v14690_v50, %v14694_v32  ;;  %v2717_v51 = vmax.f32 %v2317_v60, %v2657_v22  ;;  %v2320_v40 = vmax.f32 %v21986_v29, %v21950_v37  ;;  %v740_v22 = vld [vmem:[%s21712_s5 + $0x558] sm:$0xff] }
 0x38e   :  { %8696 = vmatmul.mubr.msk.f32.gmra.mrb[106].mxu1 %vm14513_vm13, %v14665_v55 }
 0x38f   :  { %v14719_v41 = vpop.permute.xlu1 %2771  ;;  %11715 = vrot.lane.b32.xlu0 %v11714_v6, %s11814_s20  ;;  %v14722_v36 = vpop.permute.xlu0 %2769  ;;  %2785 = vrot.lane.b32.xlu1 %v2711_v8, %s11813_s3  ;;  %v729_v8 = vld [vmem:[%s21712_s5 + $0x500] sm:$0xff]  ;;  %v731_v6 = vld [vmem:[%s21712_s5 + $0x510] sm:$0xff] }
 0x390   :  { %v14728_v44 = vsel %vm2817_vm11, %v14722_v36, %v14719_v41  ;;  %v14732_v56 = vsel %vm2817_vm11, 0.0, %v14722_v36  ;;  %9288 = vmatpush1.bf16.msra.mxu0 %v9287_v42  ;;  %v9297_v42 = vpack.c.bf16 %v732_v30, %v730_v62  ;;  %v9299_v33 = vpack.c.bf16 %v731_v6, %v729_v8  ;;  %v21987_v62 = vld [vmem:[#allocation42_spill] sm:$0xff]  ;;  %v739_v8 = vld [vmem:[%s21712_s5 + $0x550] sm:$0xff]  ;;  %v742_v6 = vld [vmem:[%s21712_s5 + $0x568] sm:$0xff] }
 0x391   :  { %3678 = vmatprep.mubr.f32.mxu1 %v14728_v44  ;;  %v11719_v14 = vpack.i.bf16 %v14728_v44, %v14732_v56  ;;  %9290 = vmatprep.subr.bf16.mxu0 %v9289_v25  ;;  %v2660_v25 = vsel %vm126_vm1, %v14288_v43, %v14640_v53  ;;  %v21988_v30 = vmax.f32 %v21987_v62, 0.0 }
 0x392   :  { %8698 = vmatmul.mubr.msk.f32.gmra.mrb[108].mxu1 %vm14513_vm13, %v14722_v36  ;;  %v2720_v37 = vmax.f32 %v2320_v40, %v2660_v25  ;;  %v744_v25 = vld [vmem:[%s21712_s5 + $0x578] sm:$0xff] }
 0x393   :  { %v14758_v38 = vpop.permute.xlu1 %2775  ;;  %11720 = vrot.lane.b32.xlu0 %v11719_v14, %s11814_s20  ;;  %v14761_v48 = vpop.permute.xlu0 %2777  ;;  %2791 = vrot.lane.b32.xlu1 %v2714_v5, %s11813_s3  ;;  %v9301_v5 = vpack.c.bf16 %v736_v9, %v734_v15  ;;  %v733_v14 = vld [vmem:[%s21712_s5 + $0x520] sm:$0xff]  ;;  %v2323_v58 = vmax.f32 %v21988_v30, %v14045_v54 }
 0x394   :  { %v14767_v7 = vsel %vm2817_vm11, %v14758_v38, %v14761_v48  ;;  %v14771_v27 = vsel %vm2817_vm11, 0.0, %v14758_v38  ;;  %9292 = vmatpush1.bf16.msra.mxu0 %v9291_v13 }
 0x395   :  { %3684 = vmatprep.mubr.f32.mxu1 %v14767_v7  ;;  %v11724_v63 = vpack.i.bf16 %v14767_v7, %v14771_v27  ;;  %9294 = vmatprep.subr.bf16.mxu0 %v9293_v23  ;;  %v735_v23 = vld [vmem:[%s21712_s5 + $0x530] sm:$0xff]  ;;  %v2723_v54 = vmax.f32 %v2323_v58, %v2663_v21  ;;  %v3346_v58 = vld [vmem:[%s21714_s9 + $0x608] sm:$0xff] }
 0x396   :  { %8700 = vmatmul.mubr.msk.f32.gmra.mrb[110].mxu1 %vm14513_vm13, %v14758_v38 }
 0x397   :  { %v14797_v26 = vpop.permute.xlu1 %2783  ;;  %11725 = vrot.lane.b32.xlu0 %v11724_v63, %s11814_s20  ;;  %v14800_v43 = vpop.permute.xlu0 %2781  ;;  %2797 = vrot.lane.b32.xlu1 %v2717_v51, %s11813_s3  ;;  %v9305_v63 = vpack.c.bf16 %v740_v22, %v738_v35 }
 0x398   :  { %v14805_v53 = vsel %vm2817_vm11, 0.0, %v14800_v43  ;;  %v14810_v39 = vsel %vm2817_vm11, %v14800_v43, %v14797_v26  ;;  %9296 = vmatpush1.bf16.msra.mxu0 %v9295_v46  ;;  %v9303_v46 = vpack.c.bf16 %v735_v23, %v733_v14  ;;  %v746_v14 = vld [vmem:[%s21712_s5 + $0x588] sm:$0xff]  ;;  %v748_v23 = vld [vmem:[%s21712_s5 + $0x598] sm:$0xff] }
 0x399   :  { %3690 = vmatprep.mubr.f32.mxu1 %v14810_v39  ;;  %v11729_v13 = vpack.i.bf16 %v14810_v39, %v14805_v53  ;;  %9298 = vmatprep.subr.bf16.mxu0 %v9297_v42  ;;  %v737_v42 = vld [vmem:[%s21712_s5 + $0x540] sm:$0xff] }
 0x39a   :  { %8702 = vmatmul.mubr.msk.f32.gmra.mrb[112].mxu1 %vm14513_vm13, %v14800_v43  ;;  %v9307_v40 = vpack.c.bf16 %v739_v8, %v737_v42  ;;  %v747_v42 = vld [vmem:[%s21712_s5 + $0x590] sm:$0xff] }
 0x39b   :  { %v14836_v11 = vpop.permute.xlu1 %2787  ;;  %11730 = vrot.lane.b32.xlu0 %v11729_v13, %s11814_s20  ;;  %v14839_v10 = vpop.permute.xlu0 %2789  ;;  %2803 = vrot.lane.b32.xlu1 %v2720_v37, %s11813_s3  ;;  %v9309_v37 = vpack.c.bf16 %v744_v25, %v742_v6  ;;  %v741_v13 = vld [vmem:[%s21712_s5 + $0x560] sm:$0xff]  ;;  %v750_v6 = vld [vmem:[%s21712_s5 + $0x5a8] sm:$0xff] }
 0x39c   :  { %v14844_v45 = vsel %vm2817_vm11, 0.0, %v14836_v11  ;;  %v14849_v60 = vsel %vm2817_vm11, %v14836_v11, %v14839_v10  ;;  %9300 = vmatpush1.bf16.msra.mxu0 %v9299_v33  ;;  %v752_v25 = vld [vmem:[%s21712_s5 + $0x5b8] sm:$0xff] }
 0x39d   :  { %v11734_v51 = vpack.i.bf16 %v14849_v60, %v14844_v45  ;;  %3696 = vmatprep.mubr.f32.mxu1 %v14849_v60  ;;  %9302 = vmatprep.subr.bf16.mxu0 %v9301_v5  ;;  %v743_v5 = vld [vmem:[%s21712_s5 + $0x570] sm:$0xff] }
 0x39e   :  { %8704 = vmatmul.mubr.msk.f32.gmra.mrb[114].mxu1 %vm14513_vm13, %v14836_v11  ;;  %v9311_v30 = vpack.c.bf16 %v743_v5, %v741_v13 }
 0x39f   :  { %v14869_v15 = vpop.permute.xlu1 %2795  ;;  %11735 = vrot.lane.b32.xlu0 %v11734_v51, %s11814_s20  ;;  %v14872_v9 = vpop.permute.xlu0 %2793  ;;  %2809 = vrot.lane.b32.xlu1 %v2723_v54, %s11813_s3  ;;  %v9313_v51 = vpack.c.bf16 %v748_v23, %v746_v14  ;;  %v9317_v23 = vpack.c.bf16 %v752_v25, %v750_v6  ;;  %v758_v6 = vld [vmem:[%s21712_s5 + $0x5e8] sm:$0xff]  ;;  %v760_v25 = vld [vmem:[%s21712_s5 + $0x5f8] sm:$0xff] }
 0x3a0   :  { %v14877_v2 = vsel %vm2817_vm11, 0.0, %v14872_v9  ;;  %v14882_v29 = vsel %vm2817_vm11, %v14872_v9, %v14869_v15  ;;  %9304 = vmatpush1.bf16.msra.mxu0 %v9303_v46  ;;  %v3349_v46 = vld [vmem:[%s21714_s9 + $0x620] sm:$0xff] }
 0x3a1   :  { %3702 = vmatprep.mubr.f32.mxu1 %v14882_v29  ;;  %v11739_v33 = vpack.i.bf16 %v14882_v29, %v14877_v2  ;;  %9306 = vmatprep.subr.bf16.mxu0 %v9305_v63  ;;  %v745_v63 = vld [vmem:[%s21712_s5 + $0x580] sm:$0xff]  ;;  %v9565_v8 = vpack.c.bf16 %v3349_v46, %v3346_v58  ;;  %v751_v46 = vld [vmem:[%s21712_s5 + $0x5b0] sm:$0xff] }
 0x3a2   :  { %8706 = vmatmul.mubr.msk.f32.gmra.mrb[116].mxu1 %vm14513_vm13, %v14872_v9  ;;  %v9315_v5 = vpack.c.bf16 %v747_v42, %v745_v63  ;;  %v749_v58 = vld [vmem:[%s21712_s5 + $0x5a0] sm:$0xff] }
 0x3a3   :  { %v14902_v21 = vpop.permute.xlu1 %2799  ;;  %11740 = vrot.lane.b32.xlu0 %v11739_v33, %s11814_s20  ;;  %v14905_v35 = vpop.permute.xlu0 %2801  ;;  %9566 = vmatprep.subr.bf16.mxu1 %v9565_v8  ;;  %v753_v42 = vld [vmem:[%s21712_s5 + $0x5c0] sm:$0xff]  ;;  %v755_v8 = vld [vmem:[%s21712_s5 + $0x5d0] sm:$0xff] }
 0x3a4   :  { %v14909_v22 = vsel %vm2817_vm11, 0.0, %v14902_v21  ;;  %v14914_v62 = vsel %vm2817_vm11, %v14902_v21, %v14905_v35  ;;  %9308 = vmatpush1.bf16.msra.mxu0 %v9307_v40 }
 0x3a5   :  { %v11744_v54 = vpack.i.bf16 %v14914_v62, %v14909_v22  ;;  %3708 = vmatprep.mubr.f32.mxu1 %v14914_v62  ;;  %9310 = vmatprep.subr.bf16.mxu0 %v9309_v37 }
 0x3a6   :  { %8708 = vmatmul.mubr.msk.f32.gmra.mrb[118].mxu1 %vm14513_vm13, %v14902_v21 }
 0x3a7   :  { %v14940_v40 = vpop.permute.xlu1 %2807  ;;  %11745 = vrot.lane.b32.xlu0 %v11744_v54, %s11814_s20  ;;  %v14943_v33 = vpop.permute.xlu0 %2805  ;;  %v756_v54 = vld [vmem:[%s21712_s5 + $0x5d8] sm:$0xff] }
 0x3a8   :  { %21989 = vst [vmem:[#allocation8_spill] sm:$0xff] %v14943_v33  ;;  %v14947_v37 = vsel %vm2817_vm11, 0.0, %v14943_v33  ;;  %v14952_v13 = vsel %vm2817_vm11, %v14943_v33, %v14940_v40  ;;  %9312 = vmatpush1.bf16.msra.mxu0 %v9311_v30  ;;  %v754_v30 = vld [vmem:[%s21712_s5 + $0x5c8] sm:$0xff] }
 0x3a9   :  { %3714 = vmatprep.mubr.f32.mxu1 %v14952_v13  ;;  %v11749_v14 = vpack.i.bf16 %v14952_v13, %v14947_v37  ;;  %9314 = vmatprep.subr.bf16.mxu0 %v9313_v51  ;;  %v9319_v51 = vpack.c.bf16 %v751_v46, %v749_v58  ;;  %v9321_v63 = vpack.c.bf16 %v756_v54, %v754_v30  ;;  %v759_v58 = vld [vmem:[%s21712_s5 + $0x5f0] sm:$0xff]  ;;  %v762_v46 = vld [vmem:[%s21712_s5 + $0x608] sm:$0xff]  ;;  %v764_v30 = vld [vmem:[%s21712_s5 + $0x618] sm:$0xff] }
 0x3aa   :  { %8710 = vmatmul.mubr.msk.f32.gmra.mrb[120].mxu1 %vm14513_vm13, %v14943_v33 }
 0x3ab   :  { %11750 = vrot.lane.b32.xlu0 %v11749_v14, %s11814_s20  ;;  %v9325_v14 = vpack.c.bf16 %v760_v25, %v758_v6  ;;  %v3348_v6 = vld [vmem:[%s21714_s9 + $0x618] sm:$0xff]  ;;  %v21991_v25 = vld [vmem:[#allocation43_spill] sm:$0xff] }
 0x3ac   :  { %9316 = vmatpush1.bf16.msra.mxu0 %v9315_v5  ;;  %v9323_v5 = vpack.c.bf16 %v755_v8, %v753_v42  ;;  %v3345_v8 = vld [vmem:[%s21714_s9 + $0x600] sm:$0xff] }
 0x3ad   :  { %9318 = vmatprep.subr.bf16.mxu0 %v9317_v23  ;;  %v757_v23 = vld [vmem:[%s21712_s5 + $0x5e0] sm:$0xff] }
 0x3ae   :  { %v9327_v54 = vpack.c.bf16 %v759_v58, %v757_v23  ;;  %v3352_v58 = vld [vmem:[%s21714_s9 + $0x638] sm:$0xff] }
 0x3b0   :  { %9320 = vmatpush1.bf16.msra.mxu0 %v9319_v51  ;;  %v9329_v51 = vpack.c.bf16 %v764_v30, %v762_v46  ;;  %v3355_v46 = vld [vmem:[%s21714_s9 + $0x650] sm:$0xff] }
 0x3b1   :  { %9322 = vmatprep.subr.bf16.mxu0 %v9321_v63  ;;  %v11711_v63 = vpop.permute.xlu1 %11710  ;;  %v9569_v18 = vpack.c.bf16 %v3355_v46, %v3352_v58 }
 0x3b2   :  { %v11713_v58 = vunpack.i.h.bf16 %v11711_v63 }
 0x3b4   :  { %9324 = vmatpush1.bf16.msra.mxu0 %v9323_v5  ;;  %v21992_v5 = vmax.f32 %v21991_v25, 0.0  ;;  %v11712_v25 = vunpack.i.l.bf16 %v11711_v63  ;;  %v3360_v63 = vld [vmem:[%s21714_s9 + $0x678] sm:$0xff] }
 0x3b5   :  { %9326 = vmatprep.subr.bf16.mxu0 %v9325_v14 }
 0x3b6   :  { %v2326_v23 = vmax.f32 %v21992_v5, %v14068_v19  ;;  %v9567_v19 = vpack.c.bf16 %v3348_v6, %v3345_v8  ;;  %v3358_v6 = vld [vmem:[%s21714_s9 + $0x668] sm:$0xff]  ;;  %v15054_v61 = vsel %vm2817_vm11, 0.0, %v11712_v25 }
 0x3b8   :  { %9328 = vmatpush1.bf16.msra.mxu0 %v9327_v54 }
 0x3b9   :  { %9330 = vmatprep.subr.bf16.mxu0 %v9329_v51 }
 0x3dd   :  { %v14997_v42 = vpop.permute.xlu1 %2908 }
 0x3de   :  { %21990 = vst [vmem:[#allocation31_spill] sm:$0xff] %v14997_v42 }
 0x3e1   :  { %v2636_v14 = vpop.permute.xlu1 %2635 }
 0x3e2   :  { %v2666_v30 = vsel %vm126_vm1, %v14481_v34, %v2636_v14  ;;  %v3351_v34 = vld [vmem:[%s21714_s9 + $0x630] sm:$0xff]  ;;  %v3361_v14 = vld [vmem:[%s21714_s9 + $0x680] sm:$0xff]  ;;  %vm3086_vm1 = vcmask 654336  }
 0x3e3   :  { %v2726_v54 = vmax.f32 %v2326_v23, %v2666_v30  ;;  %v15016_v51 = vpop.permute.xlu0 %2910  ;;  %v3354_v23 = vld [vmem:[%s21714_s9 + $0x648] sm:$0xff]  ;;  %v9573_v52 = vpack.c.bf16 %v3361_v14, %v3358_v6  ;;  %v2819_v6 = vsel %vm2817_vm11, %v14509_v0, %v11713_v58  ;;  %v9575_v14 = vpack.c.bf16 %v3360_v63, %v3357_v47  ;;  %v3373_v47 = vld [vmem:[%s21714_s9 + $0x6e0] sm:$0xff] }
 0x3e4   :  { %21993 = vst [vmem:[#allocation9_spill] sm:$0xff] %v15016_v51  ;;  %v15026_v5 = vsel %vm2968_vm14, %v14997_v42, %v15016_v51  ;;  %v9571_v30 = vpack.c.bf16 %v3354_v23, %v3351_v34  ;;  %v3366_v51 = vld [vmem:[%s21714_s9 + $0x6a8] sm:$0xff]  ;;  %v22000_v58 = vunpack.i.h.bf16 %v14082_v17  ;;  %v3372_v17 = vld [vmem:[%s21714_s9 + $0x6d8] sm:$0xff] }
 0x3e5   :  { %21997 = vst [vmem:[#allocation46_spill] sm:$0xff] %v15026_v5  ;;  %3785 = vmatprep.mubr.f32.mxu1 %v15026_v5  ;;  %2815 = vrot.lane.b32.xlu1 %v2726_v54, %s11813_s3  ;;  %v15036_v8 = vpop.permute.xlu1 %441  ;;  %v3370_v0 = vld [vmem:[%s21714_s9 + $0x6c8] sm:$0xff] }
 0x3e6   :  { %8712 = vmatmul.mubr.msk.f32.vlgmr.msra.gmra.mrb[102].mxu1 %vm15019_vm15, %v14997_v42 }
 0x3e7   :  { %v15047_v46 = vpop.permute.xlu0 %2813  ;;  %9568 = vmatpush1.bf16.msra.mxu1 %v9567_v19 }
 0x3e8   :  { %21998 = vst [vmem:[#allocation45_spill] sm:$0xff] %v15047_v46  ;;  %v15051_v54 = vsel %vm2817_vm11, %v11712_v25, %v15047_v46  ;;  %9570 = vmatprep.subr.bf16.mxu1 %v9569_v18  ;;  %v3364_v18 = vld [vmem:[%s21714_s9 + $0x698] sm:$0xff]  ;;  %v3367_v25 = vld [vmem:[%s21714_s9 + $0x6b0] sm:$0xff] }
 0x3e9   :  { %21999 = vst [vmem:[#allocation10_spill] sm:$0xff] %v15051_v54  ;;  %v11754_v19 = vpack.i.bf16 %v15051_v54, %v15054_v61  ;;  %3030 = vrot.lane.b32.xlu1 %v14694_v32, %s11815_s27  ;;  %v15066_v34 = vpop.permute.xlu1 %476  ;;  %v9577_v32 = vpack.c.bf16 %v3367_v25, %v3364_v18  ;;  %v3363_v54 = vld [vmem:[%s21714_s9 + $0x690] sm:$0xff]  ;;  %v9581_v25 = vpack.c.bf16 %v3373_v47, %v3370_v0 }
 0x3eb   :  { %v440_v23 = vpop.permute.xlu0 %439  ;;  %11755 = vrot.lane.b32.xlu0 %v11754_v19, %s11814_s20  ;;  %9572 = vmatpush1.bf16.msra.mxu1 %v9571_v30 }
 0x3ec   :  { %9574 = vmatprep.subr.bf16.mxu1 %v9573_v52  ;;  %v15094_v52 = vsel %vm2877_vm0, %v2819_v6, 0.0  ;;  %v448_v30 = vsel %vm443_vm6, %v22000_v58, %v440_v23  ;;  %v449_v18 = vsel %vm443_vm6, %v440_v23, %v15036_v8  ;;  %v3369_v6 = vld [vmem:[%s21714_s9 + $0x6c0] sm:$0xff]  ;;  %v22001_v58 = vunpack.i.h.bf16 %v14110_v59  ;;  %v3379_v23 = vld [vmem:[%s21714_s9 + $0x710] sm:$0xff] }
 0x3ed   :  { %3036 = vrot.lane.b32.xlu1 %v14732_v56, %s11815_s27  ;;  %v15085_v19 = vpop.permute.xlu1 %511  ;;  %v9579_v56 = vpack.c.bf16 %v3366_v51, %v3363_v54  ;;  %v3376_v54 = vld [vmem:[%s21714_s9 + $0x6f8] sm:$0xff]  ;;  %v462_v0 = vmax.f32 %v14578_v28, %v449_v18  ;;  %v3378_v28 = vld [vmem:[%s21714_s9 + $0x708] sm:$0xff]  ;;  %vm4879_vm6 = vcmask 392192  }
 0x3ee   :  { %v9585_v33 = vpack.c.bf16 %v3379_v23, %v3376_v54  ;;  %v3385_v54 = vld [vmem:[%s21714_s9 + $0x740] sm:$0xff]  ;;  %v22004_v23 = vunpack.i.h.bf16 %v14553_v31  ;;  %v3384_v31 = vld [vmem:[%s21714_s9 + $0x738] sm:$0xff] }
 0x3ef   :  { %v475_v63 = vpop.permute.xlu0 %474  ;;  %2912 = vrot.lane.b32.xlu0 %v15094_v52, %s11814_s20  ;;  %9576 = vmatpush1.bf16.msra.mxu1 %v9575_v14  ;;  %v22002_v14 = vmax.f32 %v12923_v4, 0.0  ;;  %v3375_v4 = vld [vmem:[%s21714_s9 + $0x6f0] sm:$0xff] }
 0x3f0   :  { %9578 = vmatprep.subr.bf16.mxu1 %v9577_v32  ;;  %v483_v46 = vsel %vm478_vm7, %v22001_v58, %v475_v63  ;;  %v484_v59 = vsel %vm478_vm7, %v475_v63, %v15066_v34  ;;  %v761_v63 = vld [vmem:[%s21712_s5 + $0x600] sm:$0xff]  ;;  %vm4894_vm7 = vcmask 752640  }
 0x3f1   :  { %3042 = vrot.lane.b32.xlu1 %v14771_v27, %s11815_s27  ;;  %v545_v51 = vpop.permute.xlu1 %544  ;;  %v461_v32 = vmax.f32 %v22002_v14, %v448_v30  ;;  %v9583_v27 = vpack.c.bf16 %v3372_v17, %v3369_v6  ;;  %v497_v30 = vmax.f32 %v462_v0, %v484_v59 }
 0x3f2   :  { %v553_v14 = vsel %vm548_vm9, %v22004_v23, %v545_v51 }
 0x3f3   :  { %v510_v47 = vpop.permute.xlu0 %509  ;;  %9580 = vmatpush1.bf16.msra.mxu1 %v9579_v56  ;;  %v496_v58 = vmax.f32 %v461_v32, %v483_v46  ;;  %v763_v56 = vld [vmem:[%s21712_s5 + $0x610] sm:$0xff] }
 0x3f4   :  { %v518_v42 = vsel %vm513_vm8, %v22003_v16, %v510_v47  ;;  %v519_v5 = vsel %vm513_vm8, %v510_v47, %v15085_v19  ;;  %9582 = vmatprep.subr.bf16.mxu1 %v9581_v25  ;;  %v9331_v0 = vpack.c.bf16 %v763_v56, %v761_v63  ;;  %v3381_v47 = vld [vmem:[%s21714_s9 + $0x720] sm:$0xff]  ;;  %vm4910_vm8 = vcmask 64512  }
 0x3f5   :  { %3048 = vrot.lane.b32.xlu1 %v14805_v53, %s11815_s27  ;;  %v2768_v1 = vpop.permute.xlu1 %2767  ;;  %v531_v46 = vmax.f32 %v496_v58, %v518_v42  ;;  %v532_v18 = vmax.f32 %v497_v30, %v519_v5  ;;  %v766_v53 = vld [vmem:[%s21712_s5 + $0x628] sm:$0xff]  ;;  %v9587_v42 = vpack.c.bf16 %v3378_v28, %v3375_v4  ;;  %v3203_v4 = vld [vmem:[%s21714_s9 + $0x190] sm:$0xff]  ;;  %v9591_v56 = vpack.c.bf16 %v3384_v31, %v3381_v47 }
 0x3f6   :  { %v2821_v16 = vsel %vm2817_vm11, %v14684_v57, %v2768_v1  ;;  %v768_v57 = vld [vmem:[%s21712_s5 + $0x638] sm:$0xff]  ;;  %v3382_v5 = vld [vmem:[%s21714_s9 + $0x728] sm:$0xff] }
 0x3f7   :  { %v15147_v25 = vsel %vm2877_vm0, %v2821_v16, 0.0  ;;  %v15149_v6 = vpop.permute.xlu0 %546  ;;  %9584 = vmatpush1.bf16.msra.mxu1 %v9583_v27  ;;  %v566_v27 = vmax.f32 %v531_v46, %v553_v14  ;;  %v9333_v58 = vpack.c.bf16 %v768_v57, %v766_v53  ;;  %v3206_v28 = vld [vmem:[%s21714_s9 + $0x1a8] sm:$0xff]  ;;  %v9589_v1 = vpack.c.bf16 %v3385_v54, %v3382_v5  ;;  %v3391_v46 = vld [vmem:[%s21714_s9 + $0x770] sm:$0xff]  ;;  %v3212_v54 = vld [vmem:[%s21714_s9 + $0x1d8] sm:$0xff] }
 0x3f8   :  { %v554_v17 = vsel %vm548_vm9, %v545_v51, %v15149_v6  ;;  %2918 = vrot.lane.b32.xlu0 %v15147_v25, %s11814_s20  ;;  %9586 = vmatprep.subr.bf16.mxu1 %v9585_v33  ;;  %v765_v33 = vld [vmem:[%s21712_s5 + $0x620] sm:$0xff]  ;;  %v22005_v16 = vmax.f32 %v21954_v24, 0.0  ;;  %v9705_v57 = vpack.c.bf16 %v3206_v28, %v3203_v4  ;;  %v3155_v24 = vld [vmem:[%s21714_s9 + $0x10] sm:$0xff]  ;;  %v3218_v4 = vld [vmem:[%s21714_s9 + $0x208] sm:$0xff]  ;;  %vm4925_vm9 = vcmask 424960  }
 0x3f9   :  { %v567_v32 = vmax.f32 %v532_v18, %v554_v17  ;;  %3054 = vrot.lane.b32.xlu1 %v14844_v45, %s11815_s27  ;;  %v2774_v59 = vpop.permute.xlu1 %2773  ;;  %v767_v45 = vld [vmem:[%s21712_s5 + $0x630] sm:$0xff] }
 0x3fa   :  { %v2823_v51 = vsel %vm2817_vm11, %v14719_v41, %v2774_v59  ;;  %v3388_v41 = vld [vmem:[%s21714_s9 + $0x758] sm:$0xff]  ;;  %v463_v63 = vmax.f32 %v22005_v16, %v15036_v8  ;;  %v9335_v53 = vpack.c.bf16 %v767_v45, %v765_v33  ;;  %v3158_v8 = vld [vmem:[%s21714_s9 + $0x28] sm:$0xff] }
 0x3fb   :  { %v15193_v30 = vsel %vm2877_vm0, %v2823_v51, 0.0  ;;  %990 = vmatprep.mubr.f32.mxu0 %v567_v32  ;;  %9588 = vmatpush1.bf16.msra.mxu1 %v9587_v42  ;;  %v3387_v32 = vld [vmem:[%s21714_s9 + $0x750] sm:$0xff]  ;;  %v3390_v59 = vld [vmem:[%s21714_s9 + $0x768] sm:$0xff] }
 0x3fc   :  { %991 = vmatmul.mubr.f32.vlgmr.msra.gmra.mrb[6].mxu0 %v566_v27  ;;  %2924 = vrot.lane.b32.xlu0 %v15193_v30, %s11814_s20  ;;  %v498_v42 = vmax.f32 %v463_v63, %v15066_v34  ;;  %v3164_v27 = vld [vmem:[%s21714_s9 + $0x58] sm:$0xff]  ;;  %v9595_v28 = vpack.c.bf16 %v3390_v59, %v3387_v32  ;;  %v3393_v63 = vld [vmem:[%s21714_s9 + $0x780] sm:$0xff] }
 0x3fd   :  { %9332 = vmatpush1.bf16.msra.mxu0 %v9331_v0  ;;  %3060 = vrot.lane.b32.xlu1 %v14877_v2, %s11815_s27  ;;  %v2780_v18 = vpop.permute.xlu1 %2779  ;;  %v9593_v2 = vpack.c.bf16 %v3391_v46, %v3388_v41  ;;  %v3397_v41 = vld [vmem:[%s21714_s9 + $0x7a0] sm:$0xff] }
 0x3fe   :  { %v2825_v17 = vsel %vm2817_vm11, %v14761_v48, %v2780_v18  ;;  %9334 = vmatprep.subr.bf16.mxu0 %v9333_v58  ;;  %1061 = vmatprep.mubr.f32.mxu0 %v21905_v49  ;;  %v533_v34 = vmax.f32 %v498_v42, %v15085_v19  ;;  %v3209_v48 = vld [vmem:[%s21714_s9 + $0x1c0] sm:$0xff]  ;;  %v9707_v19 = vpack.c.bf16 %v3158_v8, %v3155_v24  ;;  %v3215_v58 = vld [vmem:[%s21714_s9 + $0x1f0] sm:$0xff] }
 0x3ff   :  { %v15219_v5 = vsel %vm2877_vm0, %v2825_v17, 0.0  ;;  %9590 = vmatprep.subr.bf16.mxu1 %v9589_v1  ;;  %v3394_v1 = vld [vmem:[%s21714_s9 + $0x788] sm:$0xff]  ;;  %v3167_v42 = vld [vmem:[%s21714_s9 + $0x70] sm:$0xff]  ;;  %v9713_v8 = vpack.c.bf16 %v3218_v4, %v3215_v58  ;;  %v3173_v58 = vld [vmem:[%s21714_s9 + $0xa0] sm:$0xff] }
 0x400   :  { %2930 = vrot.lane.b32.xlu0 %v15219_v5, %s11814_s20  ;;  %9592 = vmatpush1.bf16.msra.mxu1 %v9591_v56  ;;  %v568_v0 = vmax.f32 %v533_v34, %v15149_v6  ;;  %v9709_v6 = vpack.c.bf16 %v3212_v54, %v3209_v48  ;;  %v3396_v56 = vld [vmem:[%s21714_s9 + $0x798] sm:$0xff]  ;;  %v3170_v17 = vld [vmem:[%s21714_s9 + $0x88] sm:$0xff] }
 0x401   :  { %9336 = vmatpush1.bf16.msra.mxu0 %v9335_v53  ;;  %v15230_v23 = vpop.permute.xlu0 %11715  ;;  %3066 = vrot.lane.b32.xlu1 %v14909_v22, %s11815_s27  ;;  %v2786_v14 = vpop.permute.xlu1 %2785  ;;  %v3161_v22 = vld [vmem:[%s21714_s9 + $0x40] sm:$0xff]  ;;  %v3224_v48 = vld [vmem:[%s21714_s9 + $0x238] sm:$0xff]  ;;  %v9599_v54 = vpack.c.bf16 %v3396_v56, %v3393_v63  ;;  %v3406_v56 = vld [vmem:[%s21714_s9 + $0x7e8] sm:$0xff] }
 0x402   :  { %v21826_v33 = vunpack.i.h.bf16 %v15230_v23  ;;  %v11717_v47 = vunpack.i.l.bf16 %v15230_v23  ;;  %v2827_v31 = vsel %vm2817_vm11, %v14797_v26, %v2786_v14  ;;  %9706 = vmatprep.subr.bf16.mxu0 %v9705_v57  ;;  %9594 = vmatprep.subr.bf16.mxu1 %v9593_v2  ;;  %v9711_v16 = vpack.c.bf16 %v3164_v27, %v3161_v22  ;;  %v3400_v14 = vld [vmem:[%s21714_s9 + $0x7b8] sm:$0xff] }
 0x403   :  { %v15252_v51 = vsel %vm2877_vm0, %v2827_v31, 0.0  ;;  %v3402_v31 = vld [vmem:[%s21714_s9 + $0x7c8] sm:$0xff]  ;;  %v3176_v4 = vld [vmem:[%s21714_s9 + $0xb8] sm:$0xff] }
 0x404   :  { %8642 = vmatmul.mubr.msk.f32.vlgmr.msra.gmra.mrb[6].mxu0 %vm420_vm12, %v568_v0  ;;  %2936 = vrot.lane.b32.xlu0 %v15252_v51, %s11814_s20  ;;  %v15263_v26 = vsel %vm2968_vm14, %v11717_v47, %v21826_v33  ;;  %v15267_v45 = vsel %vm2968_vm14, %v15094_v52, %v11717_v47  ;;  %v9715_v0 = vpack.c.bf16 %v3170_v17, %v3167_v42  ;;  %v3399_v47 = vld [vmem:[%s21714_s9 + $0x7b0] sm:$0xff] }
 0x405   :  { %9708 = vmatpush3.bf16.msra.mxu0 %v9707_v19  ;;  %v15278_v46 = vpop.permute.xlu0 %11720  ;;  %3791 = vmatprep.mubr.f32.mxu1 %v15263_v26  ;;  %v2792_v52 = vpop.permute.xlu1 %2791  ;;  %v3403_v19 = vld [vmem:[%s21714_s9 + $0x7d0] sm:$0xff]  ;;  %v9603_v63 = vpack.c.bf16 %v3402_v31, %v3399_v47  ;;  %v9719_v17 = vpack.c.bf16 %v3176_v4, %v3173_v58  ;;  %v3412_v4 = vld [vmem:[%s21714_s9 + $0x818] sm:$0xff] }
 0x406   :  { %v21825_v18 = vunpack.i.h.bf16 %v15278_v46  ;;  %v11722_v53 = vunpack.i.l.bf16 %v15278_v46  ;;  %3072 = vrot.lane.b32.xlu1 %v14947_v37, %s11815_s27  ;;  %v2829_v57 = vsel %vm2817_vm11, %v14839_v10, %v2792_v52  ;;  %3792 = vmatmul.mubr.f32.gmra.mrb[104].mxu1 %v15267_v45  ;;  %v3221_v37 = vld [vmem:[%s21714_s9 + $0x220] sm:$0xff]  ;;  %v9597_v10 = vpack.c.bf16 %v3397_v41, %v3394_v1 }
 0x407   :  { %v15301_v24 = vsel %vm2877_vm0, %v2829_v57, 0.0  ;;  %9710 = vmatprep.subr.bf16.mxu0 %v9709_v6  ;;  %4285 = vmatprep.mubr.f32.mxu0 %v21905_v49  ;;  %v9717_v1 = vpack.c.bf16 %v3224_v48, %v3221_v37  ;;  %v3408_v37 = vld [vmem:[%s21714_s9 + $0x7f8] sm:$0xff] }
 0x408   :  { %2942 = vrot.lane.b32.xlu0 %v15301_v24, %s11814_s20  ;;  %v15312_v2 = vsel %vm2968_vm14, %v11722_v53, %v21825_v18  ;;  %v15316_v34 = vsel %vm2968_vm14, %v15147_v25, %v11722_v53  ;;  %9596 = vmatpush1.bf16.msra.mxu1 %v9595_v28  ;;  %v3409_v53 = vld [vmem:[%s21714_s9 + $0x800] sm:$0xff] }
 0x409   :  { %9712 = vmatpush3.bf16.msra.mxu0 %v9711_v16  ;;  %v15327_v32 = vpop.permute.xlu0 %11725  ;;  %v2798_v59 = vpop.permute.xlu1 %2797  ;;  %3797 = vmatprep.mubr.f32.mxu1 %v15312_v2  ;;  %v3230_v16 = vld [vmem:[%s21714_s9 + $0x268] sm:$0xff]  ;;  %v9605_v47 = vpack.c.bf16 %v3409_v53, %v3406_v56 }
 0x40a   :  { %v21823_v22 = vunpack.i.h.bf16 %v15327_v32  ;;  %v11727_v27 = vunpack.i.l.bf16 %v15327_v32  ;;  %v2831_v6 = vsel %vm2817_vm11, %v14869_v15, %v2798_v59  ;;  %3078 = vrot.lane.b32.xlu1 %v15054_v61, %s11815_s27  ;;  %3798 = vmatmul.mubr.f32.gmra.mrb[106].mxu1 %v15316_v34  ;;  %v3227_v15 = vld [vmem:[%s21714_s9 + $0x250] sm:$0xff]  ;;  %v9601_v61 = vpack.c.bf16 %v3403_v19, %v3400_v14  ;;  %v3182_v19 = vld [vmem:[%s21714_s9 + $0xe8] sm:$0xff] }
 0x40b   :  { %v15350_v28 = vsel %vm2877_vm0, %v2831_v6, 0.0  ;;  %9714 = vmatprep.subr.bf16.mxu0 %v9713_v8  ;;  %9598 = vmatprep.subr.bf16.mxu1 %v9597_v10  ;;  %v3405_v8 = vld [vmem:[%s21714_s9 + $0x7e0] sm:$0xff]  ;;  %v3179_v14 = vld [vmem:[%s21714_s9 + $0xd0] sm:$0xff]  ;;  %v3236_v6 = vld [vmem:[%s21714_s9 + $0x298] sm:$0xff] }
 0x40c   :  { %2948 = vrot.lane.b32.xlu0 %v15350_v28, %s11814_s20  ;;  %v15360_v41 = vsel %vm2968_vm14, %v11727_v27, %v21823_v22  ;;  %v15364_v52 = vsel %vm2968_vm14, %v15193_v30, %v11727_v27  ;;  %9600 = vmatpush1.bf16.msra.mxu1 %v9599_v54  ;;  %v9607_v58 = vpack.c.bf16 %v3408_v37, %v3405_v8  ;;  %v3414_v56 = vld [vmem:[%s21714_s9 + $0x828] sm:$0xff]  ;;  %v3185_v8 = vld [vmem:[%s21714_s9 + $0x100] sm:$0xff]  ;;  %v3188_v37 = vld [vmem:[%s21714_s9 + $0x118] sm:$0xff] }
 0x40d   :  { %9716 = vmatpush3.bf16.msra.mxu0 %v9715_v0  ;;  %v15375_v57 = vpop.permute.xlu0 %11730  ;;  %v2804_v42 = vpop.permute.xlu1 %2803  ;;  %3803 = vmatprep.mubr.f32.mxu1 %v15360_v41  ;;  %v9721_v0 = vpack.c.bf16 %v3230_v16, %v3227_v15  ;;  %v9723_v16 = vpack.c.bf16 %v3182_v19, %v3179_v14 }
 0x40e   :  { %v21822_v10 = vunpack.i.h.bf16 %v15375_v57  ;;  %v11732_v48 = vunpack.i.l.bf16 %v15375_v57  ;;  %v2833_v54 = vsel %vm2817_vm11, %v14905_v35, %v2804_v42  ;;  %3084 = vrot.lane.b32.xlu1 %v21905_v49, %s11815_s27  ;;  %3804 = vmatmul.mubr.f32.gmra.mrb[108].mxu1 %v15364_v52  ;;  %v3233_v35 = vld [vmem:[%s21714_s9 + $0x280] sm:$0xff] }
 0x40f   :  { %v15398_v59 = vsel %vm2877_vm0, %v2833_v54, 0.0  ;;  %9718 = vmatprep.subr.bf16.mxu0 %v9717_v1  ;;  %9602 = vmatprep.subr.bf16.mxu1 %v9601_v61  ;;  %v3415_v1 = vld [vmem:[%s21714_s9 + $0x830] sm:$0xff]  ;;  %v9725_v54 = vpack.c.bf16 %v3236_v6, %v3233_v35  ;;  %v3421_v6 = vld [vmem:[%s21714_s9 + $0x860] sm:$0xff] }
 0x410   :  { %2954 = vrot.lane.b32.xlu0 %v15398_v59, %s11814_s20  ;;  %v15408_v31 = vsel %vm2968_vm14, %v11732_v48, %v21822_v10  ;;  %v15412_v27 = vsel %vm2968_vm14, %v15219_v5, %v11732_v48  ;;  %9604 = vmatpush1.bf16.msra.mxu1 %v9603_v63  ;;  %v3411_v63 = vld [vmem:[%s21714_s9 + $0x810] sm:$0xff] }
 0x411   :  { %9720 = vmatpush3.bf16.msra.mxu0 %v9719_v17  ;;  %v15423_v15 = vpop.permute.xlu0 %11735  ;;  %v2810_v61 = vpop.permute.xlu1 %2809  ;;  %3809 = vmatprep.mubr.f32.mxu1 %v15408_v31  ;;  %v9611_v35 = vpack.c.bf16 %v3414_v56, %v3411_v63 }
 0x412   :  { %v21820_v53 = vunpack.i.h.bf16 %v15423_v15  ;;  %v11737_v42 = vunpack.i.l.bf16 %v15423_v15  ;;  %v2835_v17 = vsel %vm2817_vm11, %v14940_v40, %v2810_v61  ;;  %3034 = vrot.lane.b32.xlu1 %v15147_v25, %s11815_s27  ;;  %3810 = vmatmul.mubr.f32.gmra.mrb[110].mxu1 %v15412_v27  ;;  %v3239_v40 = vld [vmem:[%s21714_s9 + $0x2b0] sm:$0xff]  ;;  %v9609_v25 = vpack.c.bf16 %v3415_v1, %v3412_v4  ;;  %v3417_v61 = vld [vmem:[%s21714_s9 + $0x840] sm:$0xff] }
 0x413   :  { %v15446_v48 = vsel %vm2877_vm0, %v2835_v17, 0.0  ;;  %9722 = vmatprep.subr.bf16.mxu0 %v9721_v0  ;;  %9606 = vmatprep.subr.bf16.mxu1 %v9605_v47  ;;  %v3242_v0 = vld [vmem:[%s21714_s9 + $0x2c8] sm:$0xff]  ;;  %v9727_v1 = vpack.c.bf16 %v3188_v37, %v3185_v8  ;;  %v3245_v8 = vld [vmem:[%s21714_s9 + $0x2e0] sm:$0xff] }
 0x414   :  { %2960 = vrot.lane.b32.xlu0 %v15446_v48, %s11814_s20  ;;  %v15456_v14 = vsel %vm2968_vm14, %v11737_v42, %v21820_v53  ;;  %v15460_v19 = vsel %vm2968_vm14, %v15252_v51, %v11737_v42  ;;  %9608 = vmatpush1.bf16.msra.mxu1 %v9607_v58  ;;  %v3418_v47 = vld [vmem:[%s21714_s9 + $0x848] sm:$0xff]  ;;  %v3420_v58 = vld [vmem:[%s21714_s9 + $0x858] sm:$0xff]  ;;  %v9729_v17 = vpack.c.bf16 %v3242_v0, %v3239_v40  ;;  %v3427_v0 = vld [vmem:[%s21714_s9 + $0x890] sm:$0xff] }
 0x415   :  { %9724 = vmatpush3.bf16.msra.mxu0 %v9723_v16  ;;  %v15471_v4 = vpop.permute.xlu0 %11740  ;;  %3815 = vmatprep.mubr.f32.mxu1 %v15456_v14  ;;  %v3191_v16 = vld [vmem:[%s21714_s9 + $0x130] sm:$0xff]  ;;  %v3194_v42 = vld [vmem:[%s21714_s9 + $0x148] sm:$0xff]  ;;  %v9613_v37 = vpack.c.bf16 %v3421_v6, %v3418_v47  ;;  %v9615_v40 = vpack.c.bf16 %v3420_v58, %v3417_v61 }
 0x416   :  { %v21821_v63 = vunpack.i.h.bf16 %v15471_v4  ;;  %v11742_v56 = vunpack.i.l.bf16 %v15471_v4  ;;  %3040 = vrot.lane.b32.xlu1 %v15193_v30, %s11815_s27  ;;  %3816 = vmatmul.mubr.f32.gmra.mrb[112].mxu1 %v15460_v19  ;;  %v9731_v6 = vpack.c.bf16 %v3194_v42, %v3191_v16  ;;  %v3200_v16 = vld [vmem:[%s21714_s9 + $0x178] sm:$0xff] }
 0x417   :  { %9726 = vmatprep.subr.bf16.mxu0 %v9725_v54  ;;  %9610 = vmatprep.subr.bf16.mxu1 %v9609_v25  ;;  %v3248_v54 = vld [vmem:[%s21714_s9 + $0x2f8] sm:$0xff] }
 0x418   :  { %v15497_v30 = vsel %vm2968_vm14, %v11742_v56, %v21821_v63  ;;  %v15501_v53 = vsel %vm2968_vm14, %v15301_v24, %v11742_v56  ;;  %9612 = vmatpush1.bf16.msra.mxu1 %v9611_v35  ;;  %v3424_v25 = vld [vmem:[%s21714_s9 + $0x878] sm:$0xff]  ;;  %v3423_v56 = vld [vmem:[%s21714_s9 + $0x870] sm:$0xff]  ;;  %v3426_v35 = vld [vmem:[%s21714_s9 + $0x888] sm:$0xff]  ;;  %v9733_v42 = vpack.c.bf16 %v3248_v54, %v3245_v8 }
 0x419   :  { %9728 = vmatpush3.bf16.msra.mxu0 %v9727_v1  ;;  %v15512_v47 = vpop.permute.xlu0 %11745  ;;  %3821 = vmatprep.mubr.f32.mxu1 %v15497_v30  ;;  %v3197_v1 = vld [vmem:[%s21714_s9 + $0x160] sm:$0xff]  ;;  %v3299_v63 = vld [vmem:[%s21714_s9 + $0x490] sm:$0xff]  ;;  %v9617_v10 = vpack.c.bf16 %v3427_v0, %v3424_v25  ;;  %v9619_v8 = vpack.c.bf16 %v3426_v35, %v3423_v56 }
 0x41a   :  { %22006 = vst [vmem:[#allocation48_spill] sm:$0xff] %v15512_v47  ;;  %v21824_v61 = vunpack.i.h.bf16 %v15512_v47  ;;  %v11747_v58 = vunpack.i.l.bf16 %v15512_v47  ;;  %3046 = vrot.lane.b32.xlu1 %v15219_v5, %s11815_s27  ;;  %3822 = vmatmul.mubr.f32.gmra.mrb[114].mxu1 %v15501_v53  ;;  %v3433_v54 = vld [vmem:[%s21714_s9 + $0x8c0] sm:$0xff]  ;;  %v9735_v0 = vpack.c.bf16 %v3200_v16, %v3197_v1  ;;  %v3254_v1 = vld [vmem:[%s21714_s9 + $0x328] sm:$0xff] }
 0x41b   :  { %9730 = vmatprep.subr.bf16.mxu0 %v9729_v17  ;;  %9614 = vmatprep.subr.bf16.mxu1 %v9613_v37  ;;  %v3302_v17 = vld [vmem:[%s21714_s9 + $0x4a8] sm:$0xff] }
 0x41c   :  { %v15538_v5 = vsel %vm2968_vm14, %v11747_v58, %v21824_v61  ;;  %v15542_v22 = vsel %vm2968_vm14, %v15350_v28, %v11747_v58  ;;  %9616 = vmatpush1.bf16.msra.mxu1 %v9615_v40  ;;  %v3430_v37 = vld [vmem:[%s21714_s9 + $0x8a8] sm:$0xff]  ;;  %v3429_v58 = vld [vmem:[%s21714_s9 + $0x8a0] sm:$0xff]  ;;  %v3432_v40 = vld [vmem:[%s21714_s9 + $0x8b8] sm:$0xff]  ;;  %v9737_v16 = vpack.c.bf16 %v3302_v17, %v3299_v63 }
 0x41d   :  { %9732 = vmatpush3.bf16.msra.mxu0 %v9731_v6  ;;  %v15553_v25 = vpop.permute.xlu0 %11750  ;;  %3827 = vmatprep.mubr.f32.mxu1 %v15538_v5  ;;  %v3251_v6 = vld [vmem:[%s21714_s9 + $0x310] sm:$0xff]  ;;  %v3305_v61 = vld [vmem:[%s21714_s9 + $0x4c0] sm:$0xff]  ;;  %v9621_v18 = vpack.c.bf16 %v3433_v54, %v3430_v37  ;;  %v9623_v63 = vpack.c.bf16 %v3432_v40, %v3429_v58  ;;  %v3260_v58 = vld [vmem:[%s21714_s9 + $0x358] sm:$0xff] }
 0x41e   :  { %v11753_v56 = vunpack.i.h.bf16 %v15553_v25  ;;  %v11752_v35 = vunpack.i.l.bf16 %v15553_v25  ;;  %3052 = vrot.lane.b32.xlu1 %v15252_v51, %s11815_s27  ;;  %3828 = vmatmul.mubr.f32.gmra.mrb[116].mxu1 %v15542_v22  ;;  %v3308_v51 = vld [vmem:[%s21714_s9 + $0x4d8] sm:$0xff]  ;;  %v9739_v17 = vpack.c.bf16 %v3254_v1, %v3251_v6  ;;  %v3435_v37 = vld [vmem:[%s21714_s9 + $0x8d0] sm:$0xff]  ;;  %v3442_v6 = vld [vmem:[%s21714_s9 + $0x908] sm:$0xff] }
 0x41f   :  { %9734 = vmatprep.subr.bf16.mxu0 %v9733_v42  ;;  %9618 = vmatprep.subr.bf16.mxu1 %v9617_v10  ;;  %v3436_v42 = vld [vmem:[%s21714_s9 + $0x8d8] sm:$0xff]  ;;  %v3439_v10 = vld [vmem:[%s21714_s9 + $0x8f0] sm:$0xff]  ;;  %v9741_v54 = vpack.c.bf16 %v3308_v51, %v3305_v61  ;;  %v3445_v1 = vld [vmem:[%s21714_s9 + $0x920] sm:$0xff] }
 0x420   :  { %v15582_v33 = vsel %vm2968_vm14, %v11752_v35, %v11753_v56  ;;  %v15586_v47 = vsel %vm2968_vm14, %v15398_v59, %v11752_v35  ;;  %9620 = vmatpush1.bf16.msra.mxu1 %v9619_v8  ;;  %v3438_v8 = vld [vmem:[%s21714_s9 + $0x8e8] sm:$0xff]  ;;  %v3311_v40 = vld [vmem:[%s21714_s9 + $0x4f0] sm:$0xff]  ;;  %v9625_v35 = vpack.c.bf16 %v3439_v10, %v3436_v42  ;;  %v3317_v42 = vld [vmem:[%s21714_s9 + $0x520] sm:$0xff] }
 0x421   :  { %9736 = vmatpush3.bf16.msra.mxu0 %v9735_v0  ;;  %3833 = vmatprep.mubr.f32.mxu1 %v15582_v33  ;;  %v3257_v0 = vld [vmem:[%s21714_s9 + $0x340] sm:$0xff]  ;;  %v9627_v61 = vpack.c.bf16 %v3438_v8, %v3435_v37  ;;  %v3263_v51 = vld [vmem:[%s21714_s9 + $0x370] sm:$0xff]  ;;  %v3272_v8 = vld [vmem:[%s21714_s9 + $0x3b8] sm:$0xff] }
 0x422   :  { %3058 = vrot.lane.b32.xlu1 %v15301_v24, %s11815_s27  ;;  %3834 = vmatmul.mubr.f32.gmra.mrb[118].mxu1 %v15586_v47  ;;  %v3314_v24 = vld [vmem:[%s21714_s9 + $0x508] sm:$0xff]  ;;  %v3269_v37 = vld [vmem:[%s21714_s9 + $0x3a0] sm:$0xff] }
 0x423   :  { %9738 = vmatprep.subr.bf16.mxu0 %v9737_v16  ;;  %9622 = vmatprep.subr.bf16.mxu1 %v9621_v18  ;;  %v9743_v16 = vpack.c.bf16 %v3260_v58, %v3257_v0  ;;  %v9745_v18 = vpack.c.bf16 %v3314_v24, %v3311_v40  ;;  %v3275_v58 = vld [vmem:[%s21714_s9 + $0x3d0] sm:$0xff]  ;;  %v3278_v40 = vld [vmem:[%s21714_s9 + $0x3e8] sm:$0xff]  ;;  %v3332_v24 = vld [vmem:[%s21714_s9 + $0x598] sm:$0xff] }
 0x424   :  { %4286 = vmatmul.mubr.f32.vlgmr.msra.gmra.mrb[8].mxu0 %v21905_v49  ;;  %9624 = vmatpush1.bf16.msra.mxu1 %v9623_v63  ;;  %v3266_v63 = vld [vmem:[%s21714_s9 + $0x388] sm:$0xff]  ;;  %v3473_v25 = vld [vmem:[%s21714_s9 + $0xa00] sm:$0xff] }
 0x425   :  { %4290 = vmatprep.mubr.f32.mxu0 %v14529_v20  ;;  %9740 = vmatpush3.bf16.msra.mxu0 %v9739_v17  ;;  %v3320_v20 = vld [vmem:[%s21714_s9 + $0x538] sm:$0xff]  ;;  %v9747_v10 = vpack.c.bf16 %v3266_v63, %v3263_v51  ;;  %v3287_v63 = vld [vmem:[%s21714_s9 + $0x430] sm:$0xff] }
 0x426   :  { %3064 = vrot.lane.b32.xlu1 %v15350_v28, %s11815_s27  ;;  %9742 = vmatprep.subr.bf16.mxu0 %v9741_v54  ;;  %v9629_v28 = vpack.c.bf16 %v3445_v1, %v3442_v6  ;;  %v9749_v17 = vpack.c.bf16 %v3320_v20, %v3317_v42  ;;  %v3326_v54 = vld [vmem:[%s21714_s9 + $0x568] sm:$0xff]  ;;  %v3281_v6 = vld [vmem:[%s21714_s9 + $0x400] sm:$0xff]  ;;  %v3284_v1 = vld [vmem:[%s21714_s9 + $0x418] sm:$0xff] }
 0x427   :  { %9626 = vmatprep.subr.bf16.mxu1 %v9625_v35  ;;  %v9755_v35 = vpack.c.bf16 %v3278_v40, %v3275_v58  ;;  %v3290_v42 = vld [vmem:[%s21714_s9 + $0x448] sm:$0xff]  ;;  %v3341_v20 = vld [vmem:[%s21714_s9 + $0x5e0] sm:$0xff]  ;;  %v22007_v58 = vld [vmem:[#allocation8_spill] sm:$0xff] }
 0x428   :  { %8724 = vmatmul.mubr.msk.f32.gmra.mrb[10].mxu0 %vm14513_vm13, %v14476_v3  ;;  %9628 = vmatpush1.bf16.msra.mxu1 %v9627_v61  ;;  %v3323_v3 = vld [vmem:[%s21714_s9 + $0x550] sm:$0xff] }
 0x429   :  { %4295 = vmatprep.mubr.f32.mxu0 %v14690_v50  ;;  %9744 = vmatpush3.bf16.msra.mxu0 %v9743_v16  ;;  %v9753_v0 = vpack.c.bf16 %v3326_v54, %v3323_v3  ;;  %v3335_v16 = vld [vmem:[%s21714_s9 + $0x5b0] sm:$0xff] }
 0x42a   :  { %3070 = vrot.lane.b32.xlu1 %v15398_v59, %s11815_s27  ;;  %9746 = vmatprep.subr.bf16.mxu0 %v9745_v18  ;;  %v9751_v59 = vpack.c.bf16 %v3272_v8, %v3269_v37  ;;  %v9759_v18 = vpack.c.bf16 %v3284_v1, %v3281_v6  ;;  %v3296_v37 = vld [vmem:[%s21714_s9 + $0x478] sm:$0xff]  ;;  %v3395_v8 = vld [vmem:[%s21714_s9 + $0x790] sm:$0xff]  ;;  %v22009_v6 = vld [vmem:[#allocation31_spill] sm:$0xff] }
 0x42b   :  { %9630 = vmatprep.subr.bf16.mxu1 %v9629_v28  ;;  %v9763_v28 = vpack.c.bf16 %v3290_v42, %v3287_v63  ;;  %v3413_v63 = vld [vmem:[%s21714_s9 + $0x820] sm:$0xff] }
 0x42c   :  { %8726 = vmatmul.mubr.msk.f32.gmra.mrb[12].mxu0 %vm14513_vm13, %v14665_v55  ;;  %v3329_v55 = vld [vmem:[%s21714_s9 + $0x580] sm:$0xff] }
 0x42d   :  { %4300 = vmatprep.mubr.f32.mxu0 %v14728_v44  ;;  %9748 = vmatpush3.bf16.msra.mxu0 %v9747_v10  ;;  %v9757_v61 = vpack.c.bf16 %v3332_v24, %v3329_v55  ;;  %v3353_v24 = vld [vmem:[%s21714_s9 + $0x640] sm:$0xff] }
 0x42e   :  { %3076 = vrot.lane.b32.xlu1 %v15446_v48, %s11815_s27  ;;  %9750 = vmatprep.subr.bf16.mxu0 %v9749_v17  ;;  %v3293_v17 = vld [vmem:[%s21714_s9 + $0x460] sm:$0xff] }
 0x42f   :  { %v9767_v3 = vpack.c.bf16 %v3296_v37, %v3293_v17  ;;  %v3371_v17 = vld [vmem:[%s21714_s9 + $0x6d0] sm:$0xff]  ;;  %v3441_v1 = vld [vmem:[%s21714_s9 + $0x900] sm:$0xff] }
 0x430   :  { %8728 = vmatmul.mubr.msk.f32.gmra.mrb[14].mxu0 %vm14513_vm13, %v14722_v36  ;;  %v3338_v36 = vld [vmem:[%s21714_s9 + $0x5c8] sm:$0xff] }
 0x431   :  { %4305 = vmatprep.mubr.f32.mxu0 %v14767_v7  ;;  %9752 = vmatpush3.bf16.msra.mxu0 %v9751_v59  ;;  %v9761_v51 = vpack.c.bf16 %v3338_v36, %v3335_v16  ;;  %v3350_v59 = vld [vmem:[%s21714_s9 + $0x628] sm:$0xff] }
 0x432   :  { %9754 = vmatprep.subr.bf16.mxu0 %v9753_v0  ;;  %v3404_v0 = vld [vmem:[%s21714_s9 + $0x7d8] sm:$0xff] }
 0x434   :  { %8730 = vmatmul.mubr.msk.f32.gmra.mrb[16].mxu0 %vm14513_vm13, %v14758_v38  ;;  %v3344_v38 = vld [vmem:[%s21714_s9 + $0x5f8] sm:$0xff] }
 0x435   :  { %4310 = vmatprep.mubr.f32.mxu0 %v14810_v39  ;;  %9756 = vmatpush3.bf16.msra.mxu0 %v9755_v35  ;;  %v9765_v10 = vpack.c.bf16 %v3344_v38, %v3341_v20  ;;  %v3356_v35 = vld [vmem:[%s21714_s9 + $0x658] sm:$0xff]  ;;  %v3365_v38 = vld [vmem:[%s21714_s9 + $0x6a0] sm:$0xff] }
 0x436   :  { %9758 = vmatprep.subr.bf16.mxu0 %v9757_v61  ;;  %v3407_v61 = vld [vmem:[%s21714_s9 + $0x7f0] sm:$0xff]  ;;  %v9775_v16 = vpack.c.bf16 %v3356_v35, %v3353_v24 }
 0x437   :  { %v9777_v36 = vpack.c.bf16 %v3410_v12, %v3407_v61  ;;  %v3383_v35 = vld [vmem:[%s21714_s9 + $0x730] sm:$0xff] }
 0x438   :  { %8732 = vmatmul.mubr.msk.f32.gmra.mrb[18].mxu0 %vm14513_vm13, %v14800_v43  ;;  %v3398_v43 = vld [vmem:[%s21714_s9 + $0x7a8] sm:$0xff] }
 0x439   :  { %4315 = vmatprep.mubr.f32.mxu0 %v14849_v60  ;;  %9760 = vmatpush3.bf16.msra.mxu0 %v9759_v18  ;;  %v9769_v54 = vpack.c.bf16 %v3398_v43, %v3395_v8  ;;  %v3359_v18 = vld [vmem:[%s21714_s9 + $0x670] sm:$0xff]  ;;  %v3425_v43 = vld [vmem:[%s21714_s9 + $0x880] sm:$0xff] }
 0x43a   :  { %9762 = vmatprep.subr.bf16.mxu0 %v9761_v51  ;;  %v3362_v51 = vld [vmem:[%s21714_s9 + $0x688] sm:$0xff] }
 0x43b   :  { %v9779_v42 = vpack.c.bf16 %v3362_v51, %v3359_v18  ;;  %v3451_v51 = vld [vmem:[%s21714_s9 + $0x950] sm:$0xff] }
 0x43c   :  { %8734 = vmatmul.mubr.msk.f32.gmra.mrb[20].mxu0 %vm14513_vm13, %v14836_v11  ;;  %v3347_v11 = vld [vmem:[%s21714_s9 + $0x610] sm:$0xff] }
 0x43d   :  { %4320 = vmatprep.mubr.f32.mxu0 %v14882_v29  ;;  %9764 = vmatpush3.bf16.msra.mxu0 %v9763_v28  ;;  %v9771_v40 = vpack.c.bf16 %v3350_v59, %v3347_v11  ;;  %v3368_v28 = vld [vmem:[%s21714_s9 + $0x6b8] sm:$0xff] }
 0x43e   :  { %9766 = vmatprep.subr.bf16.mxu0 %v9765_v10  ;;  %v9783_v10 = vpack.c.bf16 %v3368_v28, %v3365_v38  ;;  %v3392_v38 = vld [vmem:[%s21714_s9 + $0x778] sm:$0xff]  ;;  %v3447_v28 = vld [vmem:[%s21714_s9 + $0x930] sm:$0xff] }
 0x440   :  { %8736 = vmatmul.mubr.msk.f32.gmra.mrb[22].mxu0 %vm14513_vm13, %v14872_v9  ;;  %v3401_v9 = vld [vmem:[%s21714_s9 + $0x7c0] sm:$0xff] }
 0x441   :  { %4325 = vmatprep.mubr.f32.mxu0 %v14914_v62  ;;  %9768 = vmatpush3.bf16.msra.mxu0 %v9767_v3  ;;  %v9773_v55 = vpack.c.bf16 %v3404_v0, %v3401_v9  ;;  %v22011_v3 = vld [vmem:[#allocation45_spill] sm:$0xff] }
 0x442   :  { %9770 = vmatprep.subr.bf16.mxu0 %v9769_v54 }
 0x444   :  { %8738 = vmatmul.mubr.msk.f32.gmra.mrb[24].mxu0 %vm14513_vm13, %v14902_v21  ;;  %v22008_v21 = vld [vmem:[#allocation46_spill] sm:$0xff] }
 0x445   :  { %4330 = vmatprep.mubr.f32.mxu0 %v14952_v13 }
 0x448   :  { %8740 = vmatmul.mubr.msk.f32.gmra.mrb[26].mxu0 %vm14513_vm13, %v22007_v58 }
 0x449   :  { %4400 = vmatprep.mubr.f32.mxu0 %v22008_v21  ;;  %v3431_v21 = vld [vmem:[%s21714_s9 + $0x8b0] sm:$0xff] }
 0x44c   :  { %8742 = vmatmul.mubr.msk.f32.vlgmr.msra.gmra.mrb[28].mxu0 %vm15019_vm15, %v22009_v6  ;;  %v3386_v6 = vld [vmem:[%s21714_s9 + $0x748] sm:$0xff] }
 0x44d   :  { %4405 = vmatprep.mubr.f32.mxu0 %v15263_v26  ;;  %9772 = vmatpush3.bf16.msra.mxu0 %v9771_v40  ;;  %v3416_v26 = vld [vmem:[%s21714_s9 + $0x838] sm:$0xff] }
 0x44e   :  { %9774 = vmatprep.subr.bf16.mxu0 %v9773_v55  ;;  %v9781_v20 = vpack.c.bf16 %v3416_v26, %v3413_v63  ;;  %v3389_v26 = vld [vmem:[%s21714_s9 + $0x760] sm:$0xff] }
 0x450   :  { %4406 = vmatmul.mubr.f32.gmra.mrb[30].mxu0 %v15267_v45  ;;  %v3419_v45 = vld [vmem:[%s21714_s9 + $0x850] sm:$0xff] }
 0x451   :  { %4410 = vmatprep.mubr.f32.mxu0 %v15312_v2  ;;  %9776 = vmatpush3.bf16.msra.mxu0 %v9775_v16  ;;  %v3422_v2 = vld [vmem:[%s21714_s9 + $0x868] sm:$0xff] }
 0x452   :  { %9778 = vmatprep.subr.bf16.mxu0 %v9777_v36  ;;  %v9785_v8 = vpack.c.bf16 %v3422_v2, %v3419_v45  ;;  %v3440_v36 = vld [vmem:[%s21714_s9 + $0x8f8] sm:$0xff]  ;;  %v3450_v45 = vld [vmem:[%s21714_s9 + $0x948] sm:$0xff] }
 0x453   :  { %v22012_v2 = vld [vmem:[#allocation9_spill] sm:$0xff] }
 0x454   :  { %4411 = vmatmul.mubr.f32.gmra.mrb[32].mxu0 %v15316_v34  ;;  %v3374_v34 = vld [vmem:[%s21714_s9 + $0x6e8] sm:$0xff] }
 0x455   :  { %4415 = vmatprep.mubr.f32.mxu0 %v15360_v41  ;;  %9780 = vmatpush3.bf16.msra.mxu0 %v9779_v42  ;;  %v3428_v41 = vld [vmem:[%s21714_s9 + $0x898] sm:$0xff]  ;;  %v9787_v59 = vpack.c.bf16 %v3374_v34, %v3371_v17  ;;  %v3454_v17 = vld [vmem:[%s21714_s9 + $0x968] sm:$0xff]  ;;  %v9799_v34 = vpack.c.bf16 %v3392_v38, %v3389_v26  ;;  %v3471_v26 = vld [vmem:[%s21714_s9 + $0x9f0] sm:$0xff] }
 0x456   :  { %9782 = vmatprep.subr.bf16.mxu0 %v9781_v20  ;;  %v9789_v9 = vpack.c.bf16 %v3428_v41, %v3425_v43  ;;  %v3491_v41 = vld [vmem:[%s21714_s9 + $0xa90] sm:$0xff] }
 0x457   :  { %v2816_v37 = vpop.permute.xlu1 %2815 }
 0x458   :  { %v2837_v54 = vsel %vm2817_vm11, %v22011_v3, %v2816_v37  ;;  %4416 = vmatmul.mubr.f32.gmra.mrb[34].mxu0 %v15364_v52  ;;  %v3377_v52 = vld [vmem:[%s21714_s9 + $0x700] sm:$0xff]  ;;  %v9635_v37 = vpack.c.bf16 %v3450_v45, %v3447_v28  ;;  %v3494_v3 = vld [vmem:[%s21714_s9 + $0xaa8] sm:$0xff]  ;;  %v3500_v28 = vld [vmem:[%s21714_s9 + $0xad8] sm:$0xff]  ;;  %vm4956_vm11 = vcmask 97280  }
 0x459   :  { %v2887_v11 = vsel %vm2877_vm0, %v2837_v54, 0.0  ;;  %4420 = vmatprep.mubr.f32.mxu0 %v15408_v31  ;;  %9784 = vmatpush3.bf16.msra.mxu0 %v9783_v10  ;;  %v3380_v31 = vld [vmem:[%s21714_s9 + $0x718] sm:$0xff] }
 0x45a   :  { %3082 = vrot.lane.b32.xlu1 %v2887_v11, %s11815_s27  ;;  %2966 = vrot.lane.b32.xlu0 %v2887_v11, %s11814_s20  ;;  %v9791_v24 = vpack.c.bf16 %v3380_v31, %v3377_v52  ;;  %v9801_v31 = vpack.c.bf16 %v3494_v3, %v3491_v41  ;;  %v3452_v41 = vld [vmem:[%s21714_s9 + $0x958] sm:$0xff] }
 0x45b   :  { %v15813_v0 = vpop.permute.xlu1 %3030  ;;  %9786 = vmatprep.subr.bf16.mxu0 %v9785_v8  ;;  %v3457_v8 = vld [vmem:[%s21714_s9 + $0x980] sm:$0xff] }
 0x45c   :  { %4421 = vmatmul.mubr.f32.gmra.mrb[36].mxu0 %v15412_v27  ;;  %v3434_v27 = vld [vmem:[%s21714_s9 + $0x8c8] sm:$0xff]  ;;  %v9637_v11 = vpack.c.bf16 %v3457_v8, %v3454_v17  ;;  %v3477_v8 = vld [vmem:[%s21714_s9 + $0xa20] sm:$0xff] }
 0x45d   :  { %4425 = vmatprep.mubr.f32.mxu0 %v15456_v14  ;;  %v15823_v58 = vpop.permute.xlu0 %11755  ;;  %9788 = vmatpush3.bf16.msra.mxu0 %v9787_v59 }
 0x45e   :  { %v11758_v40 = vunpack.i.h.bf16 %v15823_v58  ;;  %v11757_v55 = vunpack.i.l.bf16 %v15823_v58  ;;  %3032 = vrot.lane.b32.xlu0 %v14690_v50, %s11815_s27  ;;  %9790 = vmatprep.subr.bf16.mxu0 %v9789_v9  ;;  %v9793_v50 = vpack.c.bf16 %v3434_v27, %v3431_v21  ;;  %v22013_v9 = vunpack.i.h.bf16 %v15230_v23  ;;  %v3459_v23 = vld [vmem:[%s21714_s9 + $0x990] sm:$0xff]  ;;  %v3462_v21 = vld [vmem:[%s21714_s9 + $0x9a8] sm:$0xff] }
 0x45f   :  { %v15835_v14 = vpop.permute.xlu1 %3036  ;;  %v3547_v58 = vld [vmem:[%s21714_s9 + $0xc50] sm:$0xff] }
 0x460   :  { %4426 = vmatmul.mubr.f32.gmra.mrb[38].mxu0 %v15460_v19  ;;  %v2987_v61 = vsel %vm2968_vm14, %v11757_v55, %v11758_v40  ;;  %v15846_v12 = vsel %vm2968_vm14, %v15446_v48, %v11757_v55  ;;  %v3444_v19 = vld [vmem:[%s21714_s9 + $0x918] sm:$0xff]  ;;  %v3437_v48 = vld [vmem:[%s21714_s9 + $0x8e0] sm:$0xff] }
 0x461   :  { %4430 = vmatprep.mubr.f32.mxu0 %v15497_v30  ;;  %v2913_v16 = vpop.permute.xlu0 %2912  ;;  %3839 = vmatprep.mubr.f32.mxu1 %v2987_v61  ;;  %v3448_v30 = vld [vmem:[%s21714_s9 + $0x938] sm:$0xff]  ;;  %v9631_v42 = vpack.c.bf16 %v3444_v19, %v3441_v1  ;;  %v9797_v20 = vpack.c.bf16 %v3440_v36, %v3437_v48  ;;  %v3465_v1 = vld [vmem:[%s21714_s9 + $0x9c0] sm:$0xff]  ;;  %v3443_v19 = vld [vmem:[%s21714_s9 + $0x910] sm:$0xff] }
 0x462   :  { %3038 = vrot.lane.b32.xlu0 %v14728_v44, %s11815_s27  ;;  %3840 = vmatmul.mubr.f32.gmra.mrb[120].mxu1 %v15846_v12  ;;  %v15869_v18 = vsel %vm3086_vm1, %v2913_v16, %v15813_v0  ;;  %v9795_v44 = vpack.c.bf16 %v3386_v6, %v3383_v35  ;;  %v15895_v10 = vsel %vm2968_vm14, %v22012_v2, %v2913_v16  ;;  %v22014_v35 = vunpack.i.h.bf16 %v15278_v46  ;;  %v3466_v6 = vld [vmem:[%s21714_s9 + $0x9c8] sm:$0xff]  ;;  %v3468_v46 = vld [vmem:[%s21714_s9 + $0x9d8] sm:$0xff] }
 0x463   :  { %v15877_v63 = vpop.permute.xlu1 %3042  ;;  %3910 = vmatprep.mubr.f32.mxu1 %v15869_v18  ;;  %9792 = vmatpush3.bf16.msra.mxu0 %v9791_v24  ;;  %v3446_v16 = vld [vmem:[%s21714_s9 + $0x928] sm:$0xff]  ;;  %v3472_v36 = vld [vmem:[%s21714_s9 + $0x9f8] sm:$0xff] }
 0x464   :  { %4431 = vmatmul.mubr.f32.gmra.mrb[40].mxu0 %v15501_v53  ;;  %9794 = vmatprep.subr.bf16.mxu0 %v9793_v50  ;;  %v9633_v53 = vpack.c.bf16 %v3451_v51, %v3448_v30  ;;  %v22015_v51 = vunpack.i.h.bf16 %v15327_v32  ;;  %v3497_v32 = vld [vmem:[%s21714_s9 + $0xac0] sm:$0xff] }
 0x465   :  { %4435 = vmatprep.mubr.f32.mxu0 %v15538_v5  ;;  %v3453_v5 = vld [vmem:[%s21714_s9 + $0x960] sm:$0xff] }
 0x466   :  { %3044 = vrot.lane.b32.xlu0 %v14767_v7, %s11815_s27  ;;  %3911 = vmatmul.mubr.f32.vlgmr.msra.gmra.mrb[102].mxu1 %v15895_v10  ;;  %v3456_v7 = vld [vmem:[%s21714_s9 + $0x978] sm:$0xff] }
 0x467   :  { %9796 = vmatpush3.bf16.msra.mxu0 %v9795_v44  ;;  %9632 = vmatpush1.bf16.msra.mxu1 %v9631_v42  ;;  %v15913_v43 = vpop.permute.xlu1 %3048  ;;  %v9639_v59 = vpack.c.bf16 %v3456_v7, %v3453_v5  ;;  %v3474_v42 = vld [vmem:[%s21714_s9 + $0xa08] sm:$0xff]  ;;  %v3480_v5 = vld [vmem:[%s21714_s9 + $0xa38] sm:$0xff]  ;;  %v9805_v7 = vpack.c.bf16 %v3500_v28, %v3497_v32  ;;  %v3499_v32 = vld [vmem:[%s21714_s9 + $0xad0] sm:$0xff] }
 0x468   :  { %4436 = vmatmul.mubr.f32.gmra.mrb[42].mxu0 %v15542_v22  ;;  %9798 = vmatprep.subr.bf16.mxu0 %v9797_v20  ;;  %v9803_v20 = vpack.c.bf16 %v3446_v16, %v3443_v19  ;;  %v22019_v16 = vunpack.i.h.bf16 %v15471_v4  ;;  %v3461_v4 = vld [vmem:[%s21714_s9 + $0x9a0] sm:$0xff]  ;;  %v3495_v28 = vld [vmem:[%s21714_s9 + $0xab0] sm:$0xff] }
 0x469   :  { %4440 = vmatprep.mubr.f32.mxu0 %v15582_v33  ;;  %9634 = vmatprep.subr.bf16.mxu1 %v9633_v53  ;;  %v3460_v33 = vld [vmem:[%s21714_s9 + $0x998] sm:$0xff]  ;;  %v9651_v53 = vpack.c.bf16 %v3474_v42, %v3471_v26 }
 0x46a   :  { %3050 = vrot.lane.b32.xlu0 %v14810_v39, %s11815_s27  ;;  %v2919_v54 = vpop.permute.xlu0 %2918  ;;  %v3463_v39 = vld [vmem:[%s21714_s9 + $0x9b0] sm:$0xff] }
 0x46b   :  { %v3144_v22 = vsel %vm3086_vm1, %v2919_v54, %v15835_v14  ;;  %v15930_v52 = vsel %vm2968_vm14, %v22013_v9, %v2919_v54  ;;  %9800 = vmatpush3.bf16.msra.mxu0 %v9799_v34  ;;  %9636 = vmatpush1.bf16.msra.mxu1 %v9635_v37  ;;  %v15946_v27 = vpop.permute.xlu1 %3054  ;;  %v22016_v34 = vunpack.i.h.bf16 %v15375_v57  ;;  %v3449_v57 = vld [vmem:[%s21714_s9 + $0x940] sm:$0xff]  ;;  %v3487_v9 = vld [vmem:[%s21714_s9 + $0xa70] sm:$0xff] }
 0x46c   :  { %4441 = vmatmul.mubr.f32.gmra.mrb[44].mxu0 %v15586_v47  ;;  %3916 = vmatprep.mubr.f32.mxu1 %v3144_v22  ;;  %v9641_v47 = vpack.c.bf16 %v3463_v39, %v3460_v33 }
 0x46d   :  { %4445 = vmatprep.mubr.f32.mxu0 %v2987_v61  ;;  %3917 = vmatmul.mubr.f32.gmra.mrb[104].mxu1 %v15930_v52  ;;  %v9643_v61 = vpack.c.bf16 %v3462_v21, %v3459_v23  ;;  %v9807_v23 = vpack.c.bf16 %v3452_v41, %v3449_v57  ;;  %v3503_v21 = vld [vmem:[%s21714_s9 + $0xaf0] sm:$0xff]  ;;  %v3470_v57 = vld [vmem:[%s21714_s9 + $0x9e8] sm:$0xff] }
 0x46e   :  { %3056 = vrot.lane.b32.xlu0 %v14849_v60, %s11815_s27  ;;  %v2925_v55 = vpop.permute.xlu0 %2924  ;;  %9638 = vmatprep.subr.bf16.mxu1 %v9637_v11  ;;  %v3469_v60 = vld [vmem:[%s21714_s9 + $0x9e0] sm:$0xff]  ;;  %v3502_v41 = vld [vmem:[%s21714_s9 + $0xae8] sm:$0xff] }
 0x46f   :  { %v3145_v24 = vsel %vm3086_vm1, %v2925_v55, %v15877_v63  ;;  %v15955_v50 = vsel %vm2968_vm14, %v22014_v35, %v2925_v55  ;;  %9640 = vmatpush1.bf16.msra.mxu1 %v9639_v59  ;;  %9802 = vmatprep.subr.bf16.mxu0 %v9801_v31  ;;  %v9645_v48 = vpack.c.bf16 %v3469_v60, %v3466_v6  ;;  %v15999_v38 = vpop.permute.xlu1 %3060  ;;  %v3486_v31 = vld [vmem:[%s21714_s9 + $0xa68] sm:$0xff]  ;;  %v3493_v60 = vld [vmem:[%s21714_s9 + $0xaa0] sm:$0xff] }
 0x470   :  { %4446 = vmatmul.mubr.f32.gmra.mrb[46].mxu0 %v15846_v12  ;;  %3922 = vmatprep.mubr.f32.mxu1 %v3145_v24  ;;  %v9655_v59 = vpack.c.bf16 %v3480_v5, %v3477_v8  ;;  %v3506_v55 = vld [vmem:[%s21714_s9 + $0xb08] sm:$0xff]  ;;  %v3515_v8 = vld [vmem:[%s21714_s9 + $0xb50] sm:$0xff] }
 0x471   :  { %4515 = vmatprep.mubr.f32.mxu0 %v15869_v18  ;;  %3923 = vmatmul.mubr.f32.gmra.mrb[106].mxu1 %v15955_v50  ;;  %v9647_v18 = vpack.c.bf16 %v3468_v46, %v3465_v1  ;;  %v3489_v1 = vld [vmem:[%s21714_s9 + $0xa80] sm:$0xff]  ;;  %v9809_v46 = vpack.c.bf16 %v3506_v55, %v3503_v21  ;;  %v3518_v5 = vld [vmem:[%s21714_s9 + $0xb68] sm:$0xff] }
 0x472   :  { %3062 = vrot.lane.b32.xlu0 %v14882_v29, %s11815_s27  ;;  %v2931_v12 = vpop.permute.xlu0 %2930  ;;  %9642 = vmatprep.subr.bf16.mxu1 %v9641_v47  ;;  %v3475_v29 = vld [vmem:[%s21714_s9 + $0xa10] sm:$0xff]  ;;  %v3458_v47 = vld [vmem:[%s21714_s9 + $0x988] sm:$0xff] }
 0x473   :  { %v3146_v30 = vsel %vm3086_vm1, %v2931_v12, %v15913_v43  ;;  %v15988_v44 = vsel %vm2968_vm14, %v22015_v51, %v2931_v12  ;;  %9644 = vmatpush1.bf16.msra.mxu1 %v9643_v61  ;;  %v9649_v2 = vpack.c.bf16 %v3475_v29, %v3472_v36  ;;  %v16038_v3 = vpop.permute.xlu1 %3066  ;;  %v3512_v51 = vld [vmem:[%s21714_s9 + $0xb38] sm:$0xff] }
 0x474   :  { %4516 = vmatmul.mubr.f32.vlgmr.msra.gmra.mrb[48].mxu0 %v15895_v10  ;;  %3928 = vmatprep.mubr.f32.mxu1 %v3146_v30  ;;  %v3478_v10 = vld [vmem:[%s21714_s9 + $0xa28] sm:$0xff]  ;;  %v3464_v29 = vld [vmem:[%s21714_s9 + $0x9b8] sm:$0xff] }
 0x475   :  { %4520 = vmatprep.mubr.f32.mxu0 %v3144_v22  ;;  %3929 = vmatmul.mubr.f32.gmra.mrb[108].mxu1 %v15988_v44  ;;  %v3484_v22 = vld [vmem:[%s21714_s9 + $0xa58] sm:$0xff] }
 0x476   :  { %3068 = vrot.lane.b32.xlu0 %v14914_v62, %s11815_s27  ;;  %v2937_v45 = vpop.permute.xlu0 %2936  ;;  %9646 = vmatprep.subr.bf16.mxu1 %v9645_v48  ;;  %v3481_v62 = vld [vmem:[%s21714_s9 + $0xa40] sm:$0xff]  ;;  %v9657_v61 = vpack.c.bf16 %v3487_v9, %v3484_v22  ;;  %v3492_v48 = vld [vmem:[%s21714_s9 + $0xa98] sm:$0xff]  ;;  %v9817_v9 = vpack.c.bf16 %v3518_v5, %v3515_v8  ;;  %v3519_v8 = vld [vmem:[%s21714_s9 + $0xb70] sm:$0xff] }
 0x477   :  { %v3147_v17 = vsel %vm3086_vm1, %v2937_v45, %v15946_v27  ;;  %v16019_v37 = vsel %vm2968_vm14, %v22016_v34, %v2937_v45  ;;  %9648 = vmatpush1.bf16.msra.mxu1 %v9647_v18  ;;  %9804 = vmatpush3.bf16.msra.mxu0 %v9803_v20  ;;  %v9653_v11 = vpack.c.bf16 %v3481_v62, %v3478_v10  ;;  %v3498_v34 = vld [vmem:[%s21714_s9 + $0xac8] sm:$0xff] }
 0x478   :  { %4521 = vmatmul.mubr.f32.gmra.mrb[50].mxu0 %v15930_v52  ;;  %3934 = vmatprep.mubr.f32.mxu1 %v3147_v17  ;;  %v3483_v52 = vld [vmem:[%s21714_s9 + $0xa50] sm:$0xff]  ;;  %v16102_v18 = vpop.permute.xlu1 %3072  ;;  %v9663_v20 = vpack.c.bf16 %v3492_v48, %v3489_v1  ;;  %v9815_v62 = vpack.c.bf16 %v3464_v29, %v3461_v4  ;;  %v9667_v22 = vpack.c.bf16 %v3498_v34, %v3495_v28  ;;  %v3514_v48 = vld [vmem:[%s21714_s9 + $0xb48] sm:$0xff]  ;;  %v3513_v29 = vld [vmem:[%s21714_s9 + $0xb40] sm:$0xff] }
 0x479   :  { %4525 = vmatprep.mubr.f32.mxu0 %v3145_v24  ;;  %3935 = vmatmul.mubr.f32.gmra.mrb[110].mxu1 %v16019_v37  ;;  %v22018_v24 = vld [vmem:[#allocation10_spill] sm:$0xff]  ;;  %v9659_v6 = vpack.c.bf16 %v3486_v31, %v3483_v52  ;;  %v3488_v28 = vld [vmem:[%s21714_s9 + $0xa78] sm:$0xff]  ;;  %v3522_v5 = vld [vmem:[%s21714_s9 + $0xb88] sm:$0xff] }
 0x47a   :  { %3074 = vrot.lane.b32.xlu0 %v14952_v13, %s11815_s27  ;;  %v2943_v54 = vpop.permute.xlu0 %2942  ;;  %9650 = vmatprep.subr.bf16.mxu1 %v9649_v2  ;;  %v22017_v13 = vunpack.i.h.bf16 %v15423_v15  ;;  %v3455_v15 = vld [vmem:[%s21714_s9 + $0x970] sm:$0xff]  ;;  %v3521_v52 = vld [vmem:[%s21714_s9 + $0xb80] sm:$0xff] }
 0x47b   :  { %v3148_v33 = vsel %vm3086_vm1, %v2943_v54, %v15999_v38  ;;  %9652 = vmatpush1.bf16.msra.mxu1 %v9651_v53  ;;  %9806 = vmatprep.subr.bf16.mxu0 %v9805_v7  ;;  %v9811_v36 = vpack.c.bf16 %v3458_v47, %v3455_v15  ;;  %v22020_v53 = vld [vmem:[#allocation48_spill] sm:$0xff]  ;;  %v3504_v15 = vld [vmem:[%s21714_s9 + $0xaf8] sm:$0xff] }
 0x47c   :  { %v16056_v39 = vsel %vm2968_vm14, %v22017_v13, %v2943_v54  ;;  %4526 = vmatmul.mubr.f32.gmra.mrb[52].mxu0 %v15955_v50  ;;  %3940 = vmatprep.mubr.f32.mxu1 %v3148_v33  ;;  %v3490_v50 = vld [vmem:[%s21714_s9 + $0xa88] sm:$0xff]  ;;  %v22021_v10 = vunpack.i.h.bf16 %v22020_v53  ;;  %v3467_v7 = vld [vmem:[%s21714_s9 + $0x9d0] sm:$0xff]  ;;  %v16151_v54 = vpop.permute.xlu1 %3078 }
 0x47d   :  { %4530 = vmatprep.mubr.f32.mxu0 %v3146_v30  ;;  %3941 = vmatmul.mubr.f32.gmra.mrb[112].mxu1 %v16056_v39  ;;  %v3509_v30 = vld [vmem:[%s21714_s9 + $0xb20] sm:$0xff]  ;;  %v9661_v42 = vpack.c.bf16 %v3493_v60, %v3490_v50  ;;  %v9819_v21 = vpack.c.bf16 %v3470_v57, %v3467_v7  ;;  %v3511_v47 = vld [vmem:[%s21714_s9 + $0xb30] sm:$0xff]  ;;  %v3526_v57 = vld [vmem:[%s21714_s9 + $0xba8] sm:$0xff] }
 0x47e   :  { %3080 = vrot.lane.b32.xlu0 %v22018_v24, %s11815_s27  ;;  %v2949_v35 = vpop.permute.xlu0 %2948  ;;  %9654 = vmatprep.subr.bf16.mxu1 %v9653_v11  ;;  %v9813_v45 = vpack.c.bf16 %v3512_v51, %v3509_v30  ;;  %v3507_v50 = vld [vmem:[%s21714_s9 + $0xb10] sm:$0xff]  ;;  %v3533_v30 = vld [vmem:[%s21714_s9 + $0xbe0] sm:$0xff]  ;;  %v3536_v51 = vld [vmem:[%s21714_s9 + $0xbf8] sm:$0xff] }
 0x47f   :  { %v3149_v19 = vsel %vm3086_vm1, %v2949_v35, %v16038_v3  ;;  %v16091_v12 = vsel %vm2968_vm14, %v22019_v16, %v2949_v35  ;;  %9656 = vmatpush1.bf16.msra.mxu1 %v9655_v59  ;;  %9808 = vmatpush3.bf16.msra.mxu0 %v9807_v23  ;;  %v3501_v23 = vld [vmem:[%s21714_s9 + $0xae0] sm:$0xff]  ;;  %v3527_v35 = vld [vmem:[%s21714_s9 + $0xbb0] sm:$0xff]  ;;  %v3482_v16 = vld [vmem:[%s21714_s9 + $0xa48] sm:$0xff] }
 0x480   :  { %4531 = vmatmul.mubr.f32.gmra.mrb[54].mxu0 %v15988_v44  ;;  %3946 = vmatprep.mubr.f32.mxu1 %v3149_v19  ;;  %v3496_v44 = vld [vmem:[%s21714_s9 + $0xab8] sm:$0xff]  ;;  %v3539_v53 = vld [vmem:[%s21714_s9 + $0xc10] sm:$0xff] }
 0x481   :  { %4535 = vmatprep.mubr.f32.mxu0 %v3147_v17  ;;  %3947 = vmatmul.mubr.f32.gmra.mrb[114].mxu1 %v16091_v12  ;;  %v9665_v59 = vpack.c.bf16 %v3499_v32, %v3496_v44  ;;  %v3520_v44 = vld [vmem:[%s21714_s9 + $0xb78] sm:$0xff]  ;;  %v3485_v32 = vld [vmem:[%s21714_s9 + $0xa60] sm:$0xff] }
 0x482   :  { %v2955_v26 = vpop.permute.xlu0 %2954  ;;  %9658 = vmatprep.subr.bf16.mxu1 %v9657_v61  ;;  %9810 = vmatprep.subr.bf16.mxu0 %v9809_v46  ;;  %v3530_v61 = vld [vmem:[%s21714_s9 + $0xbc8] sm:$0xff]  ;;  %v9831_v34 = vpack.c.bf16 %v3488_v28, %v3485_v32 }
 0x483   :  { %v3150_v2 = vsel %vm3086_vm1, %v2955_v26, %v16102_v18  ;;  %v16126_v17 = vsel %vm2968_vm14, %v22021_v10, %v2955_v26  ;;  %9660 = vmatpush1.bf16.msra.mxu1 %v9659_v6  ;;  %9812 = vmatpush3.bf16.msra.mxu0 %v9811_v36  ;;  %v9671_v6 = vpack.c.bf16 %v3504_v15, %v3501_v23  ;;  %v3510_v46 = vld [vmem:[%s21714_s9 + $0xb28] sm:$0xff]  ;;  %v3516_v26 = vld [vmem:[%s21714_s9 + $0xb58] sm:$0xff] }
 0x484   :  { %4536 = vmatmul.mubr.f32.gmra.mrb[56].mxu0 %v16019_v37  ;;  %3952 = vmatprep.mubr.f32.mxu1 %v3150_v2  ;;  %v3505_v37 = vld [vmem:[%s21714_s9 + $0xb00] sm:$0xff]  ;;  %v9825_v36 = vpack.c.bf16 %v3530_v61, %v3527_v35  ;;  %v9675_v4 = vpack.c.bf16 %v3510_v46, %v3507_v50  ;;  %v3542_v10 = vld [vmem:[%s21714_s9 + $0xc28] sm:$0xff]  ;;  %v3540_v50 = vld [vmem:[%s21714_s9 + $0xc18] sm:$0xff] }
 0x485   :  { %4540 = vmatprep.mubr.f32.mxu0 %v3148_v33  ;;  %3953 = vmatmul.mubr.f32.gmra.mrb[116].mxu1 %v16126_v17  ;;  %v3524_v33 = vld [vmem:[%s21714_s9 + $0xb98] sm:$0xff]  ;;  %v9669_v55 = vpack.c.bf16 %v3505_v37, %v3502_v41  ;;  %v16245_v7 = vpack.c.bf16 %v3542_v10, %v3539_v53  ;;  %v3529_v41 = vld [vmem:[%s21714_s9 + $0xbc0] sm:$0xff]  ;;  %v9683_v37 = vpack.c.bf16 %v3522_v5, %v3519_v8  ;;  %v3534_v23 = vld [vmem:[%s21714_s9 + $0xbe8] sm:$0xff] }
 0x486   :  { %v2961_v11 = vpop.permute.xlu0 %2960  ;;  %9662 = vmatprep.subr.bf16.mxu1 %v9661_v42  ;;  %9814 = vmatprep.subr.bf16.mxu0 %v9813_v45  ;;  %v9821_v24 = vpack.c.bf16 %v3524_v33, %v3521_v52  ;;  %v3523_v45 = vld [vmem:[%s21714_s9 + $0xb90] sm:$0xff]  ;;  %v3548_v46 = vld [vmem:[%s21714_s9 + $0xc58] sm:$0xff]  ;;  %v3549_v53 = vld [vmem:[%s21714_s9 + $0xc60] sm:$0xff] }
 0x487   :  { %v3151_v13 = vsel %vm3086_vm1, %v2961_v11, %v16151_v54  ;;  %v2986_v31 = vsel %vm2968_vm14, %v11753_v56, %v2961_v11  ;;  %9664 = vmatpush1.bf16.msra.mxu1 %v9663_v20  ;;  %9816 = vmatpush3.bf16.msra.mxu0 %v9815_v62  ;;  %v3476_v56 = vld [vmem:[%s21714_s9 + $0xa18] sm:$0xff]  ;;  %v9681_v62 = vpack.c.bf16 %v3523_v45, %v3520_v44  ;;  %v3535_v52 = vld [vmem:[%s21714_s9 + $0xbf0] sm:$0xff] }
 0x488   :  { %4541 = vmatmul.mubr.f32.gmra.mrb[58].mxu0 %v16056_v39  ;;  %3958 = vmatprep.mubr.f32.mxu1 %v3151_v13  ;;  %v3508_v39 = vld [vmem:[%s21714_s9 + $0xb18] sm:$0xff]  ;;  %v9823_v60 = vpack.c.bf16 %v3476_v56, %v3473_v25  ;;  %v9685_v11 = vpack.c.bf16 %v3529_v41, %v3526_v57  ;;  %v16278_v56 = vpop.permute.xlu1 %3084 }
 0x489   :  { %4545 = vmatprep.mubr.f32.mxu0 %v3149_v19  ;;  %3959 = vmatmul.mubr.f32.gmra.mrb[118].mxu1 %v2986_v31  ;;  %v9673_v1 = vpack.c.bf16 %v3511_v47, %v3508_v39  ;;  %v3479_v19 = vld [vmem:[%s21714_s9 + $0xa30] sm:$0xff]  ;;  %v3552_v10 = vld [vmem:[%s21714_s9 + $0xc78] sm:$0xff] }
 0x48a   :  { %9666 = vmatprep.subr.bf16.mxu1 %v9665_v59  ;;  %9818 = vmatprep.subr.bf16.mxu0 %v9817_v9  ;;  %v9827_v42 = vpack.c.bf16 %v3482_v16, %v3479_v19  ;;  %v3525_v59 = vld [vmem:[%s21714_s9 + $0xba0] sm:$0xff]  ;;  %v3532_v9 = vld [vmem:[%s21714_s9 + $0xbd8] sm:$0xff]  ;;  %v9703_v8 = vpack.c.bf16 %v3552_v10, %v3549_v53 }
 0x48b   :  { %9668 = vmatpush1.bf16.msra.mxu1 %v9667_v22  ;;  %9820 = vmatpush3.bf16.msra.mxu0 %v9819_v21  ;;  %v3528_v22 = vld [vmem:[%s21714_s9 + $0xbb8] sm:$0xff]  ;;  %v3538_v21 = vld [vmem:[%s21714_s9 + $0xc08] sm:$0xff]  ;;  %v5062_v53 = vld [vmem:[%s21715_s12 + $0x60] sm:$0xff] }
 0x48c   :  { %4546 = vmatmul.mubr.f32.gmra.mrb[60].mxu0 %v16091_v12  ;;  %9670 = vmatprep.subr.bf16.mxu1 %v9669_v55  ;;  %v3517_v12 = vld [vmem:[%s21714_s9 + $0xb60] sm:$0xff]  ;;  %v9687_v33 = vpack.c.bf16 %v3528_v22, %v3525_v59  ;;  %v16280_v39 = vpop.permute.xlu1 %3034  ;;  %v3556_v41 = vld [vmem:[%s21714_s9 + $0xc98] sm:$0xff]  ;;  %v3555_v22 = vld [vmem:[%s21714_s9 + $0xc90] sm:$0xff] }
 0x48d   :  { %4550 = vmatprep.mubr.f32.mxu0 %v3150_v2  ;;  %9822 = vmatprep.subr.bf16.mxu0 %v9821_v24  ;;  %v9677_v20 = vpack.c.bf16 %v3517_v12, %v3514_v48  ;;  %v9829_v2 = vpack.c.bf16 %v3536_v51, %v3533_v30  ;;  %v3541_v55 = vld [vmem:[%s21714_s9 + $0xc20] sm:$0xff]  ;;  %v3543_v48 = vld [vmem:[%s21714_s9 + $0xc30] sm:$0xff]  ;;  %v3546_v51 = vld [vmem:[%s21714_s9 + $0xc48] sm:$0xff] }
 0x48e   :  { %v9693_v25 = vpack.c.bf16 %v3541_v55, %v3538_v21  ;;  %v9699_v32 = vpack.c.bf16 %v3546_v51, %v3543_v48  ;;  %v5050_v48 = vld [vmem:[%s21715_s12] sm:$0xff] }
 0x48f   :  { %9672 = vmatpush1.bf16.msra.mxu1 %v9671_v6  ;;  %9824 = vmatpush3.bf16.msra.mxu0 %v9823_v60  ;;  %v3537_v6 = vld [vmem:[%s21714_s9 + $0xc00] sm:$0xff]  ;;  %v3544_v60 = vld [vmem:[%s21714_s9 + $0xc38] sm:$0xff] }
 0x490   :  { %4551 = vmatmul.mubr.f32.gmra.mrb[62].mxu0 %v16126_v17  ;;  %9674 = vmatprep.subr.bf16.mxu1 %v9673_v1  ;;  %v9679_v17 = vpack.c.bf16 %v3516_v26, %v3513_v29  ;;  %v16282_v47 = vpop.permute.xlu1 %3040  ;;  %v9695_v16 = vpack.c.bf16 %v3540_v50, %v3537_v6  ;;  %v9697_v30 = vpack.c.bf16 %v3547_v58, %v3544_v60  ;;  %v3553_v29 = vld [vmem:[%s21714_s9 + $0xc80] sm:$0xff]  ;;  %v5057_v60 = vld [vmem:[%s21715_s12 + $0x38] sm:$0xff] }
 0x491   :  { %4555 = vmatprep.mubr.f32.mxu0 %v3151_v13  ;;  %9826 = vmatprep.subr.bf16.mxu0 %v9825_v36  ;;  %v9689_v13 = vpack.c.bf16 %v3535_v52, %v3532_v9 }
 0x493   :  { %9676 = vmatpush1.bf16.msra.mxu1 %v9675_v4  ;;  %9828 = vmatpush3.bf16.msra.mxu0 %v9827_v42  ;;  %v3550_v4 = vld [vmem:[%s21714_s9 + $0xc68] sm:$0xff] }
 0x494   :  { %4556 = vmatmul.mubr.f32.gmra.mrb[64].mxu0 %v2986_v31  ;;  %9678 = vmatprep.subr.bf16.mxu1 %v9677_v20  ;;  %v3531_v31 = vld [vmem:[%s21714_s9 + $0xbd0] sm:$0xff]  ;;  %v16298_v1 = vpop.permute.xlu1 %3046  ;;  %v3554_v42 = vld [vmem:[%s21714_s9 + $0xc88] sm:$0xff]  ;;  %v9701_v28 = vpack.c.bf16 %v3553_v29, %v3550_v4  ;;  %v5061_v29 = vld [vmem:[%s21715_s12 + $0x58] sm:$0xff] }
 0x495   :  { %9830 = vmatprep.subr.bf16.mxu0 %v9829_v2  ;;  %v9691_v15 = vpack.c.bf16 %v3534_v23, %v3531_v31  ;;  %v5063_v4 = vld [vmem:[%s21715_s12 + $0x68] sm:$0xff] }
 0x497   :  { %9680 = vmatpush1.bf16.msra.mxu1 %v9679_v17  ;;  %9832 = vmatpush3.bf16.msra.mxu0 %v9831_v34 }
 0x498   :  { %9682 = vmatprep.subr.bf16.mxu1 %v9681_v62  ;;  %9834 = vmatprep.subr.bf16.mxu0 %v16245_v7  ;;  %v16331_v20 = vpop.permute.xlu1 %3052 }
 0x49b   :  { %9684 = vmatpush1.bf16.msra.mxu1 %v9683_v37  ;;  %v3557_v37 = vld [vmem:[%s21714_s9 + $0xca0] sm:$0xff] }
 0x49c   :  { %9686 = vmatprep.subr.bf16.mxu1 %v9685_v11  ;;  %v16352_v57 = vpop.permute.xlu1 %3058 }
 0x49f   :  { %9688 = vmatpush1.bf16.msra.mxu1 %v9687_v33 }
 0x4a0   :  { %9690 = vmatprep.subr.bf16.mxu1 %v9689_v13  ;;  %v16367_v9 = vpop.permute.xlu1 %3064 }
 0x4a3   :  { %9692 = vmatpush1.bf16.msra.mxu1 %v9691_v15 }
 0x4a4   :  { %9694 = vmatprep.subr.bf16.mxu1 %v9693_v25  ;;  %v16377_v21 = vpop.permute.xlu1 %3070 }
 0x4a8   :  { %v16383_v25 = vpop.permute.xlu1 %3076 }
 0x4cc   :  { %v2967_v24 = vpop.permute.xlu0 %2966 }
 0x4cd   :  { %v3152_v35 = vsel %vm3086_vm1, %v2967_v24, %v16278_v56  ;;  %v2988_v61 = vsel %vm2968_vm14, %v11758_v40, %v2967_v24  ;;  %v3545_v40 = vld [vmem:[%s21714_s9 + $0xc40] sm:$0xff]  ;;  %v5051_v24 = vld [vmem:[%s21715_s12 + $0x8] sm:$0xff] }
 0x4ce   :  { %3964 = vmatprep.mubr.f32.mxu1 %v3152_v35  ;;  %4560 = vmatprep.mubr.f32.mxu0 %v3152_v35  ;;  %v9837_v26 = vpack.c.bf16 %v3548_v46, %v3545_v40  ;;  %v5055_v35 = vld [vmem:[%s21715_s12 + $0x28] sm:$0xff]  ;;  %v16401_v40 = vpop.permute.xlu1 %3082 }
 0x4cf   :  { %3965 = vmatmul.mubr.f32.gmra.mrb[120].mxu1 %v2988_v61  ;;  %4561 = vmatmul.mubr.f32.gmra.mrb[66].mxu0 %v2988_v61  ;;  %v5053_v61 = vld [vmem:[%s21715_s12 + $0x18] sm:$0xff]  ;;  %v9845_v50 = vpack.c.bf16 %v5055_v35, %v5051_v24 }
 0x4d0   :  { %v3033_v19 = vpop.permute.xlu0 %3032  ;;  %v10593_v58 = vpack.c.bf16 %v5057_v60, %v5053_v61  ;;  %v5077_v24 = vld [vmem:[%s21715_s12 + $0xd8] sm:$0xff] }
 0x4d1   :  { %v3087_v12 = vsel %vm3086_vm1, %v15813_v0, %v3033_v19  ;;  %v3088_v36 = vsel %vm3086_vm1, %v3033_v19, %v16280_v39  ;;  %v3551_v0 = vld [vmem:[%s21714_s9 + $0xc70] sm:$0xff]  ;;  %v5081_v35 = vld [vmem:[%s21715_s12 + $0xf8] sm:$0xff]  ;;  %s11817_s9 = smov 4  }
 0x4d2   :  { %4035 = vmatprep.mubr.f32.mxu1 %v3088_v36  ;;  %4630 = vmatprep.mubr.f32.mxu0 %v3088_v36  ;;  %v9841_v17 = vpack.c.bf16 %v3554_v42, %v3551_v0  ;;  %v5056_v36 = vld [vmem:[%s21715_s12 + $0x30] sm:$0xff]  ;;  %v22022_v42 = vld [vmem:[#allocation5_spill] sm:$0xff]  ;;  %v10605_v60 = vpack.c.bf16 %v5081_v35, %v5077_v24 }
 0x4d3   :  { %4036 = vmatmul.mubr.f32.vlgmr.msra.gmra.mrb[102].mxu1 %v3087_v12  ;;  %4631 = vmatmul.mubr.f32.vlgmr.msra.gmra.mrb[68].mxu0 %v3087_v12  ;;  %v5052_v12 = vld [vmem:[%s21715_s12 + $0x10] sm:$0xff]  ;;  %v5093_v24 = vld [vmem:[%s21715_s12 + $0x158] sm:$0xff] }
 0x4d4   :  { %9696 = vmatpush1.bf16.msra.mxu1 %v9695_v16  ;;  %v3039_v44 = vpop.permute.xlu0 %3038  ;;  %9836 = vmatpush3.bf16.msra.mxu0 %v16245_v7  ;;  %v16412_v16 = vld [vmem:[%s21716_s10] sm:$0x7] }
 0x4d5   :  { %v3090_v45 = vsel %vm3086_vm1, %v3039_v44, %v16282_v47  ;;  %v3089_v2 = vsel %vm3086_vm1, %v15835_v14, %v3039_v44  ;;  %9698 = vmatprep.subr.bf16.mxu1 %v9697_v30  ;;  %9838 = vmatprep.subr.bf16.mxu0 %v9837_v26  ;;  %v5059_v30 = vld [vmem:[%s21715_s12 + $0x48] sm:$0xff]  ;;  %v16445_v44 = vrot.slane %v16412_v16, %v22022_v42 }
 0x4d6   :  { %4041 = vmatprep.mubr.f32.mxu1 %v3090_v45  ;;  %4635 = vmatprep.mubr.f32.mxu0 %v3090_v45  ;;  %v10595_v45 = vpack.c.bf16 %v5056_v36, %v5052_v12  ;;  %v9849_v10 = vpack.c.bf16 %v5063_v4, %v5059_v30 }
 0x4d7   :  { %v16344_v34 = vpop.f32.mrb[6].mxu0  ;;  %4042 = vmatmul.mubr.f32.gmra.mrb[104].mxu1 %v3089_v2  ;;  %4636 = vmatmul.mubr.f32.gmra.mrb[70].mxu0 %v3089_v2  ;;  %v5058_v2 = vld [vmem:[%s21715_s12 + $0x40] sm:$0xff] }
 0x4d8   :  { %v16346_v62 = vpop.f32.mrb[7].mxu0  ;;  %v3045_v14 = vpop.permute.xlu0 %3044  ;;  %9700 = vmatpush1.bf16.msra.mxu1 %v9699_v32  ;;  %9840 = vmatpush3.bf16.msra.mxu0 %v9837_v26  ;;  %v5065_v26 = vld [vmem:[%s21715_s12 + $0x78] sm:$0xff] }
 0x4d9   :  { %v3092_v5 = vsel %vm3086_vm1, %v3045_v14, %v16298_v1  ;;  %v3091_v7 = vsel %vm3086_vm1, %v15877_v63, %v3045_v14  ;;  %9702 = vmatprep.subr.bf16.mxu1 %v9701_v28  ;;  %9842 = vmatprep.subr.bf16.mxu0 %v9841_v17  ;;  %v5060_v14 = vld [vmem:[%s21715_s12 + $0x50] sm:$0xff] }
 0x4da   :  { %4047 = vmatprep.mubr.f32.mxu1 %v3092_v5  ;;  %4640 = vmatprep.mubr.f32.mxu0 %v3092_v5  ;;  %v5067_v5 = vld [vmem:[%s21715_s12 + $0x88] sm:$0xff] }
 0x4db   :  { %4048 = vmatmul.mubr.f32.gmra.mrb[106].mxu1 %v3091_v7  ;;  %4641 = vmatmul.mubr.f32.gmra.mrb[72].mxu0 %v3091_v7 }
 0x4dc   :  { %v3051_v11 = vpop.permute.xlu0 %3050  ;;  %9704 = vmatpush1.bf16.msra.mxu1 %v9703_v8  ;;  %9844 = vmatpush3.bf16.msra.mxu0 %v9841_v17  ;;  %v10597_v17 = vpack.c.bf16 %v5065_v26, %v5061_v29  ;;  %v5064_v8 = vld [vmem:[%s21715_s12 + $0x70] sm:$0xff] }
 0x4dd   :  { %v3094_v63 = vsel %vm3086_vm1, %v3051_v11, %v16331_v20  ;;  %v3093_v59 = vsel %vm3086_vm1, %v15913_v43, %v3051_v11  ;;  %4108 = vmatprep.subr.mxu1 %v3556_v41  ;;  %9090 = vmatprep.subr.mxu0 %v3557_v37  ;;  %v5069_v11 = vld [vmem:[%s21715_s12 + $0x98] sm:$0xff] }
 0x4de   :  { %4053 = vmatprep.mubr.f32.mxu1 %v3094_v63  ;;  %4645 = vmatprep.mubr.f32.mxu0 %v3094_v63  ;;  %v5073_v63 = vld [vmem:[%s21715_s12 + $0xb8] sm:$0xff] }
 0x4df   :  { %4054 = vmatmul.mubr.f32.gmra.mrb[108].mxu1 %v3093_v59  ;;  %4646 = vmatmul.mubr.f32.gmra.mrb[74].mxu0 %v3093_v59 }
 0x4e0   :  { %v3057_v52 = vpop.permute.xlu0 %3056  ;;  %4109 = vmatpush1.msra.mxu1 %v3555_v22  ;;  %9091 = vmatpush3.msra.mxu0 %v3557_v37  ;;  %v5071_v37 = vld [vmem:[%s21715_s12 + $0xa8] sm:$0xff]  ;;  %v9851_v22 = vpack.c.bf16 %v5062_v53, %v5058_v2  ;;  %v5078_v53 = vld [vmem:[%s21715_s12 + $0xe0] sm:$0xff] }
 0x4e1   :  { %v3096_v33 = vsel %vm3086_vm1, %v3057_v52, %v16352_v57  ;;  %v3095_v43 = vsel %vm3086_vm1, %v15946_v27, %v3057_v52  ;;  %9846 = vmatprep.subr.bf16.mxu0 %v9845_v50  ;;  %10594 = vmatprep.subr.bf16.mxu1 %v10593_v58  ;;  %v10599_v52 = vpack.c.bf16 %v5064_v8, %v5060_v14 }
 0x4e2   :  { %4059 = vmatprep.mubr.f32.mxu1 %v3096_v33  ;;  %4650 = vmatprep.mubr.f32.mxu0 %v3096_v33  ;;  %v5066_v33 = vld [vmem:[%s21715_s12 + $0x80] sm:$0xff] }
 0x4e3   :  { %4060 = vmatmul.mubr.f32.gmra.mrb[110].mxu1 %v3095_v43  ;;  %4651 = vmatmul.mubr.f32.gmra.mrb[76].mxu0 %v3095_v43  ;;  %v5070_v43 = vld [vmem:[%s21715_s12 + $0xa0] sm:$0xff] }
 0x4e4   :  { %v3063_v13 = vpop.permute.xlu0 %3062 }
 0x4e5   :  { %v3098_v31 = vsel %vm3086_vm1, %v3063_v13, %v16367_v9  ;;  %v3097_v23 = vsel %vm3086_vm1, %v15999_v38, %v3063_v13  ;;  %v9853_v13 = vpack.c.bf16 %v5071_v37, %v5067_v5  ;;  %v5083_v5 = vld [vmem:[%s21715_s12 + $0x108] sm:$0xff]  ;;  %v5085_v37 = vld [vmem:[%s21715_s12 + $0x118] sm:$0xff] }
 0x4e6   :  { %4065 = vmatprep.mubr.f32.mxu1 %v3098_v31  ;;  %4655 = vmatprep.mubr.f32.mxu0 %v3098_v31  ;;  %v10601_v31 = vpack.c.bf16 %v5073_v63, %v5069_v11 }
 0x4e7   :  { %4066 = vmatmul.mubr.f32.gmra.mrb[112].mxu1 %v3097_v23  ;;  %4656 = vmatmul.mubr.f32.gmra.mrb[78].mxu0 %v3097_v23  ;;  %v5068_v23 = vld [vmem:[%s21715_s12 + $0x90] sm:$0xff] }
 0x4e8   :  { %v3069_v55 = vpop.permute.xlu0 %3068 }
 0x4e9   :  { %v3100_v27 = vsel %vm3086_vm1, %v3069_v55, %v16377_v21  ;;  %v3099_v15 = vsel %vm3086_vm1, %v16038_v3, %v3069_v55  ;;  %v5072_v55 = vld [vmem:[%s21715_s12 + $0xb0] sm:$0xff] }
 0x4ea   :  { %4071 = vmatprep.mubr.f32.mxu1 %v3100_v27  ;;  %4660 = vmatprep.mubr.f32.mxu0 %v3100_v27  ;;  %v5075_v27 = vld [vmem:[%s21715_s12 + $0xc8] sm:$0xff] }
 0x4eb   :  { %4072 = vmatmul.mubr.f32.gmra.mrb[114].mxu1 %v3099_v15  ;;  %4661 = vmatmul.mubr.f32.gmra.mrb[80].mxu0 %v3099_v15 }
 0x4ec   :  { %v3075_v38 = vpop.permute.xlu0 %3074 }
 0x4ed   :  { %v3102_v3 = vsel %vm3086_vm1, %v3075_v38, %v16383_v25  ;;  %v3101_v6 = vsel %vm3086_vm1, %v16102_v18, %v3075_v38  ;;  %v5079_v38 = vld [vmem:[%s21715_s12 + $0xe8] sm:$0xff] }
 0x4ee   :  { %4077 = vmatprep.mubr.f32.mxu1 %v3102_v3  ;;  %4665 = vmatprep.mubr.f32.mxu0 %v3102_v3  ;;  %v9855_v3 = vpack.c.bf16 %v5070_v43, %v5066_v33  ;;  %v9857_v50 = vpack.c.bf16 %v5079_v38, %v5075_v27  ;;  %v5095_v38 = vld [vmem:[%s21715_s12 + $0x168] sm:$0xff] }
 0x4ef   :  { %4078 = vmatmul.mubr.f32.gmra.mrb[116].mxu1 %v3101_v6  ;;  %4666 = vmatmul.mubr.f32.gmra.mrb[82].mxu0 %v3101_v6  ;;  %v10603_v6 = vpack.c.bf16 %v5072_v55, %v5068_v23  ;;  %v5088_v23 = vld [vmem:[%s21715_s12 + $0x130] sm:$0xff] }
 0x4f0   :  { %v3081_v46 = vpop.permute.xlu0 %3080 }
 0x4f1   :  { %v3104_v19 = vsel %vm3086_vm1, %v3081_v46, %v16401_v40  ;;  %v3103_v18 = vsel %vm3086_vm1, %v16151_v54, %v3081_v46  ;;  %v5054_v54 = vld [vmem:[%s21715_s12 + $0x20] sm:$0xff] }
 0x4f2   :  { %4083 = vmatprep.mubr.f32.mxu1 %v3104_v19  ;;  %4670 = vmatprep.mubr.f32.mxu0 %v3104_v19  ;;  %v9847_v28 = vpack.c.bf16 %v5054_v54, %v5050_v48 }
 0x4f3   :  { %4084 = vmatmul.mubr.f32.gmra.mrb[118].mxu1 %v3103_v18  ;;  %4671 = vmatmul.mubr.f32.gmra.mrb[84].mxu0 %v3103_v18 }
 0x4f4   :  { %4089 = vmatprep.mubr.f32.mxu1 %v16278_v56  ;;  %4675 = vmatprep.mubr.f32.mxu0 %v16278_v56 }
 0x4f7   :  { %4090 = vmatmul.mubr.f32.gmra.mrb[120].mxu1 %v16278_v56  ;;  %4676 = vmatmul.mubr.f32.gmra.mrb[86].mxu0 %v16278_v56  ;;  %v8797_v51 = vpop.f32.mrb[8].mxu0 }
 0x4f8   :  { %9092 = vmatprep.mubr.msk.f32.mxu0 %vm3575_vm2, %v16280_v39  ;;  %v8798_v0 = vpop.f32.mrb[9].mxu0  ;;  %4160 = vmatprep.mubr.f32.mxu1 %v21905_v49 }
 0x4f9   :  { %v8799_v32 = vadd.f32 %v8798_v0, %v8797_v51 }
 0x4fb   :  { %v16463_v7 = vadd.f32 %v8799_v32, %v16445_v44  ;;  %v8800_v41 = vpop.f32.mrb[10].mxu0  ;;  %8713 = vmatmul.mubr.msk.f32.vlgmr.msra.gmra.mrb[102].mxu1 %vm3575_vm2, %v16280_v39  ;;  %9093 = vmatmul.mubr.msk.f32.vlgmr.msra.gmra.mrb[88].mxu0 %vm3575_vm2, %v16282_v47 }
 0x4fc   :  { %v8801_v59 = vpop.f32.mrb[11].mxu0  ;;  %9095 = vmatprep.mubr.msk.f32.mxu0 %vm3575_vm2, %v16298_v1  ;;  %4166 = vmatprep.mubr.f32.mxu1 %v21905_v49 }
 0x4fd   :  { %v16481_v39 = vadd.f32 %v8801_v59, %v8800_v41  ;;  %9848 = vmatpush1.bf16.msra.mxu0 %v9847_v28  ;;  %10596 = vmatpush1.bf16.msra.mxu1 %v10595_v45  ;;  %v5087_v41 = vld [vmem:[%s21715_s12 + $0x128] sm:$0xff]  ;;  %v5082_v59 = vld [vmem:[%s21715_s12 + $0x100] sm:$0xff] }
 0x4fe   :  { %9850 = vmatprep.subr.bf16.mxu0 %v9849_v10  ;;  %10598 = vmatprep.subr.bf16.mxu1 %v10597_v17  ;;  %v5080_v17 = vld [vmem:[%s21715_s12 + $0xf0] sm:$0xff]  ;;  %v9861_v63 = vpack.c.bf16 %v5087_v41, %v5083_v5  ;;  %v5111_v5 = vld [vmem:[%s21715_s12 + $0x1e8] sm:$0xff]  ;;  %v5109_v41 = vld [vmem:[%s21715_s12 + $0x1d8] sm:$0xff] }
 0x4ff   :  { %v8803_v15 = vpop.f32.mrb[12].mxu0  ;;  %8714 = vmatmul.mubr.msk.f32.gmra.mrb[104].mxu1 %vm3575_vm2, %v16282_v47  ;;  %9096 = vmatmul.mubr.msk.f32.gmra.mrb[90].mxu0 %vm3575_vm2, %v16331_v20 }
 0x500   :  { %v8804_v61 = vpop.f32.mrb[13].mxu0  ;;  %9098 = vmatprep.mubr.msk.f32.mxu0 %vm3575_vm2, %v16352_v57  ;;  %4172 = vmatprep.mubr.f32.mxu1 %v21905_v49 }
 0x501   :  { %v16514_v47 = vadd.f32 %v8804_v61, %v8803_v15  ;;  %9852 = vmatpush1.bf16.msra.mxu0 %v9851_v22  ;;  %10600 = vmatpush1.bf16.msra.mxu1 %v10599_v52  ;;  %v5086_v22 = vld [vmem:[%s21715_s12 + $0x120] sm:$0xff]  ;;  %v4293_v52 = vadd.f32 %v16481_v39, %v16445_v44  ;;  %v5091_v39 = vld [vmem:[%s21715_s12 + $0x148] sm:$0xff] }
 0x502   :  { %9854 = vmatprep.subr.bf16.mxu0 %v9853_v13  ;;  %10602 = vmatprep.subr.bf16.mxu1 %v10601_v31  ;;  %v9863_v13 = vpack.c.bf16 %v5086_v22, %v5082_v59  ;;  %v5084_v31 = vld [vmem:[%s21715_s12 + $0x110] sm:$0xff]  ;;  %v9865_v61 = vpack.c.bf16 %v5095_v38, %v5091_v39  ;;  %v5110_v59 = vld [vmem:[%s21715_s12 + $0x1e0] sm:$0xff]  ;;  %v5119_v39 = vld [vmem:[%s21715_s12 + $0x228] sm:$0xff] }
 0x503   :  { %v8806_v58 = vpop.f32.mrb[14].mxu0  ;;  %8715 = vmatmul.mubr.msk.f32.gmra.mrb[106].mxu1 %vm3575_vm2, %v16298_v1  ;;  %9099 = vmatmul.mubr.msk.f32.gmra.mrb[92].mxu0 %vm3575_vm2, %v16367_v9  ;;  %v10611_v55 = vpack.c.bf16 %v5088_v23, %v5084_v31  ;;  %v5112_v31 = vld [vmem:[%s21715_s12 + $0x1f0] sm:$0xff]  ;;  %v5117_v38 = vld [vmem:[%s21715_s12 + $0x218] sm:$0xff] }
 0x504   :  { %v8807_v46 = vpop.f32.mrb[15].mxu0  ;;  %9101 = vmatprep.mubr.msk.f32.mxu0 %vm3575_vm2, %v16377_v21  ;;  %4178 = vmatprep.mubr.f32.mxu1 %v21905_v49 }
 0x505   :  { %v16523_v19 = vadd.f32 %v8807_v46, %v8806_v58  ;;  %9856 = vmatpush1.bf16.msra.mxu0 %v9855_v3  ;;  %10604 = vmatpush1.bf16.msra.mxu1 %v10603_v6  ;;  %v5097_v3 = vld [vmem:[%s21715_s12 + $0x178] sm:$0xff]  ;;  %v5090_v6 = vld [vmem:[%s21715_s12 + $0x140] sm:$0xff] }
 0x506   :  { %9858 = vmatprep.subr.bf16.mxu0 %v9857_v50  ;;  %10606 = vmatprep.subr.bf16.mxu1 %v10605_v60  ;;  %v5094_v50 = vld [vmem:[%s21715_s12 + $0x160] sm:$0xff]  ;;  %v4298_v60 = vadd.f32 %v16514_v47, %v16445_v44  ;;  %v10613_v46 = vpack.c.bf16 %v5097_v3, %v5093_v24  ;;  %v5099_v47 = vld [vmem:[%s21715_s12 + $0x188] sm:$0xff] }
 0x507   :  { %v8809_v18 = vpop.f32.mrb[16].mxu0  ;;  %8716 = vmatmul.mubr.msk.f32.gmra.mrb[108].mxu1 %vm3575_vm2, %v16331_v20  ;;  %9102 = vmatmul.mubr.msk.f32.gmra.mrb[94].mxu0 %vm3575_vm2, %v16383_v25  ;;  %v5114_v3 = vld [vmem:[%s21715_s12 + $0x200] sm:$0xff] }
 0x508   :  { %v8810_v1 = vpop.f32.mrb[17].mxu0  ;;  %9104 = vmatprep.mubr.msk.f32.mxu0 %vm3575_vm2, %v16401_v40  ;;  %4184 = vmatprep.mubr.f32.mxu1 %v21905_v49 }
 0x509   :  { %v16532_v48 = vadd.f32 %v8810_v1, %v8809_v18  ;;  %v9867_v18 = vpack.c.bf16 %v5094_v50, %v5090_v6  ;;  %v5092_v1 = vld [vmem:[%s21715_s12 + $0x150] sm:$0xff]  ;;  %v5118_v6 = vld [vmem:[%s21715_s12 + $0x220] sm:$0xff] }
 0x50b   :  { %v8812_v54 = vpop.f32.mrb[18].mxu0  ;;  %8717 = vmatmul.mubr.msk.f32.gmra.mrb[110].mxu1 %vm3575_vm2, %v16352_v57  ;;  %9105 = vmatmul.mubr.msk.f32.gmra.mrb[96].mxu0 %vm3575_vm2, %v16278_v56  ;;  %v4308_v22 = vadd.f32 %v16532_v48, %v16445_v44  ;;  %v5115_v48 = vld [vmem:[%s21715_s12 + $0x208] sm:$0xff] }
 0x50c   :  { %v8813_v12 = vpop.f32.mrb[19].mxu0  ;;  %4190 = vmatprep.mubr.f32.mxu1 %v21905_v49 }
 0x50d   :  { %v16539_v20 = vadd.f32 %v8813_v12, %v8812_v54  ;;  %v5096_v54 = vld [vmem:[%s21715_s12 + $0x170] sm:$0xff] }
 0x50e   :  { %v10615_v12 = vpack.c.bf16 %v5096_v54, %v5092_v1  ;;  %v5120_v1 = vld [vmem:[%s21715_s12 + $0x230] sm:$0xff] }
 0x50f   :  { %v8815_v36 = vpop.f32.mrb[20].mxu0  ;;  %8718 = vmatmul.mubr.msk.f32.gmra.mrb[112].mxu1 %vm3575_vm2, %v16367_v9  ;;  %v4313_v50 = vadd.f32 %v16539_v20, %v16445_v44  ;;  %v5123_v20 = vld [vmem:[%s21715_s12 + $0x248] sm:$0xff] }
 0x510   :  { %v8816_v30 = vpop.f32.mrb[21].mxu0  ;;  %4196 = vmatprep.mubr.f32.mxu1 %v21905_v49 }
 0x511   :  { %v16544_v51 = vadd.f32 %v8816_v30, %v8815_v36 }
 0x513   :  { %v8818_v4 = vpop.f32.mrb[22].mxu0  ;;  %8719 = vmatmul.mubr.msk.f32.gmra.mrb[114].mxu1 %vm3575_vm2, %v16377_v21 }
 0x514   :  { %v8819_v57 = vpop.f32.mrb[23].mxu0  ;;  %4202 = vmatprep.mubr.f32.mxu1 %v21905_v49 }
 0x515   :  { %v16549_v29 = vadd.f32 %v8819_v57, %v8818_v4  ;;  %v5103_v4 = vld [vmem:[%s21715_s12 + $0x1a8] sm:$0xff]  ;;  %v5101_v57 = vld [vmem:[%s21715_s12 + $0x198] sm:$0xff] }
 0x517   :  { %v8821_v26 = vpop.f32.mrb[24].mxu0  ;;  %8720 = vmatmul.mubr.msk.f32.gmra.mrb[116].mxu1 %vm3575_vm2, %v16383_v25  ;;  %v5074_v25 = vld [vmem:[%s21715_s12 + $0xc0] sm:$0xff] }
 0x518   :  { %v8822_v0 = vpop.f32.mrb[25].mxu0  ;;  %4208 = vmatprep.mubr.f32.mxu1 %v21905_v49  ;;  %v9859_v10 = vpack.c.bf16 %v5078_v53, %v5074_v25 }
 0x519   :  { %v16554_v9 = vadd.f32 %v8822_v0, %v8821_v26  ;;  %v9869_v0 = vpack.c.bf16 %v5103_v4, %v5099_v47  ;;  %v5127_v47 = vld [vmem:[%s21715_s12 + $0x268] sm:$0xff]  ;;  %v5125_v4 = vld [vmem:[%s21715_s12 + $0x258] sm:$0xff] }
 0x51a   :  { %9860 = vmatpush1.bf16.msra.mxu0 %v9859_v10  ;;  %v5104_v10 = vld [vmem:[%s21715_s12 + $0x1b0] sm:$0xff] }
 0x51b   :  { %v8824_v32 = vpop.f32.mrb[26].mxu0  ;;  %8721 = vmatmul.mubr.msk.f32.gmra.mrb[118].mxu1 %vm3575_vm2, %v16401_v40  ;;  %v5076_v40 = vld [vmem:[%s21715_s12 + $0xd0] sm:$0xff]  ;;  %9862 = vmatprep.subr.bf16.mxu0 %v9861_v63  ;;  %v5113_v63 = vld [vmem:[%s21715_s12 + $0x1f8] sm:$0xff] }
 0x51c   :  { %v8825_v28 = vpop.f32.mrb[27].mxu0  ;;  %4214 = vmatprep.mubr.f32.mxu1 %v21905_v49 }
 0x51d   :  { %v16559_v21 = vadd.f32 %v8825_v28, %v8824_v32  ;;  %v5105_v32 = vld [vmem:[%s21715_s12 + $0x1b8] sm:$0xff]  ;;  %v5098_v28 = vld [vmem:[%s21715_s12 + $0x180] sm:$0xff] }
 0x51e   :  { %9864 = vmatpush1.bf16.msra.mxu0 %v9863_v13  ;;  %v10617_v53 = vpack.c.bf16 %v5105_v32, %v5101_v57  ;;  %v5108_v13 = vld [vmem:[%s21715_s12 + $0x1d0] sm:$0xff]  ;;  %v5122_v32 = vld [vmem:[%s21715_s12 + $0x240] sm:$0xff] }
 0x51f   :  { %v8859_v45 = vpop.f32.mrb[28].mxu0  ;;  %8722 = vmatmul.mubr.msk.f32.gmra.mrb[120].mxu1 %vm3575_vm2, %v16278_v56  ;;  %v10607_v56 = vpack.c.bf16 %v5080_v17, %v5076_v40  ;;  %9866 = vmatprep.subr.bf16.mxu0 %v9865_v61  ;;  %v10623_v23 = vpack.c.bf16 %v5112_v31, %v5108_v13  ;;  %v5121_v61 = vld [vmem:[%s21715_s12 + $0x238] sm:$0xff]  ;;  %v5136_v13 = vld [vmem:[%s21715_s12 + $0x2b0] sm:$0xff] }
 0x520   :  { %v8860_v2 = vpop.f32.mrb[29].mxu0 }
 0x521   :  { %v8861_v49 = vadd.f32 %v8860_v2, %v8859_v45  ;;  %10608 = vmatpush1.bf16.msra.mxu1 %v10607_v56  ;;  %v5102_v45 = vld [vmem:[%s21715_s12 + $0x1a0] sm:$0xff]  ;;  %v4303_v2 = vadd.f32 %v16523_v19, %v16445_v44  ;;  %v5107_v19 = vld [vmem:[%s21715_s12 + $0x1c8] sm:$0xff] }
 0x522   :  { %9868 = vmatpush1.bf16.msra.mxu0 %v9867_v18  ;;  %v9871_v40 = vpack.c.bf16 %v5102_v45, %v5098_v28  ;;  %v5116_v18 = vld [vmem:[%s21715_s12 + $0x210] sm:$0xff]  ;;  %v5126_v28 = vld [vmem:[%s21715_s12 + $0x260] sm:$0xff]  ;;  %v4318_v45 = vadd.f32 %v16544_v51, %v16445_v44  ;;  %v5131_v51 = vld [vmem:[%s21715_s12 + $0x288] sm:$0xff] }
 0x523   :  { %v16576_v14 = vadd.f32 %v8861_v49, %v16463_v7  ;;  %v8862_v8 = vpop.f32.mrb[30].mxu0  ;;  %v5089_v7 = vld [vmem:[%s21715_s12 + $0x138] sm:$0xff]  ;;  %v5100_v49 = vld [vmem:[%s21715_s12 + $0x190] sm:$0xff]  ;;  %9870 = vmatprep.subr.bf16.mxu0 %v9869_v0  ;;  %v10627_v54 = vpack.c.bf16 %v5120_v1, %v5116_v18 }
 0x524   :  { %v8863_v11 = vpop.f32.mrb[31].mxu0  ;;  %v10609_v43 = vpack.c.bf16 %v5089_v7, %v5085_v37  ;;  %v10619_v17 = vpack.c.bf16 %v5104_v10, %v5100_v49  ;;  %v5106_v7 = vld [vmem:[%s21715_s12 + $0x1c0] sm:$0xff]  ;;  %v5129_v0 = vld [vmem:[%s21715_s12 + $0x278] sm:$0xff]  ;;  %v5128_v49 = vld [vmem:[%s21715_s12 + $0x270] sm:$0xff] }
 0x525   :  { %v8864_v33 = vadd.f32 %v8863_v11, %v8862_v8  ;;  %v9873_v11 = vpack.c.bf16 %v5111_v5, %v5107_v19  ;;  %v5135_v19 = vld [vmem:[%s21715_s12 + $0x2a8] sm:$0xff]  ;;  %v5133_v5 = vld [vmem:[%s21715_s12 + $0x298] sm:$0xff]  ;;  %v5144_v18 = vld [vmem:[%s21715_s12 + $0x2f0] sm:$0xff] }
 0x526   :  { %10610 = vmatprep.subr.bf16.mxu1 %v10609_v43  ;;  %9872 = vmatpush1.bf16.msra.mxu0 %v9871_v40  ;;  %v9875_v43 = vpack.c.bf16 %v5110_v59, %v5106_v7  ;;  %v5124_v40 = vld [vmem:[%s21715_s12 + $0x250] sm:$0xff]  ;;  %v5134_v7 = vld [vmem:[%s21715_s12 + $0x2a0] sm:$0xff]  ;;  %v4323_v59 = vadd.f32 %v16549_v29, %v16445_v44  ;;  %v5139_v29 = vld [vmem:[%s21715_s12 + $0x2c8] sm:$0xff] }
 0x527   :  { %v16604_v27 = vadd.f32 %v8864_v33, %v4293_v52  ;;  %v8865_v15 = vpop.f32.mrb[32].mxu0  ;;  %10612 = vmatpush1.bf16.msra.mxu1 %v10611_v55  ;;  %v10621_v33 = vpack.c.bf16 %v5113_v63, %v5109_v41  ;;  %9874 = vmatprep.subr.bf16.mxu0 %v9873_v11  ;;  %v10631_v10 = vpack.c.bf16 %v5128_v49, %v5124_v40  ;;  %v5137_v11 = vld [vmem:[%s21715_s12 + $0x2b8] sm:$0xff]  ;;  %v5130_v63 = vld [vmem:[%s21715_s12 + $0x280] sm:$0xff]  ;;  %v5152_v40 = vld [vmem:[%s21715_s12 + $0x330] sm:$0xff] }
 0x528   :  { %v8866_v35 = vpop.f32.mrb[33].mxu0  ;;  %10614 = vmatprep.subr.bf16.mxu1 %v10613_v46  ;;  %v9879_v46 = vpack.c.bf16 %v5118_v6, %v5114_v3  ;;  %v5142_v3 = vld [vmem:[%s21715_s12 + $0x2e0] sm:$0xff]  ;;  %v4328_v6 = vadd.f32 %v16554_v9, %v16445_v44  ;;  %v5147_v9 = vld [vmem:[%s21715_s12 + $0x308] sm:$0xff] }
 0x529   :  { %v8867_v58 = vadd.f32 %v8866_v35, %v8865_v15  ;;  %v9877_v35 = vpack.c.bf16 %v5119_v39, %v5115_v48  ;;  %v5143_v48 = vld [vmem:[%s21715_s12 + $0x2e8] sm:$0xff]  ;;  %v5141_v39 = vld [vmem:[%s21715_s12 + $0x2d8] sm:$0xff] }
 0x52a   :  { %9876 = vmatpush1.bf16.msra.mxu0 %v9875_v43  ;;  %v5132_v43 = vld [vmem:[%s21715_s12 + $0x290] sm:$0xff] }
 0x52b   :  { %v16632_v36 = vadd.f32 %v8867_v58, %v4298_v60  ;;  %v8868_v30 = vpop.f32.mrb[34].mxu0  ;;  %10616 = vmatpush1.bf16.msra.mxu1 %v10615_v12  ;;  %v10625_v58 = vpack.c.bf16 %v5121_v61, %v5117_v38  ;;  %9878 = vmatprep.subr.bf16.mxu0 %v9877_v35  ;;  %v10635_v31 = vpack.c.bf16 %v5136_v13, %v5132_v43  ;;  %v5145_v35 = vld [vmem:[%s21715_s12 + $0x2f8] sm:$0xff]  ;;  %v5138_v61 = vld [vmem:[%s21715_s12 + $0x2c0] sm:$0xff] }
 0x52c   :  { %v8869_v26 = vpop.f32.mrb[35].mxu0  ;;  %10618 = vmatprep.subr.bf16.mxu1 %v10617_v53  ;;  %v9883_v53 = vpack.c.bf16 %v5126_v28, %v5122_v32  ;;  %v5150_v32 = vld [vmem:[%s21715_s12 + $0x320] sm:$0xff]  ;;  %v4333_v28 = vadd.f32 %v16559_v21, %v16445_v44  ;;  %v5155_v44 = vld [vmem:[%s21715_s12 + $0x348] sm:$0xff] }
 0x52d   :  { %v8870_v25 = vadd.f32 %v8869_v26, %v8868_v30  ;;  %v9881_v26 = vpack.c.bf16 %v5127_v47, %v5123_v20  ;;  %v5151_v20 = vld [vmem:[%s21715_s12 + $0x328] sm:$0xff]  ;;  %v5149_v47 = vld [vmem:[%s21715_s12 + $0x318] sm:$0xff] }
 0x52e   :  { %9880 = vmatpush1.bf16.msra.mxu0 %v9879_v46  ;;  %v5140_v46 = vld [vmem:[%s21715_s12 + $0x2d0] sm:$0xff]  ;;  %v5159_v21 = vld [vmem:[%s21715_s12 + $0x368] sm:$0xff] }
 0x52f   :  { %v16660_v56 = vadd.f32 %v8870_v25, %v4303_v2  ;;  %v8871_v8 = vpop.f32.mrb[36].mxu0  ;;  %10620 = vmatpush1.bf16.msra.mxu1 %v10619_v17  ;;  %v10629_v25 = vpack.c.bf16 %v5129_v0, %v5125_v4  ;;  %9882 = vmatprep.subr.bf16.mxu0 %v9881_v26  ;;  %v10639_v1 = vpack.c.bf16 %v5144_v18, %v5140_v46  ;;  %v5153_v26 = vld [vmem:[%s21715_s12 + $0x338] sm:$0xff]  ;;  %v5146_v0 = vld [vmem:[%s21715_s12 + $0x300] sm:$0xff]  ;;  %v5171_v18 = vld [vmem:[%s21715_s12 + $0x3c8] sm:$0xff] }
 0x530   :  { %v8872_v37 = vpop.f32.mrb[37].mxu0  ;;  %10622 = vmatprep.subr.bf16.mxu1 %v10621_v33  ;;  %v9887_v33 = vpack.c.bf16 %v5134_v7, %v5130_v63 }
 0x531   :  { %v8873_v52 = vadd.f32 %v8872_v37, %v8871_v8  ;;  %v9885_v37 = vpack.c.bf16 %v5135_v19, %v5131_v51  ;;  %v5157_v51 = vld [vmem:[%s21715_s12 + $0x358] sm:$0xff] }
 0x532   :  { %9884 = vmatpush1.bf16.msra.mxu0 %v9883_v53  ;;  %v5148_v53 = vld [vmem:[%s21715_s12 + $0x310] sm:$0xff] }
 0x533   :  { %v16688_v55 = vadd.f32 %v8873_v52, %v4308_v22  ;;  %v8874_v15 = vpop.f32.mrb[38].mxu0  ;;  %10624 = vmatpush1.bf16.msra.mxu1 %v10623_v23  ;;  %v10633_v52 = vpack.c.bf16 %v5137_v11, %v5133_v5  ;;  %9886 = vmatprep.subr.bf16.mxu0 %v9885_v37  ;;  %v10643_v49 = vpack.c.bf16 %v5152_v40, %v5148_v53  ;;  %v5154_v37 = vld [vmem:[%s21715_s12 + $0x340] sm:$0xff] }
 0x534   :  { %v8875_v24 = vpop.f32.mrb[39].mxu0  ;;  %10626 = vmatprep.subr.bf16.mxu1 %v10625_v58  ;;  %v9891_v58 = vpack.c.bf16 %v5142_v3, %v5138_v61  ;;  %v9897_v5 = vpack.c.bf16 %v5159_v21, %v5155_v44  ;;  %v5158_v11 = vld [vmem:[%s21715_s12 + $0x360] sm:$0xff] }
 0x535   :  { %v8876_v60 = vadd.f32 %v8875_v24, %v8874_v15  ;;  %v9889_v24 = vpack.c.bf16 %v5143_v48, %v5139_v29  ;;  %v5165_v29 = vld [vmem:[%s21715_s12 + $0x398] sm:$0xff] }
 0x536   :  { %9888 = vmatpush1.bf16.msra.mxu0 %v9887_v33 }
 0x537   :  { %v16716_v12 = vadd.f32 %v8876_v60, %v4313_v50  ;;  %v8877_v30 = vpop.f32.mrb[40].mxu0  ;;  %10628 = vmatpush1.bf16.msra.mxu1 %v10627_v54  ;;  %v10637_v60 = vpack.c.bf16 %v5145_v35, %v5141_v39  ;;  %9890 = vmatprep.subr.bf16.mxu0 %v9889_v24  ;;  %v5166_v24 = vld [vmem:[%s21715_s12 + $0x3a0] sm:$0xff] }
 0x538   :  { %v8878_v57 = vpop.f32.mrb[41].mxu0  ;;  %10630 = vmatprep.subr.bf16.mxu1 %v10629_v25  ;;  %v9895_v25 = vpack.c.bf16 %v5150_v32, %v5146_v0  ;;  %v5172_v32 = vld [vmem:[%s21715_s12 + $0x3d0] sm:$0xff] }
 0x539   :  { %v8879_v2 = vadd.f32 %v8878_v57, %v8877_v30  ;;  %v9893_v57 = vpack.c.bf16 %v5151_v20, %v5147_v9 }
 0x53a   :  { %9892 = vmatpush1.bf16.msra.mxu0 %v9891_v58 }
 0x53b   :  { %v16744_v17 = vadd.f32 %v8879_v2, %v4318_v45  ;;  %v8880_v8 = vpop.f32.mrb[42].mxu0  ;;  %10632 = vmatpush1.bf16.msra.mxu1 %v10631_v10  ;;  %v10641_v2 = vpack.c.bf16 %v5153_v26, %v5149_v47  ;;  %9894 = vmatprep.subr.bf16.mxu0 %v9893_v57  ;;  %v5170_v47 = vld [vmem:[%s21715_s12 + $0x3c0] sm:$0xff] }
 0x53c   :  { %v8881_v41 = vpop.f32.mrb[43].mxu0  ;;  %10634 = vmatprep.subr.bf16.mxu1 %v10633_v52  ;;  %v5160_v52 = vld [vmem:[%s21715_s12 + $0x370] sm:$0xff] }
 0x53d   :  { %v8882_v22 = vadd.f32 %v8881_v41, %v8880_v8  ;;  %v5161_v41 = vld [vmem:[%s21715_s12 + $0x378] sm:$0xff] }
 0x53e   :  { %9896 = vmatpush1.bf16.msra.mxu0 %v9895_v25  ;;  %v10645_v7 = vpack.c.bf16 %v5161_v41, %v5157_v51 }
 0x53f   :  { %v16772_v23 = vadd.f32 %v8882_v22, %v4323_v59  ;;  %v8883_v15 = vpop.f32.mrb[44].mxu0  ;;  %10636 = vmatpush1.bf16.msra.mxu1 %v10635_v31  ;;  %v9899_v59 = vpack.c.bf16 %v5158_v11, %v5154_v37  ;;  %v5156_v22 = vld [vmem:[%s21715_s12 + $0x350] sm:$0xff]  ;;  %9898 = vmatprep.subr.bf16.mxu0 %v9897_v5  ;;  %v5163_v31 = vld [vmem:[%s21715_s12 + $0x388] sm:$0xff] }
 0x540   :  { %v8884_v38 = vpop.f32.mrb[45].mxu0  ;;  %10638 = vmatprep.subr.bf16.mxu1 %v10637_v60  ;;  %v10647_v33 = vpack.c.bf16 %v5160_v52, %v5156_v22 }
 0x541   :  { %v8885_v50 = vadd.f32 %v8884_v38, %v8883_v15  ;;  %v5167_v15 = vld [vmem:[%s21715_s12 + $0x3a8] sm:$0xff]  ;;  %v5162_v38 = vld [vmem:[%s21715_s12 + $0x380] sm:$0xff] }
 0x542   :  { %9900 = vmatpush1.bf16.msra.mxu0 %v9899_v59  ;;  %v9901_v39 = vpack.c.bf16 %v5167_v15, %v5163_v31  ;;  %v9903_v3 = vpack.c.bf16 %v5166_v24, %v5162_v38  ;;  %v5179_v15 = vld [vmem:[%s21715_s12 + $0x408] sm:$0xff] }
 0x543   :  { %v16800_v54 = vadd.f32 %v8885_v50, %v4328_v6  ;;  %v8886_v30 = vpop.f32.mrb[46].mxu0  ;;  %10640 = vmatpush1.bf16.msra.mxu1 %v10639_v1  ;;  %v5164_v6 = vld [vmem:[%s21715_s12 + $0x390] sm:$0xff]  ;;  %v5175_v1 = vld [vmem:[%s21715_s12 + $0x3e8] sm:$0xff] }
 0x544   :  { %v8887_v4 = vpop.f32.mrb[47].mxu0  ;;  %10642 = vmatprep.subr.bf16.mxu1 %v10641_v2  ;;  %v5168_v50 = vld [vmem:[%s21715_s12 + $0x3b0] sm:$0xff]  ;;  %9902 = vmatprep.subr.bf16.mxu0 %v9901_v39  ;;  %v9905_v20 = vpack.c.bf16 %v5175_v1, %v5171_v18 }
 0x545   :  { %v8888_v45 = vadd.f32 %v8887_v4, %v8886_v30  ;;  %v10651_v60 = vpack.c.bf16 %v5168_v50, %v5164_v6  ;;  %v5173_v30 = vld [vmem:[%s21715_s12 + $0x3d8] sm:$0xff]  ;;  %v5174_v4 = vld [vmem:[%s21715_s12 + $0x3e0] sm:$0xff] }
 0x546   :  { %9904 = vmatpush1.bf16.msra.mxu0 %v9903_v3  ;;  %v9907_v0 = vpack.c.bf16 %v5174_v4, %v5170_v47 }
 0x547   :  { %v16828_v10 = vadd.f32 %v8888_v45, %v4333_v28  ;;  %v8921_v8 = vpop.f32.mrb[48].mxu0  ;;  %10644 = vmatpush1.bf16.msra.mxu1 %v10643_v49  ;;  %v5176_v28 = vld [vmem:[%s21715_s12 + $0x3f0] sm:$0xff]  ;;  %9906 = vmatprep.subr.bf16.mxu0 %v9905_v20 }
 0x548   :  { %v8922_v19 = vpop.f32.mrb[49].mxu0  ;;  %10646 = vmatprep.subr.bf16.mxu1 %v10645_v7  ;;  %v10655_v45 = vpack.c.bf16 %v5176_v28, %v5172_v32 }
 0x549   :  { %v8923_v63 = vadd.f32 %v8922_v19, %v8921_v8 }
 0x54a   :  { %9908 = vmatpush1.bf16.msra.mxu0 %v9907_v0 }
 0x54b   :  { %v16855_v43 = vadd.f32 %v8923_v63, %v16576_v14  ;;  %v8924_v13 = vpop.f32.mrb[50].mxu0  ;;  %10648 = vmatpush1.bf16.msra.mxu1 %v10647_v33  ;;  %v5169_v14 = vld [vmem:[%s21715_s12 + $0x3b8] sm:$0xff] }
 0x54c   :  { %v8925_v48 = vpop.f32.mrb[51].mxu0  ;;  %v10649_v61 = vpack.c.bf16 %v5169_v14, %v5165_v29 }
 0x54d   :  { %v8926_v35 = vadd.f32 %v8925_v48, %v8924_v13 }
 0x54e   :  { %10650 = vmatprep.subr.bf16.mxu1 %v10649_v61 }
 0x54f   :  { %v16882_v58 = vadd.f32 %v8926_v35, %v16604_v27  ;;  %v8927_v46 = vpop.f32.mrb[52].mxu0  ;;  %10652 = vmatpush1.bf16.msra.mxu1 %v10651_v60  ;;  %v5177_v27 = vld [vmem:[%s21715_s12 + $0x3f8] sm:$0xff] }
 0x550   :  { %v8928_v9 = vpop.f32.mrb[53].mxu0  ;;  %v10653_v26 = vpack.c.bf16 %v5177_v27, %v5173_v30 }
 0x551   :  { %v8929_v57 = vadd.f32 %v8928_v9, %v8927_v46 }
 0x552   :  { %10654 = vmatprep.subr.bf16.mxu1 %v10653_v26 }
 0x553   :  { %v4528_v2 = vadd.f32 %v8929_v57, %v16632_v36  ;;  %v8930_v25 = vpop.f32.mrb[54].mxu0  ;;  %10656 = vmatpush1.bf16.msra.mxu1 %v10655_v45 }
 0x554   :  { %v8931_v53 = vpop.f32.mrb[55].mxu0 }
 0x555   :  { %v8932_v40 = vadd.f32 %v8931_v53, %v8930_v25 }
 0x557   :  { %v4533_v49 = vadd.f32 %v8932_v40, %v16660_v56  ;;  %v8933_v8 = vpop.f32.mrb[56].mxu0 }
 0x558   :  { %v8934_v44 = vpop.f32.mrb[57].mxu0 }
 0x559   :  { %v8935_v21 = vadd.f32 %v8934_v44, %v8933_v8 }
 0x55b   :  { %v4538_v51 = vadd.f32 %v8935_v21, %v16688_v55  ;;  %v8936_v19 = vpop.f32.mrb[58].mxu0 }
 0x55c   :  { %v8937_v5 = vpop.f32.mrb[59].mxu0 }
 0x55d   :  { %v8938_v41 = vadd.f32 %v8937_v5, %v8936_v19 }
 0x55f   :  { %v4543_v37 = vadd.f32 %v8938_v41, %v16716_v12  ;;  %v8939_v11 = vpop.f32.mrb[60].mxu0  ;;  %v5183_v12 = vld [vmem:[%s21715_s12 + $0x428] sm:$0xff] }
 0x560   :  { %v8940_v36 = vpop.f32.mrb[61].mxu0  ;;  %v9909_v29 = vpack.c.bf16 %v5183_v12, %v5179_v15 }
 0x561   :  { %v8941_v63 = vadd.f32 %v8940_v36, %v8939_v11  ;;  %v22023_v11 = vld [vmem:[#allocation3_spill] sm:$0xff] }
 0x562   :  { %9910 = vmatprep.subr.bf16.mxu0 %v9909_v29  ;;  %v16944_v36 = vrot.slane %v16412_v16, %v22023_v11  ;;  %v5187_v29 = vld [vmem:[%s21715_s12 + $0x448] sm:$0xff] }
 0x563   :  { %v4548_v7 = vadd.f32 %v8941_v63, %v16744_v17  ;;  %v8942_v59 = vpop.f32.mrb[62].mxu0  ;;  %v5181_v17 = vld [vmem:[%s21715_s12 + $0x418] sm:$0xff]  ;;  %v22024_v63 = vld [vmem:[#allocation4_spill] sm:$0xff] }
 0x564   :  { %v8943_v22 = vpop.f32.mrb[63].mxu0 }
 0x565   :  { %v8944_v52 = vadd.f32 %v8943_v22, %v8942_v59  ;;  %v16948_v59 = vrot.slane %v16412_v16, %v22024_v63 }
 0x567   :  { %v4553_v56 = vadd.f32 %v8944_v52, %v16772_v23  ;;  %v8945_v33 = vpop.f32.mrb[64].mxu0  ;;  %v5185_v23 = vld [vmem:[%s21715_s12 + $0x438] sm:$0xff] }
 0x568   :  { %v8946_v13 = vpop.f32.mrb[65].mxu0  ;;  %v10657_v48 = vpack.c.bf16 %v5185_v23, %v5181_v17  ;;  %v5184_v17 = vld [vmem:[%s21715_s12 + $0x430] sm:$0xff]  ;;  %v5191_v23 = vld [vmem:[%s21715_s12 + $0x468] sm:$0xff] }
 0x569   :  { %v8947_v31 = vadd.f32 %v8946_v13, %v8945_v33  ;;  %v5182_v13 = vld [vmem:[%s21715_s12 + $0x420] sm:$0xff] }
 0x56a   :  { %10658 = vmatprep.subr.bf16.mxu1 %v10657_v48 }
 0x56b   :  { %v4558_v55 = vadd.f32 %v8947_v31, %v16800_v54  ;;  %v5180_v31 = vld [vmem:[%s21715_s12 + $0x410] sm:$0xff] }
 0x5a2   :  { %v8948_v54 = vpop.f32.mrb[66].mxu0 }
 0x5a3   :  { %v8949_v39 = vpop.f32.mrb[67].mxu0 }
 0x5a4   :  { %v8950_v14 = vadd.f32 %v8949_v39, %v8948_v54  ;;  %v5189_v39 = vld [vmem:[%s21715_s12 + $0x458] sm:$0xff] }
 0x5a6   :  { %v4563_v38 = vadd.f32 %v8950_v14, %v16828_v10  ;;  %v8983_v24 = vpop.f32.mrb[68].mxu0  ;;  %v5193_v14 = vld [vmem:[%s21715_s12 + $0x478] sm:$0xff] }
 0x5a7   :  { %v8984_v35 = vpop.f32.mrb[69].mxu0 }
 0x5a8   :  { %v8985_v61 = vadd.f32 %v8984_v35, %v8983_v24 }
 0x5aa   :  { %v8986_v3 = vpop.f32.mrb[70].mxu0  ;;  %v4633_v6 = vadd.f32 %v8985_v61, %v16855_v43 }
 0x5ab   :  { %v8987_v50 = vpop.f32.mrb[71].mxu0 }
 0x5ac   :  { %v8988_v60 = vadd.f32 %v8987_v50, %v8986_v3  ;;  %v10659_v50 = vpack.c.bf16 %v5184_v17, %v5180_v31 }
 0x5ae   :  { %v8989_v46 = vpop.f32.mrb[72].mxu0  ;;  %v4638_v18 = vadd.f32 %v8988_v60, %v16882_v58  ;;  %v9913_v60 = vpack.c.bf16 %v5191_v23, %v5187_v29  ;;  %v5205_v29 = vld [vmem:[%s21715_s12 + $0x4d8] sm:$0xff] }
 0x5af   :  { %v8990_v1 = vpop.f32.mrb[73].mxu0 }
 0x5b0   :  { %v8991_v30 = vadd.f32 %v8990_v1, %v8989_v46 }
 0x5b2   :  { %v8992_v9 = vpop.f32.mrb[74].mxu0  ;;  %v16930_v20 = vadd.f32 %v8991_v30, %v4528_v2 }
 0x5b3   :  { %v8993_v27 = vpop.f32.mrb[75].mxu0 }
 0x5b4   :  { %v8994_v47 = vadd.f32 %v8993_v27, %v8992_v9  ;;  %v10661_v27 = vpack.c.bf16 %v5193_v14, %v5189_v39 }
 0x5b6   :  { %v8995_v4 = vpop.f32.mrb[76].mxu0  ;;  %v4648_v10 = vadd.f32 %v8994_v47, %v4533_v49  ;;  %v5190_v47 = vld [vmem:[%s21715_s12 + $0x460] sm:$0xff] }
 0x5b7   :  { %v8996_v57 = vpop.f32.mrb[77].mxu0 }
 0x5b8   :  { %v8997_v26 = vadd.f32 %v8996_v57, %v8995_v4  ;;  %v5188_v4 = vld [vmem:[%s21715_s12 + $0x450] sm:$0xff] }
 0x5b9   :  { %v5192_v57 = vld [vmem:[%s21715_s12 + $0x470] sm:$0xff] }
 0x5ba   :  { %v8998_v0 = vpop.f32.mrb[78].mxu0  ;;  %v16932_v32 = vadd.f32 %v8997_v26, %v4538_v51 }
 0x5bb   :  { %v8999_v43 = vpop.f32.mrb[79].mxu0 }
 0x5bc   :  { %v9000_v28 = vadd.f32 %v8999_v43, %v8998_v0  ;;  %v5195_v0 = vld [vmem:[%s21715_s12 + $0x488] sm:$0xff] }
 0x5bd   :  { %v5199_v43 = vld [vmem:[%s21715_s12 + $0x4a8] sm:$0xff] }
 0x5be   :  { %v9001_v45 = vpop.f32.mrb[80].mxu0  ;;  %v16934_v25 = vadd.f32 %v9000_v28, %v4543_v37 }
 0x5bf   :  { %v9002_v58 = vpop.f32.mrb[81].mxu0 }
 0x5c0   :  { %v9003_v53 = vadd.f32 %v9002_v58, %v9001_v45  ;;  %v5197_v45 = vld [vmem:[%s21715_s12 + $0x498] sm:$0xff] }
 0x5c2   :  { %v9004_v40 = vpop.f32.mrb[82].mxu0  ;;  %v16936_v8 = vadd.f32 %v9003_v53, %v4548_v7 }
 0x5c3   :  { %v9005_v2 = vpop.f32.mrb[83].mxu0 }
 0x5c4   :  { %v9006_v44 = vadd.f32 %v9005_v2, %v9004_v40 }
 0x5c6   :  { %v9007_v21 = vpop.f32.mrb[84].mxu0  ;;  %v16938_v19 = vadd.f32 %v9006_v44, %v4553_v56  ;;  %v5178_v56 = vld [vmem:[%s21715_s12 + $0x400] sm:$0xff] }
 0x5c7   :  { %v9008_v49 = vpop.f32.mrb[85].mxu0  ;;  %v9911_v3 = vpack.c.bf16 %v5182_v13, %v5178_v56  ;;  %v5196_v56 = vld [vmem:[%s21715_s12 + $0x490] sm:$0xff] }
 0x5c8   :  { %v9009_v5 = vadd.f32 %v9008_v49, %v9007_v21  ;;  %v10663_v21 = vpack.c.bf16 %v5192_v57, %v5188_v4  ;;  %v5194_v49 = vld [vmem:[%s21715_s12 + $0x480] sm:$0xff]  ;;  %v5200_v13 = vld [vmem:[%s21715_s12 + $0x4b0] sm:$0xff]  ;;  %v5215_v4 = vld [vmem:[%s21715_s12 + $0x528] sm:$0xff] }
 0x5c9   :  { %v5213_v57 = vld [vmem:[%s21715_s12 + $0x518] sm:$0xff] }
 0x5ca   :  { %v9010_v41 = vpop.f32.mrb[86].mxu0  ;;  %v16940_v51 = vadd.f32 %v9009_v5, %v4558_v55 }
 0x5cb   :  { %v9011_v37 = vpop.f32.mrb[87].mxu0 }
 0x5cc   :  { %v9012_v7 = vadd.f32 %v9011_v37, %v9010_v41 }
 0x5ce   :  { %v4162_v22 = vpop.f32.mrb[102].mxu1  ;;  %v9094_v52 = vpop.f32.mrb[88].mxu0  ;;  %v16950_v33 = vadd.f32 %v9012_v7, %v4563_v38 }
 0x5cf   :  { %v11482_v16 = vadd.f32 %v4162_v22, %v16944_v36  ;;  %v4753_v55 = vadd.f32 %v9094_v52, %v4638_v18  ;;  %v4164_v15 = vpop.f32.mrb[103].mxu1  ;;  %v4747_v12 = vpop.f32.mrb[89].mxu0  ;;  %v9917_v22 = vpack.c.bf16 %v5199_v43, %v5195_v0  ;;  %v5198_v52 = vld [vmem:[%s21715_s12 + $0x4a0] sm:$0xff] }
 0x5d0   :  { %v11483_v48 = vadd.f32 %v4164_v15, %v16948_v59  ;;  %v16972_v54 = vadd.f32 %v4747_v12, %v4633_v6  ;;  %v5186_v6 = vld [vmem:[%s21715_s12 + $0x440] sm:$0xff]  ;;  %v5203_v15 = vld [vmem:[%s21715_s12 + $0x4c8] sm:$0xff]  ;;  %v9919_v14 = vpack.c.bf16 %v5198_v52, %v5194_v49  ;;  %v5212_v49 = vld [vmem:[%s21715_s12 + $0x510] sm:$0xff] }
 0x5d1   :  { %v4801_v38 = vmax.f32 %v4753_v55, 0.0  ;;  %v4796_v46 = vmax.f32 %v11482_v16, 0.0  ;;  %v9915_v44 = vpack.c.bf16 %v5190_v47, %v5186_v6  ;;  %v5207_v12 = vld [vmem:[%s21715_s12 + $0x4e8] sm:$0xff] }
 0x5d2   :  { %v4797_v24 = vmax.f32 %v11483_v48, 0.0  ;;  %v4168_v35 = vpop.f32.mrb[104].mxu1  ;;  %v9097_v61 = vpop.f32.mrb[90].mxu0  ;;  %v9921_v6 = vpack.c.bf16 %v5207_v12, %v5203_v15 }
 0x5d3   :  { %v11484_v18 = vadd.f32 %v4168_v35, %v16944_v36  ;;  %v16984_v1 = vadd.f32 %v9097_v61, %v4648_v10  ;;  %v4757_v30 = vpop.f32.mrb[91].mxu0  ;;  %4833 = vrot.lane.b32.xlu1 %v4801_v38, %s21830_s2  ;;  %v4170_v9 = vpop.f32.mrb[105].mxu1  ;;  %v10667_v38 = vpack.c.bf16 %v5200_v13, %v5196_v56  ;;  %v5206_v35 = vld [vmem:[%s21715_s12 + $0x4e0] sm:$0xff]  ;;  %v5223_v56 = vld [vmem:[%s21715_s12 + $0x568] sm:$0xff]  ;;  %v5221_v13 = vld [vmem:[%s21715_s12 + $0x558] sm:$0xff] }
 0x5d4   :  { %v4758_v10 = vadd.f32 %v4757_v30, %v16930_v20  ;;  %v11485_v26 = vadd.f32 %v4170_v9, %v16948_v59  ;;  %6616 = vmatprep.mubr.f32.mxu0 %v4797_v24  ;;  %7468 = vmatprep.mubr.f32.mxu1 %v4797_v24  ;;  %v5201_v20 = vld [vmem:[%s21715_s12 + $0x4b8] sm:$0xff]  ;;  %v5202_v24 = vld [vmem:[%s21715_s12 + $0x4c0] sm:$0xff]  ;;  %v5211_v30 = vld [vmem:[%s21715_s12 + $0x508] sm:$0xff] }
 0x5d5   :  { %v4799_v28 = vmax.f32 %v11484_v18, 0.0  ;;  %6617 = vmatmul.mubr.f32.vlgmr.msra.gmra.mrb[98].mxu0 %v4796_v46  ;;  %7469 = vmatmul.mubr.f32.vlgmr.msra.gmra.mrb[122].mxu1 %v4796_v46  ;;  %v10665_v55 = vpack.c.bf16 %v5201_v20, %v5197_v45  ;;  %v5204_v46 = vld [vmem:[%s21715_s12 + $0x4d0] sm:$0xff]  ;;  %v5210_v20 = vld [vmem:[%s21715_s12 + $0x500] sm:$0xff] }
 0x5d6   :  { %v4804_v58 = vmax.f32 %v4758_v10, 0.0  ;;  %v4800_v53 = vmax.f32 %v11485_v26, 0.0  ;;  %v4174_v40 = vpop.f32.mrb[106].mxu1  ;;  %v9100_v2 = vpop.f32.mrb[92].mxu0  ;;  %9912 = vmatpush1.bf16.msra.mxu0 %v9911_v3  ;;  %10660 = vmatpush1.bf16.msra.mxu1 %v10659_v50  ;;  %v5208_v18 = vld [vmem:[%s21715_s12 + $0x4f0] sm:$0xff]  ;;  %v5217_v10 = vld [vmem:[%s21715_s12 + $0x538] sm:$0xff] }
 0x5d7   :  { %v11486_v5 = vadd.f32 %v4174_v40, %v16944_v36  ;;  %v17015_v41 = vadd.f32 %v9100_v2, %v16934_v25  ;;  %v4176_v37 = vpop.f32.mrb[107].mxu1  ;;  %v4767_v7 = vpop.f32.mrb[93].mxu0  ;;  %9914 = vmatprep.subr.bf16.mxu0 %v9913_v60  ;;  %10662 = vmatprep.subr.bf16.mxu1 %v10661_v27  ;;  %v4807_v26 = vmax.f32 %v16984_v1, 0.0  ;;  %v10671_v45 = vpack.c.bf16 %v5208_v18, %v5204_v46 }
 0x5d8   :  { %v11759_v31 = vpack.i.bf16 %v4800_v53, %v4799_v28  ;;  %v11487_v25 = vadd.f32 %v4176_v37, %v16948_v59  ;;  %v17028_v16 = vadd.f32 %v4767_v7, %v16932_v32  ;;  %4847 = vrot.lane.b32.xlu1 %v4804_v58, %s11816_s23  ;;  %v5209_v32 = vld [vmem:[%s21715_s12 + $0x4f8] sm:$0xff]  ;;  %v9923_v28 = vpack.c.bf16 %v5206_v35, %v5202_v24  ;;  %v5214_v58 = vld [vmem:[%s21715_s12 + $0x520] sm:$0xff]  ;;  %v5219_v37 = vld [vmem:[%s21715_s12 + $0x548] sm:$0xff] }
 0x5d9   :  { %v4802_v17 = vmax.f32 %v11486_v5, 0.0  ;;  %v10669_v47 = vpack.c.bf16 %v5209_v32, %v5205_v29  ;;  %v5216_v5 = vld [vmem:[%s21715_s12 + $0x530] sm:$0xff]  ;;  %v9929_v29 = vpack.c.bf16 %v5223_v56, %v5219_v37  ;;  %v4813_v46 = vmax.f32 %v17015_v41, 0.0  ;;  %v5230_v41 = vld [vmem:[%s21715_s12 + $0x5a0] sm:$0xff] }
 0x5da   :  { %v4803_v23 = vmax.f32 %v11487_v25, 0.0  ;;  %v4180_v48 = vpop.f32.mrb[108].mxu1  ;;  %v9103_v39 = vpop.f32.mrb[94].mxu0  ;;  %11760 = vrot.lane.b32.xlu0 %v11759_v31, %s21830_s2  ;;  %9916 = vmatpush1.bf16.msra.mxu0 %v9915_v44  ;;  %v9925_v44 = vpack.c.bf16 %v5215_v4, %v5211_v30  ;;  %v5225_v31 = vld [vmem:[%s21715_s12 + $0x578] sm:$0xff]  ;;  %v4810_v25 = vmax.f32 %v17028_v16, 0.0  ;;  %v5222_v16 = vld [vmem:[%s21715_s12 + $0x560] sm:$0xff] }
 0x5db   :  { %v11488_v61 = vadd.f32 %v4180_v48, %v16944_v36  ;;  %v17052_v3 = vadd.f32 %v9103_v39, %v16938_v19  ;;  %v4182_v50 = vpop.f32.mrb[109].mxu1  ;;  %v4777_v60 = vpop.f32.mrb[95].mxu0  ;;  %10664 = vmatpush1.bf16.msra.mxu1 %v10663_v21  ;;  %9918 = vmatprep.subr.bf16.mxu0 %v9917_v22  ;;  %v10673_v21 = vpack.c.bf16 %v5217_v10, %v5213_v57  ;;  %v5220_v48 = vld [vmem:[%s21715_s12 + $0x550] sm:$0xff]  ;;  %v5226_v10 = vld [vmem:[%s21715_s12 + $0x580] sm:$0xff]  ;;  %s11821_s2 = smov 52  }
 0x5dc   :  { %v11764_v9 = vpack.i.bf16 %v4803_v23, %v4802_v17  ;;  %v11489_v19 = vadd.f32 %v4182_v50, %v16948_v59  ;;  %v17065_v27 = vadd.f32 %v4777_v60, %v16936_v8  ;;  %10666 = vmatprep.subr.bf16.mxu1 %v10665_v55  ;;  %v10675_v17 = vpack.c.bf16 %v5216_v5, %v5212_v49  ;;  %v5218_v23 = vld [vmem:[%s21715_s12 + $0x540] sm:$0xff]  ;;  %v5224_v35 = vld [vmem:[%s21715_s12 + $0x570] sm:$0xff]  ;;  %v5231_v50 = vld [vmem:[%s21715_s12 + $0x5a8] sm:$0xff] }
 0x5dd   :  { %v4805_v53 = vmax.f32 %v11488_v61, 0.0  ;;  %v10677_v32 = vpack.c.bf16 %v5225_v31, %v5221_v13  ;;  %v5227_v61 = vld [vmem:[%s21715_s12 + $0x588] sm:$0xff]  ;;  %v5229_v60 = vld [vmem:[%s21715_s12 + $0x598] sm:$0xff]  ;;  %v10679_v4 = vpack.c.bf16 %v5224_v35, %v5220_v48  ;;  %v9935_v49 = vpack.c.bf16 %v5230_v41, %v5226_v10  ;;  %v5238_v56 = vld [vmem:[%s21715_s12 + $0x5e0] sm:$0xff] }
 0x5de   :  { %v4806_v0 = vmax.f32 %v11489_v19, 0.0  ;;  %v4186_v43 = vpop.f32.mrb[110].mxu1  ;;  %v9106_v8 = vpop.f32.mrb[96].mxu0  ;;  %11765 = vrot.lane.b32.xlu0 %v11764_v9, %s11816_s23  ;;  %9920 = vmatpush1.bf16.msra.mxu0 %v9919_v14  ;;  %v9931_v9 = vpack.c.bf16 %v5222_v16, %v5218_v23  ;;  %v9933_v57 = vpack.c.bf16 %v5231_v50, %v5227_v61  ;;  %v5236_v13 = vld [vmem:[%s21715_s12 + $0x5d0] sm:$0xff]  ;;  %v4816_v31 = vmax.f32 %v17065_v27, 0.0  ;;  %v5245_v27 = vld [vmem:[%s21715_s12 + $0x618] sm:$0xff] }
 0x5df   :  { %v17085_v40 = vadd.f32 %v9106_v8, %v16950_v33  ;;  %v4188_v1 = vpop.f32.mrb[111].mxu1  ;;  %v4787_v2 = vpop.f32.mrb[97].mxu0  ;;  %10668 = vmatpush1.bf16.msra.mxu1 %v10667_v38  ;;  %9922 = vmatprep.subr.bf16.mxu0 %v9921_v6  ;;  %v11490_v7 = vadd.f32 %v4186_v43, %v16944_v36  ;;  %v5233_v6 = vld [vmem:[%s21715_s12 + $0x5b8] sm:$0xff]  ;;  %v5244_v50 = vld [vmem:[%s21715_s12 + $0x610] sm:$0xff] }
 0x5e0   :  { %v11769_v33 = vpack.i.bf16 %v4807_v26, %v4806_v0  ;;  %v11491_v22 = vadd.f32 %v4188_v1, %v16948_v59  ;;  %v17099_v52 = vadd.f32 %v4787_v2, %v16940_v51  ;;  %10670 = vmatprep.subr.bf16.mxu1 %v10669_v47  ;;  %v9927_v51 = vpack.c.bf16 %v5214_v58, %v5210_v20  ;;  %v5228_v26 = vld [vmem:[%s21715_s12 + $0x590] sm:$0xff]  ;;  %v5235_v20 = vld [vmem:[%s21715_s12 + $0x5c8] sm:$0xff]  ;;  %v5237_v1 = vld [vmem:[%s21715_s12 + $0x5d8] sm:$0xff] }
 0x5e1   :  { %v4808_v39 = vmax.f32 %v11490_v7, 0.0  ;;  %v5239_v58 = vld [vmem:[%s21715_s12 + $0x5e8] sm:$0xff]  ;;  %v5241_v2 = vld [vmem:[%s21715_s12 + $0x5f8] sm:$0xff] }
 0x5e2   :  { %v4809_v55 = vmax.f32 %v11491_v22, 0.0  ;;  %v4192_v15 = vpop.f32.mrb[112].mxu1  ;;  %11770 = vrot.lane.b32.xlu1 %v11769_v33, %s11817_s9  ;;  %4858 = vrot.lane.b32.xlu0 %v4805_v53, %s11817_s9  ;;  %v9937_v7 = vpack.c.bf16 %v5239_v58, %v5235_v20  ;;  %v5234_v22 = vld [vmem:[%s21715_s12 + $0x5c0] sm:$0xff]  ;;  %v4822_v20 = vmax.f32 %v17099_v52, 0.0  ;;  %v5265_v52 = vld [vmem:[%s21715_s12 + $0x6b8] sm:$0xff] }
 0x5e3   :  { %v4194_v12 = vpop.f32.mrb[113].mxu1  ;;  %9924 = vmatpush1.bf16.msra.mxu0 %v9923_v28  ;;  %10672 = vmatpush1.bf16.msra.mxu1 %v10671_v45  ;;  %v11492_v38 = vadd.f32 %v4192_v15, %v16944_v36  ;;  %v10681_v28 = vpack.c.bf16 %v5233_v6, %v5229_v60  ;;  %v5232_v45 = vld [vmem:[%s21715_s12 + $0x5b0] sm:$0xff]  ;;  %v10685_v15 = vpack.c.bf16 %v5241_v2, %v5237_v1  ;;  %v5251_v6 = vld [vmem:[%s21715_s12 + $0x648] sm:$0xff] }
 0x5e4   :  { %v11774_v14 = vpack.i.bf16 %v4810_v25, %v4809_v55  ;;  %v11493_v24 = vadd.f32 %v4194_v12, %v16948_v59  ;;  %9926 = vmatprep.subr.bf16.mxu0 %v9925_v44  ;;  %10674 = vmatprep.subr.bf16.mxu1 %v10673_v21  ;;  %v10683_v33 = vpack.c.bf16 %v5232_v45, %v5228_v26  ;;  %v5243_v12 = vld [vmem:[%s21715_s12 + $0x608] sm:$0xff]  ;;  %v5248_v60 = vld [vmem:[%s21715_s12 + $0x630] sm:$0xff]  ;;  %v5254_v45 = vld [vmem:[%s21715_s12 + $0x660] sm:$0xff] }
 0x5e5   :  { %v4811_v0 = vmax.f32 %v11492_v38, 0.0  ;;  %v9939_v48 = vpack.c.bf16 %v5238_v56, %v5234_v22  ;;  %v5252_v2 = vld [vmem:[%s21715_s12 + $0x650] sm:$0xff] }
 0x5e6   :  { %v4812_v18 = vmax.f32 %v11493_v24, 0.0  ;;  %v4198_v30 = vpop.f32.mrb[114].mxu1  ;;  %11775 = vrot.lane.b32.xlu1 %v11774_v14, %s11818_s24  ;;  %4873 = vrot.lane.b32.xlu0 %v4808_v39, %s11818_s24  ;;  %v5242_v39 = vld [vmem:[%s21715_s12 + $0x600] sm:$0xff] }
 0x5e7   :  { %v11494_v19 = vadd.f32 %v4198_v30, %v16944_v36  ;;  %v4200_v47 = vpop.f32.mrb[115].mxu1  ;;  %9928 = vmatpush1.bf16.msra.mxu0 %v9927_v51  ;;  %10676 = vmatpush1.bf16.msra.mxu1 %v10675_v17  ;;  %v5240_v51 = vld [vmem:[%s21715_s12 + $0x5f0] sm:$0xff]  ;;  %v5247_v17 = vld [vmem:[%s21715_s12 + $0x628] sm:$0xff]  ;;  %v5246_v14 = vld [vmem:[%s21715_s12 + $0x620] sm:$0xff] }
 0x5e8   :  { %v11779_v43 = vpack.i.bf16 %v4813_v46, %v4812_v18  ;;  %v11495_v8 = vadd.f32 %v4200_v47, %v16948_v59  ;;  %9930 = vmatprep.subr.bf16.mxu0 %v9929_v29  ;;  %10678 = vmatprep.subr.bf16.mxu1 %v10677_v32  ;;  %v5249_v32 = vld [vmem:[%s21715_s12 + $0x638] sm:$0xff]  ;;  %v10687_v35 = vpack.c.bf16 %v5240_v51, %v5236_v13  ;;  %v4819_v46 = vmax.f32 %v17052_v3, 0.0 }
 0x5e9   :  { %v4814_v53 = vmax.f32 %v11494_v19, 0.0  ;;  %v9941_v61 = vpack.c.bf16 %v5247_v17, %v5243_v12  ;;  %v5255_v19 = vld [vmem:[%s21715_s12 + $0x668] sm:$0xff]  ;;  %v5253_v47 = vld [vmem:[%s21715_s12 + $0x658] sm:$0xff]  ;;  %v9943_v41 = vpack.c.bf16 %v5246_v14, %v5242_v39  ;;  %v5268_v39 = vld [vmem:[%s21715_s12 + $0x6d0] sm:$0xff] }
 0x5ea   :  { %v4815_v44 = vmax.f32 %v11495_v8, 0.0  ;;  %v4204_v21 = vpop.f32.mrb[116].mxu1  ;;  %11780 = vrot.lane.b32.xlu1 %v11779_v43, %s11819_s19  ;;  %4888 = vrot.lane.b32.xlu0 %v4811_v0, %s11819_s19  ;;  %v10691_v0 = vpack.c.bf16 %v5248_v60, %v5244_v50  ;;  %v9945_v43 = vpack.c.bf16 %v5255_v19, %v5251_v6  ;;  %v5269_v51 = vld [vmem:[%s21715_s12 + $0x6d8] sm:$0xff]  ;;  %v5272_v14 = vld [vmem:[%s21715_s12 + $0x6f0] sm:$0xff] }
 0x5eb   :  { %v11496_v5 = vadd.f32 %v4204_v21, %v16944_v36  ;;  %v4206_v37 = vpop.f32.mrb[117].mxu1  ;;  %9932 = vmatpush1.bf16.msra.mxu0 %v9931_v9  ;;  %10680 = vmatpush1.bf16.msra.mxu1 %v10679_v4  ;;  %v10689_v9 = vpack.c.bf16 %v5249_v32, %v5245_v27  ;;  %v5257_v4 = vld [vmem:[%s21715_s12 + $0x678] sm:$0xff]  ;;  %v5259_v21 = vld [vmem:[%s21715_s12 + $0x688] sm:$0xff]  ;;  %v5266_v27 = vld [vmem:[%s21715_s12 + $0x6c0] sm:$0xff]  ;;  %v10703_v50 = vpack.c.bf16 %v5272_v14, %v5268_v39 }
 0x5ec   :  { %v11784_v25 = vpack.i.bf16 %v4815_v44, %v4814_v53  ;;  %v11497_v55 = vadd.f32 %v4206_v37, %v16948_v59  ;;  %9934 = vmatprep.subr.bf16.mxu0 %v9933_v57  ;;  %10682 = vmatprep.subr.bf16.mxu1 %v10681_v28  ;;  %v10693_v8 = vpack.c.bf16 %v5257_v4, %v5253_v47  ;;  %v5250_v28 = vld [vmem:[%s21715_s12 + $0x640] sm:$0xff]  ;;  %v5256_v44 = vld [vmem:[%s21715_s12 + $0x670] sm:$0xff]  ;;  %v5273_v12 = vld [vmem:[%s21715_s12 + $0x6f8] sm:$0xff] }
 0x5ed   :  { %v4817_v29 = vmax.f32 %v11496_v5, 0.0  ;;  %v10695_v5 = vpack.c.bf16 %v5256_v44, %v5252_v2  ;;  %v5258_v37 = vld [vmem:[%s21715_s12 + $0x680] sm:$0xff]  ;;  %v5283_v19 = vld [vmem:[%s21715_s12 + $0x748] sm:$0xff]  ;;  %v5285_v4 = vld [vmem:[%s21715_s12 + $0x758] sm:$0xff] }
 0x5ee   :  { %v4818_v23 = vmax.f32 %v11497_v55, 0.0  ;;  %v4210_v16 = vpop.f32.mrb[118].mxu1  ;;  %4908 = vrot.lane.b32.xlu1 %v4816_v31, %s11820_s0  ;;  %11785 = vrot.lane.b32.xlu0 %v11784_v25, %s11820_s0  ;;  %v5260_v31 = vld [vmem:[%s21715_s12 + $0x690] sm:$0xff]  ;;  %v5267_v55 = vld [vmem:[%s21715_s12 + $0x6c8] sm:$0xff] }
 0x5ef   :  { %v11498_v38 = vadd.f32 %v4210_v16, %v16944_v36  ;;  %v4212_v24 = vpop.f32.mrb[119].mxu1  ;;  %9936 = vmatpush1.bf16.msra.mxu0 %v9935_v49  ;;  %10684 = vmatpush1.bf16.msra.mxu1 %v10683_v33  ;;  %v9947_v49 = vpack.c.bf16 %v5254_v45, %v5250_v28  ;;  %v5262_v33 = vld [vmem:[%s21715_s12 + $0x6a0] sm:$0xff]  ;;  %v5264_v25 = vld [vmem:[%s21715_s12 + $0x6b0] sm:$0xff]  ;;  %v5287_v47 = vld [vmem:[%s21715_s12 + $0x768] sm:$0xff] }
 0x5f0   :  { %v11789_v18 = vpack.i.bf16 %v4818_v23, %v4817_v29  ;;  %v11499_v30 = vadd.f32 %v4212_v24, %v16948_v59  ;;  %9938 = vmatprep.subr.bf16.mxu0 %v9937_v7  ;;  %10686 = vmatprep.subr.bf16.mxu1 %v10685_v15  ;;  %v5271_v15 = vld [vmem:[%s21715_s12 + $0x6e8] sm:$0xff]  ;;  %v9951_v17 = vpack.c.bf16 %v5262_v33, %v5258_v37  ;;  %v5270_v32 = vld [vmem:[%s21715_s12 + $0x6e0] sm:$0xff]  ;;  %v4825_v23 = vmax.f32 %v17085_v40, 0.0  ;;  %v5277_v24 = vld [vmem:[%s21715_s12 + $0x718] sm:$0xff] }
 0x5f1   :  { %v4820_v57 = vmax.f32 %v11498_v38, 0.0  ;;  %v10699_v29 = vpack.c.bf16 %v5264_v25, %v5260_v31  ;;  %v9953_v16 = vpack.c.bf16 %v5271_v15, %v5267_v55  ;;  %v5275_v38 = vld [vmem:[%s21715_s12 + $0x708] sm:$0xff]  ;;  %v5274_v60 = vld [vmem:[%s21715_s12 + $0x700] sm:$0xff]  ;;  %v5288_v28 = vld [vmem:[%s21715_s12 + $0x770] sm:$0xff] }
 0x5f2   :  { %v4821_v3 = vmax.f32 %v11499_v30, 0.0  ;;  %v4216_v10 = vpop.f32.mrb[120].mxu1  ;;  %4923 = vrot.lane.b32.xlu1 %v4819_v46, %s11821_s2  ;;  %11790 = vrot.lane.b32.xlu0 %v11789_v18, %s11821_s2  ;;  %v5279_v40 = vld [vmem:[%s21715_s12 + $0x728] sm:$0xff]  ;;  %v5278_v6 = vld [vmem:[%s21715_s12 + $0x720] sm:$0xff] }
 0x5f3   :  { %v4218_v26 = vpop.f32.mrb[121].mxu1  ;;  %9940 = vmatpush1.bf16.msra.mxu0 %v9939_v48  ;;  %10688 = vmatpush1.bf16.msra.mxu1 %v10687_v35  ;;  %v11500_v53 = vadd.f32 %v4216_v10, %v16944_v36  ;;  %v5263_v36 = vld [vmem:[%s21715_s12 + $0x6a8] sm:$0xff]  ;;  %v10701_v48 = vpack.c.bf16 %v5273_v12, %v5269_v51  ;;  %v5281_v35 = vld [vmem:[%s21715_s12 + $0x738] sm:$0xff]  ;;  %v9957_v46 = vpack.c.bf16 %v5279_v40, %v5275_v38  ;;  %v5276_v30 = vld [vmem:[%s21715_s12 + $0x710] sm:$0xff] }
 0x5f4   :  { %v11794_v58 = vpack.i.bf16 %v4821_v3, %v4820_v57  ;;  %v11501_v1 = vadd.f32 %v4218_v26, %v16948_v59  ;;  %9942 = vmatprep.subr.bf16.mxu0 %v9941_v61  ;;  %10690 = vmatprep.subr.bf16.mxu1 %v10689_v9  ;;  %v5261_v59 = vld [vmem:[%s21715_s12 + $0x698] sm:$0xff]  ;;  %v9949_v56 = vpack.c.bf16 %v5263_v36, %v5259_v21  ;;  %v5280_v9 = vld [vmem:[%s21715_s12 + $0x730] sm:$0xff]  ;;  %v5286_v26 = vld [vmem:[%s21715_s12 + $0x760] sm:$0xff] }
 0x5f5   :  { %v4823_v7 = vmax.f32 %v11500_v53, 0.0  ;;  %v10697_v13 = vpack.c.bf16 %v5265_v52, %v5261_v59  ;;  %v9955_v61 = vpack.c.bf16 %v5270_v32, %v5266_v27  ;;  %v10705_v18 = vpack.c.bf16 %v5281_v35, %v5277_v24  ;;  %v5289_v57 = vld [vmem:[%s21715_s12 + $0x778] sm:$0xff]  ;;  %v5291_v45 = vld [vmem:[%s21715_s12 + $0x788] sm:$0xff]  ;;  %v5290_v44 = vld [vmem:[%s21715_s12 + $0x780] sm:$0xff] }
 0x5f6   :  { %4938 = vrot.lane.b32.xlu1 %v4822_v20, %s11822_s21  ;;  %11795 = vrot.lane.b32.xlu0 %v11794_v58, %s11822_s21  ;;  %v4824_v22 = vmax.f32 %v11501_v1, 0.0  ;;  %v9959_v3 = vpack.c.bf16 %v5278_v6, %v5274_v60  ;;  %v10707_v10 = vpack.c.bf16 %v5280_v9, %v5276_v30  ;;  %v5295_v20 = vld [vmem:[%s21715_s12 + $0x7a8] sm:$0xff]  ;;  %v5293_v58 = vld [vmem:[%s21715_s12 + $0x798] sm:$0xff] }
 0x5f7   :  { %9944 = vmatpush1.bf16.msra.mxu0 %v9943_v41  ;;  %10692 = vmatpush1.bf16.msra.mxu1 %v10691_v0  ;;  %v5282_v41 = vld [vmem:[%s21715_s12 + $0x740] sm:$0xff]  ;;  %v9961_v0 = vpack.c.bf16 %v5287_v47, %v5283_v19  ;;  %v5297_v53 = vld [vmem:[%s21715_s12 + $0x7b8] sm:$0xff]  ;;  %v9965_v36 = vpack.c.bf16 %v5295_v20, %v5291_v45  ;;  %v5292_v52 = vld [vmem:[%s21715_s12 + $0x790] sm:$0xff] }
 0x5f8   :  { %9946 = vmatprep.subr.bf16.mxu0 %v9945_v43  ;;  %10694 = vmatprep.subr.bf16.mxu1 %v10693_v8  ;;  %v10709_v43 = vpack.c.bf16 %v5289_v57, %v5285_v4  ;;  %v5284_v8 = vld [vmem:[%s21715_s12 + $0x750] sm:$0xff]  ;;  %v9963_v1 = vpack.c.bf16 %v5286_v26, %v5282_v41  ;;  %v5294_v21 = vld [vmem:[%s21715_s12 + $0x7a0] sm:$0xff]  ;;  %v10713_v59 = vpack.c.bf16 %v5297_v53, %v5293_v58  ;;  %v5303_v37 = vld [vmem:[%s21715_s12 + $0x7e8] sm:$0xff] }
 0x5f9   :  { %v10711_v2 = vpack.c.bf16 %v5288_v28, %v5284_v8  ;;  %v5301_v33 = vld [vmem:[%s21715_s12 + $0x7d8] sm:$0xff]  ;;  %v5302_v31 = vld [vmem:[%s21715_s12 + $0x7e0] sm:$0xff]  ;;  %v5300_v15 = vld [vmem:[%s21715_s12 + $0x7d0] sm:$0xff] }
 0x5fa   :  { %4952 = vrot.lane.b32.xlu1 %v4824_v22, %s11823_s22  ;;  %4950 = vrot.lane.b32.xlu0 %v4823_v7, %s11823_s22  ;;  %v5305_v7 = vld [vmem:[%s21715_s12 + $0x7f8] sm:$0xff]  ;;  %v9967_v22 = vpack.c.bf16 %v5294_v21, %v5290_v44  ;;  %v5304_v51 = vld [vmem:[%s21715_s12 + $0x7f0] sm:$0xff] }
 0x5fb   :  { %9948 = vmatpush1.bf16.msra.mxu0 %v9947_v49  ;;  %10696 = vmatpush1.bf16.msra.mxu1 %v10695_v5  ;;  %v5296_v49 = vld [vmem:[%s21715_s12 + $0x7b0] sm:$0xff]  ;;  %v5299_v5 = vld [vmem:[%s21715_s12 + $0x7c8] sm:$0xff]  ;;  %v10717_v55 = vpack.c.bf16 %v5305_v7, %v5301_v33  ;;  %v5313_v27 = vld [vmem:[%s21715_s12 + $0x838] sm:$0xff] }
 0x5fc   :  { %9950 = vmatprep.subr.bf16.mxu0 %v9949_v56  ;;  %10698 = vmatprep.subr.bf16.mxu1 %v10697_v13  ;;  %v10715_v56 = vpack.c.bf16 %v5296_v49, %v5292_v52  ;;  %v5298_v13 = vld [vmem:[%s21715_s12 + $0x7c0] sm:$0xff]  ;;  %v9969_v25 = vpack.c.bf16 %v5303_v37, %v5299_v5  ;;  %v5307_v12 = vld [vmem:[%s21715_s12 + $0x808] sm:$0xff]  ;;  %v5308_v40 = vld [vmem:[%s21715_s12 + $0x810] sm:$0xff] }
 0x5fd   :  { %v9971_v32 = vpack.c.bf16 %v5302_v31, %v5298_v13  ;;  %v5306_v14 = vld [vmem:[%s21715_s12 + $0x800] sm:$0xff]  ;;  %v5312_v24 = vld [vmem:[%s21715_s12 + $0x830] sm:$0xff]  ;;  %v5315_v35 = vld [vmem:[%s21715_s12 + $0x848] sm:$0xff] }
 0x5fe   :  { %4954 = vrot.lane.b32.xlu0 %v4825_v23, %s11823_s22  ;;  %v10719_v23 = vpack.c.bf16 %v5304_v51, %v5300_v15  ;;  %v5310_v38 = vld [vmem:[%s21715_s12 + $0x820] sm:$0xff]  ;;  %v5317_v60 = vld [vmem:[%s21715_s12 + $0x858] sm:$0xff]  ;;  %v10723_v19 = vpack.c.bf16 %v5312_v24, %v5308_v40  ;;  %v5316_v41 = vld [vmem:[%s21715_s12 + $0x850] sm:$0xff] }
 0x5ff   :  { %9952 = vmatpush1.bf16.msra.mxu0 %v9951_v17  ;;  %10700 = vmatpush1.bf16.msra.mxu1 %v10699_v29  ;;  %v5311_v17 = vld [vmem:[%s21715_s12 + $0x828] sm:$0xff]  ;;  %v5309_v29 = vld [vmem:[%s21715_s12 + $0x818] sm:$0xff]  ;;  %v9975_v9 = vpack.c.bf16 %v5310_v38, %v5306_v14  ;;  %v5314_v47 = vld [vmem:[%s21715_s12 + $0x840] sm:$0xff] }
 0x600   :  { %9954 = vmatprep.subr.bf16.mxu0 %v9953_v16  ;;  %10702 = vmatprep.subr.bf16.mxu1 %v10701_v48  ;;  %v9973_v16 = vpack.c.bf16 %v5311_v17, %v5307_v12  ;;  %v10721_v48 = vpack.c.bf16 %v5313_v27, %v5309_v29  ;;  %v5321_v6 = vld [vmem:[%s21715_s12 + $0x878] sm:$0xff]  ;;  %v5318_v4 = vld [vmem:[%s21715_s12 + $0x860] sm:$0xff]  ;;  %v5320_v26 = vld [vmem:[%s21715_s12 + $0x870] sm:$0xff] }
 0x601   :  { %v5327_v28 = vld [vmem:[%s21715_s12 + $0x8a8] sm:$0xff]  ;;  %v5325_v45 = vld [vmem:[%s21715_s12 + $0x898] sm:$0xff]  ;;  %v5322_v44 = vld [vmem:[%s21715_s12 + $0x880] sm:$0xff] }
 0x602   :  { %v5329_v20 = vld [vmem:[%s21715_s12 + $0x8b8] sm:$0xff]  ;;  %v5326_v21 = vld [vmem:[%s21715_s12 + $0x8a0] sm:$0xff]  ;;  %v5324_v49 = vld [vmem:[%s21715_s12 + $0x890] sm:$0xff] }
 0x603   :  { %9956 = vmatpush1.bf16.msra.mxu0 %v9955_v61  ;;  %10704 = vmatpush1.bf16.msra.mxu1 %v10703_v50  ;;  %v5319_v50 = vld [vmem:[%s21715_s12 + $0x868] sm:$0xff]  ;;  %v10729_v52 = vpack.c.bf16 %v5329_v20, %v5325_v45  ;;  %v5328_v5 = vld [vmem:[%s21715_s12 + $0x8b0] sm:$0xff]  ;;  %v5337_v13 = vld [vmem:[%s21715_s12 + $0x8f8] sm:$0xff] }
 0x604   :  { %9958 = vmatprep.subr.bf16.mxu0 %v9957_v46  ;;  %10706 = vmatprep.subr.bf16.mxu1 %v10705_v18  ;;  %v4798_v46 = vmax.f32 %v16972_v54, 0.0  ;;  %v5331_v37 = vld [vmem:[%s21715_s12 + $0x8c8] sm:$0xff]  ;;  %v5330_v15 = vld [vmem:[%s21715_s12 + $0x8c0] sm:$0xff]  ;;  %v5332_v27 = vld [vmem:[%s21715_s12 + $0x8d0] sm:$0xff] }
 0x605   :  { %v5334_v51 = vld [vmem:[%s21715_s12 + $0x8e0] sm:$0xff]  ;;  %v5343_v14 = vld [vmem:[%s21715_s12 + $0x928] sm:$0xff]  ;;  %v5341_v38 = vld [vmem:[%s21715_s12 + $0x918] sm:$0xff] }
 0x606   :  { %v5345_v40 = vld [vmem:[%s21715_s12 + $0x938] sm:$0xff]  ;;  %v5346_v45 = vld [vmem:[%s21715_s12 + $0x940] sm:$0xff] }
 0x607   :  { %9960 = vmatpush1.bf16.msra.mxu0 %v9959_v3  ;;  %10708 = vmatpush1.bf16.msra.mxu1 %v10707_v10  ;;  %v9977_v3 = vpack.c.bf16 %v5319_v50, %v5315_v35  ;;  %v10725_v10 = vpack.c.bf16 %v5321_v6, %v5317_v60  ;;  %v9987_v35 = vpack.c.bf16 %v5334_v51, %v5330_v15  ;;  %v5338_v60 = vld [vmem:[%s21715_s12 + $0x900] sm:$0xff] }
 0x608   :  { %9962 = vmatprep.subr.bf16.mxu0 %v9961_v0  ;;  %10710 = vmatprep.subr.bf16.mxu1 %v10709_v43  ;;  %v5323_v0 = vld [vmem:[%s21715_s12 + $0x888] sm:$0xff]  ;;  %v5342_v6 = vld [vmem:[%s21715_s12 + $0x920] sm:$0xff] }
 0x609   :  { %v5350_v20 = vld [vmem:[%s21715_s12 + $0x960] sm:$0xff] }
 0x60a   :  { %v5358_v15 = vld [vmem:[%s21715_s12 + $0x9a0] sm:$0xff] }
 0x60b   :  { %9964 = vmatpush1.bf16.msra.mxu0 %v9963_v1  ;;  %10712 = vmatpush1.bf16.msra.mxu1 %v10711_v2  ;;  %v9979_v1 = vpack.c.bf16 %v5318_v4, %v5314_v47  ;;  %v10727_v2 = vpack.c.bf16 %v5320_v26, %v5316_v41  ;;  %v5344_v47 = vld [vmem:[%s21715_s12 + $0x930] sm:$0xff]  ;;  %v5347_v4 = vld [vmem:[%s21715_s12 + $0x948] sm:$0xff]  ;;  %v5353_v41 = vld [vmem:[%s21715_s12 + $0x978] sm:$0xff] }
 0x60c   :  { %9966 = vmatprep.subr.bf16.mxu0 %v9965_v36  ;;  %10714 = vmatprep.subr.bf16.mxu1 %v10713_v59  ;;  %v9981_v59 = vpack.c.bf16 %v5327_v28, %v5323_v0  ;;  %v9991_v0 = vpack.c.bf16 %v5342_v6, %v5338_v60 }
 0x60f   :  { %9968 = vmatpush1.bf16.msra.mxu0 %v9967_v22  ;;  %10716 = vmatpush1.bf16.msra.mxu1 %v10715_v56  ;;  %v5335_v22 = vld [vmem:[%s21715_s12 + $0x8e8] sm:$0xff]  ;;  %v5333_v56 = vld [vmem:[%s21715_s12 + $0x8d8] sm:$0xff] }
 0x610   :  { %9970 = vmatprep.subr.bf16.mxu0 %v9969_v25  ;;  %10718 = vmatprep.subr.bf16.mxu1 %v10717_v55  ;;  %v9983_v25 = vpack.c.bf16 %v5326_v21, %v5322_v44  ;;  %v10731_v55 = vpack.c.bf16 %v5328_v5, %v5324_v49  ;;  %v9985_v17 = vpack.c.bf16 %v5335_v22, %v5331_v37  ;;  %v5348_v21 = vld [vmem:[%s21715_s12 + $0x950] sm:$0xff]  ;;  %v5359_v5 = vld [vmem:[%s21715_s12 + $0x9a8] sm:$0xff]  ;;  %v5357_v37 = vld [vmem:[%s21715_s12 + $0x998] sm:$0xff] }
 0x611   :  { %v10733_v29 = vpack.c.bf16 %v5337_v13, %v5333_v56  ;;  %v5361_v22 = vld [vmem:[%s21715_s12 + $0x9b8] sm:$0xff]  ;;  %v9995_v13 = vpack.c.bf16 %v5350_v20, %v5346_v45  ;;  %v5375_v20 = vld [vmem:[%s21715_s12 + $0xa28] sm:$0xff] }
 0x613   :  { %9972 = vmatpush1.bf16.msra.mxu0 %v9971_v32  ;;  %10720 = vmatpush1.bf16.msra.mxu1 %v10719_v23  ;;  %v5336_v32 = vld [vmem:[%s21715_s12 + $0x8f0] sm:$0xff]  ;;  %v5339_v23 = vld [vmem:[%s21715_s12 + $0x908] sm:$0xff] }
 0x614   :  { %9974 = vmatprep.subr.bf16.mxu0 %v9973_v16  ;;  %10722 = vmatprep.subr.bf16.mxu1 %v10721_v48  ;;  %v10735_v50 = vpack.c.bf16 %v5336_v32, %v5332_v27  ;;  %v5360_v27 = vld [vmem:[%s21715_s12 + $0x9b0] sm:$0xff]  ;;  %v5363_v32 = vld [vmem:[%s21715_s12 + $0x9c8] sm:$0xff] }
 0x645   :  { %v17390_v39 = vpop.permute.xlu1 %4833 }
 0x64a   :  { %v17440_v43 = vpop.permute.xlu1 %4847 }
 0x64c   :  { %v17407_v61 = vpop.permute.xlu0 %11760 }
 0x64d   :  { %v11763_v18 = vunpack.i.h.bf16 %v17407_v61  ;;  %v11762_v30 = vunpack.i.l.bf16 %v17407_v61 }
 0x64f   :  { %v4835_v57 = vsel %vm1214_vm3, %v11762_v30, %v11763_v18  ;;  %v4961_v54 = vsel %vm1214_vm3, %v4798_v46, %v11762_v30  ;;  %v9989_v30 = vpack.c.bf16 %v5343_v14, %v5339_v23 }
 0x650   :  { %v17442_v8 = vpop.permute.xlu0 %11765  ;;  %6687 = vmatprep.mubr.f32.mxu0 %v4835_v57  ;;  %7539 = vmatprep.mubr.f32.mxu1 %v4835_v57 }
 0x651   :  { %v11768_v58 = vunpack.i.h.bf16 %v17442_v8  ;;  %v11767_v53 = vunpack.i.l.bf16 %v17442_v8  ;;  %6688 = vmatmul.mubr.f32.vlgmr.msra.gmra.mrb[98].mxu0 %v4961_v54  ;;  %7540 = vmatmul.mubr.f32.vlgmr.msra.gmra.mrb[122].mxu1 %v4961_v54  ;;  %v5585_v8 = vld [vmem:[%s21715_s12 + $0x10b8] sm:$0xff] }
 0x652   :  { %9976 = vmatpush1.bf16.msra.mxu0 %v9975_v9  ;;  %10724 = vmatpush1.bf16.msra.mxu1 %v10723_v19  ;;  %v10737_v9 = vpack.c.bf16 %v5345_v40, %v5341_v38  ;;  %v5340_v19 = vld [vmem:[%s21715_s12 + $0x910] sm:$0xff]  ;;  %v5367_v40 = vld [vmem:[%s21715_s12 + $0x9e8] sm:$0xff] }
 0x653   :  { %9978 = vmatprep.subr.bf16.mxu0 %v9977_v3  ;;  %v4849_v36 = vsel %vm1400_vm5, %v11767_v53, %v11768_v58  ;;  %10726 = vmatprep.subr.bf16.mxu1 %v10725_v10  ;;  %v5351_v3 = vld [vmem:[%s21715_s12 + $0x968] sm:$0xff]  ;;  %v5349_v10 = vld [vmem:[%s21715_s12 + $0x958] sm:$0xff]  ;;  %v10739_v28 = vpack.c.bf16 %v5344_v47, %v5340_v19  ;;  %v5366_v19 = vld [vmem:[%s21715_s12 + $0x9e0] sm:$0xff]  ;;  %v10001_v47 = vpack.c.bf16 %v5367_v40, %v5363_v32 }
 0x654   :  { %v17475_v33 = vpop.permute.xlu1 %11770  ;;  %v17477_v7 = vpop.permute.xlu0 %4858  ;;  %6758 = vmatprep.mubr.f32.mxu0 %v4849_v36  ;;  %7610 = vmatprep.mubr.f32.mxu1 %v4849_v36  ;;  %v10741_v44 = vpack.c.bf16 %v5353_v41, %v5349_v10  ;;  %v5352_v36 = vld [vmem:[%s21715_s12 + $0x970] sm:$0xff]  ;;  %v5371_v41 = vld [vmem:[%s21715_s12 + $0xa08] sm:$0xff]  ;;  %v5385_v32 = vld [vmem:[%s21715_s12 + $0xa78] sm:$0xff] }
 0x655   :  { %v11772_v31 = vunpack.i.l.bf16 %v17475_v33  ;;  %v5368_v10 = vld [vmem:[%s21715_s12 + $0x9f0] sm:$0xff] }
 0x656   :  { %9980 = vmatpush1.bf16.msra.mxu0 %v9979_v1  ;;  %10728 = vmatpush1.bf16.msra.mxu1 %v10727_v2  ;;  %v9993_v2 = vpack.c.bf16 %v5351_v3, %v5347_v4  ;;  %v5364_v3 = vld [vmem:[%s21715_s12 + $0x9d0] sm:$0xff] }
 0x657   :  { %v17499_v12 = vsel %vm4864_vm4, %v17477_v7, %v11772_v31  ;;  %9982 = vmatprep.subr.bf16.mxu0 %v9981_v59  ;;  %10730 = vmatprep.subr.bf16.mxu1 %v10729_v52  ;;  %v5355_v59 = vld [vmem:[%s21715_s12 + $0x988] sm:$0xff] }
 0x658   :  { %v17510_v16 = vpop.permute.xlu1 %11775  ;;  %v17512_v48 = vpop.permute.xlu0 %4873  ;;  %v9997_v51 = vpack.c.bf16 %v5359_v5, %v5355_v59  ;;  %v10751_v59 = vpack.c.bf16 %v5368_v10, %v5364_v3  ;;  %v5374_v5 = vld [vmem:[%s21715_s12 + $0xa20] sm:$0xff]  ;;  %v5391_v3 = vld [vmem:[%s21715_s12 + $0xaa8] sm:$0xff]  ;;  %v5389_v10 = vld [vmem:[%s21715_s12 + $0xa98] sm:$0xff] }
 0x659   :  { %v11777_v24 = vunpack.i.l.bf16 %v17510_v16 }
 0x65a   :  { %9984 = vmatpush1.bf16.msra.mxu0 %v9983_v25  ;;  %10732 = vmatpush1.bf16.msra.mxu1 %v10731_v55  ;;  %v10743_v25 = vpack.c.bf16 %v5352_v36, %v5348_v21  ;;  %v5354_v55 = vld [vmem:[%s21715_s12 + $0x980] sm:$0xff] }
 0x65b   :  { %v17534_v46 = vsel %vm4879_vm6, %v17512_v48, %v11777_v24  ;;  %9986 = vmatprep.subr.bf16.mxu0 %v9985_v17  ;;  %10734 = vmatprep.subr.bf16.mxu1 %v10733_v29  ;;  %v10745_v17 = vpack.c.bf16 %v5361_v22, %v5357_v37  ;;  %v5356_v29 = vld [vmem:[%s21715_s12 + $0x990] sm:$0xff]  ;;  %v9999_v6 = vpack.c.bf16 %v5358_v15, %v5354_v55  ;;  %v5379_v55 = vld [vmem:[%s21715_s12 + $0xa48] sm:$0xff] }
 0x65c   :  { %v17545_v57 = vpop.permute.xlu1 %11780  ;;  %v17547_v54 = vpop.permute.xlu0 %4888  ;;  %v10005_v37 = vpack.c.bf16 %v5375_v20, %v5371_v41  ;;  %v5393_v41 = vld [vmem:[%s21715_s12 + $0xab8] sm:$0xff] }
 0x65d   :  { %v11782_v26 = vunpack.i.l.bf16 %v17545_v57 }
 0x65e   :  { %9988 = vmatpush1.bf16.msra.mxu0 %v9987_v35  ;;  %10736 = vmatpush1.bf16.msra.mxu1 %v10735_v50  ;;  %v5365_v35 = vld [vmem:[%s21715_s12 + $0x9d8] sm:$0xff] }
 0x65f   :  { %v17569_v1 = vsel %vm4894_vm7, %v17547_v54, %v11782_v26  ;;  %9990 = vmatprep.subr.bf16.mxu0 %v9989_v30  ;;  %10738 = vmatprep.subr.bf16.mxu1 %v10737_v9  ;;  %v5369_v50 = vld [vmem:[%s21715_s12 + $0x9f8] sm:$0xff]  ;;  %v10747_v30 = vpack.c.bf16 %v5360_v27, %v5356_v29  ;;  %v5362_v9 = vld [vmem:[%s21715_s12 + $0x9c0] sm:$0xff]  ;;  %v5383_v29 = vld [vmem:[%s21715_s12 + $0xa68] sm:$0xff] }
 0x660   :  { %v4909_v52 = vpop.permute.xlu1 %4908  ;;  %v17580_v49 = vpop.permute.xlu0 %11785  ;;  %v10749_v4 = vpack.c.bf16 %v5369_v50, %v5365_v35  ;;  %v10003_v36 = vpack.c.bf16 %v5366_v19, %v5362_v9  ;;  %v5381_v27 = vld [vmem:[%s21715_s12 + $0xa58] sm:$0xff]  ;;  %v5378_v50 = vld [vmem:[%s21715_s12 + $0xa40] sm:$0xff]  ;;  %v5380_v19 = vld [vmem:[%s21715_s12 + $0xa50] sm:$0xff] }
 0x661   :  { %v11788_v56 = vunpack.i.h.bf16 %v17580_v49  ;;  %v10757_v9 = vpack.c.bf16 %v5385_v32, %v5381_v27  ;;  %v5394_v32 = vld [vmem:[%s21715_s12 + $0xac0] sm:$0xff] }
 0x662   :  { %9992 = vmatpush1.bf16.msra.mxu0 %v9991_v0  ;;  %10740 = vmatpush1.bf16.msra.mxu1 %v10739_v28 }
 0x663   :  { %9994 = vmatprep.subr.bf16.mxu0 %v9993_v2  ;;  %10742 = vmatprep.subr.bf16.mxu1 %v10741_v44  ;;  %v17610_v23 = vsel %vm4910_vm8, %v11788_v56, %v4909_v52  ;;  %v5373_v2 = vld [vmem:[%s21715_s12 + $0xa18] sm:$0xff]  ;;  %v5370_v52 = vld [vmem:[%s21715_s12 + $0xa00] sm:$0xff] }
 0x664   :  { %v4924_v14 = vpop.permute.xlu1 %4923  ;;  %v17612_v38 = vpop.permute.xlu0 %11790  ;;  %v5377_v44 = vld [vmem:[%s21715_s12 + $0xa38] sm:$0xff]  ;;  %v10007_v40 = vpack.c.bf16 %v5374_v5, %v5370_v52  ;;  %v10761_v52 = vpack.c.bf16 %v5393_v41, %v5389_v10  ;;  %v5388_v5 = vld [vmem:[%s21715_s12 + $0xa90] sm:$0xff]  ;;  %v5402_v41 = vld [vmem:[%s21715_s12 + $0xb00] sm:$0xff] }
 0x665   :  { %v11793_v60 = vunpack.i.h.bf16 %v17612_v38  ;;  %v10753_v22 = vpack.c.bf16 %v5377_v44, %v5373_v2  ;;  %v5386_v44 = vld [vmem:[%s21715_s12 + $0xa80] sm:$0xff] }
 0x666   :  { %9996 = vmatpush1.bf16.msra.mxu0 %v9995_v13  ;;  %10744 = vmatpush1.bf16.msra.mxu1 %v10743_v25  ;;  %v5372_v13 = vld [vmem:[%s21715_s12 + $0xa10] sm:$0xff] }
 0x667   :  { %9998 = vmatprep.subr.bf16.mxu0 %v9997_v51  ;;  %10746 = vmatprep.subr.bf16.mxu1 %v10745_v17  ;;  %v17642_v0 = vsel %vm4925_vm9, %v11793_v60, %v4924_v14  ;;  %v5376_v25 = vld [vmem:[%s21715_s12 + $0xa30] sm:$0xff] }
 0x668   :  { %v17644_v28 = vpop.permute.xlu1 %4938  ;;  %v17646_v45 = vpop.permute.xlu0 %11795  ;;  %v10755_v35 = vpack.c.bf16 %v5376_v25, %v5372_v13  ;;  %v5399_v13 = vld [vmem:[%s21715_s12 + $0xae8] sm:$0xff]  ;;  %v5397_v25 = vld [vmem:[%s21715_s12 + $0xad8] sm:$0xff] }
 0x669   :  { %v11798_v21 = vunpack.i.h.bf16 %v17646_v45 }
 0x66a   :  { %10000 = vmatpush1.bf16.msra.mxu0 %v9999_v6  ;;  %10748 = vmatpush1.bf16.msra.mxu1 %v10747_v30  ;;  %v5382_v6 = vld [vmem:[%s21715_s12 + $0xa60] sm:$0xff]  ;;  %v10009_v30 = vpack.c.bf16 %v5383_v29, %v5379_v55  ;;  %v5401_v55 = vld [vmem:[%s21715_s12 + $0xaf8] sm:$0xff] }
 0x66b   :  { %10002 = vmatprep.subr.bf16.mxu0 %v10001_v47  ;;  %10750 = vmatprep.subr.bf16.mxu1 %v10749_v4  ;;  %v17677_v15 = vsel %vm4940_vm10, %v11798_v21, %v17644_v28  ;;  %v5384_v47 = vld [vmem:[%s21715_s12 + $0xa70] sm:$0xff]  ;;  %v5387_v4 = vld [vmem:[%s21715_s12 + $0xa88] sm:$0xff]  ;;  %v10011_v20 = vpack.c.bf16 %v5382_v6, %v5378_v50  ;;  %v10765_v50 = vpack.c.bf16 %v5401_v55, %v5397_v25  ;;  %v5410_v55 = vld [vmem:[%s21715_s12 + $0xb40] sm:$0xff] }
 0x66c   :  { %v17679_v51 = vpop.permute.xlu1 %4952  ;;  %v17681_v17 = vpop.permute.xlu0 %4950  ;;  %v10759_v2 = vpack.c.bf16 %v5384_v47, %v5380_v19  ;;  %v5396_v6 = vld [vmem:[%s21715_s12 + $0xad0] sm:$0xff]  ;;  %v5407_v19 = vld [vmem:[%s21715_s12 + $0xb28] sm:$0xff]  ;;  %v5405_v47 = vld [vmem:[%s21715_s12 + $0xb18] sm:$0xff] }
 0x66d   :  { %v17695_v14 = vsel %vm4956_vm11, %v17681_v17, %v17679_v51 }
 0x66e   :  { %10004 = vmatpush1.bf16.msra.mxu0 %v10003_v36  ;;  %10752 = vmatpush1.bf16.msra.mxu1 %v10751_v59  ;;  %v5390_v36 = vld [vmem:[%s21715_s12 + $0xaa0] sm:$0xff]  ;;  %v10013_v59 = vpack.c.bf16 %v5391_v3, %v5387_v4  ;;  %v5409_v4 = vld [vmem:[%s21715_s12 + $0xb38] sm:$0xff] }
 0x66f   :  { %10006 = vmatprep.subr.bf16.mxu0 %v10005_v37  ;;  %10754 = vmatprep.subr.bf16.mxu1 %v10753_v22  ;;  %v5392_v37 = vld [vmem:[%s21715_s12 + $0xab0] sm:$0xff]  ;;  %v5395_v22 = vld [vmem:[%s21715_s12 + $0xac8] sm:$0xff]  ;;  %v10015_v29 = vpack.c.bf16 %v5390_v36, %v5386_v44  ;;  %v10769_v44 = vpack.c.bf16 %v5409_v4, %v5405_v47  ;;  %v5418_v4 = vld [vmem:[%s21715_s12 + $0xb80] sm:$0xff] }
 0x670   :  { %v10763_v27 = vpack.c.bf16 %v5392_v37, %v5388_v5  ;;  %v5404_v36 = vld [vmem:[%s21715_s12 + $0xb10] sm:$0xff]  ;;  %v5415_v5 = vld [vmem:[%s21715_s12 + $0xb68] sm:$0xff]  ;;  %v5413_v37 = vld [vmem:[%s21715_s12 + $0xb58] sm:$0xff] }
 0x672   :  { %10008 = vmatpush1.bf16.msra.mxu0 %v10007_v40  ;;  %10756 = vmatpush1.bf16.msra.mxu1 %v10755_v35  ;;  %v5398_v40 = vld [vmem:[%s21715_s12 + $0xae0] sm:$0xff]  ;;  %v10017_v35 = vpack.c.bf16 %v5399_v13, %v5395_v22  ;;  %v5417_v22 = vld [vmem:[%s21715_s12 + $0xb78] sm:$0xff] }
 0x673   :  { %10010 = vmatprep.subr.bf16.mxu0 %v10009_v30  ;;  %10758 = vmatprep.subr.bf16.mxu1 %v10757_v9  ;;  %v5400_v30 = vld [vmem:[%s21715_s12 + $0xaf0] sm:$0xff]  ;;  %v5403_v9 = vld [vmem:[%s21715_s12 + $0xb08] sm:$0xff]  ;;  %v10019_v3 = vpack.c.bf16 %v5398_v40, %v5394_v32  ;;  %v10773_v32 = vpack.c.bf16 %v5417_v22, %v5413_v37  ;;  %v5426_v22 = vld [vmem:[%s21715_s12 + $0xbc0] sm:$0xff] }
 0x674   :  { %v10767_v10 = vpack.c.bf16 %v5400_v30, %v5396_v6  ;;  %v5412_v40 = vld [vmem:[%s21715_s12 + $0xb50] sm:$0xff]  ;;  %v5423_v6 = vld [vmem:[%s21715_s12 + $0xba8] sm:$0xff]  ;;  %v5421_v30 = vld [vmem:[%s21715_s12 + $0xb98] sm:$0xff] }
 0x676   :  { %10012 = vmatpush1.bf16.msra.mxu0 %v10011_v20  ;;  %10760 = vmatpush1.bf16.msra.mxu1 %v10759_v2  ;;  %v5406_v20 = vld [vmem:[%s21715_s12 + $0xb20] sm:$0xff]  ;;  %v10021_v2 = vpack.c.bf16 %v5407_v19, %v5403_v9  ;;  %v5425_v9 = vld [vmem:[%s21715_s12 + $0xbb8] sm:$0xff] }
 0x677   :  { %10014 = vmatprep.subr.bf16.mxu0 %v10013_v59  ;;  %10762 = vmatprep.subr.bf16.mxu1 %v10761_v52  ;;  %v5408_v59 = vld [vmem:[%s21715_s12 + $0xb30] sm:$0xff]  ;;  %v5411_v52 = vld [vmem:[%s21715_s12 + $0xb48] sm:$0xff]  ;;  %v10023_v13 = vpack.c.bf16 %v5406_v20, %v5402_v41  ;;  %v10777_v41 = vpack.c.bf16 %v5425_v9, %v5421_v30 }
 0x678   :  { %v10771_v25 = vpack.c.bf16 %v5408_v59, %v5404_v36  ;;  %v5420_v20 = vld [vmem:[%s21715_s12 + $0xb90] sm:$0xff]  ;;  %v5431_v36 = vld [vmem:[%s21715_s12 + $0xbe8] sm:$0xff]  ;;  %v5429_v59 = vld [vmem:[%s21715_s12 + $0xbd8] sm:$0xff] }
 0x67a   :  { %10016 = vmatpush1.bf16.msra.mxu0 %v10015_v29  ;;  %10764 = vmatpush1.bf16.msra.mxu1 %v10763_v27  ;;  %v5414_v29 = vld [vmem:[%s21715_s12 + $0xb60] sm:$0xff]  ;;  %v10025_v27 = vpack.c.bf16 %v5415_v5, %v5411_v52  ;;  %v5433_v52 = vld [vmem:[%s21715_s12 + $0xbf8] sm:$0xff] }
 0x67b   :  { %10018 = vmatprep.subr.bf16.mxu0 %v10017_v35  ;;  %10766 = vmatprep.subr.bf16.mxu1 %v10765_v50  ;;  %v5416_v35 = vld [vmem:[%s21715_s12 + $0xb70] sm:$0xff]  ;;  %v5419_v50 = vld [vmem:[%s21715_s12 + $0xb88] sm:$0xff]  ;;  %v10027_v19 = vpack.c.bf16 %v5414_v29, %v5410_v55  ;;  %v10781_v55 = vpack.c.bf16 %v5433_v52, %v5429_v59  ;;  %v4836_v59 = vsel %vm1214_vm3, %v11763_v18, %v17390_v39  ;;  %vm8488_vm3 = vcmask 130048  }
 0x67c   :  { %v10775_v47 = vpack.c.bf16 %v5416_v35, %v5412_v40  ;;  %v5428_v29 = vld [vmem:[%s21715_s12 + $0xbd0] sm:$0xff]  ;;  %v5439_v40 = vld [vmem:[%s21715_s12 + $0xc28] sm:$0xff]  ;;  %v5437_v35 = vld [vmem:[%s21715_s12 + $0xc18] sm:$0xff]  ;;  %v4962_v61 = vsel %vm1400_vm5, %v4836_v59, %v11767_v53  ;;  %v4963_v53 = vsel %vm4864_vm4, %v17440_v43, %v17477_v7 }
 0x67d   :  { %v5454_v7 = vld [vmem:[%s21715_s12 + $0xca0] sm:$0xff] }
 0x67e   :  { %10020 = vmatpush1.bf16.msra.mxu0 %v10019_v3  ;;  %10768 = vmatpush1.bf16.msra.mxu1 %v10767_v10  ;;  %v5422_v3 = vld [vmem:[%s21715_s12 + $0xba0] sm:$0xff]  ;;  %v10029_v10 = vpack.c.bf16 %v5423_v6, %v5419_v50  ;;  %v5441_v50 = vld [vmem:[%s21715_s12 + $0xc38] sm:$0xff] }
 0x67f   :  { %10022 = vmatprep.subr.bf16.mxu0 %v10021_v2  ;;  %10770 = vmatprep.subr.bf16.mxu1 %v10769_v44  ;;  %v5424_v2 = vld [vmem:[%s21715_s12 + $0xbb0] sm:$0xff]  ;;  %v5427_v44 = vld [vmem:[%s21715_s12 + $0xbc8] sm:$0xff]  ;;  %v10031_v5 = vpack.c.bf16 %v5422_v3, %v5418_v4  ;;  %v5438_v4 = vld [vmem:[%s21715_s12 + $0xc20] sm:$0xff] }
 0x680   :  { %v10779_v37 = vpack.c.bf16 %v5424_v2, %v5420_v20  ;;  %v5436_v3 = vld [vmem:[%s21715_s12 + $0xc10] sm:$0xff]  ;;  %v5447_v20 = vld [vmem:[%s21715_s12 + $0xc68] sm:$0xff]  ;;  %v5445_v2 = vld [vmem:[%s21715_s12 + $0xc58] sm:$0xff] }
 0x682   :  { %10024 = vmatpush1.bf16.msra.mxu0 %v10023_v13  ;;  %10772 = vmatpush1.bf16.msra.mxu1 %v10771_v25  ;;  %v5430_v13 = vld [vmem:[%s21715_s12 + $0xbe0] sm:$0xff]  ;;  %v10033_v25 = vpack.c.bf16 %v5431_v36, %v5427_v44  ;;  %v5449_v44 = vld [vmem:[%s21715_s12 + $0xc78] sm:$0xff] }
 0x683   :  { %10026 = vmatprep.subr.bf16.mxu0 %v10025_v27  ;;  %10774 = vmatprep.subr.bf16.mxu1 %v10773_v32  ;;  %v5432_v27 = vld [vmem:[%s21715_s12 + $0xbf0] sm:$0xff]  ;;  %v5435_v32 = vld [vmem:[%s21715_s12 + $0xc08] sm:$0xff]  ;;  %v10035_v6 = vpack.c.bf16 %v5430_v13, %v5426_v22  ;;  %v10789_v18 = vpack.c.bf16 %v5449_v44, %v5445_v2  ;;  %v5458_v2 = vld [vmem:[%s21715_s12 + $0xcc0] sm:$0xff] }
 0x684   :  { %v10783_v30 = vpack.c.bf16 %v5432_v27, %v5428_v29  ;;  %v10037_v9 = vpack.c.bf16 %v5439_v40, %v5435_v32  ;;  %v5444_v22 = vld [vmem:[%s21715_s12 + $0xc50] sm:$0xff]  ;;  %v5453_v29 = vld [vmem:[%s21715_s12 + $0xc98] sm:$0xff]  ;;  %v5462_v44 = vld [vmem:[%s21715_s12 + $0xce0] sm:$0xff] }
 0x685   :  { %v5448_v13 = vld [vmem:[%s21715_s12 + $0xc70] sm:$0xff]  ;;  %v5457_v27 = vld [vmem:[%s21715_s12 + $0xcb8] sm:$0xff] }
 0x686   :  { %10028 = vmatpush1.bf16.msra.mxu0 %v10027_v19  ;;  %10776 = vmatpush1.bf16.msra.mxu1 %v10775_v47  ;;  %v10785_v19 = vpack.c.bf16 %v5441_v50, %v5437_v35  ;;  %v5434_v47 = vld [vmem:[%s21715_s12 + $0xc00] sm:$0xff]  ;;  %v10791_v40 = vpack.c.bf16 %v5448_v13, %v5444_v22  ;;  %v5469_v22 = vld [vmem:[%s21715_s12 + $0xd18] sm:$0xff] }
 0x687   :  { %10030 = vmatprep.subr.bf16.mxu0 %v10029_v10  ;;  %10778 = vmatprep.subr.bf16.mxu1 %v10777_v41  ;;  %v5440_v10 = vld [vmem:[%s21715_s12 + $0xc30] sm:$0xff]  ;;  %v5443_v41 = vld [vmem:[%s21715_s12 + $0xc48] sm:$0xff]  ;;  %v10039_v36 = vpack.c.bf16 %v5438_v4, %v5434_v47  ;;  %v5450_v50 = vld [vmem:[%s21715_s12 + $0xc80] sm:$0xff] }
 0x688   :  { %v10787_v52 = vpack.c.bf16 %v5440_v10, %v5436_v3  ;;  %v10041_v39 = vpack.c.bf16 %v5447_v20, %v5443_v41  ;;  %v5463_v47 = vld [vmem:[%s21715_s12 + $0xce8] sm:$0xff]  ;;  %v5461_v4 = vld [vmem:[%s21715_s12 + $0xcd8] sm:$0xff]  ;;  %v10047_v10 = vpack.c.bf16 %v5454_v7, %v5450_v50 }
 0x689   :  { %v5465_v3 = vld [vmem:[%s21715_s12 + $0xcf8] sm:$0xff] }
 0x68a   :  { %10032 = vmatpush1.bf16.msra.mxu0 %v10031_v5  ;;  %10780 = vmatpush1.bf16.msra.mxu1 %v10779_v37  ;;  %v5442_v5 = vld [vmem:[%s21715_s12 + $0xc40] sm:$0xff]  ;;  %v10797_v59 = vpack.c.bf16 %v5465_v3, %v5461_v4  ;;  %v5481_v50 = vld [vmem:[%s21715_s12 + $0xd78] sm:$0xff]  ;;  %v5480_v3 = vld [vmem:[%s21715_s12 + $0xd70] sm:$0xff] }
 0x68b   :  { %10034 = vmatprep.subr.bf16.mxu0 %v10033_v25  ;;  %10782 = vmatprep.subr.bf16.mxu1 %v10781_v55  ;;  %v5446_v37 = vld [vmem:[%s21715_s12 + $0xc60] sm:$0xff]  ;;  %v5451_v25 = vld [vmem:[%s21715_s12 + $0xc88] sm:$0xff] }
 0x68c   :  { %v5455_v55 = vld [vmem:[%s21715_s12 + $0xca8] sm:$0xff]  ;;  %v10043_v32 = vpack.c.bf16 %v5446_v37, %v5442_v5 }
 0x68d   :  { %v10045_v35 = vpack.c.bf16 %v5455_v55, %v5451_v25  ;;  %v5467_v5 = vld [vmem:[%s21715_s12 + $0xd08] sm:$0xff]  ;;  %v5466_v25 = vld [vmem:[%s21715_s12 + $0xd00] sm:$0xff] }
 0x68e   :  { %10036 = vmatpush1.bf16.msra.mxu0 %v10035_v6  ;;  %10784 = vmatpush1.bf16.msra.mxu1 %v10783_v30  ;;  %v5452_v6 = vld [vmem:[%s21715_s12 + $0xc90] sm:$0xff]  ;;  %v10793_v30 = vpack.c.bf16 %v5457_v27, %v5453_v29  ;;  %v5471_v37 = vld [vmem:[%s21715_s12 + $0xd28] sm:$0xff]  ;;  %v5470_v55 = vld [vmem:[%s21715_s12 + $0xd20] sm:$0xff] }
 0x68f   :  { %10038 = vmatprep.subr.bf16.mxu0 %v10037_v9  ;;  %10786 = vmatprep.subr.bf16.mxu1 %v10785_v19  ;;  %v5456_v9 = vld [vmem:[%s21715_s12 + $0xcb0] sm:$0xff]  ;;  %v5459_v19 = vld [vmem:[%s21715_s12 + $0xcc8] sm:$0xff]  ;;  %v10053_v13 = vpack.c.bf16 %v5471_v37, %v5467_v5  ;;  %v10055_v7 = vpack.c.bf16 %v5470_v55, %v5466_v25  ;;  %v5486_v5 = vld [vmem:[%s21715_s12 + $0xda0] sm:$0xff] }
 0x690   :  { %v10795_v41 = vpack.c.bf16 %v5456_v9, %v5452_v6  ;;  %v10049_v20 = vpack.c.bf16 %v5463_v47, %v5459_v19  ;;  %v5472_v27 = vld [vmem:[%s21715_s12 + $0xd30] sm:$0xff]  ;;  %v5474_v9 = vld [vmem:[%s21715_s12 + $0xd40] sm:$0xff]  ;;  %v5497_v25 = vld [vmem:[%s21715_s12 + $0xdf8] sm:$0xff] }
 0x691   :  { %6759 = vmatmul.mubr.f32.vlgmr.msra.gmra.mrb[98].mxu0 %v4962_v61  ;;  %7611 = vmatmul.mubr.f32.vlgmr.msra.gmra.mrb[122].mxu1 %v4962_v61  ;;  %v5473_v61 = vld [vmem:[%s21715_s12 + $0xd38] sm:$0xff]  ;;  %v5478_v19 = vld [vmem:[%s21715_s12 + $0xd60] sm:$0xff]  ;;  %v5476_v47 = vld [vmem:[%s21715_s12 + $0xd50] sm:$0xff] }
 0x692   :  { %10040 = vmatpush1.bf16.msra.mxu0 %v10039_v36  ;;  %6829 = vmatprep.mubr.f32.mxu0 %v4963_v53  ;;  %v5460_v36 = vld [vmem:[%s21715_s12 + $0xcd0] sm:$0xff]  ;;  %v10801_v29 = vpack.c.bf16 %v5473_v61, %v5469_v22 }
 0x693   :  { %10788 = vmatpush1.bf16.msra.mxu1 %v10787_v52  ;;  %7681 = vmatprep.mubr.f32.mxu1 %v4963_v53  ;;  %v5464_v52 = vld [vmem:[%s21715_s12 + $0xcf0] sm:$0xff] }
 0x694   :  { %10042 = vmatprep.subr.bf16.mxu0 %v10041_v39  ;;  %10790 = vmatprep.subr.bf16.mxu1 %v10789_v18  ;;  %v10051_v39 = vpack.c.bf16 %v5462_v44, %v5458_v2  ;;  %v10799_v18 = vpack.c.bf16 %v5464_v52, %v5460_v36  ;;  %v5468_v53 = vld [vmem:[%s21715_s12 + $0xd10] sm:$0xff]  ;;  %v5489_v2 = vld [vmem:[%s21715_s12 + $0xdb8] sm:$0xff]  ;;  %v10059_v44 = vpack.c.bf16 %v5478_v19, %v5474_v9  ;;  %v5482_v52 = vld [vmem:[%s21715_s12 + $0xd80] sm:$0xff] }
 0x695   :  { %v10803_v6 = vpack.c.bf16 %v5472_v27, %v5468_v53  ;;  %v10807_v36 = vpack.c.bf16 %v5480_v3, %v5476_v47  ;;  %v5484_v37 = vld [vmem:[%s21715_s12 + $0xd90] sm:$0xff]  ;;  %v10063_v55 = vpack.c.bf16 %v5486_v5, %v5482_v52  ;;  %v5490_v27 = vld [vmem:[%s21715_s12 + $0xdc0] sm:$0xff]  ;;  %v5505_v9 = vld [vmem:[%s21715_s12 + $0xe38] sm:$0xff] }
 0x696   :  { %10044 = vmatpush1.bf16.msra.mxu0 %v10043_v32  ;;  %v5475_v32 = vld [vmem:[%s21715_s12 + $0xd48] sm:$0xff]  ;;  %v5488_v61 = vld [vmem:[%s21715_s12 + $0xdb0] sm:$0xff]  ;;  %v5498_v3 = vld [vmem:[%s21715_s12 + $0xe00] sm:$0xff] }
 0x697   :  { %10792 = vmatpush1.bf16.msra.mxu1 %v10791_v40  ;;  %10046 = vmatprep.subr.bf16.mxu0 %v10045_v35  ;;  %v5479_v40 = vld [vmem:[%s21715_s12 + $0xd68] sm:$0xff]  ;;  %v5477_v35 = vld [vmem:[%s21715_s12 + $0xd58] sm:$0xff]  ;;  %v10811_v53 = vpack.c.bf16 %v5488_v61, %v5484_v37  ;;  %v5506_v61 = vld [vmem:[%s21715_s12 + $0xe40] sm:$0xff] }
 0x698   :  { %10794 = vmatprep.subr.bf16.mxu1 %v10793_v30  ;;  %v10057_v30 = vpack.c.bf16 %v5479_v40, %v5475_v32  ;;  %v10805_v4 = vpack.c.bf16 %v5481_v50, %v5477_v35  ;;  %v5494_v32 = vld [vmem:[%s21715_s12 + $0xde0] sm:$0xff]  ;;  %v5492_v40 = vld [vmem:[%s21715_s12 + $0xdd0] sm:$0xff]  ;;  %v5513_v52 = vld [vmem:[%s21715_s12 + $0xe78] sm:$0xff] }
 0x699   :  { %v5496_v50 = vld [vmem:[%s21715_s12 + $0xdf0] sm:$0xff]  ;;  %v10067_v19 = vpack.c.bf16 %v5494_v32, %v5490_v27  ;;  %v5521_v27 = vld [vmem:[%s21715_s12 + $0xeb8] sm:$0xff] }
 0x69a   :  { %10048 = vmatpush1.bf16.msra.mxu0 %v10047_v10  ;;  %v5483_v10 = vld [vmem:[%s21715_s12 + $0xd88] sm:$0xff]  ;;  %v10815_v47 = vpack.c.bf16 %v5496_v50, %v5492_v40  ;;  %v5514_v50 = vld [vmem:[%s21715_s12 + $0xe80] sm:$0xff] }
 0x69b   :  { %10796 = vmatpush1.bf16.msra.mxu1 %v10795_v41  ;;  %10050 = vmatprep.subr.bf16.mxu0 %v10049_v20  ;;  %v5487_v41 = vld [vmem:[%s21715_s12 + $0xda8] sm:$0xff]  ;;  %v5485_v20 = vld [vmem:[%s21715_s12 + $0xd98] sm:$0xff] }
 0x69c   :  { %10798 = vmatprep.subr.bf16.mxu1 %v10797_v59  ;;  %v10061_v59 = vpack.c.bf16 %v5487_v41, %v5483_v10  ;;  %v10809_v22 = vpack.c.bf16 %v5489_v2, %v5485_v20  ;;  %v5502_v10 = vld [vmem:[%s21715_s12 + $0xe20] sm:$0xff]  ;;  %v5500_v41 = vld [vmem:[%s21715_s12 + $0xe10] sm:$0xff] }
 0x69d   :  { %v5504_v2 = vld [vmem:[%s21715_s12 + $0xe30] sm:$0xff]  ;;  %v10071_v5 = vpack.c.bf16 %v5502_v10, %v5498_v3  ;;  %v5529_v3 = vld [vmem:[%s21715_s12 + $0xef8] sm:$0xff] }
 0x69e   :  { %10052 = vmatpush1.bf16.msra.mxu0 %v10051_v39  ;;  %v5491_v39 = vld [vmem:[%s21715_s12 + $0xdc8] sm:$0xff]  ;;  %v10819_v37 = vpack.c.bf16 %v5504_v2, %v5500_v41  ;;  %v5522_v2 = vld [vmem:[%s21715_s12 + $0xec0] sm:$0xff] }
 0x69f   :  { %10800 = vmatpush1.bf16.msra.mxu1 %v10799_v18  ;;  %10054 = vmatprep.subr.bf16.mxu0 %v10053_v13  ;;  %v5495_v18 = vld [vmem:[%s21715_s12 + $0xde8] sm:$0xff]  ;;  %v5493_v13 = vld [vmem:[%s21715_s12 + $0xdd8] sm:$0xff] }
 0x6a0   :  { %10802 = vmatprep.subr.bf16.mxu1 %v10801_v29  ;;  %v10065_v29 = vpack.c.bf16 %v5495_v18, %v5491_v39  ;;  %v10813_v35 = vpack.c.bf16 %v5497_v25, %v5493_v13  ;;  %v5510_v39 = vld [vmem:[%s21715_s12 + $0xe60] sm:$0xff]  ;;  %v5508_v18 = vld [vmem:[%s21715_s12 + $0xe50] sm:$0xff] }
 0x6a1   :  { %v5512_v25 = vld [vmem:[%s21715_s12 + $0xe70] sm:$0xff]  ;;  %v10075_v32 = vpack.c.bf16 %v5510_v39, %v5506_v61  ;;  %v5537_v61 = vld [vmem:[%s21715_s12 + $0xf38] sm:$0xff] }
 0x6a2   :  { %10056 = vmatpush1.bf16.msra.mxu0 %v10055_v7  ;;  %v5499_v7 = vld [vmem:[%s21715_s12 + $0xe08] sm:$0xff]  ;;  %v10823_v40 = vpack.c.bf16 %v5512_v25, %v5508_v18  ;;  %v5530_v25 = vld [vmem:[%s21715_s12 + $0xf00] sm:$0xff] }
 0x6a3   :  { %10804 = vmatpush1.bf16.msra.mxu1 %v10803_v6  ;;  %10058 = vmatprep.subr.bf16.mxu0 %v10057_v30  ;;  %v5503_v6 = vld [vmem:[%s21715_s12 + $0xe28] sm:$0xff]  ;;  %v5501_v30 = vld [vmem:[%s21715_s12 + $0xe18] sm:$0xff] }
 0x6a4   :  { %10806 = vmatprep.subr.bf16.mxu1 %v10805_v4  ;;  %v10069_v4 = vpack.c.bf16 %v5503_v6, %v5499_v7  ;;  %v10817_v20 = vpack.c.bf16 %v5505_v9, %v5501_v30  ;;  %v5518_v7 = vld [vmem:[%s21715_s12 + $0xea0] sm:$0xff]  ;;  %v5516_v6 = vld [vmem:[%s21715_s12 + $0xe90] sm:$0xff] }
 0x6a5   :  { %v5520_v9 = vld [vmem:[%s21715_s12 + $0xeb0] sm:$0xff]  ;;  %v10079_v10 = vpack.c.bf16 %v5518_v7, %v5514_v50  ;;  %v5545_v50 = vld [vmem:[%s21715_s12 + $0xf78] sm:$0xff] }
 0x6a6   :  { %10060 = vmatpush1.bf16.msra.mxu0 %v10059_v44  ;;  %v5507_v44 = vld [vmem:[%s21715_s12 + $0xe48] sm:$0xff]  ;;  %v10827_v41 = vpack.c.bf16 %v5520_v9, %v5516_v6  ;;  %v5538_v9 = vld [vmem:[%s21715_s12 + $0xf40] sm:$0xff] }
 0x6a7   :  { %10808 = vmatpush1.bf16.msra.mxu1 %v10807_v36  ;;  %10062 = vmatprep.subr.bf16.mxu0 %v10061_v59  ;;  %v5511_v36 = vld [vmem:[%s21715_s12 + $0xe68] sm:$0xff]  ;;  %v5509_v59 = vld [vmem:[%s21715_s12 + $0xe58] sm:$0xff] }
 0x6a8   :  { %10810 = vmatprep.subr.bf16.mxu1 %v10809_v22  ;;  %v10073_v22 = vpack.c.bf16 %v5511_v36, %v5507_v44  ;;  %v10821_v13 = vpack.c.bf16 %v5513_v52, %v5509_v59  ;;  %v5526_v44 = vld [vmem:[%s21715_s12 + $0xee0] sm:$0xff]  ;;  %v5524_v36 = vld [vmem:[%s21715_s12 + $0xed0] sm:$0xff] }
 0x6a9   :  { %v5528_v52 = vld [vmem:[%s21715_s12 + $0xef0] sm:$0xff]  ;;  %v10083_v39 = vpack.c.bf16 %v5526_v44, %v5522_v2  ;;  %v5553_v2 = vld [vmem:[%s21715_s12 + $0xfb8] sm:$0xff] }
 0x6aa   :  { %10064 = vmatpush1.bf16.msra.mxu0 %v10063_v55  ;;  %v5515_v55 = vld [vmem:[%s21715_s12 + $0xe88] sm:$0xff]  ;;  %v10831_v18 = vpack.c.bf16 %v5528_v52, %v5524_v36  ;;  %v5546_v52 = vld [vmem:[%s21715_s12 + $0xf80] sm:$0xff] }
 0x6ab   :  { %10812 = vmatpush1.bf16.msra.mxu1 %v10811_v53  ;;  %10066 = vmatprep.subr.bf16.mxu0 %v10065_v29  ;;  %v5519_v53 = vld [vmem:[%s21715_s12 + $0xea8] sm:$0xff]  ;;  %v5517_v29 = vld [vmem:[%s21715_s12 + $0xe98] sm:$0xff] }
 0x6ac   :  { %10814 = vmatprep.subr.bf16.mxu1 %v10813_v35  ;;  %v10077_v35 = vpack.c.bf16 %v5519_v53, %v5515_v55  ;;  %v10825_v30 = vpack.c.bf16 %v5521_v27, %v5517_v29  ;;  %v5534_v55 = vld [vmem:[%s21715_s12 + $0xf20] sm:$0xff]  ;;  %v5532_v53 = vld [vmem:[%s21715_s12 + $0xf10] sm:$0xff] }
 0x6ad   :  { %v5536_v27 = vld [vmem:[%s21715_s12 + $0xf30] sm:$0xff]  ;;  %v10087_v7 = vpack.c.bf16 %v5534_v55, %v5530_v25  ;;  %v5561_v25 = vld [vmem:[%s21715_s12 + $0xff8] sm:$0xff] }
 0x6ae   :  { %10068 = vmatpush1.bf16.msra.mxu0 %v10067_v19  ;;  %v5523_v19 = vld [vmem:[%s21715_s12 + $0xec8] sm:$0xff]  ;;  %v10835_v6 = vpack.c.bf16 %v5536_v27, %v5532_v53  ;;  %v5554_v27 = vld [vmem:[%s21715_s12 + $0xfc0] sm:$0xff] }
 0x6af   :  { %10816 = vmatpush1.bf16.msra.mxu1 %v10815_v47  ;;  %10070 = vmatprep.subr.bf16.mxu0 %v10069_v4  ;;  %v5527_v47 = vld [vmem:[%s21715_s12 + $0xee8] sm:$0xff]  ;;  %v5525_v4 = vld [vmem:[%s21715_s12 + $0xed8] sm:$0xff] }
 0x6b0   :  { %10818 = vmatprep.subr.bf16.mxu1 %v10817_v20  ;;  %v10081_v20 = vpack.c.bf16 %v5527_v47, %v5523_v19  ;;  %v10829_v59 = vpack.c.bf16 %v5529_v3, %v5525_v4  ;;  %v5542_v19 = vld [vmem:[%s21715_s12 + $0xf60] sm:$0xff]  ;;  %v5540_v47 = vld [vmem:[%s21715_s12 + $0xf50] sm:$0xff] }
 0x6b1   :  { %v5544_v3 = vld [vmem:[%s21715_s12 + $0xf70] sm:$0xff]  ;;  %v10091_v44 = vpack.c.bf16 %v5542_v19, %v5538_v9  ;;  %v5569_v9 = vld [vmem:[%s21715_s12 + $0x1038] sm:$0xff] }
 0x6b2   :  { %10072 = vmatpush1.bf16.msra.mxu0 %v10071_v5  ;;  %v5531_v5 = vld [vmem:[%s21715_s12 + $0xf08] sm:$0xff]  ;;  %v10839_v36 = vpack.c.bf16 %v5544_v3, %v5540_v47  ;;  %v11773_v47 = vunpack.i.h.bf16 %v17475_v33  ;;  %v4850_v33 = vsel %vm1400_vm5, %v11768_v58, %v17440_v43  ;;  %v5581_v43 = vld [vmem:[%s21715_s12 + $0x1098] sm:$0xff]  ;;  %vm8632_vm5 = vcmask 72704  }
 0x6b3   :  { %10820 = vmatpush1.bf16.msra.mxu1 %v10819_v37  ;;  %10074 = vmatprep.subr.bf16.mxu0 %v10073_v22  ;;  %v5535_v37 = vld [vmem:[%s21715_s12 + $0xf28] sm:$0xff]  ;;  %v5533_v22 = vld [vmem:[%s21715_s12 + $0xf18] sm:$0xff] }
 0x6b4   :  { %10822 = vmatprep.subr.bf16.mxu1 %v10821_v13  ;;  %v10085_v13 = vpack.c.bf16 %v5535_v37, %v5531_v5  ;;  %v10833_v29 = vpack.c.bf16 %v5537_v61, %v5533_v22  ;;  %v5550_v5 = vld [vmem:[%s21715_s12 + $0xfa0] sm:$0xff]  ;;  %v5548_v37 = vld [vmem:[%s21715_s12 + $0xf90] sm:$0xff] }
 0x6b5   :  { %v5552_v61 = vld [vmem:[%s21715_s12 + $0xfb0] sm:$0xff]  ;;  %v10095_v55 = vpack.c.bf16 %v5550_v5, %v5546_v52  ;;  %v5573_v5 = vld [vmem:[%s21715_s12 + $0x1058] sm:$0xff] }
 0x6b6   :  { %10076 = vmatpush1.bf16.msra.mxu0 %v10075_v32  ;;  %v5539_v32 = vld [vmem:[%s21715_s12 + $0xf48] sm:$0xff]  ;;  %v10843_v53 = vpack.c.bf16 %v5552_v61, %v5548_v37  ;;  %v5577_v37 = vld [vmem:[%s21715_s12 + $0x1078] sm:$0xff] }
 0x6b7   :  { %10824 = vmatpush1.bf16.msra.mxu1 %v10823_v40  ;;  %10078 = vmatprep.subr.bf16.mxu0 %v10077_v35  ;;  %v5543_v40 = vld [vmem:[%s21715_s12 + $0xf68] sm:$0xff]  ;;  %v5541_v35 = vld [vmem:[%s21715_s12 + $0xf58] sm:$0xff] }
 0x6b8   :  { %10826 = vmatprep.subr.bf16.mxu1 %v10825_v30  ;;  %v10089_v30 = vpack.c.bf16 %v5543_v40, %v5539_v32  ;;  %v10837_v4 = vpack.c.bf16 %v5545_v50, %v5541_v35  ;;  %v5558_v32 = vld [vmem:[%s21715_s12 + $0xfe0] sm:$0xff]  ;;  %v5556_v40 = vld [vmem:[%s21715_s12 + $0xfd0] sm:$0xff] }
 0x6b9   :  { %v5560_v50 = vld [vmem:[%s21715_s12 + $0xff0] sm:$0xff]  ;;  %v10099_v19 = vpack.c.bf16 %v5558_v32, %v5554_v27 }
 0x6ba   :  { %10080 = vmatpush1.bf16.msra.mxu0 %v10079_v10  ;;  %v5547_v10 = vld [vmem:[%s21715_s12 + $0xf88] sm:$0xff] }
 0x6bb   :  { %10828 = vmatpush1.bf16.msra.mxu1 %v10827_v41  ;;  %10082 = vmatprep.subr.bf16.mxu0 %v10081_v20  ;;  %v5551_v41 = vld [vmem:[%s21715_s12 + $0xfa8] sm:$0xff]  ;;  %v5549_v20 = vld [vmem:[%s21715_s12 + $0xf98] sm:$0xff] }
 0x6bc   :  { %10830 = vmatprep.subr.bf16.mxu1 %v10829_v59  ;;  %v10093_v59 = vpack.c.bf16 %v5551_v41, %v5547_v10  ;;  %v10841_v22 = vpack.c.bf16 %v5553_v2, %v5549_v20  ;;  %v5562_v10 = vld [vmem:[%s21715_s12 + $0x1000] sm:$0xff]  ;;  %v5564_v2 = vld [vmem:[%s21715_s12 + $0x1010] sm:$0xff] }
 0x6bd   :  { %v5566_v41 = vld [vmem:[%s21715_s12 + $0x1020] sm:$0xff] }
 0x6be   :  { %10084 = vmatpush1.bf16.msra.mxu0 %v10083_v39  ;;  %v5555_v39 = vld [vmem:[%s21715_s12 + $0xfc8] sm:$0xff]  ;;  %v10103_v52 = vpack.c.bf16 %v5566_v41, %v5562_v10  ;;  %v5586_v41 = vld [vmem:[%s21715_s12 + $0x10c0] sm:$0xff] }
 0x6bf   :  { %10832 = vmatpush1.bf16.msra.mxu1 %v10831_v18  ;;  %10086 = vmatprep.subr.bf16.mxu0 %v10085_v13  ;;  %v5559_v18 = vld [vmem:[%s21715_s12 + $0xfe8] sm:$0xff]  ;;  %v5557_v13 = vld [vmem:[%s21715_s12 + $0xfd8] sm:$0xff] }
 0x6c0   :  { %10834 = vmatprep.subr.bf16.mxu1 %v10833_v29  ;;  %v10097_v29 = vpack.c.bf16 %v5559_v18, %v5555_v39  ;;  %v10845_v35 = vpack.c.bf16 %v5561_v25, %v5557_v13  ;;  %v5570_v39 = vld [vmem:[%s21715_s12 + $0x1040] sm:$0xff]  ;;  %v5572_v13 = vld [vmem:[%s21715_s12 + $0x1050] sm:$0xff] }
 0x6c1   :  { %v5574_v18 = vld [vmem:[%s21715_s12 + $0x1060] sm:$0xff]  ;;  %v5576_v25 = vld [vmem:[%s21715_s12 + $0x1070] sm:$0xff] }
 0x6c2   :  { %10088 = vmatpush1.bf16.msra.mxu0 %v10087_v7  ;;  %v5563_v7 = vld [vmem:[%s21715_s12 + $0x1008] sm:$0xff]  ;;  %v10107_v27 = vpack.c.bf16 %v5574_v18, %v5570_v39  ;;  %v10855_v32 = vpack.c.bf16 %v5576_v25, %v5572_v13  ;;  %v5594_v18 = vld [vmem:[%s21715_s12 + $0x1100] sm:$0xff]  ;;  %v5600_v25 = vld [vmem:[%s21715_s12 + $0x1130] sm:$0xff] }
 0x6c3   :  { %10836 = vmatpush1.bf16.msra.mxu1 %v10835_v6  ;;  %10090 = vmatprep.subr.bf16.mxu0 %v10089_v30  ;;  %v5567_v6 = vld [vmem:[%s21715_s12 + $0x1028] sm:$0xff]  ;;  %v5565_v30 = vld [vmem:[%s21715_s12 + $0x1018] sm:$0xff]  ;;  %v5598_v13 = vld [vmem:[%s21715_s12 + $0x1120] sm:$0xff] }
 0x6c4   :  { %10838 = vmatprep.subr.bf16.mxu1 %v10837_v4  ;;  %v10847_v4 = vpack.c.bf16 %v5560_v50, %v5556_v40  ;;  %v10101_v3 = vpack.c.bf16 %v5567_v6, %v5563_v7  ;;  %v10849_v20 = vpack.c.bf16 %v5569_v9, %v5565_v30  ;;  %v5582_v50 = vld [vmem:[%s21715_s12 + $0x10a0] sm:$0xff]  ;;  %v5580_v7 = vld [vmem:[%s21715_s12 + $0x1090] sm:$0xff]  ;;  %v5587_v30 = vld [vmem:[%s21715_s12 + $0x10c8] sm:$0xff] }
 0x6c5   :  { %v5584_v6 = vld [vmem:[%s21715_s12 + $0x10b0] sm:$0xff]  ;;  %v5591_v9 = vld [vmem:[%s21715_s12 + $0x10e8] sm:$0xff] }
 0x6c6   :  { %10092 = vmatpush1.bf16.msra.mxu0 %v10091_v44  ;;  %v5568_v44 = vld [vmem:[%s21715_s12 + $0x1030] sm:$0xff]  ;;  %v10113_v10 = vpack.c.bf16 %v5591_v9, %v5587_v30  ;;  %v5613_v30 = vld [vmem:[%s21715_s12 + $0x1198] sm:$0xff] }
 0x6c7   :  { %10840 = vmatpush1.bf16.msra.mxu1 %v10839_v36  ;;  %10094 = vmatprep.subr.bf16.mxu0 %v10093_v59  ;;  %v5571_v36 = vld [vmem:[%s21715_s12 + $0x1048] sm:$0xff]  ;;  %v10851_v61 = vpack.c.bf16 %v5568_v44, %v5564_v2  ;;  %v5588_v2 = vld [vmem:[%s21715_s12 + $0x10d0] sm:$0xff]  ;;  %v5617_v9 = vld [vmem:[%s21715_s12 + $0x11b8] sm:$0xff] }
 0x6c8   :  { %10842 = vmatprep.subr.bf16.mxu1 %v10841_v22  ;;  %v5575_v59 = vld [vmem:[%s21715_s12 + $0x1068] sm:$0xff]  ;;  %v4866_v22 = vsel %vm4864_vm4, %v11772_v31, %v11773_v47  ;;  %v5593_v47 = vld [vmem:[%s21715_s12 + $0x10f8] sm:$0xff] }
 0x6c9   :  { %v10105_v31 = vpack.c.bf16 %v5575_v59, %v5571_v36  ;;  %v4964_v58 = vsel %vm4879_vm6, %v4866_v22, %v17512_v48  ;;  %v10857_v48 = vpack.c.bf16 %v5585_v8, %v5581_v43  ;;  %v5592_v36 = vld [vmem:[%s21715_s12 + $0x10f0] sm:$0xff]  ;;  %v5595_v59 = vld [vmem:[%s21715_s12 + $0x1108] sm:$0xff]  ;;  %v5609_v43 = vld [vmem:[%s21715_s12 + $0x1178] sm:$0xff]  ;;  %v10119_v8 = vpack.c.bf16 %v5598_v13, %v5594_v18 }
 0x6ca   :  { %10096 = vmatpush1.bf16.msra.mxu0 %v10095_v55  ;;  %v5579_v55 = vld [vmem:[%s21715_s12 + $0x1088] sm:$0xff]  ;;  %v5620_v18 = vld [vmem:[%s21715_s12 + $0x11d0] sm:$0xff] }
 0x6cb   :  { %10844 = vmatpush1.bf16.msra.mxu1 %v10843_v53  ;;  %10098 = vmatprep.subr.bf16.mxu0 %v10097_v29  ;;  %v5583_v53 = vld [vmem:[%s21715_s12 + $0x10a8] sm:$0xff]  ;;  %v10853_v29 = vpack.c.bf16 %v5577_v37, %v5573_v5  ;;  %v5597_v5 = vld [vmem:[%s21715_s12 + $0x1118] sm:$0xff] }
 0x6cc   :  { %10846 = vmatprep.subr.bf16.mxu1 %v10845_v35  ;;  %v10109_v40 = vpack.c.bf16 %v5583_v53, %v5579_v55  ;;  %v5578_v35 = vld [vmem:[%s21715_s12 + $0x1080] sm:$0xff]  ;;  %v5601_v37 = vld [vmem:[%s21715_s12 + $0x1138] sm:$0xff]  ;;  %v5603_v55 = vld [vmem:[%s21715_s12 + $0x1148] sm:$0xff] }
 0x6cd   :  { %v5607_v53 = vld [vmem:[%s21715_s12 + $0x1168] sm:$0xff] }
 0x6ce   :  { %10100 = vmatpush1.bf16.msra.mxu0 %v10099_v19  ;;  %v5589_v19 = vld [vmem:[%s21715_s12 + $0x10d8] sm:$0xff] }
 0x6cf   :  { %10848 = vmatpush1.bf16.msra.mxu1 %v10847_v4  ;;  %10102 = vmatprep.subr.bf16.mxu0 %v10101_v3  ;;  %v10111_v4 = vpack.c.bf16 %v5582_v50, %v5578_v35  ;;  %v10859_v3 = vpack.c.bf16 %v5584_v6, %v5580_v7  ;;  %v10861_v44 = vpack.c.bf16 %v5593_v47, %v5589_v19  ;;  %v5604_v35 = vld [vmem:[%s21715_s12 + $0x1150] sm:$0xff]  ;;  %v5615_v6 = vld [vmem:[%s21715_s12 + $0x11a8] sm:$0xff] }
 0x6d0   :  { %10850 = vmatprep.subr.bf16.mxu1 %v10849_v20  ;;  %v5590_v20 = vld [vmem:[%s21715_s12 + $0x10e0] sm:$0xff]  ;;  %v5608_v7 = vld [vmem:[%s21715_s12 + $0x1170] sm:$0xff] }
 0x6d1   :  { %6830 = vmatmul.mubr.f32.vlgmr.msra.gmra.mrb[98].mxu0 %v4850_v33  ;;  %v10115_v22 = vpack.c.bf16 %v5590_v20, %v5586_v41  ;;  %v10871_v47 = vpack.c.bf16 %v5608_v7, %v5604_v35  ;;  %v5612_v41 = vld [vmem:[%s21715_s12 + $0x1190] sm:$0xff]  ;;  %v10873_v20 = vpack.c.bf16 %v5617_v9, %v5613_v30  ;;  %v5639_v7 = vld [vmem:[%s21715_s12 + $0x1268] sm:$0xff] }
 0x6d2   :  { %7682 = vmatmul.mubr.f32.vlgmr.msra.gmra.mrb[122].mxu1 %v4850_v33  ;;  %10104 = vmatpush1.bf16.msra.mxu0 %v10103_v52  ;;  %v5599_v52 = vld [vmem:[%s21715_s12 + $0x1128] sm:$0xff]  ;;  %v5596_v33 = vld [vmem:[%s21715_s12 + $0x1110] sm:$0xff] }
 0x6d3   :  { %6900 = vmatprep.mubr.f32.mxu0 %v4964_v58  ;;  %10852 = vmatpush1.bf16.msra.mxu1 %v10851_v61  ;;  %v10863_v61 = vpack.c.bf16 %v5592_v36, %v5588_v2  ;;  %v10117_v39 = vpack.c.bf16 %v5599_v52, %v5595_v59  ;;  %v5616_v2 = vld [vmem:[%s21715_s12 + $0x11b0] sm:$0xff]  ;;  %v5623_v36 = vld [vmem:[%s21715_s12 + $0x11e8] sm:$0xff]  ;;  %v5621_v59 = vld [vmem:[%s21715_s12 + $0x11d8] sm:$0xff] }
 0x6d4   :  { %7752 = vmatprep.mubr.f32.mxu1 %v4964_v58  ;;  %10106 = vmatprep.subr.bf16.mxu0 %v10105_v31  ;;  %v10865_v31 = vpack.c.bf16 %v5601_v37, %v5597_v5  ;;  %v10867_v58 = vpack.c.bf16 %v5600_v25, %v5596_v33  ;;  %v5625_v52 = vld [vmem:[%s21715_s12 + $0x11f8] sm:$0xff]  ;;  %v10875_v37 = vpack.c.bf16 %v5616_v2, %v5612_v41  ;;  %v5624_v33 = vld [vmem:[%s21715_s12 + $0x11f0] sm:$0xff]  ;;  %v5631_v25 = vld [vmem:[%s21715_s12 + $0x1228] sm:$0xff] }
 0x6d5   :  { %10854 = vmatprep.subr.bf16.mxu1 %v10853_v29  ;;  %v5605_v29 = vld [vmem:[%s21715_s12 + $0x1158] sm:$0xff]  ;;  %v10877_v13 = vpack.c.bf16 %v5625_v52, %v5621_v59  ;;  %v5632_v35 = vld [vmem:[%s21715_s12 + $0x1230] sm:$0xff]  ;;  %v5647_v2 = vld [vmem:[%s21715_s12 + $0x12a8] sm:$0xff] }
 0x6d6   :  { %10108 = vmatpush1.bf16.msra.mxu0 %v10107_v27  ;;  %v10121_v27 = vpack.c.bf16 %v5607_v53, %v5603_v55  ;;  %v10869_v50 = vpack.c.bf16 %v5609_v43, %v5605_v29  ;;  %v5629_v55 = vld [vmem:[%s21715_s12 + $0x1218] sm:$0xff]  ;;  %v10879_v43 = vpack.c.bf16 %v5624_v33, %v5620_v18  ;;  %v5640_v41 = vld [vmem:[%s21715_s12 + $0x1270] sm:$0xff]  ;;  %v5655_v33 = vld [vmem:[%s21715_s12 + $0x12e8] sm:$0xff] }
 0x6d7   :  { %10856 = vmatpush1.bf16.msra.mxu1 %v10855_v32  ;;  %10110 = vmatprep.subr.bf16.mxu0 %v10109_v40  ;;  %v5602_v32 = vld [vmem:[%s21715_s12 + $0x1140] sm:$0xff]  ;;  %v5633_v53 = vld [vmem:[%s21715_s12 + $0x1238] sm:$0xff]  ;;  %v5648_v18 = vld [vmem:[%s21715_s12 + $0x12b0] sm:$0xff] }
 0x6d8   :  { %10858 = vmatprep.subr.bf16.mxu1 %v10857_v48  ;;  %v5606_v40 = vld [vmem:[%s21715_s12 + $0x1160] sm:$0xff]  ;;  %v5611_v48 = vld [vmem:[%s21715_s12 + $0x1188] sm:$0xff] }
 0x6d9   :  { %v10123_v19 = vpack.c.bf16 %v5606_v40, %v5602_v32  ;;  %v5628_v32 = vld [vmem:[%s21715_s12 + $0x1210] sm:$0xff]  ;;  %v10881_v40 = vpack.c.bf16 %v5633_v53, %v5629_v55 }
 0x6da   :  { %10112 = vmatpush1.bf16.msra.mxu0 %v10111_v4  ;;  %v10125_v4 = vpack.c.bf16 %v5615_v6, %v5611_v48  ;;  %v5637_v48 = vld [vmem:[%s21715_s12 + $0x1258] sm:$0xff]  ;;  %v10883_v9 = vpack.c.bf16 %v5632_v35, %v5628_v32  ;;  %v5656_v32 = vld [vmem:[%s21715_s12 + $0x12f0] sm:$0xff]  ;;  %v5663_v35 = vld [vmem:[%s21715_s12 + $0x1328] sm:$0xff] }
 0x6db   :  { %10860 = vmatpush1.bf16.msra.mxu1 %v10859_v3  ;;  %10114 = vmatprep.subr.bf16.mxu0 %v10113_v10  ;;  %v5610_v3 = vld [vmem:[%s21715_s12 + $0x1180] sm:$0xff]  ;;  %v5641_v6 = vld [vmem:[%s21715_s12 + $0x1278] sm:$0xff] }
 0x6dc   :  { %10862 = vmatprep.subr.bf16.mxu1 %v10861_v44  ;;  %v5614_v10 = vld [vmem:[%s21715_s12 + $0x11a0] sm:$0xff]  ;;  %v5619_v44 = vld [vmem:[%s21715_s12 + $0x11c8] sm:$0xff] }
 0x6dd   :  { %v10127_v5 = vpack.c.bf16 %v5614_v10, %v5610_v3  ;;  %v5636_v3 = vld [vmem:[%s21715_s12 + $0x1250] sm:$0xff]  ;;  %v10885_v10 = vpack.c.bf16 %v5641_v6, %v5637_v48 }
 0x6de   :  { %10116 = vmatpush1.bf16.msra.mxu0 %v10115_v22  ;;  %v10129_v22 = vpack.c.bf16 %v5623_v36, %v5619_v44  ;;  %v5645_v44 = vld [vmem:[%s21715_s12 + $0x1298] sm:$0xff]  ;;  %v10887_v52 = vpack.c.bf16 %v5640_v41, %v5636_v3  ;;  %v5664_v3 = vld [vmem:[%s21715_s12 + $0x1330] sm:$0xff]  ;;  %v5671_v41 = vld [vmem:[%s21715_s12 + $0x1368] sm:$0xff] }
 0x6df   :  { %10864 = vmatpush1.bf16.msra.mxu1 %v10863_v61  ;;  %10118 = vmatprep.subr.bf16.mxu0 %v10117_v39  ;;  %v5618_v61 = vld [vmem:[%s21715_s12 + $0x11c0] sm:$0xff]  ;;  %v5649_v36 = vld [vmem:[%s21715_s12 + $0x12b8] sm:$0xff] }
 0x6e0   :  { %10866 = vmatprep.subr.bf16.mxu1 %v10865_v31  ;;  %v5622_v39 = vld [vmem:[%s21715_s12 + $0x11e0] sm:$0xff]  ;;  %v5627_v31 = vld [vmem:[%s21715_s12 + $0x1208] sm:$0xff] }
 0x6e1   :  { %v10131_v29 = vpack.c.bf16 %v5622_v39, %v5618_v61  ;;  %v5644_v61 = vld [vmem:[%s21715_s12 + $0x1290] sm:$0xff]  ;;  %v10889_v39 = vpack.c.bf16 %v5649_v36, %v5645_v44 }
 0x6e2   :  { %10120 = vmatpush1.bf16.msra.mxu0 %v10119_v8  ;;  %v10133_v8 = vpack.c.bf16 %v5631_v25, %v5627_v31  ;;  %v5653_v31 = vld [vmem:[%s21715_s12 + $0x12d8] sm:$0xff]  ;;  %v10891_v53 = vpack.c.bf16 %v5648_v18, %v5644_v61  ;;  %v5672_v61 = vld [vmem:[%s21715_s12 + $0x1370] sm:$0xff]  ;;  %v5679_v18 = vld [vmem:[%s21715_s12 + $0x13a8] sm:$0xff] }
 0x6e3   :  { %10868 = vmatpush1.bf16.msra.mxu1 %v10867_v58  ;;  %10122 = vmatprep.subr.bf16.mxu0 %v10121_v27  ;;  %v5626_v58 = vld [vmem:[%s21715_s12 + $0x1200] sm:$0xff]  ;;  %v5657_v25 = vld [vmem:[%s21715_s12 + $0x12f8] sm:$0xff] }
 0x6e4   :  { %10870 = vmatprep.subr.bf16.mxu1 %v10869_v50  ;;  %v5630_v27 = vld [vmem:[%s21715_s12 + $0x1220] sm:$0xff]  ;;  %v5635_v50 = vld [vmem:[%s21715_s12 + $0x1248] sm:$0xff] }
 0x6e5   :  { %v10135_v30 = vpack.c.bf16 %v5630_v27, %v5626_v58  ;;  %v5652_v58 = vld [vmem:[%s21715_s12 + $0x12d0] sm:$0xff]  ;;  %v10893_v27 = vpack.c.bf16 %v5657_v25, %v5653_v31 }
 0x6e6   :  { %10124 = vmatpush1.bf16.msra.mxu0 %v10123_v19  ;;  %v10137_v19 = vpack.c.bf16 %v5639_v7, %v5635_v50  ;;  %v5661_v50 = vld [vmem:[%s21715_s12 + $0x1318] sm:$0xff]  ;;  %v10895_v6 = vpack.c.bf16 %v5656_v32, %v5652_v58  ;;  %v5680_v58 = vld [vmem:[%s21715_s12 + $0x13b0] sm:$0xff]  ;;  %v5687_v32 = vld [vmem:[%s21715_s12 + $0x13e8] sm:$0xff] }
 0x6e7   :  { %10872 = vmatpush1.bf16.msra.mxu1 %v10871_v47  ;;  %10126 = vmatprep.subr.bf16.mxu0 %v10125_v4  ;;  %v5634_v47 = vld [vmem:[%s21715_s12 + $0x1240] sm:$0xff]  ;;  %v5665_v7 = vld [vmem:[%s21715_s12 + $0x1338] sm:$0xff] }
 0x6e8   :  { %10874 = vmatprep.subr.bf16.mxu1 %v10873_v20  ;;  %v5638_v4 = vld [vmem:[%s21715_s12 + $0x1260] sm:$0xff]  ;;  %v5643_v20 = vld [vmem:[%s21715_s12 + $0x1288] sm:$0xff] }
 0x6e9   :  { %v10139_v59 = vpack.c.bf16 %v5638_v4, %v5634_v47  ;;  %v5660_v47 = vld [vmem:[%s21715_s12 + $0x1310] sm:$0xff]  ;;  %v10897_v4 = vpack.c.bf16 %v5665_v7, %v5661_v50 }
 0x6ea   :  { %10128 = vmatpush1.bf16.msra.mxu0 %v10127_v5  ;;  %v10141_v5 = vpack.c.bf16 %v5647_v2, %v5643_v20  ;;  %v5669_v20 = vld [vmem:[%s21715_s12 + $0x1358] sm:$0xff]  ;;  %v10899_v36 = vpack.c.bf16 %v5664_v3, %v5660_v47  ;;  %v5688_v47 = vld [vmem:[%s21715_s12 + $0x13f0] sm:$0xff]  ;;  %v5695_v3 = vld [vmem:[%s21715_s12 + $0x1428] sm:$0xff] }
 0x6eb   :  { %10876 = vmatpush1.bf16.msra.mxu1 %v10875_v37  ;;  %10130 = vmatprep.subr.bf16.mxu0 %v10129_v22  ;;  %v5642_v37 = vld [vmem:[%s21715_s12 + $0x1280] sm:$0xff]  ;;  %v5673_v2 = vld [vmem:[%s21715_s12 + $0x1378] sm:$0xff] }
 0x6ec   :  { %10878 = vmatprep.subr.bf16.mxu1 %v10877_v13  ;;  %v5646_v22 = vld [vmem:[%s21715_s12 + $0x12a0] sm:$0xff]  ;;  %v5651_v13 = vld [vmem:[%s21715_s12 + $0x12c8] sm:$0xff] }
 0x6ed   :  { %v10143_v55 = vpack.c.bf16 %v5646_v22, %v5642_v37  ;;  %v5668_v37 = vld [vmem:[%s21715_s12 + $0x1350] sm:$0xff]  ;;  %v10901_v22 = vpack.c.bf16 %v5673_v2, %v5669_v20  ;;  %v11778_v2 = vunpack.i.h.bf16 %v17510_v16 }
 0x6ee   :  { %10132 = vmatpush1.bf16.msra.mxu0 %v10131_v29  ;;  %v10145_v29 = vpack.c.bf16 %v5655_v33, %v5651_v13  ;;  %v5677_v13 = vld [vmem:[%s21715_s12 + $0x1398] sm:$0xff]  ;;  %v10903_v25 = vpack.c.bf16 %v5672_v61, %v5668_v37  ;;  %v5692_v37 = vld [vmem:[%s21715_s12 + $0x1410] sm:$0xff]  ;;  %v5699_v61 = vld [vmem:[%s21715_s12 + $0x1448] sm:$0xff] }
 0x6ef   :  { %10880 = vmatpush1.bf16.msra.mxu1 %v10879_v43  ;;  %10134 = vmatprep.subr.bf16.mxu0 %v10133_v8  ;;  %v5650_v43 = vld [vmem:[%s21715_s12 + $0x12c0] sm:$0xff]  ;;  %v5681_v33 = vld [vmem:[%s21715_s12 + $0x13b8] sm:$0xff]  ;;  %v5704_v16 = vld [vmem:[%s21715_s12 + $0x1470] sm:$0xff] }
 0x6f0   :  { %10882 = vmatprep.subr.bf16.mxu1 %v10881_v40  ;;  %v5654_v8 = vld [vmem:[%s21715_s12 + $0x12e0] sm:$0xff]  ;;  %v5659_v40 = vld [vmem:[%s21715_s12 + $0x1308] sm:$0xff] }
 0x6f1   :  { %v10147_v48 = vpack.c.bf16 %v5654_v8, %v5650_v43  ;;  %v5676_v43 = vld [vmem:[%s21715_s12 + $0x1390] sm:$0xff]  ;;  %v10905_v8 = vpack.c.bf16 %v5681_v33, %v5677_v13  ;;  %v5701_v13 = vld [vmem:[%s21715_s12 + $0x1458] sm:$0xff] }
 0x6f2   :  { %10136 = vmatpush1.bf16.msra.mxu0 %v10135_v30  ;;  %v10149_v30 = vpack.c.bf16 %v5663_v35, %v5659_v40  ;;  %v5685_v40 = vld [vmem:[%s21715_s12 + $0x13d8] sm:$0xff]  ;;  %v10907_v7 = vpack.c.bf16 %v5680_v58, %v5676_v43 }
 0x6f3   :  { %10884 = vmatpush1.bf16.msra.mxu1 %v10883_v9  ;;  %10138 = vmatprep.subr.bf16.mxu0 %v10137_v19  ;;  %v5658_v9 = vld [vmem:[%s21715_s12 + $0x1300] sm:$0xff]  ;;  %v5689_v35 = vld [vmem:[%s21715_s12 + $0x13f8] sm:$0xff] }
 0x6f4   :  { %10886 = vmatprep.subr.bf16.mxu1 %v10885_v10  ;;  %v5662_v19 = vld [vmem:[%s21715_s12 + $0x1320] sm:$0xff]  ;;  %v5667_v10 = vld [vmem:[%s21715_s12 + $0x1348] sm:$0xff]  ;;  %v5705_v33 = vld [vmem:[%s21715_s12 + $0x1478] sm:$0xff] }
 0x6f5   :  { %v10151_v44 = vpack.c.bf16 %v5662_v19, %v5658_v9  ;;  %v5684_v9 = vld [vmem:[%s21715_s12 + $0x13d0] sm:$0xff]  ;;  %v10909_v19 = vpack.c.bf16 %v5689_v35, %v5685_v40  ;;  %v10917_v58 = vpack.c.bf16 %v5705_v33, %v5701_v13  ;;  %v5722_v13 = vld [vmem:[%s21715_s12 + $0x1500] sm:$0xff] }
 0x6f6   :  { %10140 = vmatpush1.bf16.msra.mxu0 %v10139_v59  ;;  %v10153_v59 = vpack.c.bf16 %v5671_v41, %v5667_v10  ;;  %v5693_v10 = vld [vmem:[%s21715_s12 + $0x1418] sm:$0xff]  ;;  %v5726_v33 = vld [vmem:[%s21715_s12 + $0x1520] sm:$0xff] }
 0x6f7   :  { %10888 = vmatpush1.bf16.msra.mxu1 %v10887_v52  ;;  %10142 = vmatprep.subr.bf16.mxu0 %v10141_v5  ;;  %v5666_v52 = vld [vmem:[%s21715_s12 + $0x1340] sm:$0xff]  ;;  %v5697_v41 = vld [vmem:[%s21715_s12 + $0x1438] sm:$0xff] }
 0x6f8   :  { %10890 = vmatprep.subr.bf16.mxu1 %v10889_v39  ;;  %v5670_v5 = vld [vmem:[%s21715_s12 + $0x1360] sm:$0xff]  ;;  %v5675_v39 = vld [vmem:[%s21715_s12 + $0x1388] sm:$0xff] }
 0x6f9   :  { %v10155_v31 = vpack.c.bf16 %v5670_v5, %v5666_v52  ;;  %v5694_v52 = vld [vmem:[%s21715_s12 + $0x1420] sm:$0xff]  ;;  %v10913_v5 = vpack.c.bf16 %v5697_v41, %v5693_v10 }
 0x6fa   :  { %10144 = vmatpush1.bf16.msra.mxu0 %v10143_v55  ;;  %v10157_v55 = vpack.c.bf16 %v5679_v18, %v5675_v39  ;;  %v5703_v39 = vld [vmem:[%s21715_s12 + $0x1468] sm:$0xff] }
 0x6fb   :  { %10892 = vmatpush1.bf16.msra.mxu1 %v10891_v53  ;;  %10146 = vmatprep.subr.bf16.mxu0 %v10145_v29  ;;  %v5674_v53 = vld [vmem:[%s21715_s12 + $0x1380] sm:$0xff]  ;;  %v10169_v43 = vpack.c.bf16 %v5703_v39, %v5699_v61 }
 0x6fc   :  { %10894 = vmatprep.subr.bf16.mxu1 %v10893_v27  ;;  %v5678_v29 = vld [vmem:[%s21715_s12 + $0x13a0] sm:$0xff]  ;;  %v5683_v27 = vld [vmem:[%s21715_s12 + $0x13c8] sm:$0xff] }
 0x6fd   :  { %v10159_v50 = vpack.c.bf16 %v5678_v29, %v5674_v53  ;;  %v5702_v53 = vld [vmem:[%s21715_s12 + $0x1460] sm:$0xff]  ;;  %v5700_v29 = vld [vmem:[%s21715_s12 + $0x1450] sm:$0xff] }
 0x6fe   :  { %10148 = vmatpush1.bf16.msra.mxu0 %v10147_v48  ;;  %v10161_v48 = vpack.c.bf16 %v5687_v32, %v5683_v27  ;;  %v5709_v27 = vld [vmem:[%s21715_s12 + $0x1498] sm:$0xff] }
 0x6ff   :  { %10896 = vmatpush1.bf16.msra.mxu1 %v10895_v6  ;;  %10150 = vmatprep.subr.bf16.mxu0 %v10149_v30  ;;  %v5682_v6 = vld [vmem:[%s21715_s12 + $0x13c0] sm:$0xff]  ;;  %v5713_v32 = vld [vmem:[%s21715_s12 + $0x14b8] sm:$0xff] }
 0x700   :  { %10898 = vmatprep.subr.bf16.mxu1 %v10897_v4  ;;  %v5686_v30 = vld [vmem:[%s21715_s12 + $0x13e0] sm:$0xff]  ;;  %v5691_v4 = vld [vmem:[%s21715_s12 + $0x1408] sm:$0xff] }
 0x701   :  { %v10163_v20 = vpack.c.bf16 %v5686_v30, %v5682_v6  ;;  %v5710_v6 = vld [vmem:[%s21715_s12 + $0x14a0] sm:$0xff]  ;;  %v5712_v30 = vld [vmem:[%s21715_s12 + $0x14b0] sm:$0xff] }
 0x702   :  { %10152 = vmatpush1.bf16.msra.mxu0 %v10151_v44  ;;  %v10911_v44 = vpack.c.bf16 %v5688_v47, %v5684_v9  ;;  %v5715_v9 = vld [vmem:[%s21715_s12 + $0x14c8] sm:$0xff]  ;;  %v5717_v47 = vld [vmem:[%s21715_s12 + $0x14d8] sm:$0xff] }
 0x703   :  { %10900 = vmatpush1.bf16.msra.mxu1 %v10899_v36  ;;  %10154 = vmatprep.subr.bf16.mxu0 %v10153_v59  ;;  %v10165_v36 = vpack.c.bf16 %v5695_v3, %v5691_v4  ;;  %v5690_v59 = vld [vmem:[%s21715_s12 + $0x1400] sm:$0xff]  ;;  %v5721_v4 = vld [vmem:[%s21715_s12 + $0x14f8] sm:$0xff] }
 0x704   :  { %10902 = vmatprep.subr.bf16.mxu1 %v10901_v22  ;;  %v5696_v22 = vld [vmem:[%s21715_s12 + $0x1430] sm:$0xff]  ;;  %v10167_v18 = vpack.c.bf16 %v5694_v52, %v5690_v59  ;;  %v5723_v52 = vld [vmem:[%s21715_s12 + $0x1508] sm:$0xff] }
 0x705   :  { %v5720_v59 = vld [vmem:[%s21715_s12 + $0x14f0] sm:$0xff] }
 0x706   :  { %10156 = vmatpush1.bf16.msra.mxu0 %v10155_v31  ;;  %v4881_v31 = vsel %vm4879_vm6, %v11777_v24, %v11778_v2  ;;  %v5707_v24 = vld [vmem:[%s21715_s12 + $0x1488] sm:$0xff]  ;;  %v5718_v2 = vld [vmem:[%s21715_s12 + $0x14e0] sm:$0xff] }
 0x707   :  { %10904 = vmatpush1.bf16.msra.mxu1 %v10903_v25  ;;  %10158 = vmatprep.subr.bf16.mxu0 %v10157_v55  ;;  %v10915_v25 = vpack.c.bf16 %v5696_v22, %v5692_v37  ;;  %v5698_v55 = vld [vmem:[%s21715_s12 + $0x1440] sm:$0xff]  ;;  %v4965_v40 = vsel %vm4894_vm7, %v4881_v31, %v17547_v54  ;;  %v10921_v54 = vpack.c.bf16 %v5713_v32, %v5709_v27  ;;  %v5725_v37 = vld [vmem:[%s21715_s12 + $0x1518] sm:$0xff]  ;;  %v5724_v31 = vld [vmem:[%s21715_s12 + $0x1510] sm:$0xff] }
 0x708   :  { %10906 = vmatprep.subr.bf16.mxu1 %v10905_v8  ;;  %v5711_v8 = vld [vmem:[%s21715_s12 + $0x14a8] sm:$0xff]  ;;  %v10171_v35 = vpack.c.bf16 %v5702_v53, %v5698_v55  ;;  %v5729_v22 = vld [vmem:[%s21715_s12 + $0x1538] sm:$0xff]  ;;  %v5728_v55 = vld [vmem:[%s21715_s12 + $0x1530] sm:$0xff] }
 0x709   :  { %v5731_v53 = vld [vmem:[%s21715_s12 + $0x1548] sm:$0xff]  ;;  %v5730_v27 = vld [vmem:[%s21715_s12 + $0x1540] sm:$0xff] }
 0x70a   :  { %10160 = vmatpush1.bf16.msra.mxu0 %v10159_v50  ;;  %v10919_v50 = vpack.c.bf16 %v5704_v16, %v5700_v29  ;;  %v5735_v29 = vld [vmem:[%s21715_s12 + $0x1568] sm:$0xff]  ;;  %v5737_v16 = vld [vmem:[%s21715_s12 + $0x1578] sm:$0xff]  ;;  %v5734_v32 = vld [vmem:[%s21715_s12 + $0x1560] sm:$0xff] }
 0x70b   :  { %10908 = vmatpush1.bf16.msra.mxu1 %v10907_v7  ;;  %10162 = vmatprep.subr.bf16.mxu0 %v10161_v48  ;;  %v10173_v7 = vpack.c.bf16 %v5711_v8, %v5707_v24  ;;  %v5706_v48 = vld [vmem:[%s21715_s12 + $0x1480] sm:$0xff]  ;;  %v10183_v24 = vpack.c.bf16 %v5726_v33, %v5722_v13  ;;  %v10931_v8 = vpack.c.bf16 %v5728_v55, %v5724_v31  ;;  %v5759_v13 = vld [vmem:[%s21715_s12 + $0x1628] sm:$0xff]  ;;  %v5757_v33 = vld [vmem:[%s21715_s12 + $0x1618] sm:$0xff] }
 0x70c   :  { %10910 = vmatprep.subr.bf16.mxu1 %v10909_v19  ;;  %v5719_v19 = vld [vmem:[%s21715_s12 + $0x14e8] sm:$0xff]  ;;  %v10175_v3 = vpack.c.bf16 %v5710_v6, %v5706_v48  ;;  %v5741_v6 = vld [vmem:[%s21715_s12 + $0x1598] sm:$0xff] }
 0x70d   :  { %v10177_v41 = vpack.c.bf16 %v5719_v19, %v5715_v9  ;;  %v5743_v48 = vld [vmem:[%s21715_s12 + $0x15a8] sm:$0xff]  ;;  %v5738_v19 = vld [vmem:[%s21715_s12 + $0x1580] sm:$0xff]  ;;  %v5761_v31 = vld [vmem:[%s21715_s12 + $0x1638] sm:$0xff] }
 0x70e   :  { %10164 = vmatpush1.bf16.msra.mxu0 %v10163_v20  ;;  %v5714_v20 = vld [vmem:[%s21715_s12 + $0x14c0] sm:$0xff] }
 0x70f   :  { %10912 = vmatpush1.bf16.msra.mxu1 %v10911_v44  ;;  %10166 = vmatprep.subr.bf16.mxu0 %v10165_v36  ;;  %v5716_v44 = vld [vmem:[%s21715_s12 + $0x14d0] sm:$0xff]  ;;  %v10925_v36 = vpack.c.bf16 %v5721_v4, %v5717_v47  ;;  %v10179_v61 = vpack.c.bf16 %v5718_v2, %v5714_v20  ;;  %v5742_v47 = vld [vmem:[%s21715_s12 + $0x15a0] sm:$0xff]  ;;  %v5751_v20 = vld [vmem:[%s21715_s12 + $0x15e8] sm:$0xff] }
 0x710   :  { %10914 = vmatprep.subr.bf16.mxu1 %v10913_v5  ;;  %v5727_v5 = vld [vmem:[%s21715_s12 + $0x1528] sm:$0xff]  ;;  %v10927_v39 = vpack.c.bf16 %v5720_v59, %v5716_v44  ;;  %v5740_v4 = vld [vmem:[%s21715_s12 + $0x1590] sm:$0xff]  ;;  %v5749_v2 = vld [vmem:[%s21715_s12 + $0x15d8] sm:$0xff] }
 0x711   :  { %6901 = vmatmul.mubr.f32.vlgmr.msra.gmra.mrb[98].mxu0 %v17499_v12  ;;  %v5753_v44 = vld [vmem:[%s21715_s12 + $0x15f8] sm:$0xff] }
 0x712   :  { %7753 = vmatmul.mubr.f32.vlgmr.msra.gmra.mrb[122].mxu1 %v17499_v12  ;;  %10168 = vmatpush1.bf16.msra.mxu0 %v10167_v18  ;;  %v5708_v12 = vld [vmem:[%s21715_s12 + $0x1490] sm:$0xff]  ;;  %v10181_v18 = vpack.c.bf16 %v5727_v5, %v5723_v52  ;;  %v5746_v5 = vld [vmem:[%s21715_s12 + $0x15c0] sm:$0xff] }
 0x713   :  { %6971 = vmatprep.mubr.f32.mxu0 %v4965_v40  ;;  %10916 = vmatpush1.bf16.msra.mxu1 %v10915_v25  ;;  %v10923_v10 = vpack.c.bf16 %v5712_v30, %v5708_v12  ;;  %v10929_v25 = vpack.c.bf16 %v5729_v22, %v5725_v37  ;;  %v5745_v12 = vld [vmem:[%s21715_s12 + $0x15b8] sm:$0xff]  ;;  %v5750_v37 = vld [vmem:[%s21715_s12 + $0x15e0] sm:$0xff]  ;;  %v5748_v22 = vld [vmem:[%s21715_s12 + $0x15d0] sm:$0xff] }
 0x714   :  { %7823 = vmatprep.mubr.f32.mxu1 %v4965_v40  ;;  %10170 = vmatprep.subr.bf16.mxu0 %v10169_v43  ;;  %v5733_v43 = vld [vmem:[%s21715_s12 + $0x1558] sm:$0xff]  ;;  %v5732_v40 = vld [vmem:[%s21715_s12 + $0x1550] sm:$0xff] }
 0x715   :  { %10918 = vmatprep.subr.bf16.mxu1 %v10917_v58  ;;  %v10185_v58 = vpack.c.bf16 %v5735_v29, %v5731_v53  ;;  %v5754_v29 = vld [vmem:[%s21715_s12 + $0x1600] sm:$0xff] }
 0x716   :  { %10172 = vmatpush1.bf16.msra.mxu0 %v10171_v35  ;;  %v10933_v35 = vpack.c.bf16 %v5737_v16, %v5733_v43  ;;  %v5758_v43 = vld [vmem:[%s21715_s12 + $0x1620] sm:$0xff]  ;;  %v5756_v16 = vld [vmem:[%s21715_s12 + $0x1610] sm:$0xff] }
 0x717   :  { %10920 = vmatpush1.bf16.msra.mxu1 %v10919_v50  ;;  %10174 = vmatprep.subr.bf16.mxu0 %v10173_v7  ;;  %v5736_v50 = vld [vmem:[%s21715_s12 + $0x1570] sm:$0xff]  ;;  %v5739_v7 = vld [vmem:[%s21715_s12 + $0x1588] sm:$0xff] }
 0x718   :  { %10922 = vmatprep.subr.bf16.mxu1 %v10921_v54  ;;  %v10187_v54 = vpack.c.bf16 %v5734_v32, %v5730_v27  ;;  %v10935_v30 = vpack.c.bf16 %v5736_v50, %v5732_v40  ;;  %v10189_v9 = vpack.c.bf16 %v5743_v48, %v5739_v7  ;;  %v5767_v27 = vld [vmem:[%s21715_s12 + $0x1668] sm:$0xff]  ;;  %v5765_v32 = vld [vmem:[%s21715_s12 + $0x1658] sm:$0xff]  ;;  %v5762_v48 = vld [vmem:[%s21715_s12 + $0x1640] sm:$0xff] }
 0x719   :  { %v5769_v40 = vld [vmem:[%s21715_s12 + $0x1678] sm:$0xff] }
 0x71a   :  { %10176 = vmatpush1.bf16.msra.mxu0 %v10175_v3  ;;  %v10937_v3 = vpack.c.bf16 %v5745_v12, %v5741_v6  ;;  %v5766_v6 = vld [vmem:[%s21715_s12 + $0x1660] sm:$0xff]  ;;  %v5764_v12 = vld [vmem:[%s21715_s12 + $0x1650] sm:$0xff] }
 0x71b   :  { %10924 = vmatpush1.bf16.msra.mxu1 %v10923_v10  ;;  %10178 = vmatprep.subr.bf16.mxu0 %v10177_v41  ;;  %v5744_v10 = vld [vmem:[%s21715_s12 + $0x15b0] sm:$0xff]  ;;  %v5747_v41 = vld [vmem:[%s21715_s12 + $0x15c8] sm:$0xff] }
 0x71c   :  { %10926 = vmatprep.subr.bf16.mxu1 %v10925_v36  ;;  %v10191_v36 = vpack.c.bf16 %v5742_v47, %v5738_v19  ;;  %v10939_v59 = vpack.c.bf16 %v5744_v10, %v5740_v4  ;;  %v10193_v52 = vpack.c.bf16 %v5751_v20, %v5747_v41  ;;  %v5775_v19 = vld [vmem:[%s21715_s12 + $0x16a8] sm:$0xff]  ;;  %v5773_v47 = vld [vmem:[%s21715_s12 + $0x1698] sm:$0xff]  ;;  %v5770_v20 = vld [vmem:[%s21715_s12 + $0x1680] sm:$0xff] }
 0x71d   :  { %v5777_v4 = vld [vmem:[%s21715_s12 + $0x16b8] sm:$0xff] }
 0x71e   :  { %10180 = vmatpush1.bf16.msra.mxu0 %v10179_v61  ;;  %v10941_v61 = vpack.c.bf16 %v5753_v44, %v5749_v2  ;;  %v5774_v2 = vld [vmem:[%s21715_s12 + $0x16a0] sm:$0xff]  ;;  %v5772_v44 = vld [vmem:[%s21715_s12 + $0x1690] sm:$0xff] }
 0x71f   :  { %10928 = vmatpush1.bf16.msra.mxu1 %v10927_v39  ;;  %10182 = vmatprep.subr.bf16.mxu0 %v10181_v18  ;;  %v5752_v39 = vld [vmem:[%s21715_s12 + $0x15f0] sm:$0xff]  ;;  %v5755_v18 = vld [vmem:[%s21715_s12 + $0x1608] sm:$0xff] }
 0x720   :  { %10930 = vmatprep.subr.bf16.mxu1 %v10929_v25  ;;  %v10195_v25 = vpack.c.bf16 %v5750_v37, %v5746_v5  ;;  %v10943_v55 = vpack.c.bf16 %v5752_v39, %v5748_v22  ;;  %v10197_v53 = vpack.c.bf16 %v5759_v13, %v5755_v18  ;;  %v5783_v5 = vld [vmem:[%s21715_s12 + $0x16e8] sm:$0xff]  ;;  %v5781_v37 = vld [vmem:[%s21715_s12 + $0x16d8] sm:$0xff]  ;;  %v5778_v13 = vld [vmem:[%s21715_s12 + $0x16c0] sm:$0xff] }
 0x721   :  { %v5785_v22 = vld [vmem:[%s21715_s12 + $0x16f8] sm:$0xff] }
 0x722   :  { %10184 = vmatpush1.bf16.msra.mxu0 %v10183_v24  ;;  %v10945_v24 = vpack.c.bf16 %v5761_v31, %v5757_v33  ;;  %v5782_v33 = vld [vmem:[%s21715_s12 + $0x16e0] sm:$0xff]  ;;  %v5780_v31 = vld [vmem:[%s21715_s12 + $0x16d0] sm:$0xff] }
 0x723   :  { %10932 = vmatpush1.bf16.msra.mxu1 %v10931_v8  ;;  %10186 = vmatprep.subr.bf16.mxu0 %v10185_v58  ;;  %v5760_v8 = vld [vmem:[%s21715_s12 + $0x1630] sm:$0xff]  ;;  %v5763_v58 = vld [vmem:[%s21715_s12 + $0x1648] sm:$0xff] }
 0x724   :  { %10934 = vmatprep.subr.bf16.mxu1 %v10933_v35  ;;  %v10199_v35 = vpack.c.bf16 %v5758_v43, %v5754_v29  ;;  %v10947_v50 = vpack.c.bf16 %v5760_v8, %v5756_v16  ;;  %v10201_v7 = vpack.c.bf16 %v5767_v27, %v5763_v58  ;;  %v5791_v29 = vld [vmem:[%s21715_s12 + $0x1728] sm:$0xff]  ;;  %v5789_v43 = vld [vmem:[%s21715_s12 + $0x1718] sm:$0xff]  ;;  %v5786_v27 = vld [vmem:[%s21715_s12 + $0x1700] sm:$0xff] }
 0x725   :  { %v5793_v16 = vld [vmem:[%s21715_s12 + $0x1738] sm:$0xff] }
 0x726   :  { %10188 = vmatpush1.bf16.msra.mxu0 %v10187_v54  ;;  %v10949_v54 = vpack.c.bf16 %v5769_v40, %v5765_v32  ;;  %v5790_v32 = vld [vmem:[%s21715_s12 + $0x1720] sm:$0xff]  ;;  %v5788_v40 = vld [vmem:[%s21715_s12 + $0x1710] sm:$0xff] }
 0x727   :  { %10936 = vmatpush1.bf16.msra.mxu1 %v10935_v30  ;;  %10190 = vmatprep.subr.bf16.mxu0 %v10189_v9  ;;  %v5768_v30 = vld [vmem:[%s21715_s12 + $0x1670] sm:$0xff]  ;;  %v5771_v9 = vld [vmem:[%s21715_s12 + $0x1688] sm:$0xff] }
 0x728   :  { %10938 = vmatprep.subr.bf16.mxu1 %v10937_v3  ;;  %v10203_v3 = vpack.c.bf16 %v5766_v6, %v5762_v48  ;;  %v10951_v10 = vpack.c.bf16 %v5768_v30, %v5764_v12  ;;  %v10205_v41 = vpack.c.bf16 %v5775_v19, %v5771_v9  ;;  %v5799_v48 = vld [vmem:[%s21715_s12 + $0x1768] sm:$0xff]  ;;  %v5797_v6 = vld [vmem:[%s21715_s12 + $0x1758] sm:$0xff]  ;;  %v5794_v19 = vld [vmem:[%s21715_s12 + $0x1740] sm:$0xff] }
 0x729   :  { %v5801_v12 = vld [vmem:[%s21715_s12 + $0x1778] sm:$0xff] }
 0x72a   :  { %10192 = vmatpush1.bf16.msra.mxu0 %v10191_v36  ;;  %v10953_v36 = vpack.c.bf16 %v5777_v4, %v5773_v47  ;;  %v5798_v47 = vld [vmem:[%s21715_s12 + $0x1760] sm:$0xff]  ;;  %v5796_v4 = vld [vmem:[%s21715_s12 + $0x1750] sm:$0xff] }
 0x72b   :  { %10940 = vmatpush1.bf16.msra.mxu1 %v10939_v59  ;;  %10194 = vmatprep.subr.bf16.mxu0 %v10193_v52  ;;  %v5776_v59 = vld [vmem:[%s21715_s12 + $0x16b0] sm:$0xff]  ;;  %v5779_v52 = vld [vmem:[%s21715_s12 + $0x16c8] sm:$0xff] }
 0x72c   :  { %10942 = vmatprep.subr.bf16.mxu1 %v10941_v61  ;;  %v10207_v61 = vpack.c.bf16 %v5774_v2, %v5770_v20  ;;  %v10955_v39 = vpack.c.bf16 %v5776_v59, %v5772_v44  ;;  %v10209_v18 = vpack.c.bf16 %v5783_v5, %v5779_v52  ;;  %v5807_v20 = vld [vmem:[%s21715_s12 + $0x17a8] sm:$0xff]  ;;  %v5805_v2 = vld [vmem:[%s21715_s12 + $0x1798] sm:$0xff]  ;;  %v5802_v5 = vld [vmem:[%s21715_s12 + $0x1780] sm:$0xff] }
 0x72d   :  { %v5809_v44 = vld [vmem:[%s21715_s12 + $0x17b8] sm:$0xff] }
 0x72e   :  { %10196 = vmatpush1.bf16.msra.mxu0 %v10195_v25  ;;  %v10957_v25 = vpack.c.bf16 %v5785_v22, %v5781_v37  ;;  %v5806_v37 = vld [vmem:[%s21715_s12 + $0x17a0] sm:$0xff]  ;;  %v5804_v22 = vld [vmem:[%s21715_s12 + $0x1790] sm:$0xff] }
 0x72f   :  { %10944 = vmatpush1.bf16.msra.mxu1 %v10943_v55  ;;  %10198 = vmatprep.subr.bf16.mxu0 %v10197_v53  ;;  %v5784_v55 = vld [vmem:[%s21715_s12 + $0x16f0] sm:$0xff]  ;;  %v5787_v53 = vld [vmem:[%s21715_s12 + $0x1708] sm:$0xff] }
 0x730   :  { %10946 = vmatprep.subr.bf16.mxu1 %v10945_v24  ;;  %v10211_v24 = vpack.c.bf16 %v5782_v33, %v5778_v13  ;;  %v10959_v8 = vpack.c.bf16 %v5784_v55, %v5780_v31  ;;  %v10213_v58 = vpack.c.bf16 %v5791_v29, %v5787_v53  ;;  %v5815_v13 = vld [vmem:[%s21715_s12 + $0x17e8] sm:$0xff]  ;;  %v5813_v33 = vld [vmem:[%s21715_s12 + $0x17d8] sm:$0xff]  ;;  %v5810_v29 = vld [vmem:[%s21715_s12 + $0x17c0] sm:$0xff] }
 0x731   :  { %v5817_v31 = vld [vmem:[%s21715_s12 + $0x17f8] sm:$0xff] }
 0x732   :  { %10200 = vmatpush1.bf16.msra.mxu0 %v10199_v35  ;;  %v10961_v35 = vpack.c.bf16 %v5793_v16, %v5789_v43  ;;  %v5814_v43 = vld [vmem:[%s21715_s12 + $0x17e0] sm:$0xff]  ;;  %v5812_v16 = vld [vmem:[%s21715_s12 + $0x17d0] sm:$0xff] }
 0x733   :  { %10948 = vmatpush1.bf16.msra.mxu1 %v10947_v50  ;;  %10202 = vmatprep.subr.bf16.mxu0 %v10201_v7  ;;  %v5792_v50 = vld [vmem:[%s21715_s12 + $0x1730] sm:$0xff]  ;;  %v5795_v7 = vld [vmem:[%s21715_s12 + $0x1748] sm:$0xff] }
 0x734   :  { %10950 = vmatprep.subr.bf16.mxu1 %v10949_v54  ;;  %v10215_v54 = vpack.c.bf16 %v5790_v32, %v5786_v27  ;;  %v10963_v30 = vpack.c.bf16 %v5792_v50, %v5788_v40  ;;  %v10217_v9 = vpack.c.bf16 %v5799_v48, %v5795_v7  ;;  %v5823_v27 = vld [vmem:[%s21715_s12 + $0x1828] sm:$0xff]  ;;  %v5821_v32 = vld [vmem:[%s21715_s12 + $0x1818] sm:$0xff]  ;;  %v5818_v48 = vld [vmem:[%s21715_s12 + $0x1800] sm:$0xff] }
 0x735   :  { %v5825_v40 = vld [vmem:[%s21715_s12 + $0x1838] sm:$0xff] }
 0x736   :  { %10204 = vmatpush1.bf16.msra.mxu0 %v10203_v3  ;;  %v10965_v3 = vpack.c.bf16 %v5801_v12, %v5797_v6  ;;  %v5822_v6 = vld [vmem:[%s21715_s12 + $0x1820] sm:$0xff]  ;;  %v10977_v12 = vpack.c.bf16 %v5825_v40, %v5821_v32  ;;  %v5844_v40 = vld [vmem:[%s21715_s12 + $0x18d0] sm:$0xff] }
 0x737   :  { %10952 = vmatpush1.bf16.msra.mxu1 %v10951_v10  ;;  %10206 = vmatprep.subr.bf16.mxu0 %v10205_v41  ;;  %v5800_v10 = vld [vmem:[%s21715_s12 + $0x1770] sm:$0xff]  ;;  %v5803_v41 = vld [vmem:[%s21715_s12 + $0x1788] sm:$0xff]  ;;  %v5846_v32 = vld [vmem:[%s21715_s12 + $0x18e0] sm:$0xff] }
 0x738   :  { %10954 = vmatprep.subr.bf16.mxu1 %v10953_v36  ;;  %v10219_v36 = vpack.c.bf16 %v5798_v47, %v5794_v19  ;;  %v10967_v59 = vpack.c.bf16 %v5800_v10, %v5796_v4  ;;  %v10221_v52 = vpack.c.bf16 %v5807_v20, %v5803_v41  ;;  %v5831_v19 = vld [vmem:[%s21715_s12 + $0x1868] sm:$0xff]  ;;  %v11783_v47 = vunpack.i.h.bf16 %v17545_v57  ;;  %v5833_v10 = vld [vmem:[%s21715_s12 + $0x1878] sm:$0xff]  ;;  %v5826_v20 = vld [vmem:[%s21715_s12 + $0x1840] sm:$0xff] }
 0x739   :  { %v10231_v4 = vpack.c.bf16 %v5822_v6, %v5818_v48  ;;  %v5855_v48 = vld [vmem:[%s21715_s12 + $0x1928] sm:$0xff]  ;;  %v5853_v6 = vld [vmem:[%s21715_s12 + $0x1918] sm:$0xff] }
 0x73a   :  { %10208 = vmatpush1.bf16.msra.mxu0 %v10207_v61  ;;  %v10969_v61 = vpack.c.bf16 %v5809_v44, %v5805_v2  ;;  %v5830_v2 = vld [vmem:[%s21715_s12 + $0x1860] sm:$0xff]  ;;  %v5828_v44 = vld [vmem:[%s21715_s12 + $0x1850] sm:$0xff]  ;;  %v6093_v57 = vld [vmem:[%s21715_s12 + $0x2098] sm:$0xff] }
 0x73b   :  { %10956 = vmatpush1.bf16.msra.mxu1 %v10955_v39  ;;  %10210 = vmatprep.subr.bf16.mxu0 %v10209_v18  ;;  %v5808_v39 = vld [vmem:[%s21715_s12 + $0x17b0] sm:$0xff]  ;;  %v5811_v18 = vld [vmem:[%s21715_s12 + $0x17c8] sm:$0xff] }
 0x73c   :  { %10958 = vmatprep.subr.bf16.mxu1 %v10957_v25  ;;  %v10223_v25 = vpack.c.bf16 %v5806_v37, %v5802_v5  ;;  %v10971_v55 = vpack.c.bf16 %v5808_v39, %v5804_v22  ;;  %v10225_v53 = vpack.c.bf16 %v5815_v13, %v5811_v18  ;;  %v5839_v5 = vld [vmem:[%s21715_s12 + $0x18a8] sm:$0xff]  ;;  %v5837_v22 = vld [vmem:[%s21715_s12 + $0x1898] sm:$0xff]  ;;  %v4896_v39 = vsel %vm4894_vm7, %v11782_v26, %v11783_v47 }
 0x73d   :  { %v10235_v18 = vpack.c.bf16 %v5830_v2, %v5826_v20  ;;  %v5859_v20 = vld [vmem:[%s21715_s12 + $0x1948] sm:$0xff] }
 0x73e   :  { %10212 = vmatpush1.bf16.msra.mxu0 %v10211_v24  ;;  %v10973_v24 = vpack.c.bf16 %v5817_v31, %v5813_v33  ;;  %v5834_v31 = vld [vmem:[%s21715_s12 + $0x1880] sm:$0xff]  ;;  %v5863_v2 = vld [vmem:[%s21715_s12 + $0x1968] sm:$0xff] }
 0x73f   :  { %10960 = vmatpush1.bf16.msra.mxu1 %v10959_v8  ;;  %10214 = vmatprep.subr.bf16.mxu0 %v10213_v58  ;;  %v5816_v8 = vld [vmem:[%s21715_s12 + $0x17f0] sm:$0xff]  ;;  %v5819_v58 = vld [vmem:[%s21715_s12 + $0x1808] sm:$0xff] }
 0x740   :  { %10962 = vmatprep.subr.bf16.mxu1 %v10961_v35  ;;  %v10227_v35 = vpack.c.bf16 %v5814_v43, %v5810_v29  ;;  %v10975_v50 = vpack.c.bf16 %v5816_v8, %v5812_v16  ;;  %v10229_v7 = vpack.c.bf16 %v5823_v27, %v5819_v58  ;;  %v5847_v29 = vld [vmem:[%s21715_s12 + $0x18e8] sm:$0xff]  ;;  %v5845_v43 = vld [vmem:[%s21715_s12 + $0x18d8] sm:$0xff]  ;;  %v5842_v27 = vld [vmem:[%s21715_s12 + $0x18c0] sm:$0xff] }
 0x741   :  { %v5849_v16 = vld [vmem:[%s21715_s12 + $0x18f8] sm:$0xff] }
 0x742   :  { %10216 = vmatpush1.bf16.msra.mxu0 %v10215_v54  ;;  %v5820_v54 = vld [vmem:[%s21715_s12 + $0x1810] sm:$0xff] }
 0x743   :  { %10964 = vmatpush1.bf16.msra.mxu1 %v10963_v30  ;;  %10218 = vmatprep.subr.bf16.mxu0 %v10217_v9  ;;  %v5824_v30 = vld [vmem:[%s21715_s12 + $0x1830] sm:$0xff]  ;;  %v5827_v9 = vld [vmem:[%s21715_s12 + $0x1848] sm:$0xff] }
 0x744   :  { %10966 = vmatprep.subr.bf16.mxu1 %v10965_v3  ;;  %v5829_v3 = vld [vmem:[%s21715_s12 + $0x1858] sm:$0xff]  ;;  %v10979_v41 = vpack.c.bf16 %v5824_v30, %v5820_v54  ;;  %v10243_v54 = vpack.c.bf16 %v5846_v32, %v5842_v27 }
 0x745   :  { %v10981_v37 = vpack.c.bf16 %v5833_v10, %v5829_v3  ;;  %v5852_v3 = vld [vmem:[%s21715_s12 + $0x1910] sm:$0xff]  ;;  %v5877_v27 = vld [vmem:[%s21715_s12 + $0x19d8] sm:$0xff] }
 0x746   :  { %10220 = vmatpush1.bf16.msra.mxu0 %v10219_v36  ;;  %v10233_v36 = vpack.c.bf16 %v5831_v19, %v5827_v9  ;;  %v5850_v19 = vld [vmem:[%s21715_s12 + $0x1900] sm:$0xff]  ;;  %v5881_v32 = vld [vmem:[%s21715_s12 + $0x19f8] sm:$0xff] }
 0x747   :  { %10968 = vmatpush1.bf16.msra.mxu1 %v10967_v59  ;;  %10222 = vmatprep.subr.bf16.mxu0 %v10221_v52  ;;  %v5832_v59 = vld [vmem:[%s21715_s12 + $0x1870] sm:$0xff]  ;;  %v5835_v52 = vld [vmem:[%s21715_s12 + $0x1888] sm:$0xff] }
 0x748   :  { %10970 = vmatprep.subr.bf16.mxu1 %v10969_v61  ;;  %v5841_v61 = vld [vmem:[%s21715_s12 + $0x18b8] sm:$0xff]  ;;  %v10983_v13 = vpack.c.bf16 %v5832_v59, %v5828_v44  ;;  %v10237_v33 = vpack.c.bf16 %v5839_v5, %v5835_v52  ;;  %v10249_v5 = vpack.c.bf16 %v5863_v2, %v5859_v20  ;;  %v5882_v20 = vld [vmem:[%s21715_s12 + $0x1a00] sm:$0xff] }
 0x749   :  { %v10985_v26 = vpack.c.bf16 %v5841_v61, %v5837_v22  ;;  %v5861_v44 = vld [vmem:[%s21715_s12 + $0x1958] sm:$0xff]  ;;  %v5862_v22 = vld [vmem:[%s21715_s12 + $0x1960] sm:$0xff]  ;;  %v5860_v61 = vld [vmem:[%s21715_s12 + $0x1950] sm:$0xff] }
 0x74a   :  { %10224 = vmatpush1.bf16.msra.mxu0 %v10223_v25  ;;  %v5836_v25 = vld [vmem:[%s21715_s12 + $0x1890] sm:$0xff]  ;;  %v5886_v2 = vld [vmem:[%s21715_s12 + $0x1a20] sm:$0xff] }
 0x74b   :  { %10972 = vmatpush1.bf16.msra.mxu1 %v10971_v55  ;;  %10226 = vmatprep.subr.bf16.mxu0 %v10225_v53  ;;  %v5840_v55 = vld [vmem:[%s21715_s12 + $0x18b0] sm:$0xff]  ;;  %v5843_v53 = vld [vmem:[%s21715_s12 + $0x18c8] sm:$0xff] }
 0x74c   :  { %10974 = vmatprep.subr.bf16.mxu1 %v10973_v24  ;;  %v10987_v8 = vpack.c.bf16 %v5840_v55, %v5836_v25  ;;  %v10241_v58 = vpack.c.bf16 %v5847_v29, %v5843_v53  ;;  %v5866_v53 = vld [vmem:[%s21715_s12 + $0x1980] sm:$0xff] }
 0x74d   :  { %v5870_v29 = vld [vmem:[%s21715_s12 + $0x19a0] sm:$0xff] }
 0x74e   :  { %10228 = vmatpush1.bf16.msra.mxu0 %v10227_v35  ;;  %v10989_v35 = vpack.c.bf16 %v5849_v16, %v5845_v43  ;;  %v5868_v43 = vld [vmem:[%s21715_s12 + $0x1990] sm:$0xff] }
 0x74f   :  { %10976 = vmatpush1.bf16.msra.mxu1 %v10975_v50  ;;  %10230 = vmatprep.subr.bf16.mxu0 %v10229_v7  ;;  %v5848_v50 = vld [vmem:[%s21715_s12 + $0x18f0] sm:$0xff]  ;;  %v5851_v7 = vld [vmem:[%s21715_s12 + $0x1908] sm:$0xff] }
 0x750   :  { %10978 = vmatprep.subr.bf16.mxu1 %v10977_v12  ;;  %v5857_v12 = vld [vmem:[%s21715_s12 + $0x1938] sm:$0xff]  ;;  %v10991_v30 = vpack.c.bf16 %v5848_v50, %v5844_v40  ;;  %v10245_v9 = vpack.c.bf16 %v5855_v48, %v5851_v7  ;;  %v10255_v40 = vpack.c.bf16 %v5870_v29, %v5866_v53  ;;  %v5874_v7 = vld [vmem:[%s21715_s12 + $0x19c0] sm:$0xff] }
 0x751   :  { %6972 = vmatmul.mubr.f32.vlgmr.msra.gmra.mrb[98].mxu0 %v17534_v46  ;;  %v10993_v10 = vpack.c.bf16 %v5857_v12, %v5853_v6  ;;  %v5878_v48 = vld [vmem:[%s21715_s12 + $0x19e0] sm:$0xff]  ;;  %v5876_v6 = vld [vmem:[%s21715_s12 + $0x19d0] sm:$0xff]  ;;  %v11005_v12 = vpack.c.bf16 %v5881_v32, %v5877_v27  ;;  %v5901_v53 = vld [vmem:[%s21715_s12 + $0x1a98] sm:$0xff] }
 0x752   :  { %7824 = vmatmul.mubr.f32.vlgmr.msra.gmra.mrb[122].mxu1 %v17534_v46  ;;  %10232 = vmatpush1.bf16.msra.mxu0 %v10231_v4  ;;  %v5838_v46 = vld [vmem:[%s21715_s12 + $0x18a0] sm:$0xff]  ;;  %v5905_v29 = vld [vmem:[%s21715_s12 + $0x1ab8] sm:$0xff]  ;;  %v5900_v27 = vld [vmem:[%s21715_s12 + $0x1a90] sm:$0xff] }
 0x753   :  { %7042 = vmatprep.mubr.f32.mxu0 %v4896_v39  ;;  %10980 = vmatpush1.bf16.msra.mxu1 %v10979_v41  ;;  %v10239_v24 = vpack.c.bf16 %v5838_v46, %v5834_v31  ;;  %v5854_v4 = vld [vmem:[%s21715_s12 + $0x1920] sm:$0xff]  ;;  %v5856_v41 = vld [vmem:[%s21715_s12 + $0x1930] sm:$0xff]  ;;  %v5869_v31 = vld [vmem:[%s21715_s12 + $0x1998] sm:$0xff]  ;;  %v11017_v32 = vpack.c.bf16 %v5905_v29, %v5901_v53 }
 0x754   :  { %7894 = vmatprep.mubr.f32.mxu1 %v4896_v39  ;;  %10234 = vmatprep.subr.bf16.mxu0 %v10233_v36  ;;  %v5865_v36 = vld [vmem:[%s21715_s12 + $0x1978] sm:$0xff]  ;;  %v10247_v59 = vpack.c.bf16 %v5854_v4, %v5850_v19  ;;  %v10995_v52 = vpack.c.bf16 %v5856_v41, %v5852_v3  ;;  %v10259_v3 = vpack.c.bf16 %v5878_v48, %v5874_v7  ;;  %v5924_v53 = vld [vmem:[%s21715_s12 + $0x1b50] sm:$0xff] }
 0x755   :  { %10982 = vmatprep.subr.bf16.mxu1 %v10981_v37  ;;  %v5858_v37 = vld [vmem:[%s21715_s12 + $0x1940] sm:$0xff]  ;;  %v10997_v39 = vpack.c.bf16 %v5865_v36, %v5861_v44  ;;  %v5873_v46 = vld [vmem:[%s21715_s12 + $0x19b8] sm:$0xff]  ;;  %v5884_v44 = vld [vmem:[%s21715_s12 + $0x1a10] sm:$0xff] }
 0x756   :  { %10236 = vmatpush1.bf16.msra.mxu0 %v10235_v18  ;;  %v5864_v18 = vld [vmem:[%s21715_s12 + $0x1970] sm:$0xff]  ;;  %v10251_v25 = vpack.c.bf16 %v5862_v22, %v5858_v37  ;;  %v11001_v16 = vpack.c.bf16 %v5873_v46, %v5869_v31  ;;  %v5885_v19 = vld [vmem:[%s21715_s12 + $0x1a18] sm:$0xff] }
 0x757   :  { %10984 = vmatpush1.bf16.msra.mxu1 %v10983_v13  ;;  %10238 = vmatprep.subr.bf16.mxu0 %v10237_v33  ;;  %v5867_v13 = vld [vmem:[%s21715_s12 + $0x1988] sm:$0xff]  ;;  %v5889_v4 = vld [vmem:[%s21715_s12 + $0x1a38] sm:$0xff]  ;;  %v5892_v31 = vld [vmem:[%s21715_s12 + $0x1a50] sm:$0xff] }
 0x758   :  { %10986 = vmatprep.subr.bf16.mxu1 %v10985_v26  ;;  %v5871_v33 = vld [vmem:[%s21715_s12 + $0x19a8] sm:$0xff]  ;;  %v10999_v26 = vpack.c.bf16 %v5864_v18, %v5860_v61  ;;  %v11009_v36 = vpack.c.bf16 %v5889_v4, %v5885_v19  ;;  %v5893_v37 = vld [vmem:[%s21715_s12 + $0x1a58] sm:$0xff]  ;;  %v10263_v61 = vpack.c.bf16 %v5886_v2, %v5882_v20  ;;  %v5908_v19 = vld [vmem:[%s21715_s12 + $0x1ad0] sm:$0xff] }
 0x759   :  { %v10253_v55 = vpack.c.bf16 %v5871_v33, %v5867_v13  ;;  %v5897_v22 = vld [vmem:[%s21715_s12 + $0x1a78] sm:$0xff]  ;;  %v5890_v13 = vld [vmem:[%s21715_s12 + $0x1a40] sm:$0xff] }
 0x75a   :  { %10240 = vmatpush1.bf16.msra.mxu0 %v10239_v24  ;;  %v5872_v24 = vld [vmem:[%s21715_s12 + $0x19b0] sm:$0xff]  ;;  %v5894_v33 = vld [vmem:[%s21715_s12 + $0x1a60] sm:$0xff]  ;;  %v11013_v46 = vpack.c.bf16 %v5897_v22, %v5893_v37  ;;  %v5909_v7 = vld [vmem:[%s21715_s12 + $0x1ad8] sm:$0xff] }
 0x75b   :  { %10988 = vmatpush1.bf16.msra.mxu1 %v10987_v8  ;;  %10242 = vmatprep.subr.bf16.mxu0 %v10241_v58  ;;  %v5875_v8 = vld [vmem:[%s21715_s12 + $0x19c8] sm:$0xff]  ;;  %v5913_v48 = vld [vmem:[%s21715_s12 + $0x1af8] sm:$0xff]  ;;  %v5916_v37 = vld [vmem:[%s21715_s12 + $0x1b10] sm:$0xff] }
 0x75c   :  { %10990 = vmatprep.subr.bf16.mxu1 %v10989_v35  ;;  %v5879_v58 = vld [vmem:[%s21715_s12 + $0x19e8] sm:$0xff]  ;;  %v11003_v35 = vpack.c.bf16 %v5872_v24, %v5868_v43  ;;  %v10267_v43 = vpack.c.bf16 %v5894_v33, %v5890_v13  ;;  %v11021_v4 = vpack.c.bf16 %v5913_v48, %v5909_v7  ;;  %v5917_v20 = vld [vmem:[%s21715_s12 + $0x1b18] sm:$0xff]  ;;  %v5932_v7 = vld [vmem:[%s21715_s12 + $0x1b90] sm:$0xff] }
 0x75d   :  { %v10257_v50 = vpack.c.bf16 %v5879_v58, %v5875_v8  ;;  %v5898_v8 = vld [vmem:[%s21715_s12 + $0x1a80] sm:$0xff]  ;;  %v5921_v2 = vld [vmem:[%s21715_s12 + $0x1b38] sm:$0xff] }
 0x75e   :  { %10244 = vmatpush1.bf16.msra.mxu0 %v10243_v54  ;;  %v5880_v54 = vld [vmem:[%s21715_s12 + $0x19f0] sm:$0xff]  ;;  %v5902_v58 = vld [vmem:[%s21715_s12 + $0x1aa0] sm:$0xff]  ;;  %v11025_v22 = vpack.c.bf16 %v5921_v2, %v5917_v20  ;;  %v5925_v13 = vld [vmem:[%s21715_s12 + $0x1b58] sm:$0xff] }
 0x75f   :  { %10992 = vmatpush1.bf16.msra.mxu1 %v10991_v30  ;;  %10246 = vmatprep.subr.bf16.mxu0 %v10245_v9  ;;  %v5883_v30 = vld [vmem:[%s21715_s12 + $0x1a08] sm:$0xff]  ;;  %v5929_v33 = vld [vmem:[%s21715_s12 + $0x1b78] sm:$0xff]  ;;  %v5940_v20 = vld [vmem:[%s21715_s12 + $0x1bd0] sm:$0xff] }
 0x760   :  { %10994 = vmatprep.subr.bf16.mxu1 %v10993_v10  ;;  %v5887_v9 = vld [vmem:[%s21715_s12 + $0x1a28] sm:$0xff]  ;;  %v11007_v10 = vpack.c.bf16 %v5880_v54, %v5876_v6  ;;  %v10271_v6 = vpack.c.bf16 %v5902_v58, %v5898_v8  ;;  %v11029_v29 = vpack.c.bf16 %v5929_v33, %v5925_v13  ;;  %v5933_v8 = vld [vmem:[%s21715_s12 + $0x1b98] sm:$0xff]  ;;  %v5948_v33 = vld [vmem:[%s21715_s12 + $0x1c10] sm:$0xff] }
 0x761   :  { %v10261_v41 = vpack.c.bf16 %v5887_v9, %v5883_v30  ;;  %v5906_v30 = vld [vmem:[%s21715_s12 + $0x1ac0] sm:$0xff]  ;;  %v5937_v58 = vld [vmem:[%s21715_s12 + $0x1bb8] sm:$0xff] }
 0x762   :  { %10248 = vmatpush1.bf16.msra.mxu0 %v10247_v59  ;;  %v5888_v59 = vld [vmem:[%s21715_s12 + $0x1a30] sm:$0xff]  ;;  %v5910_v9 = vld [vmem:[%s21715_s12 + $0x1ae0] sm:$0xff]  ;;  %v11033_v48 = vpack.c.bf16 %v5937_v58, %v5933_v8 }
 0x763   :  { %10996 = vmatpush1.bf16.msra.mxu1 %v10995_v52  ;;  %10250 = vmatprep.subr.bf16.mxu0 %v10249_v5  ;;  %v5891_v52 = vld [vmem:[%s21715_s12 + $0x1a48] sm:$0xff]  ;;  %v5956_v8 = vld [vmem:[%s21715_s12 + $0x1c50] sm:$0xff] }
 0x764   :  { %10998 = vmatprep.subr.bf16.mxu1 %v10997_v39  ;;  %v5895_v5 = vld [vmem:[%s21715_s12 + $0x1a68] sm:$0xff]  ;;  %v11011_v39 = vpack.c.bf16 %v5888_v59, %v5884_v44  ;;  %v10275_v44 = vpack.c.bf16 %v5910_v9, %v5906_v30  ;;  %v5941_v30 = vld [vmem:[%s21715_s12 + $0x1bd8] sm:$0xff] }
 0x765   :  { %v10265_v18 = vpack.c.bf16 %v5895_v5, %v5891_v52  ;;  %v5914_v52 = vld [vmem:[%s21715_s12 + $0x1b00] sm:$0xff]  ;;  %v5945_v9 = vld [vmem:[%s21715_s12 + $0x1bf8] sm:$0xff] }
 0x766   :  { %10252 = vmatpush1.bf16.msra.mxu0 %v10251_v25  ;;  %v5896_v25 = vld [vmem:[%s21715_s12 + $0x1a70] sm:$0xff]  ;;  %v5918_v5 = vld [vmem:[%s21715_s12 + $0x1b20] sm:$0xff]  ;;  %v11037_v2 = vpack.c.bf16 %v5945_v9, %v5941_v30 }
 0x767   :  { %11000 = vmatpush1.bf16.msra.mxu1 %v10999_v26  ;;  %10254 = vmatprep.subr.bf16.mxu0 %v10253_v55  ;;  %v5899_v26 = vld [vmem:[%s21715_s12 + $0x1a88] sm:$0xff]  ;;  %v5962_v30 = vld [vmem:[%s21715_s12 + $0x1c80] sm:$0xff]  ;;  %v5964_v9 = vld [vmem:[%s21715_s12 + $0x1c90] sm:$0xff] }
 0x768   :  { %11002 = vmatprep.subr.bf16.mxu1 %v11001_v16  ;;  %v5903_v55 = vld [vmem:[%s21715_s12 + $0x1aa8] sm:$0xff]  ;;  %v11015_v16 = vpack.c.bf16 %v5896_v25, %v5892_v31  ;;  %v10279_v31 = vpack.c.bf16 %v5918_v5, %v5914_v52  ;;  %v5949_v52 = vld [vmem:[%s21715_s12 + $0x1c18] sm:$0xff] }
 0x769   :  { %v10269_v24 = vpack.c.bf16 %v5903_v55, %v5899_v26  ;;  %v5922_v26 = vld [vmem:[%s21715_s12 + $0x1b40] sm:$0xff]  ;;  %v5953_v5 = vld [vmem:[%s21715_s12 + $0x1c38] sm:$0xff] }
 0x76a   :  { %10256 = vmatpush1.bf16.msra.mxu0 %v10255_v40  ;;  %v5904_v40 = vld [vmem:[%s21715_s12 + $0x1ab0] sm:$0xff]  ;;  %v5926_v55 = vld [vmem:[%s21715_s12 + $0x1b60] sm:$0xff]  ;;  %v11041_v13 = vpack.c.bf16 %v5953_v5, %v5949_v52 }
 0x76b   :  { %11004 = vmatpush1.bf16.msra.mxu1 %v11003_v35  ;;  %10258 = vmatprep.subr.bf16.mxu0 %v10257_v50  ;;  %v5907_v35 = vld [vmem:[%s21715_s12 + $0x1ac8] sm:$0xff]  ;;  %v5972_v52 = vld [vmem:[%s21715_s12 + $0x1cd0] sm:$0xff] }
 0x76c   :  { %11006 = vmatprep.subr.bf16.mxu1 %v11005_v12  ;;  %v5911_v50 = vld [vmem:[%s21715_s12 + $0x1ae8] sm:$0xff]  ;;  %v11019_v12 = vpack.c.bf16 %v5904_v40, %v5900_v27  ;;  %v10283_v27 = vpack.c.bf16 %v5926_v55, %v5922_v26  ;;  %v11787_v26 = vunpack.i.l.bf16 %v17580_v49 }
 0x76d   :  { %v10273_v54 = vpack.c.bf16 %v5911_v50, %v5907_v35  ;;  %v5930_v35 = vld [vmem:[%s21715_s12 + $0x1b80] sm:$0xff] }
 0x76e   :  { %10260 = vmatpush1.bf16.msra.mxu0 %v10259_v3  ;;  %v5912_v3 = vld [vmem:[%s21715_s12 + $0x1af0] sm:$0xff]  ;;  %v5934_v50 = vld [vmem:[%s21715_s12 + $0x1ba0] sm:$0xff] }
 0x76f   :  { %11008 = vmatpush1.bf16.msra.mxu1 %v11007_v10  ;;  %10262 = vmatprep.subr.bf16.mxu0 %v10261_v41  ;;  %v5915_v10 = vld [vmem:[%s21715_s12 + $0x1b08] sm:$0xff] }
 0x770   :  { %11010 = vmatprep.subr.bf16.mxu1 %v11009_v36  ;;  %v5919_v41 = vld [vmem:[%s21715_s12 + $0x1b28] sm:$0xff]  ;;  %v11023_v36 = vpack.c.bf16 %v5912_v3, %v5908_v19  ;;  %v10287_v19 = vpack.c.bf16 %v5934_v50, %v5930_v35  ;;  %v5965_v50 = vld [vmem:[%s21715_s12 + $0x1c98] sm:$0xff] }
 0x771   :  { %v10277_v59 = vpack.c.bf16 %v5919_v41, %v5915_v10  ;;  %v5938_v10 = vld [vmem:[%s21715_s12 + $0x1bc0] sm:$0xff] }
 0x772   :  { %10264 = vmatpush1.bf16.msra.mxu0 %v10263_v61  ;;  %v5920_v61 = vld [vmem:[%s21715_s12 + $0x1b30] sm:$0xff]  ;;  %v5942_v41 = vld [vmem:[%s21715_s12 + $0x1be0] sm:$0xff] }
 0x773   :  { %11012 = vmatpush1.bf16.msra.mxu1 %v11011_v39  ;;  %10266 = vmatprep.subr.bf16.mxu0 %v10265_v18  ;;  %v5923_v39 = vld [vmem:[%s21715_s12 + $0x1b48] sm:$0xff] }
 0x774   :  { %11014 = vmatprep.subr.bf16.mxu1 %v11013_v46  ;;  %v5927_v18 = vld [vmem:[%s21715_s12 + $0x1b68] sm:$0xff]  ;;  %v11027_v46 = vpack.c.bf16 %v5920_v61, %v5916_v37  ;;  %v10291_v37 = vpack.c.bf16 %v5942_v41, %v5938_v10  ;;  %v5973_v10 = vld [vmem:[%s21715_s12 + $0x1cd8] sm:$0xff] }
 0x775   :  { %v10281_v25 = vpack.c.bf16 %v5927_v18, %v5923_v39  ;;  %v5946_v39 = vld [vmem:[%s21715_s12 + $0x1c00] sm:$0xff]  ;;  %v5977_v41 = vld [vmem:[%s21715_s12 + $0x1cf8] sm:$0xff] }
 0x776   :  { %10268 = vmatpush1.bf16.msra.mxu0 %v10267_v43  ;;  %v5928_v43 = vld [vmem:[%s21715_s12 + $0x1b70] sm:$0xff]  ;;  %v5950_v18 = vld [vmem:[%s21715_s12 + $0x1c20] sm:$0xff]  ;;  %v11053_v5 = vpack.c.bf16 %v5977_v41, %v5973_v10 }
 0x777   :  { %11016 = vmatpush1.bf16.msra.mxu1 %v11015_v16  ;;  %10270 = vmatprep.subr.bf16.mxu0 %v10269_v24  ;;  %v5931_v16 = vld [vmem:[%s21715_s12 + $0x1b88] sm:$0xff]  ;;  %v10295_v55 = vpack.c.bf16 %v5950_v18, %v5946_v39  ;;  %v5981_v39 = vld [vmem:[%s21715_s12 + $0x1d18] sm:$0xff]  ;;  %v6000_v41 = vld [vmem:[%s21715_s12 + $0x1db0] sm:$0xff] }
 0x778   :  { %11018 = vmatprep.subr.bf16.mxu1 %v11017_v32  ;;  %v5935_v24 = vld [vmem:[%s21715_s12 + $0x1ba8] sm:$0xff]  ;;  %v11031_v32 = vpack.c.bf16 %v5928_v43, %v5924_v53  ;;  %v5957_v53 = vld [vmem:[%s21715_s12 + $0x1c58] sm:$0xff] }
 0x779   :  { %v10285_v40 = vpack.c.bf16 %v5935_v24, %v5931_v16  ;;  %v5954_v16 = vld [vmem:[%s21715_s12 + $0x1c40] sm:$0xff]  ;;  %v5985_v18 = vld [vmem:[%s21715_s12 + $0x1d38] sm:$0xff] }
 0x77a   :  { %10272 = vmatpush1.bf16.msra.mxu0 %v10271_v6  ;;  %v5936_v6 = vld [vmem:[%s21715_s12 + $0x1bb0] sm:$0xff]  ;;  %v5958_v24 = vld [vmem:[%s21715_s12 + $0x1c60] sm:$0xff] }
 0x77b   :  { %11020 = vmatpush1.bf16.msra.mxu1 %v11019_v12  ;;  %10274 = vmatprep.subr.bf16.mxu0 %v10273_v54  ;;  %v5939_v12 = vld [vmem:[%s21715_s12 + $0x1bc8] sm:$0xff] }
 0x77c   :  { %11022 = vmatprep.subr.bf16.mxu1 %v11021_v4  ;;  %v5943_v54 = vld [vmem:[%s21715_s12 + $0x1be8] sm:$0xff]  ;;  %v11035_v4 = vpack.c.bf16 %v5936_v6, %v5932_v7  ;;  %v5969_v7 = vld [vmem:[%s21715_s12 + $0x1cb8] sm:$0xff]  ;;  %v10299_v6 = vpack.c.bf16 %v5958_v24, %v5954_v16 }
 0x77d   :  { %v10289_v3 = vpack.c.bf16 %v5943_v54, %v5939_v12  ;;  %v5991_v16 = vld [vmem:[%s21715_s12 + $0x1d68] sm:$0xff]  ;;  %v5989_v24 = vld [vmem:[%s21715_s12 + $0x1d58] sm:$0xff] }
 0x77e   :  { %10276 = vmatpush1.bf16.msra.mxu0 %v10275_v44  ;;  %v5944_v44 = vld [vmem:[%s21715_s12 + $0x1bf0] sm:$0xff] }
 0x77f   :  { %11024 = vmatpush1.bf16.msra.mxu1 %v11023_v36  ;;  %10278 = vmatprep.subr.bf16.mxu0 %v10277_v59  ;;  %v5947_v36 = vld [vmem:[%s21715_s12 + $0x1c08] sm:$0xff] }
 0x780   :  { %11026 = vmatprep.subr.bf16.mxu1 %v11025_v22  ;;  %v5951_v59 = vld [vmem:[%s21715_s12 + $0x1c28] sm:$0xff]  ;;  %v11039_v22 = vpack.c.bf16 %v5944_v44, %v5940_v20 }
 0x781   :  { %v10293_v61 = vpack.c.bf16 %v5951_v59, %v5947_v36  ;;  %v5970_v36 = vld [vmem:[%s21715_s12 + $0x1cc0] sm:$0xff] }
 0x782   :  { %10280 = vmatpush1.bf16.msra.mxu0 %v10279_v31  ;;  %v5952_v31 = vld [vmem:[%s21715_s12 + $0x1c30] sm:$0xff]  ;;  %v5974_v59 = vld [vmem:[%s21715_s12 + $0x1ce0] sm:$0xff] }
 0x783   :  { %11028 = vmatpush1.bf16.msra.mxu1 %v11027_v46  ;;  %10282 = vmatprep.subr.bf16.mxu0 %v10281_v25  ;;  %v5955_v46 = vld [vmem:[%s21715_s12 + $0x1c48] sm:$0xff]  ;;  %v11043_v43 = vpack.c.bf16 %v5952_v31, %v5948_v33 }
 0x784   :  { %11030 = vmatprep.subr.bf16.mxu1 %v11029_v29  ;;  %v5959_v25 = vld [vmem:[%s21715_s12 + $0x1c68] sm:$0xff]  ;;  %v5961_v29 = vld [vmem:[%s21715_s12 + $0x1c78] sm:$0xff] }
 0x785   :  { %v10297_v58 = vpack.c.bf16 %v5959_v25, %v5955_v46  ;;  %v11045_v35 = vpack.c.bf16 %v5961_v29, %v5957_v53  ;;  %v5978_v46 = vld [vmem:[%s21715_s12 + $0x1d00] sm:$0xff]  ;;  %v11057_v53 = vpack.c.bf16 %v5985_v18, %v5981_v39  ;;  %v5984_v29 = vld [vmem:[%s21715_s12 + $0x1d30] sm:$0xff] }
 0x786   :  { %10284 = vmatpush1.bf16.msra.mxu0 %v10283_v27  ;;  %v5960_v27 = vld [vmem:[%s21715_s12 + $0x1c70] sm:$0xff]  ;;  %v5982_v25 = vld [vmem:[%s21715_s12 + $0x1d20] sm:$0xff] }
 0x787   :  { %11032 = vmatpush1.bf16.msra.mxu1 %v11031_v32  ;;  %10286 = vmatprep.subr.bf16.mxu0 %v10285_v40  ;;  %v5963_v32 = vld [vmem:[%s21715_s12 + $0x1c88] sm:$0xff]  ;;  %v11047_v12 = vpack.c.bf16 %v5960_v27, %v5956_v8  ;;  %v5993_v8 = vld [vmem:[%s21715_s12 + $0x1d78] sm:$0xff]  ;;  %v6008_v18 = vld [vmem:[%s21715_s12 + $0x1df0] sm:$0xff] }
 0x788   :  { %11034 = vmatprep.subr.bf16.mxu1 %v11033_v48  ;;  %v5967_v40 = vld [vmem:[%s21715_s12 + $0x1ca8] sm:$0xff]  ;;  %v4911_v48 = vsel %vm4910_vm8, %v11787_v26, %v11788_v56  ;;  %v11049_v56 = vpack.c.bf16 %v5969_v7, %v5965_v50  ;;  %v5988_v50 = vld [vmem:[%s21715_s12 + $0x1d50] sm:$0xff]  ;;  %v11061_v7 = vpack.c.bf16 %v5993_v8, %v5989_v24 }
 0x789   :  { %v10301_v54 = vpack.c.bf16 %v5967_v40, %v5963_v32  ;;  %v5986_v40 = vld [vmem:[%s21715_s12 + $0x1d40] sm:$0xff]  ;;  %v6016_v8 = vld [vmem:[%s21715_s12 + $0x1e30] sm:$0xff] }
 0x78a   :  { %10288 = vmatpush1.bf16.msra.mxu0 %v10287_v19  ;;  %v5968_v19 = vld [vmem:[%s21715_s12 + $0x1cb0] sm:$0xff] }
 0x78b   :  { %11036 = vmatpush1.bf16.msra.mxu1 %v11035_v4  ;;  %10290 = vmatprep.subr.bf16.mxu0 %v10289_v3  ;;  %v5971_v4 = vld [vmem:[%s21715_s12 + $0x1cc8] sm:$0xff] }
 0x78c   :  { %11038 = vmatprep.subr.bf16.mxu1 %v11037_v2  ;;  %v5975_v3 = vld [vmem:[%s21715_s12 + $0x1ce8] sm:$0xff]  ;;  %v11051_v2 = vpack.c.bf16 %v5968_v19, %v5964_v9  ;;  %v5994_v19 = vld [vmem:[%s21715_s12 + $0x1d80] sm:$0xff] }
 0x78d   :  { %v10305_v44 = vpack.c.bf16 %v5975_v3, %v5971_v4  ;;  %v5998_v4 = vld [vmem:[%s21715_s12 + $0x1da0] sm:$0xff]  ;;  %v5996_v3 = vld [vmem:[%s21715_s12 + $0x1d90] sm:$0xff] }
 0x78e   :  { %10292 = vmatpush1.bf16.msra.mxu0 %v10291_v37  ;;  %v5976_v37 = vld [vmem:[%s21715_s12 + $0x1cf0] sm:$0xff] }
 0x78f   :  { %11040 = vmatpush1.bf16.msra.mxu1 %v11039_v22  ;;  %10294 = vmatprep.subr.bf16.mxu0 %v10293_v61  ;;  %v5979_v22 = vld [vmem:[%s21715_s12 + $0x1d08] sm:$0xff]  ;;  %v11055_v33 = vpack.c.bf16 %v5976_v37, %v5972_v52  ;;  %v11067_v52 = vpack.c.bf16 %v6000_v41, %v5996_v3  ;;  %v6002_v37 = vld [vmem:[%s21715_s12 + $0x1dc0] sm:$0xff] }
 0x790   :  { %11042 = vmatprep.subr.bf16.mxu1 %v11041_v13  ;;  %v5983_v61 = vld [vmem:[%s21715_s12 + $0x1d28] sm:$0xff]  ;;  %v10307_v13 = vpack.c.bf16 %v5974_v59, %v5970_v36  ;;  %v6009_v36 = vld [vmem:[%s21715_s12 + $0x1df8] sm:$0xff]  ;;  %v10319_v59 = vpack.c.bf16 %v5998_v4, %v5994_v19  ;;  %v6026_v41 = vld [vmem:[%s21715_s12 + $0x1e80] sm:$0xff] }
 0x791   :  { %7043 = vmatmul.mubr.f32.vlgmr.msra.gmra.mrb[98].mxu0 %v17569_v1  ;;  %v10309_v31 = vpack.c.bf16 %v5983_v61, %v5979_v22  ;;  %v6006_v22 = vld [vmem:[%s21715_s12 + $0x1de0] sm:$0xff]  ;;  %v6004_v61 = vld [vmem:[%s21715_s12 + $0x1dd0] sm:$0xff]  ;;  %v6033_v19 = vld [vmem:[%s21715_s12 + $0x1eb8] sm:$0xff] }
 0x792   :  { %7895 = vmatmul.mubr.f32.vlgmr.msra.gmra.mrb[122].mxu1 %v17569_v1  ;;  %10296 = vmatpush1.bf16.msra.mxu0 %v10295_v55  ;;  %v5966_v1 = vld [vmem:[%s21715_s12 + $0x1ca0] sm:$0xff]  ;;  %v5980_v55 = vld [vmem:[%s21715_s12 + $0x1d10] sm:$0xff] }
 0x793   :  { %7113 = vmatprep.mubr.f32.mxu0 %v4911_v48  ;;  %11044 = vmatpush1.bf16.msra.mxu1 %v11043_v43  ;;  %v10303_v20 = vpack.c.bf16 %v5966_v1, %v5962_v30  ;;  %v5987_v43 = vld [vmem:[%s21715_s12 + $0x1d48] sm:$0xff]  ;;  %v11059_v27 = vpack.c.bf16 %v5984_v29, %v5980_v55  ;;  %v6001_v30 = vld [vmem:[%s21715_s12 + $0x1db8] sm:$0xff]  ;;  %v11071_v55 = vpack.c.bf16 %v6008_v18, %v6004_v61  ;;  %v6010_v29 = vld [vmem:[%s21715_s12 + $0x1e00] sm:$0xff] }
 0x794   :  { %7965 = vmatprep.mubr.f32.mxu1 %v4911_v48  ;;  %10298 = vmatprep.subr.bf16.mxu0 %v10297_v58  ;;  %v10311_v58 = vpack.c.bf16 %v5982_v25, %v5978_v46  ;;  %v10313_v32 = vpack.c.bf16 %v5991_v16, %v5987_v43  ;;  %v5992_v48 = vld [vmem:[%s21715_s12 + $0x1d70] sm:$0xff]  ;;  %v6017_v46 = vld [vmem:[%s21715_s12 + $0x1e38] sm:$0xff]  ;;  %v10323_v25 = vpack.c.bf16 %v6006_v22, %v6002_v37  ;;  %v6014_v43 = vld [vmem:[%s21715_s12 + $0x1e20] sm:$0xff] }
 0x795   :  { %11046 = vmatprep.subr.bf16.mxu1 %v11045_v35  ;;  %v5990_v35 = vld [vmem:[%s21715_s12 + $0x1d60] sm:$0xff]  ;;  %v11063_v9 = vpack.c.bf16 %v5992_v48, %v5988_v50  ;;  %v6012_v16 = vld [vmem:[%s21715_s12 + $0x1e10] sm:$0xff]  ;;  %v6041_v37 = vld [vmem:[%s21715_s12 + $0x1ef8] sm:$0xff] }
 0x796   :  { %10300 = vmatpush1.bf16.msra.mxu0 %v10299_v6  ;;  %v5995_v6 = vld [vmem:[%s21715_s12 + $0x1d88] sm:$0xff]  ;;  %v10315_v1 = vpack.c.bf16 %v5990_v35, %v5986_v40  ;;  %v6025_v40 = vld [vmem:[%s21715_s12 + $0x1e78] sm:$0xff]  ;;  %v10327_v35 = vpack.c.bf16 %v6014_v43, %v6010_v29  ;;  %v11075_v50 = vpack.c.bf16 %v6016_v8, %v6012_v16  ;;  %v6018_v48 = vld [vmem:[%s21715_s12 + $0x1e40] sm:$0xff] }
 0x797   :  { %11048 = vmatpush1.bf16.msra.mxu1 %v11047_v12  ;;  %10302 = vmatprep.subr.bf16.mxu0 %v10301_v54  ;;  %v5999_v12 = vld [vmem:[%s21715_s12 + $0x1da8] sm:$0xff]  ;;  %v5997_v54 = vld [vmem:[%s21715_s12 + $0x1d98] sm:$0xff]  ;;  %v6034_v18 = vld [vmem:[%s21715_s12 + $0x1ec0] sm:$0xff] }
 0x798   :  { %11050 = vmatprep.subr.bf16.mxu1 %v11049_v56  ;;  %v10317_v56 = vpack.c.bf16 %v5999_v12, %v5995_v6  ;;  %v11065_v10 = vpack.c.bf16 %v6001_v30, %v5997_v54  ;;  %v6022_v6 = vld [vmem:[%s21715_s12 + $0x1e60] sm:$0xff]  ;;  %v6020_v12 = vld [vmem:[%s21715_s12 + $0x1e50] sm:$0xff]  ;;  %v6049_v29 = vld [vmem:[%s21715_s12 + $0x1f38] sm:$0xff] }
 0x799   :  { %v6024_v30 = vld [vmem:[%s21715_s12 + $0x1e70] sm:$0xff]  ;;  %v10331_v4 = vpack.c.bf16 %v6022_v6, %v6018_v48  ;;  %v6042_v8 = vld [vmem:[%s21715_s12 + $0x1f00] sm:$0xff]  ;;  %v6057_v48 = vld [vmem:[%s21715_s12 + $0x1f78] sm:$0xff] }
 0x79a   :  { %10304 = vmatpush1.bf16.msra.mxu0 %v10303_v20  ;;  %v6003_v20 = vld [vmem:[%s21715_s12 + $0x1dc8] sm:$0xff]  ;;  %v11079_v3 = vpack.c.bf16 %v6024_v30, %v6020_v12  ;;  %v6050_v30 = vld [vmem:[%s21715_s12 + $0x1f40] sm:$0xff] }
 0x79b   :  { %11052 = vmatpush1.bf16.msra.mxu1 %v11051_v2  ;;  %10306 = vmatprep.subr.bf16.mxu0 %v10305_v44  ;;  %v6007_v2 = vld [vmem:[%s21715_s12 + $0x1de8] sm:$0xff]  ;;  %v6005_v44 = vld [vmem:[%s21715_s12 + $0x1dd8] sm:$0xff] }
 0x79c   :  { %11054 = vmatprep.subr.bf16.mxu1 %v11053_v5  ;;  %v10321_v5 = vpack.c.bf16 %v6007_v2, %v6003_v20  ;;  %v11069_v39 = vpack.c.bf16 %v6009_v36, %v6005_v44  ;;  %v6030_v20 = vld [vmem:[%s21715_s12 + $0x1ea0] sm:$0xff]  ;;  %v6028_v2 = vld [vmem:[%s21715_s12 + $0x1e90] sm:$0xff] }
 0x79d   :  { %v6032_v36 = vld [vmem:[%s21715_s12 + $0x1eb0] sm:$0xff]  ;;  %v10335_v22 = vpack.c.bf16 %v6030_v20, %v6026_v41  ;;  %v6065_v41 = vld [vmem:[%s21715_s12 + $0x1fb8] sm:$0xff] }
 0x79e   :  { %10308 = vmatpush1.bf16.msra.mxu0 %v10307_v13  ;;  %v6011_v13 = vld [vmem:[%s21715_s12 + $0x1e08] sm:$0xff]  ;;  %v11083_v61 = vpack.c.bf16 %v6032_v36, %v6028_v2  ;;  %v6058_v36 = vld [vmem:[%s21715_s12 + $0x1f80] sm:$0xff] }
 0x79f   :  { %11056 = vmatpush1.bf16.msra.mxu1 %v11055_v33  ;;  %10310 = vmatprep.subr.bf16.mxu0 %v10309_v31  ;;  %v6015_v33 = vld [vmem:[%s21715_s12 + $0x1e28] sm:$0xff]  ;;  %v6013_v31 = vld [vmem:[%s21715_s12 + $0x1e18] sm:$0xff] }
 0x7a0   :  { %11058 = vmatprep.subr.bf16.mxu1 %v11057_v53  ;;  %v10325_v53 = vpack.c.bf16 %v6015_v33, %v6011_v13  ;;  %v11073_v24 = vpack.c.bf16 %v6017_v46, %v6013_v31  ;;  %v6038_v13 = vld [vmem:[%s21715_s12 + $0x1ee0] sm:$0xff]  ;;  %v6036_v33 = vld [vmem:[%s21715_s12 + $0x1ed0] sm:$0xff] }
 0x7a1   :  { %v6040_v46 = vld [vmem:[%s21715_s12 + $0x1ef0] sm:$0xff]  ;;  %v10339_v43 = vpack.c.bf16 %v6038_v13, %v6034_v18  ;;  %v6073_v18 = vld [vmem:[%s21715_s12 + $0x1ff8] sm:$0xff] }
 0x7a2   :  { %10312 = vmatpush1.bf16.msra.mxu0 %v10311_v58  ;;  %v6019_v58 = vld [vmem:[%s21715_s12 + $0x1e48] sm:$0xff]  ;;  %v11087_v16 = vpack.c.bf16 %v6040_v46, %v6036_v33  ;;  %v6066_v46 = vld [vmem:[%s21715_s12 + $0x1fc0] sm:$0xff] }
 0x7a3   :  { %11060 = vmatpush1.bf16.msra.mxu1 %v11059_v27  ;;  %10314 = vmatprep.subr.bf16.mxu0 %v10313_v32  ;;  %v6023_v27 = vld [vmem:[%s21715_s12 + $0x1e68] sm:$0xff]  ;;  %v6021_v32 = vld [vmem:[%s21715_s12 + $0x1e58] sm:$0xff] }
 0x7a4   :  { %11062 = vmatprep.subr.bf16.mxu1 %v11061_v7  ;;  %v10329_v7 = vpack.c.bf16 %v6023_v27, %v6019_v58  ;;  %v11077_v54 = vpack.c.bf16 %v6025_v40, %v6021_v32  ;;  %v6046_v58 = vld [vmem:[%s21715_s12 + $0x1f20] sm:$0xff]  ;;  %v6044_v27 = vld [vmem:[%s21715_s12 + $0x1f10] sm:$0xff] }
 0x7a5   :  { %v6048_v40 = vld [vmem:[%s21715_s12 + $0x1f30] sm:$0xff]  ;;  %v10343_v6 = vpack.c.bf16 %v6046_v58, %v6042_v8  ;;  %v6081_v8 = vld [vmem:[%s21715_s12 + $0x2038] sm:$0xff] }
 0x7a6   :  { %10316 = vmatpush1.bf16.msra.mxu0 %v10315_v1  ;;  %v6027_v1 = vld [vmem:[%s21715_s12 + $0x1e88] sm:$0xff]  ;;  %v11091_v12 = vpack.c.bf16 %v6048_v40, %v6044_v27  ;;  %v6074_v40 = vld [vmem:[%s21715_s12 + $0x2000] sm:$0xff] }
 0x7a7   :  { %11064 = vmatpush1.bf16.msra.mxu1 %v11063_v9  ;;  %10318 = vmatprep.subr.bf16.mxu0 %v10317_v56  ;;  %v6031_v9 = vld [vmem:[%s21715_s12 + $0x1ea8] sm:$0xff]  ;;  %v6029_v56 = vld [vmem:[%s21715_s12 + $0x1e98] sm:$0xff] }
 0x7a8   :  { %11066 = vmatprep.subr.bf16.mxu1 %v11065_v10  ;;  %v10333_v10 = vpack.c.bf16 %v6031_v9, %v6027_v1  ;;  %v11081_v44 = vpack.c.bf16 %v6033_v19, %v6029_v56  ;;  %v6054_v1 = vld [vmem:[%s21715_s12 + $0x1f60] sm:$0xff]  ;;  %v6052_v9 = vld [vmem:[%s21715_s12 + $0x1f50] sm:$0xff] }
 0x7a9   :  { %v6056_v19 = vld [vmem:[%s21715_s12 + $0x1f70] sm:$0xff]  ;;  %v10347_v20 = vpack.c.bf16 %v6054_v1, %v6050_v30  ;;  %v6085_v1 = vld [vmem:[%s21715_s12 + $0x2058] sm:$0xff] }
 0x7aa   :  { %10320 = vmatpush1.bf16.msra.mxu0 %v10319_v59  ;;  %v6035_v59 = vld [vmem:[%s21715_s12 + $0x1ec8] sm:$0xff]  ;;  %v11095_v2 = vpack.c.bf16 %v6056_v19, %v6052_v9  ;;  %v6089_v9 = vld [vmem:[%s21715_s12 + $0x2078] sm:$0xff]  ;;  %v6082_v19 = vld [vmem:[%s21715_s12 + $0x2040] sm:$0xff] }
 0x7ab   :  { %11068 = vmatpush1.bf16.msra.mxu1 %v11067_v52  ;;  %10322 = vmatprep.subr.bf16.mxu0 %v10321_v5  ;;  %v6039_v52 = vld [vmem:[%s21715_s12 + $0x1ee8] sm:$0xff]  ;;  %v6037_v5 = vld [vmem:[%s21715_s12 + $0x1ed8] sm:$0xff]  ;;  %v11109_v49 = vpack.c.bf16 %v6089_v9, %v6085_v1 }
 0x7ac   :  { %11070 = vmatprep.subr.bf16.mxu1 %v11069_v39  ;;  %v10337_v39 = vpack.c.bf16 %v6039_v52, %v6035_v59  ;;  %v11085_v31 = vpack.c.bf16 %v6041_v37, %v6037_v5  ;;  %v6062_v59 = vld [vmem:[%s21715_s12 + $0x1fa0] sm:$0xff]  ;;  %v6060_v52 = vld [vmem:[%s21715_s12 + $0x1f90] sm:$0xff]  ;;  %v6119_v1 = vld [vmem:[%s21715_s12 + $0x2168] sm:$0xff] }
 0x7ad   :  { %v6064_v37 = vld [vmem:[%s21715_s12 + $0x1fb0] sm:$0xff]  ;;  %v10351_v13 = vpack.c.bf16 %v6062_v59, %v6058_v36  ;;  %v6117_v9 = vld [vmem:[%s21715_s12 + $0x2158] sm:$0xff] }
 0x7ae   :  { %10324 = vmatpush1.bf16.msra.mxu0 %v10323_v25  ;;  %v6043_v25 = vld [vmem:[%s21715_s12 + $0x1f08] sm:$0xff]  ;;  %v11099_v33 = vpack.c.bf16 %v6064_v37, %v6060_v52  ;;  %v6094_v37 = vld [vmem:[%s21715_s12 + $0x20a0] sm:$0xff] }
 0x7af   :  { %11072 = vmatpush1.bf16.msra.mxu1 %v11071_v55  ;;  %10326 = vmatprep.subr.bf16.mxu0 %v10325_v53  ;;  %v6047_v55 = vld [vmem:[%s21715_s12 + $0x1f28] sm:$0xff]  ;;  %v6045_v53 = vld [vmem:[%s21715_s12 + $0x1f18] sm:$0xff] }
 0x7b0   :  { %11074 = vmatprep.subr.bf16.mxu1 %v11073_v24  ;;  %v10341_v24 = vpack.c.bf16 %v6047_v55, %v6043_v25  ;;  %v11089_v32 = vpack.c.bf16 %v6049_v29, %v6045_v53  ;;  %v6070_v25 = vld [vmem:[%s21715_s12 + $0x1fe0] sm:$0xff]  ;;  %v6068_v55 = vld [vmem:[%s21715_s12 + $0x1fd0] sm:$0xff] }
 0x7b1   :  { %v6072_v29 = vld [vmem:[%s21715_s12 + $0x1ff0] sm:$0xff]  ;;  %v10355_v58 = vpack.c.bf16 %v6070_v25, %v6066_v46 }
 0x7b2   :  { %10328 = vmatpush1.bf16.msra.mxu0 %v10327_v35  ;;  %v6051_v35 = vld [vmem:[%s21715_s12 + $0x1f48] sm:$0xff]  ;;  %v11103_v27 = vpack.c.bf16 %v6072_v29, %v6068_v55  ;;  %v6098_v55 = vld [vmem:[%s21715_s12 + $0x20c0] sm:$0xff]  ;;  %v6100_v29 = vld [vmem:[%s21715_s12 + $0x20d0] sm:$0xff] }
 0x7b3   :  { %11076 = vmatpush1.bf16.msra.mxu1 %v11075_v50  ;;  %10330 = vmatprep.subr.bf16.mxu0 %v10329_v7  ;;  %v6055_v50 = vld [vmem:[%s21715_s12 + $0x1f68] sm:$0xff]  ;;  %v6053_v7 = vld [vmem:[%s21715_s12 + $0x1f58] sm:$0xff] }
 0x7b4   :  { %11078 = vmatprep.subr.bf16.mxu1 %v11077_v54  ;;  %v10345_v54 = vpack.c.bf16 %v6055_v50, %v6051_v35  ;;  %v11093_v56 = vpack.c.bf16 %v6057_v48, %v6053_v7  ;;  %v6078_v35 = vld [vmem:[%s21715_s12 + $0x2020] sm:$0xff]  ;;  %v6076_v7 = vld [vmem:[%s21715_s12 + $0x2010] sm:$0xff] }
 0x7b5   :  { %v6080_v48 = vld [vmem:[%s21715_s12 + $0x2030] sm:$0xff]  ;;  %v10359_v30 = vpack.c.bf16 %v6078_v35, %v6074_v40 }
 0x7b6   :  { %10332 = vmatpush1.bf16.msra.mxu0 %v10331_v4  ;;  %v6059_v4 = vld [vmem:[%s21715_s12 + $0x1f88] sm:$0xff] }
 0x7b7   :  { %11080 = vmatpush1.bf16.msra.mxu1 %v11079_v3  ;;  %10334 = vmatprep.subr.bf16.mxu0 %v10333_v10  ;;  %v6063_v3 = vld [vmem:[%s21715_s12 + $0x1fa8] sm:$0xff]  ;;  %v6061_v10 = vld [vmem:[%s21715_s12 + $0x1f98] sm:$0xff] }
 0x7b8   :  { %11082 = vmatprep.subr.bf16.mxu1 %v11081_v44  ;;  %v10349_v44 = vpack.c.bf16 %v6063_v3, %v6059_v4  ;;  %v11097_v5 = vpack.c.bf16 %v6065_v41, %v6061_v10  ;;  %v6086_v4 = vld [vmem:[%s21715_s12 + $0x2060] sm:$0xff]  ;;  %v6084_v3 = vld [vmem:[%s21715_s12 + $0x2050] sm:$0xff]  ;;  %v4966_v10 = vsel %vm4910_vm8, %v11783_v47, %v11787_v26  ;;  %v6097_v47 = vld [vmem:[%s21715_s12 + $0x20b8] sm:$0xff] }
 0x7b9   :  { %v10363_v36 = vpack.c.bf16 %v6086_v4, %v6082_v19 }
 0x7ba   :  { %10336 = vmatpush1.bf16.msra.mxu0 %v10335_v22  ;;  %v6067_v22 = vld [vmem:[%s21715_s12 + $0x1fc8] sm:$0xff] }
 0x7bb   :  { %11084 = vmatpush1.bf16.msra.mxu1 %v11083_v61  ;;  %10338 = vmatprep.subr.bf16.mxu0 %v10337_v39  ;;  %v6071_v61 = vld [vmem:[%s21715_s12 + $0x1fe8] sm:$0xff]  ;;  %v6069_v39 = vld [vmem:[%s21715_s12 + $0x1fd8] sm:$0xff] }
 0x7bc   :  { %11086 = vmatprep.subr.bf16.mxu1 %v11085_v31  ;;  %v10353_v31 = vpack.c.bf16 %v6071_v61, %v6067_v22  ;;  %v11101_v53 = vpack.c.bf16 %v6073_v18, %v6069_v39  ;;  %v6092_v22 = vld [vmem:[%s21715_s12 + $0x2090] sm:$0xff]  ;;  %v6099_v39 = vld [vmem:[%s21715_s12 + $0x20c8] sm:$0xff] }
 0x7bd   :  { %v6096_v61 = vld [vmem:[%s21715_s12 + $0x20b0] sm:$0xff]  ;;  %v6103_v18 = vld [vmem:[%s21715_s12 + $0x20e8] sm:$0xff] }
 0x7be   :  { %10340 = vmatpush1.bf16.msra.mxu0 %v10339_v43  ;;  %v6075_v43 = vld [vmem:[%s21715_s12 + $0x2008] sm:$0xff]  ;;  %v11115_v46 = vpack.c.bf16 %v6096_v61, %v6092_v22  ;;  %v10369_v25 = vpack.c.bf16 %v6103_v18, %v6099_v39  ;;  %v6124_v22 = vld [vmem:[%s21715_s12 + $0x2190] sm:$0xff] }
 0x7bf   :  { %11088 = vmatpush1.bf16.msra.mxu1 %v11087_v16  ;;  %10342 = vmatprep.subr.bf16.mxu0 %v10341_v24  ;;  %v6079_v16 = vld [vmem:[%s21715_s12 + $0x2028] sm:$0xff]  ;;  %v6077_v24 = vld [vmem:[%s21715_s12 + $0x2018] sm:$0xff]  ;;  %v6128_v61 = vld [vmem:[%s21715_s12 + $0x21b0] sm:$0xff] }
 0x7c0   :  { %11090 = vmatprep.subr.bf16.mxu1 %v11089_v32  ;;  %v10357_v32 = vpack.c.bf16 %v6079_v16, %v6075_v43  ;;  %v11105_v50 = vpack.c.bf16 %v6081_v8, %v6077_v24  ;;  %v6104_v16 = vld [vmem:[%s21715_s12 + $0x20f0] sm:$0xff]  ;;  %v6107_v24 = vld [vmem:[%s21715_s12 + $0x2108] sm:$0xff] }
 0x7c1   :  { %v6111_v8 = vld [vmem:[%s21715_s12 + $0x2128] sm:$0xff]  ;;  %v11119_v40 = vpack.c.bf16 %v6104_v16, %v6100_v29  ;;  %v6132_v29 = vld [vmem:[%s21715_s12 + $0x21d0] sm:$0xff] }
 0x7c2   :  { %10344 = vmatpush1.bf16.msra.mxu0 %v10343_v6  ;;  %v6083_v6 = vld [vmem:[%s21715_s12 + $0x2048] sm:$0xff]  ;;  %v10373_v35 = vpack.c.bf16 %v6111_v8, %v6107_v24  ;;  %v6136_v16 = vld [vmem:[%s21715_s12 + $0x21f0] sm:$0xff] }
 0x7c3   :  { %11092 = vmatpush1.bf16.msra.mxu1 %v11091_v12  ;;  %10346 = vmatprep.subr.bf16.mxu0 %v10345_v54  ;;  %v6087_v12 = vld [vmem:[%s21715_s12 + $0x2068] sm:$0xff]  ;;  %v11792_v54 = vunpack.i.l.bf16 %v17612_v38  ;;  %v6225_v38 = vld [vmem:[%s21715_s12 + $0x24b8] sm:$0xff] }
 0x7c4   :  { %11094 = vmatprep.subr.bf16.mxu1 %v11093_v56  ;;  %v11107_v56 = vpack.c.bf16 %v6080_v48, %v6076_v7  ;;  %v10361_v41 = vpack.c.bf16 %v6087_v12, %v6083_v6  ;;  %v6110_v7 = vld [vmem:[%s21715_s12 + $0x2120] sm:$0xff]  ;;  %v6108_v48 = vld [vmem:[%s21715_s12 + $0x2110] sm:$0xff]  ;;  %v6131_v39 = vld [vmem:[%s21715_s12 + $0x21c8] sm:$0xff] }
 0x7c5   :  { %v4926_v26 = vsel %vm4925_vm9, %v11792_v54, %v11793_v60  ;;  %v11113_v60 = vpack.c.bf16 %v6097_v47, %v6093_v57  ;;  %v6112_v12 = vld [vmem:[%s21715_s12 + $0x2130] sm:$0xff]  ;;  %v6127_v57 = vld [vmem:[%s21715_s12 + $0x21a8] sm:$0xff]  ;;  %v6125_v47 = vld [vmem:[%s21715_s12 + $0x2198] sm:$0xff] }
 0x7c6   :  { %10348 = vmatpush1.bf16.msra.mxu0 %v10347_v20  ;;  %v6088_v20 = vld [vmem:[%s21715_s12 + $0x2070] sm:$0xff]  ;;  %v11123_v4 = vpack.c.bf16 %v6112_v12, %v6108_v48  ;;  %v6135_v18 = vld [vmem:[%s21715_s12 + $0x21e8] sm:$0xff] }
 0x7c7   :  { %11096 = vmatpush1.bf16.msra.mxu1 %v11095_v2  ;;  %10350 = vmatprep.subr.bf16.mxu0 %v10349_v44  ;;  %v6091_v2 = vld [vmem:[%s21715_s12 + $0x2088] sm:$0xff]  ;;  %v11111_v59 = vpack.c.bf16 %v6088_v20, %v6084_v3  ;;  %v6116_v20 = vld [vmem:[%s21715_s12 + $0x2150] sm:$0xff] }
 0x7c8   :  { %11098 = vmatprep.subr.bf16.mxu1 %v11097_v5  ;;  %v6095_v44 = vld [vmem:[%s21715_s12 + $0x20a8] sm:$0xff]  ;;  %v6090_v5 = vld [vmem:[%s21715_s12 + $0x2080] sm:$0xff]  ;;  %v6140_v48 = vld [vmem:[%s21715_s12 + $0x2210] sm:$0xff] }
 0x7c9   :  { %v10365_v52 = vpack.c.bf16 %v6095_v44, %v6091_v2  ;;  %v6120_v44 = vld [vmem:[%s21715_s12 + $0x2170] sm:$0xff]  ;;  %v6139_v24 = vld [vmem:[%s21715_s12 + $0x2208] sm:$0xff] }
 0x7ca   :  { %10352 = vmatpush1.bf16.msra.mxu0 %v10351_v13  ;;  %v6101_v13 = vld [vmem:[%s21715_s12 + $0x20d8] sm:$0xff]  ;;  %v6143_v8 = vld [vmem:[%s21715_s12 + $0x2228] sm:$0xff]  ;;  %v6144_v12 = vld [vmem:[%s21715_s12 + $0x2230] sm:$0xff] }
 0x7cb   :  { %11100 = vmatpush1.bf16.msra.mxu1 %v11099_v33  ;;  %10354 = vmatprep.subr.bf16.mxu0 %v10353_v31  ;;  %v6105_v33 = vld [vmem:[%s21715_s12 + $0x20f8] sm:$0xff]  ;;  %v10367_v31 = vpack.c.bf16 %v6094_v37, %v6090_v5  ;;  %v6122_v5 = vld [vmem:[%s21715_s12 + $0x2180] sm:$0xff] }
 0x7cc   :  { %11102 = vmatprep.subr.bf16.mxu1 %v11101_v53  ;;  %v6102_v53 = vld [vmem:[%s21715_s12 + $0x20e0] sm:$0xff]  ;;  %v11117_v43 = vpack.c.bf16 %v6105_v33, %v6101_v13  ;;  %v6133_v13 = vld [vmem:[%s21715_s12 + $0x21d8] sm:$0xff] }
 0x7cd   :  { %v6126_v37 = vld [vmem:[%s21715_s12 + $0x21a0] sm:$0xff]  ;;  %v6137_v33 = vld [vmem:[%s21715_s12 + $0x21f8] sm:$0xff] }
 0x7ce   :  { %10356 = vmatpush1.bf16.msra.mxu0 %v10355_v58  ;;  %v6109_v58 = vld [vmem:[%s21715_s12 + $0x2118] sm:$0xff] }
 0x7cf   :  { %11104 = vmatpush1.bf16.msra.mxu1 %v11103_v27  ;;  %10358 = vmatprep.subr.bf16.mxu0 %v10357_v32  ;;  %v6113_v27 = vld [vmem:[%s21715_s12 + $0x2138] sm:$0xff]  ;;  %v10371_v32 = vpack.c.bf16 %v6102_v53, %v6098_v55  ;;  %v6130_v55 = vld [vmem:[%s21715_s12 + $0x21c0] sm:$0xff] }
 0x7d0   :  { %11106 = vmatprep.subr.bf16.mxu1 %v11105_v50  ;;  %v6106_v50 = vld [vmem:[%s21715_s12 + $0x2100] sm:$0xff]  ;;  %v11121_v6 = vpack.c.bf16 %v6113_v27, %v6109_v58  ;;  %v6141_v58 = vld [vmem:[%s21715_s12 + $0x2218] sm:$0xff] }
 0x7d1   :  { %7114 = vmatmul.mubr.f32.vlgmr.msra.gmra.mrb[98].mxu0 %v4966_v10  ;;  %v10375_v19 = vpack.c.bf16 %v6110_v7, %v6106_v50  ;;  %v6134_v53 = vld [vmem:[%s21715_s12 + $0x21e0] sm:$0xff]  ;;  %v6145_v27 = vld [vmem:[%s21715_s12 + $0x2238] sm:$0xff] }
 0x7d2   :  { %7966 = vmatmul.mubr.f32.vlgmr.msra.gmra.mrb[122].mxu1 %v4966_v10  ;;  %10360 = vmatpush1.bf16.msra.mxu0 %v10359_v30  ;;  %v6115_v30 = vld [vmem:[%s21715_s12 + $0x2148] sm:$0xff]  ;;  %v6114_v10 = vld [vmem:[%s21715_s12 + $0x2140] sm:$0xff] }
 0x7d3   :  { %7184 = vmatprep.mubr.f32.mxu0 %v4926_v26  ;;  %11108 = vmatpush1.bf16.msra.mxu1 %v11107_v56  ;;  %v6121_v56 = vld [vmem:[%s21715_s12 + $0x2178] sm:$0xff]  ;;  %v10377_v3 = vpack.c.bf16 %v6119_v1, %v6115_v30  ;;  %v6138_v50 = vld [vmem:[%s21715_s12 + $0x2200] sm:$0xff]  ;;  %v6147_v30 = vld [vmem:[%s21715_s12 + $0x2248] sm:$0xff] }
 0x7d4   :  { %8036 = vmatprep.mubr.f32.mxu1 %v4926_v26  ;;  %10362 = vmatprep.subr.bf16.mxu0 %v10361_v41  ;;  %v6118_v41 = vld [vmem:[%s21715_s12 + $0x2160] sm:$0xff]  ;;  %v11125_v2 = vpack.c.bf16 %v6121_v56, %v6117_v9  ;;  %v6129_v26 = vld [vmem:[%s21715_s12 + $0x21b8] sm:$0xff]  ;;  %v6151_v1 = vld [vmem:[%s21715_s12 + $0x2268] sm:$0xff] }
 0x7d5   :  { %11110 = vmatprep.subr.bf16.mxu1 %v11109_v49  ;;  %v6123_v49 = vld [vmem:[%s21715_s12 + $0x2188] sm:$0xff]  ;;  %v6142_v7 = vld [vmem:[%s21715_s12 + $0x2220] sm:$0xff]  ;;  %v6149_v9 = vld [vmem:[%s21715_s12 + $0x2258] sm:$0xff] }
 0x7d6   :  { %10364 = vmatpush1.bf16.msra.mxu0 %v10363_v36  ;;  %v10379_v36 = vpack.c.bf16 %v6118_v41, %v6114_v10  ;;  %v6153_v56 = vld [vmem:[%s21715_s12 + $0x2278] sm:$0xff]  ;;  %v6146_v10 = vld [vmem:[%s21715_s12 + $0x2240] sm:$0xff] }
 0x7d7   :  { %11112 = vmatpush1.bf16.msra.mxu1 %v11111_v59  ;;  %10366 = vmatprep.subr.bf16.mxu0 %v10365_v52  ;;  %v11127_v59 = vpack.c.bf16 %v6120_v44, %v6116_v20  ;;  %v10381_v52 = vpack.c.bf16 %v6127_v57, %v6123_v49  ;;  %v6150_v41 = vld [vmem:[%s21715_s12 + $0x2260] sm:$0xff]  ;;  %v6148_v20 = vld [vmem:[%s21715_s12 + $0x2250] sm:$0xff]  ;;  %v6155_v49 = vld [vmem:[%s21715_s12 + $0x2288] sm:$0xff] }
 0x7d8   :  { %11114 = vmatprep.subr.bf16.mxu1 %v11113_v60  ;;  %v11129_v60 = vpack.c.bf16 %v6129_v26, %v6125_v47  ;;  %v6152_v44 = vld [vmem:[%s21715_s12 + $0x2270] sm:$0xff]  ;;  %v6159_v57 = vld [vmem:[%s21715_s12 + $0x22a8] sm:$0xff]  ;;  %v6157_v47 = vld [vmem:[%s21715_s12 + $0x2298] sm:$0xff] }
 0x7d9   :  { %v6161_v26 = vld [vmem:[%s21715_s12 + $0x22b8] sm:$0xff] }
 0x7da   :  { %10368 = vmatpush1.bf16.msra.mxu0 %v10367_v31  ;;  %v10383_v31 = vpack.c.bf16 %v6126_v37, %v6122_v5  ;;  %v6154_v5 = vld [vmem:[%s21715_s12 + $0x2280] sm:$0xff] }
 0x7db   :  { %11116 = vmatpush1.bf16.msra.mxu1 %v11115_v46  ;;  %10370 = vmatprep.subr.bf16.mxu0 %v10369_v25  ;;  %v11131_v46 = vpack.c.bf16 %v6128_v61, %v6124_v22  ;;  %v10385_v25 = vpack.c.bf16 %v6135_v18, %v6131_v39  ;;  %v6158_v37 = vld [vmem:[%s21715_s12 + $0x22a0] sm:$0xff]  ;;  %v6156_v22 = vld [vmem:[%s21715_s12 + $0x2290] sm:$0xff]  ;;  %v6163_v39 = vld [vmem:[%s21715_s12 + $0x22c8] sm:$0xff] }
 0x7dc   :  { %11118 = vmatprep.subr.bf16.mxu1 %v11117_v43  ;;  %v11133_v43 = vpack.c.bf16 %v6137_v33, %v6133_v13  ;;  %v6160_v61 = vld [vmem:[%s21715_s12 + $0x22b0] sm:$0xff]  ;;  %v6167_v18 = vld [vmem:[%s21715_s12 + $0x22e8] sm:$0xff]  ;;  %v6165_v13 = vld [vmem:[%s21715_s12 + $0x22d8] sm:$0xff] }
 0x7dd   :  { %v6169_v33 = vld [vmem:[%s21715_s12 + $0x22f8] sm:$0xff] }
 0x7de   :  { %10372 = vmatpush1.bf16.msra.mxu0 %v10371_v32  ;;  %v10387_v32 = vpack.c.bf16 %v6134_v53, %v6130_v55  ;;  %v6162_v55 = vld [vmem:[%s21715_s12 + $0x22c0] sm:$0xff] }
 0x7df   :  { %11120 = vmatpush1.bf16.msra.mxu1 %v11119_v40  ;;  %10374 = vmatprep.subr.bf16.mxu0 %v10373_v35  ;;  %v11135_v40 = vpack.c.bf16 %v6136_v16, %v6132_v29  ;;  %v10389_v35 = vpack.c.bf16 %v6143_v8, %v6139_v24  ;;  %v6166_v53 = vld [vmem:[%s21715_s12 + $0x22e0] sm:$0xff]  ;;  %v6164_v29 = vld [vmem:[%s21715_s12 + $0x22d0] sm:$0xff]  ;;  %v6171_v24 = vld [vmem:[%s21715_s12 + $0x2308] sm:$0xff] }
 0x7e0   :  { %11122 = vmatprep.subr.bf16.mxu1 %v11121_v6  ;;  %v11137_v6 = vpack.c.bf16 %v6145_v27, %v6141_v58  ;;  %v6168_v16 = vld [vmem:[%s21715_s12 + $0x22f0] sm:$0xff]  ;;  %v6175_v8 = vld [vmem:[%s21715_s12 + $0x2328] sm:$0xff]  ;;  %v6173_v58 = vld [vmem:[%s21715_s12 + $0x2318] sm:$0xff] }
 0x7e1   :  { %v6177_v27 = vld [vmem:[%s21715_s12 + $0x2338] sm:$0xff] }
 0x7e2   :  { %10376 = vmatpush1.bf16.msra.mxu0 %v10375_v19  ;;  %v10391_v19 = vpack.c.bf16 %v6142_v7, %v6138_v50  ;;  %v6170_v50 = vld [vmem:[%s21715_s12 + $0x2300] sm:$0xff] }
 0x7e3   :  { %11124 = vmatpush1.bf16.msra.mxu1 %v11123_v4  ;;  %10378 = vmatprep.subr.bf16.mxu0 %v10377_v3  ;;  %v11139_v4 = vpack.c.bf16 %v6144_v12, %v6140_v48  ;;  %v10393_v3 = vpack.c.bf16 %v6151_v1, %v6147_v30  ;;  %v6174_v7 = vld [vmem:[%s21715_s12 + $0x2320] sm:$0xff]  ;;  %v6172_v48 = vld [vmem:[%s21715_s12 + $0x2310] sm:$0xff]  ;;  %v6179_v30 = vld [vmem:[%s21715_s12 + $0x2348] sm:$0xff] }
 0x7e4   :  { %11126 = vmatprep.subr.bf16.mxu1 %v11125_v2  ;;  %v11141_v2 = vpack.c.bf16 %v6153_v56, %v6149_v9  ;;  %v6176_v12 = vld [vmem:[%s21715_s12 + $0x2330] sm:$0xff]  ;;  %v6183_v1 = vld [vmem:[%s21715_s12 + $0x2368] sm:$0xff]  ;;  %v6181_v9 = vld [vmem:[%s21715_s12 + $0x2358] sm:$0xff] }
 0x7e5   :  { %v6185_v56 = vld [vmem:[%s21715_s12 + $0x2378] sm:$0xff] }
 0x7e6   :  { %10380 = vmatpush1.bf16.msra.mxu0 %v10379_v36  ;;  %v10395_v36 = vpack.c.bf16 %v6150_v41, %v6146_v10  ;;  %v6178_v10 = vld [vmem:[%s21715_s12 + $0x2340] sm:$0xff] }
 0x7e7   :  { %11128 = vmatpush1.bf16.msra.mxu1 %v11127_v59  ;;  %10382 = vmatprep.subr.bf16.mxu0 %v10381_v52  ;;  %v11143_v59 = vpack.c.bf16 %v6152_v44, %v6148_v20  ;;  %v10397_v52 = vpack.c.bf16 %v6159_v57, %v6155_v49  ;;  %v6182_v41 = vld [vmem:[%s21715_s12 + $0x2360] sm:$0xff]  ;;  %v6180_v20 = vld [vmem:[%s21715_s12 + $0x2350] sm:$0xff]  ;;  %v6187_v49 = vld [vmem:[%s21715_s12 + $0x2388] sm:$0xff] }
 0x7e8   :  { %11130 = vmatprep.subr.bf16.mxu1 %v11129_v60  ;;  %v11145_v60 = vpack.c.bf16 %v6161_v26, %v6157_v47  ;;  %v6184_v44 = vld [vmem:[%s21715_s12 + $0x2370] sm:$0xff]  ;;  %v6191_v57 = vld [vmem:[%s21715_s12 + $0x23a8] sm:$0xff]  ;;  %v6189_v47 = vld [vmem:[%s21715_s12 + $0x2398] sm:$0xff] }
 0x7e9   :  { %v6193_v26 = vld [vmem:[%s21715_s12 + $0x23b8] sm:$0xff] }
 0x7ea   :  { %10384 = vmatpush1.bf16.msra.mxu0 %v10383_v31  ;;  %v10399_v31 = vpack.c.bf16 %v6158_v37, %v6154_v5  ;;  %v6186_v5 = vld [vmem:[%s21715_s12 + $0x2380] sm:$0xff] }
 0x7eb   :  { %11132 = vmatpush1.bf16.msra.mxu1 %v11131_v46  ;;  %10386 = vmatprep.subr.bf16.mxu0 %v10385_v25  ;;  %v11147_v46 = vpack.c.bf16 %v6160_v61, %v6156_v22  ;;  %v10401_v25 = vpack.c.bf16 %v6167_v18, %v6163_v39  ;;  %v6190_v37 = vld [vmem:[%s21715_s12 + $0x23a0] sm:$0xff]  ;;  %v6188_v22 = vld [vmem:[%s21715_s12 + $0x2390] sm:$0xff]  ;;  %v6195_v39 = vld [vmem:[%s21715_s12 + $0x23c8] sm:$0xff] }
 0x7ec   :  { %11134 = vmatprep.subr.bf16.mxu1 %v11133_v43  ;;  %v11149_v43 = vpack.c.bf16 %v6169_v33, %v6165_v13  ;;  %v6192_v61 = vld [vmem:[%s21715_s12 + $0x23b0] sm:$0xff]  ;;  %v6199_v18 = vld [vmem:[%s21715_s12 + $0x23e8] sm:$0xff]  ;;  %v6197_v13 = vld [vmem:[%s21715_s12 + $0x23d8] sm:$0xff] }
 0x7ed   :  { %v6201_v33 = vld [vmem:[%s21715_s12 + $0x23f8] sm:$0xff] }
 0x7ee   :  { %10388 = vmatpush1.bf16.msra.mxu0 %v10387_v32  ;;  %v10403_v32 = vpack.c.bf16 %v6166_v53, %v6162_v55  ;;  %v6194_v55 = vld [vmem:[%s21715_s12 + $0x23c0] sm:$0xff] }
 0x7ef   :  { %11136 = vmatpush1.bf16.msra.mxu1 %v11135_v40  ;;  %10390 = vmatprep.subr.bf16.mxu0 %v10389_v35  ;;  %v11151_v40 = vpack.c.bf16 %v6168_v16, %v6164_v29  ;;  %v10405_v35 = vpack.c.bf16 %v6175_v8, %v6171_v24  ;;  %v6198_v53 = vld [vmem:[%s21715_s12 + $0x23e0] sm:$0xff]  ;;  %v6196_v29 = vld [vmem:[%s21715_s12 + $0x23d0] sm:$0xff]  ;;  %v6203_v24 = vld [vmem:[%s21715_s12 + $0x2408] sm:$0xff] }
 0x7f0   :  { %11138 = vmatprep.subr.bf16.mxu1 %v11137_v6  ;;  %v11153_v6 = vpack.c.bf16 %v6177_v27, %v6173_v58  ;;  %v6200_v16 = vld [vmem:[%s21715_s12 + $0x23f0] sm:$0xff]  ;;  %v6207_v8 = vld [vmem:[%s21715_s12 + $0x2428] sm:$0xff]  ;;  %v6205_v58 = vld [vmem:[%s21715_s12 + $0x2418] sm:$0xff] }
 0x7f1   :  { %v6209_v27 = vld [vmem:[%s21715_s12 + $0x2438] sm:$0xff] }
 0x7f2   :  { %10392 = vmatpush1.bf16.msra.mxu0 %v10391_v19  ;;  %v10407_v19 = vpack.c.bf16 %v6174_v7, %v6170_v50  ;;  %v6202_v50 = vld [vmem:[%s21715_s12 + $0x2400] sm:$0xff] }
 0x7f3   :  { %11140 = vmatpush1.bf16.msra.mxu1 %v11139_v4  ;;  %10394 = vmatprep.subr.bf16.mxu0 %v10393_v3  ;;  %v11155_v4 = vpack.c.bf16 %v6176_v12, %v6172_v48  ;;  %v10409_v3 = vpack.c.bf16 %v6183_v1, %v6179_v30  ;;  %v6206_v7 = vld [vmem:[%s21715_s12 + $0x2420] sm:$0xff]  ;;  %v11169_v48 = vpack.c.bf16 %v6209_v27, %v6205_v58  ;;  %v6208_v12 = vld [vmem:[%s21715_s12 + $0x2430] sm:$0xff]  ;;  %v6211_v30 = vld [vmem:[%s21715_s12 + $0x2448] sm:$0xff] }
 0x7f4   :  { %11142 = vmatprep.subr.bf16.mxu1 %v11141_v2  ;;  %v11157_v2 = vpack.c.bf16 %v6185_v56, %v6181_v9  ;;  %v6215_v1 = vld [vmem:[%s21715_s12 + $0x2468] sm:$0xff]  ;;  %v11797_v9 = vunpack.i.l.bf16 %v17646_v45  ;;  %v10423_v56 = vpack.c.bf16 %v6206_v7, %v6202_v50  ;;  %v6241_v58 = vld [vmem:[%s21715_s12 + $0x2538] sm:$0xff]  ;;  %v6238_v50 = vld [vmem:[%s21715_s12 + $0x2520] sm:$0xff] }
 0x7f5   :  { %v6236_v7 = vld [vmem:[%s21715_s12 + $0x2510] sm:$0xff]  ;;  %v6353_v45 = vld [vmem:[%s21715_s12 + $0x28b8] sm:$0xff] }
 0x7f6   :  { %10396 = vmatpush1.bf16.msra.mxu0 %v10395_v36  ;;  %v10411_v36 = vpack.c.bf16 %v6182_v41, %v6178_v10  ;;  %v6210_v10 = vld [vmem:[%s21715_s12 + $0x2440] sm:$0xff] }
 0x7f7   :  { %11144 = vmatpush1.bf16.msra.mxu1 %v11143_v59  ;;  %10398 = vmatprep.subr.bf16.mxu0 %v10397_v52  ;;  %v11159_v59 = vpack.c.bf16 %v6184_v44, %v6180_v20  ;;  %v10413_v52 = vpack.c.bf16 %v6191_v57, %v6187_v49  ;;  %v6214_v41 = vld [vmem:[%s21715_s12 + $0x2460] sm:$0xff]  ;;  %v6212_v20 = vld [vmem:[%s21715_s12 + $0x2450] sm:$0xff]  ;;  %v10425_v44 = vpack.c.bf16 %v6215_v1, %v6211_v30  ;;  %v6219_v57 = vld [vmem:[%s21715_s12 + $0x2488] sm:$0xff] }
 0x7f8   :  { %11146 = vmatprep.subr.bf16.mxu1 %v11145_v60  ;;  %v11161_v60 = vpack.c.bf16 %v6193_v26, %v6189_v47  ;;  %v6216_v49 = vld [vmem:[%s21715_s12 + $0x2470] sm:$0xff]  ;;  %v6223_v47 = vld [vmem:[%s21715_s12 + $0x24a8] sm:$0xff]  ;;  %v6245_v1 = vld [vmem:[%s21715_s12 + $0x2558] sm:$0xff] }
 0x7f9   :  { %v6247_v30 = vld [vmem:[%s21715_s12 + $0x2568] sm:$0xff] }
 0x7fa   :  { %10400 = vmatpush1.bf16.msra.mxu0 %v10399_v31  ;;  %v10415_v31 = vpack.c.bf16 %v6190_v37, %v6186_v5  ;;  %v6218_v5 = vld [vmem:[%s21715_s12 + $0x2480] sm:$0xff] }
 0x7fb   :  { %11148 = vmatpush1.bf16.msra.mxu1 %v11147_v46  ;;  %10402 = vmatprep.subr.bf16.mxu0 %v10401_v25  ;;  %v11163_v46 = vpack.c.bf16 %v6192_v61, %v6188_v22  ;;  %v10417_v25 = vpack.c.bf16 %v6199_v18, %v6195_v39  ;;  %v6222_v37 = vld [vmem:[%s21715_s12 + $0x24a0] sm:$0xff]  ;;  %v6220_v22 = vld [vmem:[%s21715_s12 + $0x2490] sm:$0xff]  ;;  %v6227_v61 = vld [vmem:[%s21715_s12 + $0x24c8] sm:$0xff] }
 0x7fc   :  { %11150 = vmatprep.subr.bf16.mxu1 %v11149_v43  ;;  %v11165_v43 = vpack.c.bf16 %v6201_v33, %v6197_v13  ;;  %v6231_v39 = vld [vmem:[%s21715_s12 + $0x24e8] sm:$0xff]  ;;  %v6229_v18 = vld [vmem:[%s21715_s12 + $0x24d8] sm:$0xff]  ;;  %v10431_v33 = vpack.c.bf16 %v6222_v37, %v6218_v5  ;;  %v6256_v37 = vld [vmem:[%s21715_s12 + $0x25b0] sm:$0xff] }
 0x7fd   :  { %v6233_v13 = vld [vmem:[%s21715_s12 + $0x24f8] sm:$0xff] }
 0x7fe   :  { %10404 = vmatpush1.bf16.msra.mxu0 %v10403_v32  ;;  %v10419_v32 = vpack.c.bf16 %v6198_v53, %v6194_v55  ;;  %v6230_v55 = vld [vmem:[%s21715_s12 + $0x24e0] sm:$0xff]  ;;  %v6228_v53 = vld [vmem:[%s21715_s12 + $0x24d0] sm:$0xff] }
 0x7ff   :  { %11152 = vmatpush1.bf16.msra.mxu1 %v11151_v40  ;;  %10406 = vmatprep.subr.bf16.mxu0 %v10405_v35  ;;  %v11167_v40 = vpack.c.bf16 %v6200_v16, %v6196_v29  ;;  %v10421_v35 = vpack.c.bf16 %v6207_v8, %v6203_v24  ;;  %v11181_v29 = vpack.c.bf16 %v6233_v13, %v6229_v18  ;;  %v6235_v16 = vld [vmem:[%s21715_s12 + $0x2508] sm:$0xff]  ;;  %v6237_v8 = vld [vmem:[%s21715_s12 + $0x2518] sm:$0xff] }
 0x800   :  { %11154 = vmatprep.subr.bf16.mxu1 %v11153_v6  ;;  %v6204_v6 = vld [vmem:[%s21715_s12 + $0x2410] sm:$0xff]  ;;  %v6239_v24 = vld [vmem:[%s21715_s12 + $0x2528] sm:$0xff] }
 0x802   :  { %10408 = vmatpush1.bf16.msra.mxu0 %v10407_v19  ;;  %v6213_v19 = vld [vmem:[%s21715_s12 + $0x2458] sm:$0xff] }
 0x803   :  { %11156 = vmatpush1.bf16.msra.mxu1 %v11155_v4  ;;  %10410 = vmatprep.subr.bf16.mxu0 %v10409_v3  ;;  %v6217_v4 = vld [vmem:[%s21715_s12 + $0x2478] sm:$0xff]  ;;  %v11171_v3 = vpack.c.bf16 %v6208_v12, %v6204_v6  ;;  %v6240_v6 = vld [vmem:[%s21715_s12 + $0x2530] sm:$0xff]  ;;  %v6243_v12 = vld [vmem:[%s21715_s12 + $0x2548] sm:$0xff] }
 0x804   :  { %11158 = vmatprep.subr.bf16.mxu1 %v11157_v2  ;;  %v4967_v2 = vsel %vm4925_vm9, %v17610_v23, %v11792_v54  ;;  %v11173_v26 = vpack.c.bf16 %v6217_v4, %v6213_v19  ;;  %v6221_v23 = vld [vmem:[%s21715_s12 + $0x2498] sm:$0xff]  ;;  %v4941_v54 = vsel %vm4940_vm10, %v11797_v9, %v11798_v21  ;;  %v11187_v4 = vpack.c.bf16 %v6240_v6, %v6236_v7  ;;  %v6275_v7 = vld [vmem:[%s21715_s12 + $0x2648] sm:$0xff] }
 0x805   :  { %v11177_v21 = vpack.c.bf16 %v6225_v38, %v6221_v23  ;;  %v6277_v6 = vld [vmem:[%s21715_s12 + $0x2658] sm:$0xff] }
 0x806   :  { %10412 = vmatpush1.bf16.msra.mxu0 %v10411_v36  ;;  %v10427_v36 = vpack.c.bf16 %v6214_v41, %v6210_v10  ;;  %v6242_v10 = vld [vmem:[%s21715_s12 + $0x2540] sm:$0xff] }
 0x807   :  { %11160 = vmatpush1.bf16.msra.mxu1 %v11159_v59  ;;  %10414 = vmatprep.subr.bf16.mxu0 %v10413_v52  ;;  %v11175_v59 = vpack.c.bf16 %v6216_v49, %v6212_v20  ;;  %v10429_v52 = vpack.c.bf16 %v6223_v47, %v6219_v57  ;;  %v6246_v41 = vld [vmem:[%s21715_s12 + $0x2560] sm:$0xff]  ;;  %v6244_v20 = vld [vmem:[%s21715_s12 + $0x2550] sm:$0xff]  ;;  %v6251_v49 = vld [vmem:[%s21715_s12 + $0x2588] sm:$0xff] }
 0x808   :  { %11162 = vmatprep.subr.bf16.mxu1 %v11161_v60  ;;  %v6224_v60 = vld [vmem:[%s21715_s12 + $0x24b0] sm:$0xff]  ;;  %v6255_v57 = vld [vmem:[%s21715_s12 + $0x25a8] sm:$0xff]  ;;  %v6253_v47 = vld [vmem:[%s21715_s12 + $0x2598] sm:$0xff]  ;;  %v10443_v23 = vpack.c.bf16 %v6246_v41, %v6242_v10 }
 0x809   :  { %v6280_v41 = vld [vmem:[%s21715_s12 + $0x2670] sm:$0xff] }
 0x80a   :  { %10416 = vmatpush1.bf16.msra.mxu0 %v10415_v31  ;;  %v11179_v31 = vpack.c.bf16 %v6224_v60, %v6220_v22  ;;  %v6259_v22 = vld [vmem:[%s21715_s12 + $0x25c8] sm:$0xff]  ;;  %v6261_v60 = vld [vmem:[%s21715_s12 + $0x25d8] sm:$0xff] }
 0x80b   :  { %11164 = vmatpush1.bf16.msra.mxu1 %v11163_v46  ;;  %10418 = vmatprep.subr.bf16.mxu0 %v10417_v25  ;;  %v10433_v46 = vpack.c.bf16 %v6231_v39, %v6227_v61  ;;  %v6226_v25 = vld [vmem:[%s21715_s12 + $0x24c0] sm:$0xff]  ;;  %v6265_v61 = vld [vmem:[%s21715_s12 + $0x25f8] sm:$0xff] }
 0x80c   :  { %11166 = vmatprep.subr.bf16.mxu1 %v11165_v43  ;;  %v6232_v43 = vld [vmem:[%s21715_s12 + $0x24f0] sm:$0xff]  ;;  %v10435_v27 = vpack.c.bf16 %v6230_v55, %v6226_v25  ;;  %v11197_v25 = vpack.c.bf16 %v6265_v61, %v6261_v60 }
 0x80d   :  { %v6264_v55 = vld [vmem:[%s21715_s12 + $0x25f0] sm:$0xff] }
 0x80e   :  { %10420 = vmatpush1.bf16.msra.mxu0 %v10419_v32  ;;  %v11183_v32 = vpack.c.bf16 %v6232_v43, %v6228_v53  ;;  %v6267_v53 = vld [vmem:[%s21715_s12 + $0x2608] sm:$0xff]  ;;  %v6269_v43 = vld [vmem:[%s21715_s12 + $0x2618] sm:$0xff] }
 0x80f   :  { %11168 = vmatpush1.bf16.msra.mxu1 %v11167_v40  ;;  %10422 = vmatprep.subr.bf16.mxu0 %v10421_v35  ;;  %v10437_v40 = vpack.c.bf16 %v6239_v24, %v6235_v16  ;;  %v6234_v35 = vld [vmem:[%s21715_s12 + $0x2500] sm:$0xff]  ;;  %v6273_v16 = vld [vmem:[%s21715_s12 + $0x2638] sm:$0xff] }
 0x810   :  { %11170 = vmatprep.subr.bf16.mxu1 %v11169_v48  ;;  %v11185_v48 = vpack.c.bf16 %v6241_v58, %v6237_v8  ;;  %v10439_v19 = vpack.c.bf16 %v6238_v50, %v6234_v35  ;;  %v11201_v35 = vpack.c.bf16 %v6273_v16, %v6269_v43  ;;  %v6272_v50 = vld [vmem:[%s21715_s12 + $0x2630] sm:$0xff] }
 0x811   :  { %7185 = vmatmul.mubr.f32.vlgmr.msra.gmra.mrb[98].mxu0 %v4967_v2 }
 0x812   :  { %8037 = vmatmul.mubr.f32.vlgmr.msra.gmra.mrb[122].mxu1 %v4967_v2  ;;  %10424 = vmatpush1.bf16.msra.mxu0 %v10423_v56  ;;  %v6249_v56 = vld [vmem:[%s21715_s12 + $0x2578] sm:$0xff] }
 0x813   :  { %7255 = vmatprep.mubr.f32.mxu0 %v4941_v54  ;;  %11172 = vmatpush1.bf16.msra.mxu1 %v11171_v3  ;;  %v10441_v3 = vpack.c.bf16 %v6247_v30, %v6243_v12  ;;  %v11189_v2 = vpack.c.bf16 %v6249_v56, %v6245_v1  ;;  %v6281_v12 = vld [vmem:[%s21715_s12 + $0x2678] sm:$0xff] }
 0x814   :  { %8107 = vmatprep.mubr.f32.mxu1 %v4941_v54  ;;  %10426 = vmatprep.subr.bf16.mxu0 %v10425_v44  ;;  %v6248_v44 = vld [vmem:[%s21715_s12 + $0x2570] sm:$0xff]  ;;  %v10445_v54 = vpack.c.bf16 %v6255_v57, %v6251_v49  ;;  %v11205_v10 = vpack.c.bf16 %v6281_v12, %v6277_v6  ;;  %v6289_v49 = vld [vmem:[%s21715_s12 + $0x26b8] sm:$0xff] }
 0x815   :  { %11174 = vmatprep.subr.bf16.mxu1 %v11173_v26  ;;  %v6257_v26 = vld [vmem:[%s21715_s12 + $0x25b8] sm:$0xff]  ;;  %v11191_v38 = vpack.c.bf16 %v6248_v44, %v6244_v20  ;;  %v6283_v20 = vld [vmem:[%s21715_s12 + $0x2688] sm:$0xff] }
 0x816   :  { %10428 = vmatpush1.bf16.msra.mxu0 %v10427_v36  ;;  %v6250_v36 = vld [vmem:[%s21715_s12 + $0x2580] sm:$0xff]  ;;  %v11193_v5 = vpack.c.bf16 %v6257_v26, %v6253_v47  ;;  %v6285_v44 = vld [vmem:[%s21715_s12 + $0x2698] sm:$0xff] }
 0x817   :  { %11176 = vmatpush1.bf16.msra.mxu1 %v11175_v59  ;;  %10430 = vmatprep.subr.bf16.mxu0 %v10429_v52  ;;  %v6254_v59 = vld [vmem:[%s21715_s12 + $0x25a0] sm:$0xff]  ;;  %v6252_v52 = vld [vmem:[%s21715_s12 + $0x2590] sm:$0xff] }
 0x818   :  { %11178 = vmatprep.subr.bf16.mxu1 %v11177_v21  ;;  %v6263_v21 = vld [vmem:[%s21715_s12 + $0x25e8] sm:$0xff]  ;;  %v10447_v39 = vpack.c.bf16 %v6254_v59, %v6250_v36  ;;  %v11195_v18 = vpack.c.bf16 %v6256_v37, %v6252_v52  ;;  %v11209_v36 = vpack.c.bf16 %v6289_v49, %v6285_v44  ;;  %v6288_v59 = vld [vmem:[%s21715_s12 + $0x26b0] sm:$0xff]  ;;  %v6293_v37 = vld [vmem:[%s21715_s12 + $0x26d8] sm:$0xff] }
 0x819   :  { %v10449_v13 = vpack.c.bf16 %v6263_v21, %v6259_v22  ;;  %v6291_v52 = vld [vmem:[%s21715_s12 + $0x26c8] sm:$0xff]  ;;  %v6297_v22 = vld [vmem:[%s21715_s12 + $0x26f8] sm:$0xff] }
 0x81a   :  { %10432 = vmatpush1.bf16.msra.mxu0 %v10431_v33  ;;  %v6258_v33 = vld [vmem:[%s21715_s12 + $0x25c0] sm:$0xff] }
 0x81b   :  { %11180 = vmatpush1.bf16.msra.mxu1 %v11179_v31  ;;  %10434 = vmatprep.subr.bf16.mxu0 %v10433_v46  ;;  %v6262_v31 = vld [vmem:[%s21715_s12 + $0x25e0] sm:$0xff]  ;;  %v6260_v46 = vld [vmem:[%s21715_s12 + $0x25d0] sm:$0xff] }
 0x81c   :  { %11182 = vmatprep.subr.bf16.mxu1 %v11181_v29  ;;  %v6271_v29 = vld [vmem:[%s21715_s12 + $0x2628] sm:$0xff]  ;;  %v10451_v24 = vpack.c.bf16 %v6262_v31, %v6258_v33  ;;  %v11199_v8 = vpack.c.bf16 %v6264_v55, %v6260_v46  ;;  %v11213_v33 = vpack.c.bf16 %v6297_v22, %v6293_v37  ;;  %v6296_v31 = vld [vmem:[%s21715_s12 + $0x26f0] sm:$0xff]  ;;  %v6301_v55 = vld [vmem:[%s21715_s12 + $0x2718] sm:$0xff] }
 0x81d   :  { %v10453_v58 = vpack.c.bf16 %v6271_v29, %v6267_v53  ;;  %v6299_v46 = vld [vmem:[%s21715_s12 + $0x2708] sm:$0xff]  ;;  %v6305_v53 = vld [vmem:[%s21715_s12 + $0x2738] sm:$0xff] }
 0x81e   :  { %10436 = vmatpush1.bf16.msra.mxu0 %v10435_v27  ;;  %v6266_v27 = vld [vmem:[%s21715_s12 + $0x2600] sm:$0xff] }
 0x81f   :  { %11184 = vmatpush1.bf16.msra.mxu1 %v11183_v32  ;;  %10438 = vmatprep.subr.bf16.mxu0 %v10437_v40  ;;  %v6270_v32 = vld [vmem:[%s21715_s12 + $0x2620] sm:$0xff]  ;;  %v6268_v40 = vld [vmem:[%s21715_s12 + $0x2610] sm:$0xff] }
 0x820   :  { %11186 = vmatprep.subr.bf16.mxu1 %v11185_v48  ;;  %v6279_v48 = vld [vmem:[%s21715_s12 + $0x2668] sm:$0xff]  ;;  %v10455_v30 = vpack.c.bf16 %v6270_v32, %v6266_v27  ;;  %v11203_v1 = vpack.c.bf16 %v6272_v50, %v6268_v40  ;;  %v11217_v27 = vpack.c.bf16 %v6305_v53, %v6301_v55  ;;  %v6304_v32 = vld [vmem:[%s21715_s12 + $0x2730] sm:$0xff]  ;;  %v6309_v50 = vld [vmem:[%s21715_s12 + $0x2758] sm:$0xff] }
 0x821   :  { %v10457_v56 = vpack.c.bf16 %v6279_v48, %v6275_v7  ;;  %v6307_v40 = vld [vmem:[%s21715_s12 + $0x2748] sm:$0xff]  ;;  %v6313_v7 = vld [vmem:[%s21715_s12 + $0x2778] sm:$0xff] }
 0x822   :  { %10440 = vmatpush1.bf16.msra.mxu0 %v10439_v19  ;;  %v6274_v19 = vld [vmem:[%s21715_s12 + $0x2640] sm:$0xff] }
 0x823   :  { %11188 = vmatpush1.bf16.msra.mxu1 %v11187_v4  ;;  %10442 = vmatprep.subr.bf16.mxu0 %v10441_v3  ;;  %v6278_v4 = vld [vmem:[%s21715_s12 + $0x2660] sm:$0xff]  ;;  %v6276_v3 = vld [vmem:[%s21715_s12 + $0x2650] sm:$0xff] }
 0x824   :  { %11190 = vmatprep.subr.bf16.mxu1 %v11189_v2  ;;  %v6287_v2 = vld [vmem:[%s21715_s12 + $0x26a8] sm:$0xff]  ;;  %v10459_v57 = vpack.c.bf16 %v6278_v4, %v6274_v19  ;;  %v11207_v47 = vpack.c.bf16 %v6280_v41, %v6276_v3  ;;  %v11221_v19 = vpack.c.bf16 %v6313_v7, %v6309_v50  ;;  %v6312_v4 = vld [vmem:[%s21715_s12 + $0x2770] sm:$0xff]  ;;  %v6317_v41 = vld [vmem:[%s21715_s12 + $0x2798] sm:$0xff] }
 0x825   :  { %v10461_v26 = vpack.c.bf16 %v6287_v2, %v6283_v20  ;;  %v6315_v3 = vld [vmem:[%s21715_s12 + $0x2788] sm:$0xff]  ;;  %v6321_v20 = vld [vmem:[%s21715_s12 + $0x27b8] sm:$0xff]  ;;  %v6338_v7 = vld [vmem:[%s21715_s12 + $0x2840] sm:$0xff] }
 0x826   :  { %10444 = vmatpush1.bf16.msra.mxu0 %v10443_v23  ;;  %v6282_v23 = vld [vmem:[%s21715_s12 + $0x2680] sm:$0xff] }
 0x827   :  { %11192 = vmatpush1.bf16.msra.mxu1 %v11191_v38  ;;  %10446 = vmatprep.subr.bf16.mxu0 %v10445_v54  ;;  %v6286_v38 = vld [vmem:[%s21715_s12 + $0x26a0] sm:$0xff]  ;;  %v6284_v54 = vld [vmem:[%s21715_s12 + $0x2690] sm:$0xff] }
 0x828   :  { %11194 = vmatprep.subr.bf16.mxu1 %v11193_v5  ;;  %v6295_v5 = vld [vmem:[%s21715_s12 + $0x26e8] sm:$0xff]  ;;  %v10463_v21 = vpack.c.bf16 %v6286_v38, %v6282_v23  ;;  %v11211_v60 = vpack.c.bf16 %v6288_v59, %v6284_v54  ;;  %v11225_v23 = vpack.c.bf16 %v6321_v20, %v6317_v41  ;;  %v6320_v38 = vld [vmem:[%s21715_s12 + $0x27b0] sm:$0xff]  ;;  %v6325_v59 = vld [vmem:[%s21715_s12 + $0x27d8] sm:$0xff] }
 0x829   :  { %v10465_v61 = vpack.c.bf16 %v6295_v5, %v6291_v52  ;;  %v6323_v54 = vld [vmem:[%s21715_s12 + $0x27c8] sm:$0xff]  ;;  %v6329_v52 = vld [vmem:[%s21715_s12 + $0x27f8] sm:$0xff]  ;;  %v6346_v20 = vld [vmem:[%s21715_s12 + $0x2880] sm:$0xff] }
 0x82a   :  { %10448 = vmatpush1.bf16.msra.mxu0 %v10447_v39  ;;  %v6290_v39 = vld [vmem:[%s21715_s12 + $0x26c0] sm:$0xff] }
 0x82b   :  { %11196 = vmatpush1.bf16.msra.mxu1 %v11195_v18  ;;  %10450 = vmatprep.subr.bf16.mxu0 %v10449_v13  ;;  %v6294_v18 = vld [vmem:[%s21715_s12 + $0x26e0] sm:$0xff]  ;;  %v6292_v13 = vld [vmem:[%s21715_s12 + $0x26d0] sm:$0xff] }
 0x82c   :  { %11198 = vmatprep.subr.bf16.mxu1 %v11197_v25  ;;  %v6303_v25 = vld [vmem:[%s21715_s12 + $0x2728] sm:$0xff]  ;;  %v10467_v29 = vpack.c.bf16 %v6294_v18, %v6290_v39  ;;  %v11215_v43 = vpack.c.bf16 %v6296_v31, %v6292_v13  ;;  %v11229_v39 = vpack.c.bf16 %v6329_v52, %v6325_v59  ;;  %v6328_v18 = vld [vmem:[%s21715_s12 + $0x27f0] sm:$0xff]  ;;  %v6333_v31 = vld [vmem:[%s21715_s12 + $0x2818] sm:$0xff] }
 0x82d   :  { %v10469_v16 = vpack.c.bf16 %v6303_v25, %v6299_v46  ;;  %v6331_v13 = vld [vmem:[%s21715_s12 + $0x2808] sm:$0xff]  ;;  %v6337_v46 = vld [vmem:[%s21715_s12 + $0x2838] sm:$0xff]  ;;  %v6358_v59 = vld [vmem:[%s21715_s12 + $0x28e0] sm:$0xff] }
 0x82e   :  { %10452 = vmatpush1.bf16.msra.mxu0 %v10451_v24  ;;  %v6298_v24 = vld [vmem:[%s21715_s12 + $0x2700] sm:$0xff]  ;;  %v6356_v52 = vld [vmem:[%s21715_s12 + $0x28d0] sm:$0xff] }
 0x82f   :  { %11200 = vmatpush1.bf16.msra.mxu1 %v11199_v8  ;;  %10454 = vmatprep.subr.bf16.mxu0 %v10453_v58  ;;  %v6302_v8 = vld [vmem:[%s21715_s12 + $0x2720] sm:$0xff]  ;;  %v6300_v58 = vld [vmem:[%s21715_s12 + $0x2710] sm:$0xff] }
 0x830   :  { %11202 = vmatprep.subr.bf16.mxu1 %v11201_v35  ;;  %v6311_v35 = vld [vmem:[%s21715_s12 + $0x2768] sm:$0xff]  ;;  %v10471_v48 = vpack.c.bf16 %v6302_v8, %v6298_v24  ;;  %v11219_v6 = vpack.c.bf16 %v6304_v32, %v6300_v58  ;;  %v6332_v24 = vld [vmem:[%s21715_s12 + $0x2810] sm:$0xff] }
 0x831   :  { %v10473_v12 = vpack.c.bf16 %v6311_v35, %v6307_v40  ;;  %v6336_v8 = vld [vmem:[%s21715_s12 + $0x2830] sm:$0xff]  ;;  %v6339_v58 = vld [vmem:[%s21715_s12 + $0x2848] sm:$0xff]  ;;  %v6341_v40 = vld [vmem:[%s21715_s12 + $0x2858] sm:$0xff] }
 0x832   :  { %10456 = vmatpush1.bf16.msra.mxu0 %v10455_v30  ;;  %v6306_v30 = vld [vmem:[%s21715_s12 + $0x2740] sm:$0xff]  ;;  %v6345_v35 = vld [vmem:[%s21715_s12 + $0x2878] sm:$0xff]  ;;  %v11235_v50 = vpack.c.bf16 %v6336_v8, %v6332_v24 }
 0x833   :  { %11204 = vmatpush1.bf16.msra.mxu1 %v11203_v1  ;;  %10458 = vmatprep.subr.bf16.mxu0 %v10457_v56  ;;  %v6310_v1 = vld [vmem:[%s21715_s12 + $0x2760] sm:$0xff]  ;;  %v6308_v56 = vld [vmem:[%s21715_s12 + $0x2750] sm:$0xff] }
 0x834   :  { %11206 = vmatprep.subr.bf16.mxu1 %v11205_v10  ;;  %v6319_v10 = vld [vmem:[%s21715_s12 + $0x27a8] sm:$0xff]  ;;  %v10475_v2 = vpack.c.bf16 %v6310_v1, %v6306_v30  ;;  %v11223_v44 = vpack.c.bf16 %v6312_v4, %v6308_v56  ;;  %v6344_v1 = vld [vmem:[%s21715_s12 + $0x2870] sm:$0xff]  ;;  %v11237_v4 = vpack.c.bf16 %v6345_v35, %v6341_v40 }
 0x835   :  { %v10477_v49 = vpack.c.bf16 %v6319_v10, %v6315_v3  ;;  %v6347_v56 = vld [vmem:[%s21715_s12 + $0x2888] sm:$0xff]  ;;  %v6372_v40 = vld [vmem:[%s21715_s12 + $0x2950] sm:$0xff] }
 0x836   :  { %10460 = vmatpush1.bf16.msra.mxu0 %v10459_v57  ;;  %v6314_v57 = vld [vmem:[%s21715_s12 + $0x2780] sm:$0xff] }
 0x837   :  { %11208 = vmatpush1.bf16.msra.mxu1 %v11207_v47  ;;  %10462 = vmatprep.subr.bf16.mxu0 %v10461_v26  ;;  %v6318_v47 = vld [vmem:[%s21715_s12 + $0x27a0] sm:$0xff]  ;;  %v6316_v26 = vld [vmem:[%s21715_s12 + $0x2790] sm:$0xff] }
 0x838   :  { %11210 = vmatprep.subr.bf16.mxu1 %v11209_v36  ;;  %v6327_v36 = vld [vmem:[%s21715_s12 + $0x27e8] sm:$0xff]  ;;  %v10479_v5 = vpack.c.bf16 %v6318_v47, %v6314_v57  ;;  %v11227_v37 = vpack.c.bf16 %v6320_v38, %v6316_v26  ;;  %v6357_v47 = vld [vmem:[%s21715_s12 + $0x28d8] sm:$0xff] }
 0x839   :  { %v10481_v22 = vpack.c.bf16 %v6327_v36, %v6323_v54  ;;  %v6359_v57 = vld [vmem:[%s21715_s12 + $0x28e8] sm:$0xff]  ;;  %v6361_v26 = vld [vmem:[%s21715_s12 + $0x28f8] sm:$0xff]  ;;  %v6354_v36 = vld [vmem:[%s21715_s12 + $0x28c0] sm:$0xff] }
 0x83a   :  { %10464 = vmatpush1.bf16.msra.mxu0 %v10463_v21  ;;  %v6322_v21 = vld [vmem:[%s21715_s12 + $0x27c0] sm:$0xff] }
 0x83b   :  { %11212 = vmatpush1.bf16.msra.mxu1 %v11211_v60  ;;  %10466 = vmatprep.subr.bf16.mxu0 %v10465_v61  ;;  %v6326_v60 = vld [vmem:[%s21715_s12 + $0x27e0] sm:$0xff]  ;;  %v6324_v61 = vld [vmem:[%s21715_s12 + $0x27d0] sm:$0xff] }
 0x83c   :  { %11214 = vmatprep.subr.bf16.mxu1 %v11213_v33  ;;  %v6335_v33 = vld [vmem:[%s21715_s12 + $0x2828] sm:$0xff]  ;;  %v10483_v25 = vpack.c.bf16 %v6326_v60, %v6322_v21  ;;  %v11231_v55 = vpack.c.bf16 %v6328_v18, %v6324_v61  ;;  %v6365_v60 = vld [vmem:[%s21715_s12 + $0x2918] sm:$0xff] }
 0x83d   :  { %v10485_v53 = vpack.c.bf16 %v6335_v33, %v6331_v13  ;;  %v6367_v21 = vld [vmem:[%s21715_s12 + $0x2928] sm:$0xff]  ;;  %v6369_v61 = vld [vmem:[%s21715_s12 + $0x2938] sm:$0xff]  ;;  %v6362_v33 = vld [vmem:[%s21715_s12 + $0x2900] sm:$0xff] }
 0x83e   :  { %10468 = vmatpush1.bf16.msra.mxu0 %v10467_v29  ;;  %v6330_v29 = vld [vmem:[%s21715_s12 + $0x2800] sm:$0xff] }
 0x83f   :  { %11216 = vmatpush1.bf16.msra.mxu1 %v11215_v43  ;;  %10470 = vmatprep.subr.bf16.mxu0 %v10469_v16  ;;  %v6334_v43 = vld [vmem:[%s21715_s12 + $0x2820] sm:$0xff]  ;;  %v11233_v16 = vpack.c.bf16 %v6337_v46, %v6333_v31  ;;  %v6364_v46 = vld [vmem:[%s21715_s12 + $0x2910] sm:$0xff] }
 0x840   :  { %11218 = vmatprep.subr.bf16.mxu1 %v11217_v27  ;;  %v6343_v27 = vld [vmem:[%s21715_s12 + $0x2868] sm:$0xff]  ;;  %v10487_v32 = vpack.c.bf16 %v6334_v43, %v6330_v29  ;;  %v6366_v31 = vld [vmem:[%s21715_s12 + $0x2920] sm:$0xff]  ;;  %v6373_v43 = vld [vmem:[%s21715_s12 + $0x2958] sm:$0xff] }
 0x841   :  { %v10489_v30 = vpack.c.bf16 %v6343_v27, %v6339_v58  ;;  %v6375_v29 = vld [vmem:[%s21715_s12 + $0x2968] sm:$0xff]  ;;  %v10503_v24 = vpack.c.bf16 %v6366_v31, %v6362_v33  ;;  %v6370_v27 = vld [vmem:[%s21715_s12 + $0x2940] sm:$0xff]  ;;  %v6409_v33 = vld [vmem:[%s21715_s12 + $0x2a78] sm:$0xff] }
 0x842   :  { %10472 = vmatpush1.bf16.msra.mxu0 %v10471_v48  ;;  %v6342_v48 = vld [vmem:[%s21715_s12 + $0x2860] sm:$0xff] }
 0x843   :  { %11220 = vmatpush1.bf16.msra.mxu1 %v11219_v6  ;;  %10474 = vmatprep.subr.bf16.mxu0 %v10473_v12  ;;  %v6340_v6 = vld [vmem:[%s21715_s12 + $0x2850] sm:$0xff]  ;;  %v4968_v12 = vsel %vm4940_vm10, %v17642_v0, %v11797_v9  ;;  %v6349_v0 = vld [vmem:[%s21715_s12 + $0x2898] sm:$0xff]  ;;  %v4969_v9 = vsel %vm4956_vm11, %v17644_v28, %v17681_v17  ;;  %v10491_v3 = vpack.c.bf16 %v6342_v48, %v6338_v7  ;;  %v6379_v7 = vld [vmem:[%s21715_s12 + $0x2988] sm:$0xff] }
 0x844   :  { %11222 = vmatprep.subr.bf16.mxu1 %v11221_v19  ;;  %v6351_v19 = vld [vmem:[%s21715_s12 + $0x28a8] sm:$0xff]  ;;  %v11239_v10 = vpack.c.bf16 %v6344_v1, %v6340_v6  ;;  %v11241_v28 = vpack.c.bf16 %v6353_v45, %v6349_v0  ;;  %v6352_v17 = vld [vmem:[%s21715_s12 + $0x28b0] sm:$0xff]  ;;  %v6381_v6 = vld [vmem:[%s21715_s12 + $0x2998] sm:$0xff] }
 0x845   :  { %v10493_v41 = vpack.c.bf16 %v6351_v19, %v6347_v56  ;;  %v6383_v48 = vld [vmem:[%s21715_s12 + $0x29a8] sm:$0xff]  ;;  %v6378_v19 = vld [vmem:[%s21715_s12 + $0x2980] sm:$0xff]  ;;  %v6380_v0 = vld [vmem:[%s21715_s12 + $0x2990] sm:$0xff] }
 0x846   :  { %10476 = vmatpush1.bf16.msra.mxu0 %v10475_v2  ;;  %v6350_v2 = vld [vmem:[%s21715_s12 + $0x28a0] sm:$0xff]  ;;  %v10509_v56 = vpack.c.bf16 %v6383_v48, %v6379_v7  ;;  %v6412_v48 = vld [vmem:[%s21715_s12 + $0x2a90] sm:$0xff] }
 0x847   :  { %11224 = vmatpush1.bf16.msra.mxu1 %v11223_v44  ;;  %10478 = vmatprep.subr.bf16.mxu0 %v10477_v49  ;;  %v6348_v44 = vld [vmem:[%s21715_s12 + $0x2890] sm:$0xff]  ;;  %v6355_v49 = vld [vmem:[%s21715_s12 + $0x28c8] sm:$0xff]  ;;  %v6414_v7 = vld [vmem:[%s21715_s12 + $0x2aa0] sm:$0xff] }
 0x848   :  { %11226 = vmatprep.subr.bf16.mxu1 %v11225_v23  ;;  %v10495_v23 = vpack.c.bf16 %v6350_v2, %v6346_v20  ;;  %v11243_v38 = vpack.c.bf16 %v6352_v17, %v6348_v44  ;;  %v10497_v54 = vpack.c.bf16 %v6359_v57, %v6355_v49  ;;  %v6393_v20 = vld [vmem:[%s21715_s12 + $0x29f8] sm:$0xff]  ;;  %v6386_v17 = vld [vmem:[%s21715_s12 + $0x29c0] sm:$0xff]  ;;  %v6388_v57 = vld [vmem:[%s21715_s12 + $0x29d0] sm:$0xff] }
 0x849   :  { %v6390_v49 = vld [vmem:[%s21715_s12 + $0x29e0] sm:$0xff] }
 0x84a   :  { %10480 = vmatpush1.bf16.msra.mxu0 %v10479_v5  ;;  %v11245_v5 = vpack.c.bf16 %v6361_v26, %v6357_v47  ;;  %v6392_v26 = vld [vmem:[%s21715_s12 + $0x29f0] sm:$0xff] }
 0x84b   :  { %11228 = vmatpush1.bf16.msra.mxu1 %v11227_v37  ;;  %10482 = vmatprep.subr.bf16.mxu0 %v10481_v22  ;;  %v6360_v37 = vld [vmem:[%s21715_s12 + $0x28f0] sm:$0xff]  ;;  %v6363_v22 = vld [vmem:[%s21715_s12 + $0x2908] sm:$0xff] }
 0x84c   :  { %11230 = vmatprep.subr.bf16.mxu1 %v11229_v39  ;;  %v10499_v39 = vpack.c.bf16 %v6358_v59, %v6354_v36  ;;  %v11247_v18 = vpack.c.bf16 %v6360_v37, %v6356_v52  ;;  %v10501_v13 = vpack.c.bf16 %v6367_v21, %v6363_v22  ;;  %v6401_v36 = vld [vmem:[%s21715_s12 + $0x2a38] sm:$0xff]  ;;  %v10515_v59 = vpack.c.bf16 %v6390_v49, %v6386_v17  ;;  %v6394_v37 = vld [vmem:[%s21715_s12 + $0x2a00] sm:$0xff]  ;;  %v6396_v21 = vld [vmem:[%s21715_s12 + $0x2a10] sm:$0xff] }
 0x84d   :  { %v11263_v52 = vpack.c.bf16 %v6392_v26, %v6388_v57  ;;  %v6398_v22 = vld [vmem:[%s21715_s12 + $0x2a20] sm:$0xff]  ;;  %v6433_v17 = vld [vmem:[%s21715_s12 + $0x2b38] sm:$0xff] }
 0x84e   :  { %10484 = vmatpush1.bf16.msra.mxu0 %v10483_v25  ;;  %v11249_v25 = vpack.c.bf16 %v6369_v61, %v6365_v60  ;;  %v6400_v61 = vld [vmem:[%s21715_s12 + $0x2a30] sm:$0xff]  ;;  %v10519_v31 = vpack.c.bf16 %v6398_v22, %v6394_v37  ;;  %v6426_v26 = vld [vmem:[%s21715_s12 + $0x2b00] sm:$0xff]  ;;  %v6441_v37 = vld [vmem:[%s21715_s12 + $0x2b78] sm:$0xff] }
 0x84f   :  { %11232 = vmatpush1.bf16.msra.mxu1 %v11231_v55  ;;  %10486 = vmatprep.subr.bf16.mxu0 %v10485_v53  ;;  %v6368_v55 = vld [vmem:[%s21715_s12 + $0x2930] sm:$0xff]  ;;  %v6371_v53 = vld [vmem:[%s21715_s12 + $0x2948] sm:$0xff] }
 0x850   :  { %11234 = vmatprep.subr.bf16.mxu1 %v11233_v16  ;;  %v6377_v16 = vld [vmem:[%s21715_s12 + $0x2978] sm:$0xff]  ;;  %v11251_v8 = vpack.c.bf16 %v6368_v55, %v6364_v46  ;;  %v10505_v58 = vpack.c.bf16 %v6375_v29, %v6371_v53  ;;  %v11267_v46 = vpack.c.bf16 %v6400_v61, %v6396_v21  ;;  %v6402_v55 = vld [vmem:[%s21715_s12 + $0x2a40] sm:$0xff]  ;;  %v6404_v29 = vld [vmem:[%s21715_s12 + $0x2a50] sm:$0xff] }
 0x851   :  { %7256 = vmatmul.mubr.f32.vlgmr.msra.gmra.mrb[98].mxu0 %v4968_v12  ;;  %v11253_v35 = vpack.c.bf16 %v6377_v16, %v6373_v43  ;;  %v6406_v53 = vld [vmem:[%s21715_s12 + $0x2a60] sm:$0xff]  ;;  %v6408_v16 = vld [vmem:[%s21715_s12 + $0x2a70] sm:$0xff] }
 0x852   :  { %8108 = vmatmul.mubr.f32.vlgmr.msra.gmra.mrb[122].mxu1 %v4968_v12  ;;  %10488 = vmatpush1.bf16.msra.mxu0 %v10487_v32  ;;  %v6374_v32 = vld [vmem:[%s21715_s12 + $0x2960] sm:$0xff]  ;;  %v6385_v12 = vld [vmem:[%s21715_s12 + $0x29b8] sm:$0xff] }
 0x853   :  { %7326 = vmatprep.mubr.f32.mxu0 %v4969_v9  ;;  %11236 = vmatpush1.bf16.msra.mxu1 %v11235_v50  ;;  %v6376_v50 = vld [vmem:[%s21715_s12 + $0x2970] sm:$0xff]  ;;  %v11257_v45 = vpack.c.bf16 %v6385_v12, %v6381_v6  ;;  %v6434_v61 = vld [vmem:[%s21715_s12 + $0x2b40] sm:$0xff] }
 0x854   :  { %8178 = vmatprep.mubr.f32.mxu1 %v4969_v9  ;;  %10490 = vmatprep.subr.bf16.mxu0 %v10489_v30  ;;  %v10507_v30 = vpack.c.bf16 %v6374_v32, %v6370_v27  ;;  %v11255_v1 = vpack.c.bf16 %v6376_v50, %v6372_v40  ;;  %v6384_v9 = vld [vmem:[%s21715_s12 + $0x29b0] sm:$0xff]  ;;  %v6417_v27 = vld [vmem:[%s21715_s12 + $0x2ab8] sm:$0xff]  ;;  %v10523_v32 = vpack.c.bf16 %v6406_v53, %v6402_v55  ;;  %v6410_v50 = vld [vmem:[%s21715_s12 + $0x2a80] sm:$0xff] }
 0x855   :  { %11238 = vmatprep.subr.bf16.mxu1 %v11237_v4  ;;  %v6382_v4 = vld [vmem:[%s21715_s12 + $0x29a0] sm:$0xff]  ;;  %v11259_v44 = vpack.c.bf16 %v6384_v9, %v6380_v0  ;;  %v11271_v40 = vpack.c.bf16 %v6408_v16, %v6404_v29  ;;  %v6416_v12 = vld [vmem:[%s21715_s12 + $0x2ab0] sm:$0xff]  ;;  %v6449_v55 = vld [vmem:[%s21715_s12 + $0x2bb8] sm:$0xff] }
 0x856   :  { %10492 = vmatpush1.bf16.msra.mxu0 %v10491_v3  ;;  %v6387_v3 = vld [vmem:[%s21715_s12 + $0x29c8] sm:$0xff]  ;;  %v10511_v2 = vpack.c.bf16 %v6382_v4, %v6378_v19  ;;  %v6425_v19 = vld [vmem:[%s21715_s12 + $0x2af8] sm:$0xff]  ;;  %v10527_v4 = vpack.c.bf16 %v6414_v7, %v6410_v50  ;;  %v11275_v0 = vpack.c.bf16 %v6416_v12, %v6412_v48  ;;  %v6418_v9 = vld [vmem:[%s21715_s12 + $0x2ac0] sm:$0xff] }
 0x857   :  { %11240 = vmatpush1.bf16.msra.mxu1 %v11239_v10  ;;  %10494 = vmatprep.subr.bf16.mxu0 %v10493_v41  ;;  %v6391_v10 = vld [vmem:[%s21715_s12 + $0x29e8] sm:$0xff]  ;;  %v6389_v41 = vld [vmem:[%s21715_s12 + $0x29d8] sm:$0xff]  ;;  %v6442_v16 = vld [vmem:[%s21715_s12 + $0x2b80] sm:$0xff] }
 0x858   :  { %11242 = vmatprep.subr.bf16.mxu1 %v11241_v28  ;;  %v10513_v28 = vpack.c.bf16 %v6391_v10, %v6387_v3  ;;  %v11261_v47 = vpack.c.bf16 %v6393_v20, %v6389_v41  ;;  %v6422_v3 = vld [vmem:[%s21715_s12 + $0x2ae0] sm:$0xff]  ;;  %v6420_v10 = vld [vmem:[%s21715_s12 + $0x2ad0] sm:$0xff]  ;;  %v6457_v50 = vld [vmem:[%s21715_s12 + $0x2bf8] sm:$0xff] }
 0x859   :  { %v6424_v20 = vld [vmem:[%s21715_s12 + $0x2af0] sm:$0xff]  ;;  %v10531_v49 = vpack.c.bf16 %v6422_v3, %v6418_v9  ;;  %v6450_v12 = vld [vmem:[%s21715_s12 + $0x2bc0] sm:$0xff]  ;;  %v6465_v9 = vld [vmem:[%s21715_s12 + $0x2c38] sm:$0xff] }
 0x85a   :  { %10496 = vmatpush1.bf16.msra.mxu0 %v10495_v23  ;;  %v6395_v23 = vld [vmem:[%s21715_s12 + $0x2a08] sm:$0xff]  ;;  %v11279_v57 = vpack.c.bf16 %v6424_v20, %v6420_v10  ;;  %v6458_v20 = vld [vmem:[%s21715_s12 + $0x2c00] sm:$0xff] }
 0x85b   :  { %11244 = vmatpush1.bf16.msra.mxu1 %v11243_v38  ;;  %10498 = vmatprep.subr.bf16.mxu0 %v10497_v54  ;;  %v6399_v38 = vld [vmem:[%s21715_s12 + $0x2a28] sm:$0xff]  ;;  %v6397_v54 = vld [vmem:[%s21715_s12 + $0x2a18] sm:$0xff] }
 0x85c   :  { %11246 = vmatprep.subr.bf16.mxu1 %v11245_v5  ;;  %v10517_v5 = vpack.c.bf16 %v6399_v38, %v6395_v23  ;;  %v11265_v60 = vpack.c.bf16 %v6401_v36, %v6397_v54  ;;  %v6430_v23 = vld [vmem:[%s21715_s12 + $0x2b20] sm:$0xff]  ;;  %v6428_v38 = vld [vmem:[%s21715_s12 + $0x2b10] sm:$0xff] }
 0x85d   :  { %v6432_v36 = vld [vmem:[%s21715_s12 + $0x2b30] sm:$0xff]  ;;  %v10535_v22 = vpack.c.bf16 %v6430_v23, %v6426_v26  ;;  %v6469_v26 = vld [vmem:[%s21715_s12 + $0x2c58] sm:$0xff] }
 0x85e   :  { %10500 = vmatpush1.bf16.msra.mxu0 %v10499_v39  ;;  %v6403_v39 = vld [vmem:[%s21715_s12 + $0x2a48] sm:$0xff]  ;;  %v11283_v21 = vpack.c.bf16 %v6432_v36, %v6428_v38  ;;  %v6473_v23 = vld [vmem:[%s21715_s12 + $0x2c78] sm:$0xff]  ;;  %v4955_v38 = vpop.permute.xlu0 %4954  ;;  %v6466_v36 = vld [vmem:[%s21715_s12 + $0x2c40] sm:$0xff] }
 0x85f   :  { %11248 = vmatpush1.bf16.msra.mxu1 %v11247_v18  ;;  %10502 = vmatprep.subr.bf16.mxu0 %v10501_v13  ;;  %v6407_v18 = vld [vmem:[%s21715_s12 + $0x2a68] sm:$0xff]  ;;  %v6405_v13 = vld [vmem:[%s21715_s12 + $0x2a58] sm:$0xff] }
 0x860   :  { %11250 = vmatprep.subr.bf16.mxu1 %v11249_v25  ;;  %v10521_v25 = vpack.c.bf16 %v6407_v18, %v6403_v39  ;;  %v11269_v43 = vpack.c.bf16 %v6409_v33, %v6405_v13  ;;  %v6438_v39 = vld [vmem:[%s21715_s12 + $0x2b60] sm:$0xff]  ;;  %v6436_v18 = vld [vmem:[%s21715_s12 + $0x2b50] sm:$0xff] }
 0x861   :  { %v6440_v33 = vld [vmem:[%s21715_s12 + $0x2b70] sm:$0xff]  ;;  %v10539_v53 = vpack.c.bf16 %v6438_v39, %v6434_v61  ;;  %v6477_v61 = vld [vmem:[%s21715_s12 + $0x2c98] sm:$0xff] }
 0x862   :  { %10504 = vmatpush1.bf16.msra.mxu0 %v10503_v24  ;;  %v6411_v24 = vld [vmem:[%s21715_s12 + $0x2a88] sm:$0xff]  ;;  %v11287_v29 = vpack.c.bf16 %v6440_v33, %v6436_v18  ;;  %v6481_v39 = vld [vmem:[%s21715_s12 + $0x2cb8] sm:$0xff]  ;;  %v4958_v18 = vsel %vm4956_vm11, %v17679_v51, %v4955_v38  ;;  %v6476_v51 = vld [vmem:[%s21715_s12 + $0x2c90] sm:$0xff] }
 0x863   :  { %11252 = vmatpush1.bf16.msra.mxu1 %v11251_v8  ;;  %10506 = vmatprep.subr.bf16.mxu0 %v10505_v58  ;;  %v6415_v8 = vld [vmem:[%s21715_s12 + $0x2aa8] sm:$0xff]  ;;  %v6413_v58 = vld [vmem:[%s21715_s12 + $0x2a98] sm:$0xff] }
 0x864   :  { %11254 = vmatprep.subr.bf16.mxu1 %v11253_v35  ;;  %v10525_v35 = vpack.c.bf16 %v6415_v8, %v6411_v24  ;;  %v11273_v6 = vpack.c.bf16 %v6417_v27, %v6413_v58  ;;  %v6446_v24 = vld [vmem:[%s21715_s12 + $0x2ba0] sm:$0xff]  ;;  %v6444_v8 = vld [vmem:[%s21715_s12 + $0x2b90] sm:$0xff]  ;;  %v6511_v38 = vld [vmem:[%s21715_s12 + $0x2da8] sm:$0xff] }
 0x865   :  { %v6448_v27 = vld [vmem:[%s21715_s12 + $0x2bb0] sm:$0xff]  ;;  %v10543_v7 = vpack.c.bf16 %v6446_v24, %v6442_v16  ;;  %v6489_v16 = vld [vmem:[%s21715_s12 + $0x2cf8] sm:$0xff] }
 0x866   :  { %10508 = vmatpush1.bf16.msra.mxu0 %v10507_v30  ;;  %v6419_v30 = vld [vmem:[%s21715_s12 + $0x2ac8] sm:$0xff]  ;;  %v11291_v48 = vpack.c.bf16 %v6448_v27, %v6444_v8  ;;  %v6482_v27 = vld [vmem:[%s21715_s12 + $0x2cc0] sm:$0xff] }
 0x867   :  { %11256 = vmatpush1.bf16.msra.mxu1 %v11255_v1  ;;  %10510 = vmatprep.subr.bf16.mxu0 %v10509_v56  ;;  %v6423_v1 = vld [vmem:[%s21715_s12 + $0x2ae8] sm:$0xff]  ;;  %v6421_v56 = vld [vmem:[%s21715_s12 + $0x2ad8] sm:$0xff] }
 0x868   :  { %11258 = vmatprep.subr.bf16.mxu1 %v11257_v45  ;;  %v10529_v45 = vpack.c.bf16 %v6423_v1, %v6419_v30  ;;  %v11277_v41 = vpack.c.bf16 %v6425_v19, %v6421_v56  ;;  %v6454_v30 = vld [vmem:[%s21715_s12 + $0x2be0] sm:$0xff]  ;;  %v6452_v1 = vld [vmem:[%s21715_s12 + $0x2bd0] sm:$0xff] }
 0x869   :  { %v6456_v19 = vld [vmem:[%s21715_s12 + $0x2bf0] sm:$0xff]  ;;  %v10547_v3 = vpack.c.bf16 %v6454_v30, %v6450_v12  ;;  %v6497_v12 = vld [vmem:[%s21715_s12 + $0x2d38] sm:$0xff] }
 0x86a   :  { %10512 = vmatpush1.bf16.msra.mxu0 %v10511_v2  ;;  %v6427_v2 = vld [vmem:[%s21715_s12 + $0x2b08] sm:$0xff]  ;;  %v11295_v10 = vpack.c.bf16 %v6456_v19, %v6452_v1  ;;  %v6490_v19 = vld [vmem:[%s21715_s12 + $0x2d00] sm:$0xff] }
 0x86b   :  { %11260 = vmatpush1.bf16.msra.mxu1 %v11259_v44  ;;  %10514 = vmatprep.subr.bf16.mxu0 %v10513_v28  ;;  %v6431_v44 = vld [vmem:[%s21715_s12 + $0x2b28] sm:$0xff]  ;;  %v6429_v28 = vld [vmem:[%s21715_s12 + $0x2b18] sm:$0xff] }
 0x86c   :  { %11262 = vmatprep.subr.bf16.mxu1 %v11261_v47  ;;  %v10533_v47 = vpack.c.bf16 %v6431_v44, %v6427_v2  ;;  %v11281_v54 = vpack.c.bf16 %v6433_v17, %v6429_v28  ;;  %v6462_v2 = vld [vmem:[%s21715_s12 + $0x2c20] sm:$0xff]  ;;  %v6460_v28 = vld [vmem:[%s21715_s12 + $0x2c10] sm:$0xff] }
 0x86d   :  { %v6464_v17 = vld [vmem:[%s21715_s12 + $0x2c30] sm:$0xff] }
 0x86e   :  { %10516 = vmatpush1.bf16.msra.mxu0 %v10515_v59  ;;  %v6435_v59 = vld [vmem:[%s21715_s12 + $0x2b48] sm:$0xff] }
 0x86f   :  { %11264 = vmatpush1.bf16.msra.mxu1 %v11263_v52  ;;  %10518 = vmatprep.subr.bf16.mxu0 %v10517_v5  ;;  %v6439_v52 = vld [vmem:[%s21715_s12 + $0x2b68] sm:$0xff]  ;;  %v6437_v5 = vld [vmem:[%s21715_s12 + $0x2b58] sm:$0xff] }
 0x870   :  { %11266 = vmatprep.subr.bf16.mxu1 %v11265_v60  ;;  %v10537_v60 = vpack.c.bf16 %v6439_v52, %v6435_v59  ;;  %v11285_v13 = vpack.c.bf16 %v6441_v37, %v6437_v5  ;;  %v6470_v59 = vld [vmem:[%s21715_s12 + $0x2c60] sm:$0xff]  ;;  %v6468_v52 = vld [vmem:[%s21715_s12 + $0x2c50] sm:$0xff] }
 0x871   :  { %v6472_v37 = vld [vmem:[%s21715_s12 + $0x2c70] sm:$0xff] }
 0x872   :  { %10520 = vmatpush1.bf16.msra.mxu0 %v10519_v31  ;;  %v6443_v31 = vld [vmem:[%s21715_s12 + $0x2b88] sm:$0xff]  ;;  %v11303_v33 = vpack.c.bf16 %v6472_v37, %v6468_v52  ;;  %v6506_v37 = vld [vmem:[%s21715_s12 + $0x2d80] sm:$0xff] }
 0x873   :  { %11268 = vmatpush1.bf16.msra.mxu1 %v11267_v46  ;;  %10522 = vmatprep.subr.bf16.mxu0 %v10521_v25  ;;  %v6447_v46 = vld [vmem:[%s21715_s12 + $0x2ba8] sm:$0xff]  ;;  %v6445_v25 = vld [vmem:[%s21715_s12 + $0x2b98] sm:$0xff] }
 0x874   :  { %11270 = vmatprep.subr.bf16.mxu1 %v11269_v43  ;;  %v10541_v43 = vpack.c.bf16 %v6447_v46, %v6443_v31  ;;  %v11289_v58 = vpack.c.bf16 %v6449_v55, %v6445_v25  ;;  %v6474_v46 = vld [vmem:[%s21715_s12 + $0x2c80] sm:$0xff]  ;;  %v6480_v55 = vld [vmem:[%s21715_s12 + $0x2cb0] sm:$0xff] }
 0x875   :  { %v6478_v25 = vld [vmem:[%s21715_s12 + $0x2ca0] sm:$0xff]  ;;  %v11307_v8 = vpack.c.bf16 %v6480_v55, %v6476_v51  ;;  %v6516_v55 = vld [vmem:[%s21715_s12 + $0x2dd0] sm:$0xff] }
 0x876   :  { %10524 = vmatpush1.bf16.msra.mxu0 %v10523_v32  ;;  %v6451_v32 = vld [vmem:[%s21715_s12 + $0x2bc8] sm:$0xff]  ;;  %v10559_v24 = vpack.c.bf16 %v6478_v25, %v6474_v46  ;;  %v6514_v51 = vld [vmem:[%s21715_s12 + $0x2dc0] sm:$0xff] }
 0x877   :  { %11272 = vmatpush1.bf16.msra.mxu1 %v11271_v40  ;;  %10526 = vmatprep.subr.bf16.mxu0 %v10525_v35  ;;  %v6455_v40 = vld [vmem:[%s21715_s12 + $0x2be8] sm:$0xff]  ;;  %v6453_v35 = vld [vmem:[%s21715_s12 + $0x2bd8] sm:$0xff] }
 0x878   :  { %11274 = vmatprep.subr.bf16.mxu1 %v11273_v6  ;;  %v10545_v6 = vpack.c.bf16 %v6455_v40, %v6451_v32  ;;  %v11293_v56 = vpack.c.bf16 %v6457_v50, %v6453_v35  ;;  %v6486_v32 = vld [vmem:[%s21715_s12 + $0x2ce0] sm:$0xff]  ;;  %v6484_v40 = vld [vmem:[%s21715_s12 + $0x2cd0] sm:$0xff] }
 0x879   :  { %v6488_v50 = vld [vmem:[%s21715_s12 + $0x2cf0] sm:$0xff]  ;;  %v10563_v30 = vpack.c.bf16 %v6486_v32, %v6482_v27 }
 0x87a   :  { %10528 = vmatpush1.bf16.msra.mxu0 %v10527_v4  ;;  %v6459_v4 = vld [vmem:[%s21715_s12 + $0x2c08] sm:$0xff]  ;;  %v11311_v1 = vpack.c.bf16 %v6488_v50, %v6484_v40  ;;  %v6522_v40 = vld [vmem:[%s21715_s12 + $0x2e00] sm:$0xff]  ;;  %v6524_v50 = vld [vmem:[%s21715_s12 + $0x2e10] sm:$0xff] }
 0x87b   :  { %11276 = vmatpush1.bf16.msra.mxu1 %v11275_v0  ;;  %10530 = vmatprep.subr.bf16.mxu0 %v10529_v45  ;;  %v6463_v0 = vld [vmem:[%s21715_s12 + $0x2c28] sm:$0xff]  ;;  %v6461_v45 = vld [vmem:[%s21715_s12 + $0x2c18] sm:$0xff] }
 0x87c   :  { %11278 = vmatprep.subr.bf16.mxu1 %v11277_v41  ;;  %v10549_v41 = vpack.c.bf16 %v6463_v0, %v6459_v4  ;;  %v11297_v44 = vpack.c.bf16 %v6465_v9, %v6461_v45  ;;  %v6494_v4 = vld [vmem:[%s21715_s12 + $0x2d20] sm:$0xff]  ;;  %v6492_v0 = vld [vmem:[%s21715_s12 + $0x2d10] sm:$0xff] }
 0x87d   :  { %v6496_v9 = vld [vmem:[%s21715_s12 + $0x2d30] sm:$0xff] }
 0x87e   :  { %10532 = vmatpush1.bf16.msra.mxu0 %v10531_v49  ;;  %v6467_v49 = vld [vmem:[%s21715_s12 + $0x2c48] sm:$0xff] }
 0x87f   :  { %11280 = vmatpush1.bf16.msra.mxu1 %v11279_v57  ;;  %10534 = vmatprep.subr.bf16.mxu0 %v10533_v47  ;;  %v6471_v57 = vld [vmem:[%s21715_s12 + $0x2c68] sm:$0xff]  ;;  %v10551_v47 = vpack.c.bf16 %v6462_v2, %v6458_v20  ;;  %v6505_v20 = vld [vmem:[%s21715_s12 + $0x2d78] sm:$0xff]  ;;  %v10567_v2 = vpack.c.bf16 %v6494_v4, %v6490_v19 }
 0x880   :  { %11282 = vmatprep.subr.bf16.mxu1 %v11281_v54  ;;  %v11299_v54 = vpack.c.bf16 %v6464_v17, %v6460_v28  ;;  %v10553_v5 = vpack.c.bf16 %v6471_v57, %v6467_v49  ;;  %v6498_v17 = vld [vmem:[%s21715_s12 + $0x2d40] sm:$0xff]  ;;  %v6500_v57 = vld [vmem:[%s21715_s12 + $0x2d50] sm:$0xff] }
 0x881   :  { %v6502_v49 = vld [vmem:[%s21715_s12 + $0x2d60] sm:$0xff] }
 0x882   :  { %10536 = vmatpush1.bf16.msra.mxu0 %v10535_v22  ;;  %v6475_v22 = vld [vmem:[%s21715_s12 + $0x2c88] sm:$0xff] }
 0x883   :  { %11284 = vmatpush1.bf16.msra.mxu1 %v11283_v21  ;;  %10538 = vmatprep.subr.bf16.mxu0 %v10537_v60  ;;  %v6479_v21 = vld [vmem:[%s21715_s12 + $0x2ca8] sm:$0xff]  ;;  %v11301_v60 = vpack.c.bf16 %v6473_v23, %v6469_v26  ;;  %v6504_v26 = vld [vmem:[%s21715_s12 + $0x2d70] sm:$0xff] }
 0x884   :  { %11286 = vmatprep.subr.bf16.mxu1 %v11285_v13  ;;  %v10555_v13 = vpack.c.bf16 %v6470_v59, %v6466_v36  ;;  %v10557_v31 = vpack.c.bf16 %v6479_v21, %v6475_v22  ;;  %v6507_v23 = vld [vmem:[%s21715_s12 + $0x2d88] sm:$0xff]  ;;  %v6513_v36 = vld [vmem:[%s21715_s12 + $0x2db8] sm:$0xff]  ;;  %v10571_v59 = vpack.c.bf16 %v6502_v49, %v6498_v17  ;;  %v11319_v52 = vpack.c.bf16 %v6504_v26, %v6500_v57  ;;  %v6510_v22 = vld [vmem:[%s21715_s12 + $0x2da0] sm:$0xff] }
 0x885   :  { %v6508_v21 = vld [vmem:[%s21715_s12 + $0x2d90] sm:$0xff]  ;;  %v6538_v57 = vld [vmem:[%s21715_s12 + $0x2e80] sm:$0xff] }
 0x886   :  { %10540 = vmatpush1.bf16.msra.mxu0 %v10539_v53  ;;  %v6483_v53 = vld [vmem:[%s21715_s12 + $0x2cc8] sm:$0xff] }
 0x887   :  { %11288 = vmatpush1.bf16.msra.mxu1 %v11287_v29  ;;  %10542 = vmatprep.subr.bf16.mxu0 %v10541_v43  ;;  %v6487_v29 = vld [vmem:[%s21715_s12 + $0x2ce8] sm:$0xff]  ;;  %v6485_v43 = vld [vmem:[%s21715_s12 + $0x2cd8] sm:$0xff] }
 0x888   :  { %11290 = vmatprep.subr.bf16.mxu1 %v11289_v58  ;;  %v10561_v58 = vpack.c.bf16 %v6487_v29, %v6483_v53  ;;  %v11309_v35 = vpack.c.bf16 %v6489_v16, %v6485_v43  ;;  %v6520_v29 = vld [vmem:[%s21715_s12 + $0x2df0] sm:$0xff]  ;;  %v6523_v43 = vld [vmem:[%s21715_s12 + $0x2e08] sm:$0xff] }
 0x889   :  { %v6527_v16 = vld [vmem:[%s21715_s12 + $0x2e28] sm:$0xff]  ;;  %v11327_v27 = vpack.c.bf16 %v6520_v29, %v6516_v55 }
 0x88a   :  { %10544 = vmatpush1.bf16.msra.mxu0 %v10543_v7  ;;  %v6491_v7 = vld [vmem:[%s21715_s12 + $0x2d08] sm:$0xff]  ;;  %v10581_v32 = vpack.c.bf16 %v6527_v16, %v6523_v43  ;;  %v4985_v43 = vld [vmem:[%s21718_s11 + $0x78] sm:$0xff] }
 0x88b   :  { %11292 = vmatpush1.bf16.msra.mxu1 %v11291_v48  ;;  %10546 = vmatprep.subr.bf16.mxu0 %v10545_v6  ;;  %v6495_v48 = vld [vmem:[%s21715_s12 + $0x2d28] sm:$0xff]  ;;  %v6493_v6 = vld [vmem:[%s21715_s12 + $0x2d18] sm:$0xff] }
 0x88c   :  { %11294 = vmatprep.subr.bf16.mxu1 %v11293_v56  ;;  %v10565_v56 = vpack.c.bf16 %v6495_v48, %v6491_v7  ;;  %v11313_v45 = vpack.c.bf16 %v6497_v12, %v6493_v6  ;;  %v6528_v48 = vld [vmem:[%s21715_s12 + $0x2e30] sm:$0xff]  ;;  %v6531_v6 = vld [vmem:[%s21715_s12 + $0x2e48] sm:$0xff] }
 0x88d   :  { %v6535_v12 = vld [vmem:[%s21715_s12 + $0x2e68] sm:$0xff]  ;;  %v11331_v19 = vpack.c.bf16 %v6528_v48, %v6524_v50  ;;  %v4989_v48 = vld [vmem:[%s21718_s11 + $0x98] sm:$0xff] }
 0x88e   :  { %10548 = vmatpush1.bf16.msra.mxu0 %v10547_v3  ;;  %v6499_v3 = vld [vmem:[%s21715_s12 + $0x2d48] sm:$0xff]  ;;  %v10585_v4 = vpack.c.bf16 %v6535_v12, %v6531_v6  ;;  %v4993_v6 = vld [vmem:[%s21718_s11 + $0xb8] sm:$0xff] }
 0x88f   :  { %11296 = vmatpush1.bf16.msra.mxu1 %v11295_v10  ;;  %10550 = vmatprep.subr.bf16.mxu0 %v10549_v41  ;;  %v6503_v10 = vld [vmem:[%s21715_s12 + $0x2d68] sm:$0xff]  ;;  %v6501_v41 = vld [vmem:[%s21715_s12 + $0x2d58] sm:$0xff] }
 0x890   :  { %11298 = vmatprep.subr.bf16.mxu1 %v11297_v44  ;;  %v11315_v44 = vpack.c.bf16 %v6496_v9, %v6492_v0  ;;  %v10569_v28 = vpack.c.bf16 %v6503_v10, %v6499_v3  ;;  %v6530_v0 = vld [vmem:[%s21715_s12 + $0x2e40] sm:$0xff]  ;;  %v6532_v9 = vld [vmem:[%s21715_s12 + $0x2e50] sm:$0xff]  ;;  %v4983_v55 = vld [vmem:[%s21718_s11 + $0x68] sm:$0xff] }
 0x891   :  { %7327 = vmatmul.mubr.f32.vlgmr.msra.gmra.mrb[98].mxu0 %v17677_v15  ;;  %v6536_v10 = vld [vmem:[%s21715_s12 + $0x2e70] sm:$0xff] }
 0x892   :  { %8179 = vmatmul.mubr.f32.vlgmr.msra.gmra.mrb[122].mxu1 %v17677_v15  ;;  %10552 = vmatpush1.bf16.msra.mxu0 %v10551_v47  ;;  %v11305_v15 = vpack.c.bf16 %v6481_v39, %v6477_v61  ;;  %v11317_v47 = vpack.c.bf16 %v6505_v20, %v6501_v41  ;;  %v6512_v61 = vld [vmem:[%s21715_s12 + $0x2db0] sm:$0xff]  ;;  %v6515_v39 = vld [vmem:[%s21715_s12 + $0x2dc8] sm:$0xff]  ;;  %v11335_v17 = vpack.c.bf16 %v6536_v10, %v6532_v9  ;;  %v5001_v10 = vld [vmem:[%s21718_s11 + $0xf8] sm:$0xff] }
 0x893   :  { %8753 = vmatprep.mubr.msk.f32.mxu0 %vm3575_vm2, %v4958_v18  ;;  %11300 = vmatpush1.bf16.msra.mxu1 %v11299_v54  ;;  %v6509_v54 = vld [vmem:[%s21715_s12 + $0x2d98] sm:$0xff]  ;;  %v11323_v46 = vpack.c.bf16 %v6512_v61, %v6508_v21  ;;  %v6539_v41 = vld [vmem:[%s21715_s12 + $0x2e88] sm:$0xff] }
 0x894   :  { %8754 = vmatprep.mubr.msk.f32.mxu1 %vm3575_vm2, %v4958_v18  ;;  %10554 = vmatprep.subr.bf16.mxu0 %v10553_v5  ;;  %v10573_v5 = vpack.c.bf16 %v6511_v38, %v6507_v23  ;;  %v6519_v18 = vld [vmem:[%s21715_s12 + $0x2de8] sm:$0xff]  ;;  %v6540_v23 = vld [vmem:[%s21715_s12 + $0x2e90] sm:$0xff]  ;;  %v4977_v61 = vld [vmem:[%s21718_s11 + $0x38] sm:$0xff] }
 0x895   :  { %11302 = vmatprep.subr.bf16.mxu1 %v11301_v60  ;;  %v11321_v60 = vpack.c.bf16 %v6513_v36, %v6509_v54  ;;  %v10577_v25 = vpack.c.bf16 %v6519_v18, %v6515_v39  ;;  %v6543_v20 = vld [vmem:[%s21715_s12 + $0x2ea8] sm:$0xff]  ;;  %v6544_v38 = vld [vmem:[%s21715_s12 + $0x2eb0] sm:$0xff]  ;;  %v21270_v54 = vld [vmem:[%s21717_s6] sm:$0x3] }
 0x896   :  { %10556 = vmatpush1.bf16.msra.mxu0 %v10555_v13  ;;  %v6517_v13 = vld [vmem:[%s21715_s12 + $0x2dd8] sm:$0xff]  ;;  %v10589_v49 = vpack.c.bf16 %v6543_v20, %v6539_v41  ;;  %v4975_v21 = vld [vmem:[%s21718_s11 + $0x28] sm:$0xff]  ;;  %v4970_v39 = vld [vmem:[%s21718_s11] sm:$0xff] }
 0x897   :  { %11304 = vmatpush1.bf16.msra.mxu1 %v11303_v33  ;;  %10558 = vmatprep.subr.bf16.mxu0 %v10557_v31  ;;  %v6521_v33 = vld [vmem:[%s21715_s12 + $0x2df8] sm:$0xff]  ;;  %v10575_v31 = vpack.c.bf16 %v6510_v22, %v6506_v37  ;;  %v4971_v22 = vld [vmem:[%s21718_s11 + $0x8] sm:$0xff]  ;;  %v4974_v18 = vld [vmem:[%s21718_s11 + $0x20] sm:$0xff] }
 0x898   :  { %11306 = vmatprep.subr.bf16.mxu1 %v11305_v15  ;;  %v6518_v15 = vld [vmem:[%s21715_s12 + $0x2de0] sm:$0xff]  ;;  %v11325_v53 = vpack.c.bf16 %v6521_v33, %v6517_v13  ;;  %v6549_v37 = vld [vmem:[%s21715_s12 + $0x2ed8] sm:$0xff]  ;;  %v4972_v33 = vld [vmem:[%s21718_s11 + $0x10] sm:$0xff]  ;;  %v11343_v29 = vpack.c.bf16 %v4974_v18, %v4970_v39 }
 0x899   :  { %v6546_v13 = vld [vmem:[%s21715_s12 + $0x2ec0] sm:$0xff]  ;;  %v4999_v9 = vld [vmem:[%s21718_s11 + $0xe8] sm:$0xff]  ;;  %v5013_v18 = vld [vmem:[%s21718_s11 + $0x158] sm:$0xff] }
 0x89a   :  { %10560 = vmatpush1.bf16.msra.mxu0 %v10559_v24  ;;  %v6525_v24 = vld [vmem:[%s21715_s12 + $0x2e18] sm:$0xff]  ;;  %v5015_v39 = vld [vmem:[%s21718_s11 + $0x168] sm:$0xff] }
 0x89b   :  { %11308 = vmatpush1.bf16.msra.mxu1 %v11307_v8  ;;  %10562 = vmatprep.subr.bf16.mxu0 %v10561_v58  ;;  %v6529_v8 = vld [vmem:[%s21715_s12 + $0x2e38] sm:$0xff]  ;;  %v10579_v58 = vpack.c.bf16 %v6518_v15, %v6514_v51  ;;  %v11341_v51 = vpack.c.bf16 %v4975_v21, %v4971_v22  ;;  %v4979_v15 = vld [vmem:[%s21718_s11 + $0x48] sm:$0xff]  ;;  %v5004_v22 = vld [vmem:[%s21718_s11 + $0x110] sm:$0xff] }
 0x89c   :  { %11310 = vmatprep.subr.bf16.mxu1 %v11309_v35  ;;  %v6526_v35 = vld [vmem:[%s21715_s12 + $0x2e20] sm:$0xff]  ;;  %v11329_v7 = vpack.c.bf16 %v6529_v8, %v6525_v24 }
 0x89d   :  { %v4978_v24 = vld [vmem:[%s21718_s11 + $0x40] sm:$0xff] }
 0x89e   :  { %10564 = vmatpush1.bf16.msra.mxu0 %v10563_v30  ;;  %v6533_v30 = vld [vmem:[%s21715_s12 + $0x2e58] sm:$0xff]  ;;  %v4982_v8 = vld [vmem:[%s21718_s11 + $0x60] sm:$0xff] }
 0x89f   :  { %11312 = vmatpush1.bf16.msra.mxu1 %v11311_v1  ;;  %10566 = vmatprep.subr.bf16.mxu0 %v10565_v56  ;;  %v6537_v1 = vld [vmem:[%s21715_s12 + $0x2e78] sm:$0xff]  ;;  %v10583_v56 = vpack.c.bf16 %v6526_v35, %v6522_v40  ;;  %v4987_v40 = vld [vmem:[%s21718_s11 + $0x88] sm:$0xff]  ;;  %v11347_v12 = vpack.c.bf16 %v4982_v8, %v4978_v24 }
 0x8a0   :  { %11314 = vmatprep.subr.bf16.mxu1 %v11313_v45  ;;  %v6534_v45 = vld [vmem:[%s21715_s12 + $0x2e60] sm:$0xff]  ;;  %v11333_v3 = vpack.c.bf16 %v6537_v1, %v6533_v30  ;;  %v4991_v35 = vld [vmem:[%s21718_s11 + $0xa8] sm:$0xff] }
 0x8a1   :  { %v11349_v1 = vpack.c.bf16 %v4991_v35, %v4987_v40  ;;  %v5020_v40 = vld [vmem:[%s21718_s11 + $0x190] sm:$0xff] }
 0x8a2   :  { %10568 = vmatpush1.bf16.msra.mxu0 %v10567_v2  ;;  %v6541_v2 = vld [vmem:[%s21715_s12 + $0x2e98] sm:$0xff] }
 0x8a3   :  { %11316 = vmatpush1.bf16.msra.mxu1 %v11315_v44  ;;  %10570 = vmatprep.subr.bf16.mxu0 %v10569_v28  ;;  %v6545_v44 = vld [vmem:[%s21715_s12 + $0x2eb8] sm:$0xff]  ;;  %v10587_v28 = vpack.c.bf16 %v6534_v45, %v6530_v0  ;;  %v4992_v0 = vld [vmem:[%s21718_s11 + $0xb0] sm:$0xff]  ;;  %v4995_v45 = vld [vmem:[%s21718_s11 + $0xc8] sm:$0xff] }
 0x8a4   :  { %11318 = vmatprep.subr.bf16.mxu1 %v11317_v47  ;;  %v6542_v47 = vld [vmem:[%s21715_s12 + $0x2ea0] sm:$0xff]  ;;  %v11337_v26 = vpack.c.bf16 %v6545_v44, %v6541_v2  ;;  %v11353_v2 = vpack.c.bf16 %v4999_v9, %v4995_v45  ;;  %v5032_v45 = vld [vmem:[%s21718_s11 + $0x1f0] sm:$0xff]  ;;  %v5035_v9 = vld [vmem:[%s21718_s11 + $0x208] sm:$0xff] }
 0x8a5   :  { %v10591_v36 = vpack.c.bf16 %v6542_v47, %v6538_v57  ;;  %v4994_v44 = vld [vmem:[%s21718_s11 + $0xc0] sm:$0xff]  ;;  %v5000_v57 = vld [vmem:[%s21718_s11 + $0xf0] sm:$0xff]  ;;  %v5003_v47 = vld [vmem:[%s21718_s11 + $0x108] sm:$0xff] }
 0x8a6   :  { %10572 = vmatpush1.bf16.msra.mxu0 %v10571_v59  ;;  %v11339_v59 = vpack.c.bf16 %v6544_v38, %v6540_v23  ;;  %v5005_v23 = vld [vmem:[%s21718_s11 + $0x118] sm:$0xff] }
 0x8a7   :  { %11320 = vmatpush1.bf16.msra.mxu1 %v11319_v52  ;;  %10574 = vmatprep.subr.bf16.mxu0 %v10573_v5  ;;  %v778_v52 = vrot.slane %v21270_v54, %v22024_v63  ;;  %v6547_v5 = vld [vmem:[%s21715_s12 + $0x2ec8] sm:$0xff]  ;;  %v5009_v38 = vld [vmem:[%s21718_s11 + $0x138] sm:$0xff] }
 0x8a8   :  { %11322 = vmatprep.subr.bf16.mxu1 %v11321_v60  ;;  %v4973_v60 = vld [vmem:[%s21718_s11 + $0x18] sm:$0xff]  ;;  %v11397_v21 = vpack.c.bf16 %v5009_v38, %v5005_v23  ;;  %v5047_v23 = vld [vmem:[%s21718_s11 + $0x268] sm:$0xff] }
 0x8a9   :  { %v5045_v38 = vld [vmem:[%s21718_s11 + $0x258] sm:$0xff] }
 0x8aa   :  { %10576 = vmatpush1.bf16.msra.mxu0 %v10575_v31  ;;  %v4976_v31 = vld [vmem:[%s21718_s11 + $0x30] sm:$0xff] }
 0x8ab   :  { %11324 = vmatpush1.bf16.msra.mxu1 %v11323_v46  ;;  %10578 = vmatprep.subr.bf16.mxu0 %v10577_v25  ;;  %v11481_v46 = vadd.f32 %v16346_v62, %v778_v52  ;;  %v6548_v25 = vld [vmem:[%s21715_s12 + $0x2ed0] sm:$0xff]  ;;  %v4981_v62 = vld [vmem:[%s21718_s11 + $0x58] sm:$0xff]  ;;  %v11383_v16 = vpack.c.bf16 %v4976_v31, %v4972_v33 }
 0x8ac   :  { %11326 = vmatprep.subr.bf16.mxu1 %v11325_v53  ;;  %v11381_v53 = vpack.c.bf16 %v4977_v61, %v4973_v60  ;;  %v5008_v60 = vld [vmem:[%s21718_s11 + $0x130] sm:$0xff]  ;;  %v5011_v61 = vld [vmem:[%s21718_s11 + $0x148] sm:$0xff] }
 0x8ad   :  { %v1069_v50 = vmax.f32 %v11481_v46, 0.0  ;;  %v11399_v31 = vpack.c.bf16 %v5008_v60, %v5004_v22  ;;  %v11361_v46 = vpack.c.bf16 %v5015_v39, %v5011_v61  ;;  %v5042_v22 = vld [vmem:[%s21718_s11 + $0x240] sm:$0xff]  ;;  %v5044_v60 = vld [vmem:[%s21718_s11 + $0x250] sm:$0xff] }
 0x8ae   :  { %10580 = vmatpush1.bf16.msra.mxu0 %v10579_v58  ;;  %v4980_v58 = vld [vmem:[%s21718_s11 + $0x50] sm:$0xff]  ;;  %v8447_v39 = vld [vmem:[%s21719_s14 + $0x80] sm:$0xff] }
 0x8af   :  { %11328 = vmatpush1.bf16.msra.mxu1 %v11327_v27  ;;  %10582 = vmatprep.subr.bf16.mxu0 %v10581_v32  ;;  %v11345_v27 = vpack.c.bf16 %v4983_v55, %v4979_v15  ;;  %v4984_v32 = vld [vmem:[%s21718_s11 + $0x70] sm:$0xff] }
 0x8b0   :  { %11330 = vmatprep.subr.bf16.mxu1 %v11329_v7  ;;  %v11385_v7 = vpack.c.bf16 %v4985_v43, %v4981_v62  ;;  %v11387_v30 = vpack.c.bf16 %v4984_v32, %v4980_v58  ;;  %v5012_v15 = vld [vmem:[%s21718_s11 + $0x150] sm:$0xff]  ;;  %v5023_v62 = vld [vmem:[%s21718_s11 + $0x1a8] sm:$0xff]  ;;  %v5021_v43 = vld [vmem:[%s21718_s11 + $0x198] sm:$0xff] }
 0x8b1   :  { %v5022_v32 = vld [vmem:[%s21718_s11 + $0x1a0] sm:$0xff] }
 0x8b2   :  { %10584 = vmatpush1.bf16.msra.mxu0 %v10583_v56  ;;  %v4990_v56 = vld [vmem:[%s21718_s11 + $0xa0] sm:$0xff] }
 0x8b3   :  { %11332 = vmatpush1.bf16.msra.mxu1 %v11331_v19  ;;  %10586 = vmatprep.subr.bf16.mxu0 %v10585_v4  ;;  %v4988_v19 = vld [vmem:[%s21718_s11 + $0x90] sm:$0xff]  ;;  %v11389_v4 = vpack.c.bf16 %v4993_v6, %v4989_v48  ;;  %v5031_v48 = vld [vmem:[%s21718_s11 + $0x1e8] sm:$0xff]  ;;  %v5029_v6 = vld [vmem:[%s21718_s11 + $0x1d8] sm:$0xff] }
 0x8b4   :  { %11334 = vmatprep.subr.bf16.mxu1 %v11333_v3  ;;  %v4997_v3 = vld [vmem:[%s21718_s11 + $0xd8] sm:$0xff]  ;;  %v11391_v20 = vpack.c.bf16 %v4992_v0, %v4988_v19  ;;  %v5030_v19 = vld [vmem:[%s21718_s11 + $0x1e0] sm:$0xff] }
 0x8b6   :  { %10588 = vmatpush1.bf16.msra.mxu0 %v10587_v28  ;;  %v4998_v28 = vld [vmem:[%s21718_s11 + $0xe0] sm:$0xff] }
 0x8b7   :  { %11336 = vmatpush1.bf16.msra.mxu1 %v11335_v17  ;;  %10590 = vmatprep.subr.bf16.mxu0 %v10589_v49  ;;  %v4996_v17 = vld [vmem:[%s21718_s11 + $0xd0] sm:$0xff]  ;;  %v11393_v49 = vpack.c.bf16 %v5001_v10, %v4997_v3  ;;  %v5039_v3 = vld [vmem:[%s21718_s11 + $0x228] sm:$0xff]  ;;  %v5037_v10 = vld [vmem:[%s21718_s11 + $0x218] sm:$0xff] }
 0x8b8   :  { %11338 = vmatprep.subr.bf16.mxu1 %v11337_v26  ;;  %v5007_v26 = vld [vmem:[%s21718_s11 + $0x128] sm:$0xff] }
 0x8b9   :  { %v11357_v52 = vpack.c.bf16 %v5007_v26, %v5003_v47  ;;  %v5040_v47 = vld [vmem:[%s21718_s11 + $0x230] sm:$0xff]  ;;  %v5043_v26 = vld [vmem:[%s21718_s11 + $0x248] sm:$0xff] }
 0x8ba   :  { %10592 = vmatpush1.bf16.msra.mxu0 %v10591_v36  ;;  %v11355_v36 = vpack.c.bf16 %v4998_v28, %v4994_v44  ;;  %v11373_v44 = vpack.c.bf16 %v5039_v3, %v5035_v9  ;;  %v5034_v28 = vld [vmem:[%s21718_s11 + $0x200] sm:$0xff]  ;;  %v8441_v3 = vld [vmem:[%s21719_s14 + $0x50] sm:$0xff] }
 0x8bb   :  { %11340 = vmatpush1.bf16.msra.mxu1 %v11339_v59  ;;  %7377 = vmatprep.subr.mxu0 %v6547_v5  ;;  %v11395_v59 = vpack.c.bf16 %v5000_v57, %v4996_v17  ;;  %v5002_v5 = vld [vmem:[%s21718_s11 + $0x100] sm:$0xff] }
 0x8bc   :  { %8229 = vmatprep.subr.mxu1 %v6549_v37  ;;  %v5006_v37 = vld [vmem:[%s21718_s11 + $0x120] sm:$0xff] }
 0x8bd   :  { %v11359_v33 = vpack.c.bf16 %v5006_v37, %v5002_v5  ;;  %v5038_v17 = vld [vmem:[%s21718_s11 + $0x220] sm:$0xff]  ;;  %v11377_v37 = vpack.c.bf16 %v5047_v23, %v5043_v26  ;;  %v8445_v23 = vld [vmem:[%s21719_s14 + $0x70] sm:$0xff] }
 0x8be   :  { %7378 = vmatpush1.msra.mxu0 %v6546_v13  ;;  %v5017_v13 = vld [vmem:[%s21718_s11 + $0x178] sm:$0xff] }
 0x8bf   :  { %8230 = vmatpush1.msra.mxu1 %v6548_v25  ;;  %7398 = vmatmul.mubr.f32.vlgmr.msra.gmra.mrb[98].mxu0 %v17695_v14  ;;  %v5010_v25 = vld [vmem:[%s21718_s11 + $0x140] sm:$0xff]  ;;  %v11401_v55 = vpack.c.bf16 %v5017_v13, %v5013_v18  ;;  %v8448_v18 = vld [vmem:[%s21719_s14 + $0x88] sm:$0xff] }
 0x8c0   :  { %8250 = vmatmul.mubr.f32.vlgmr.msra.gmra.mrb[122].mxu1 %v17695_v14  ;;  %11342 = vmatprep.subr.bf16.mxu0 %v11341_v51  ;;  %v4986_v14 = vld [vmem:[%s21718_s11 + $0x80] sm:$0xff] }
 0x8c1   :  { %11382 = vmatprep.subr.bf16.mxu1 %v11381_v53  ;;  %11344 = vmatpush1.bf16.msra.mxu0 %v11343_v29  ;;  %v11351_v41 = vpack.c.bf16 %v4990_v56, %v4986_v14  ;;  %v5014_v51 = vld [vmem:[%s21718_s11 + $0x160] sm:$0xff]  ;;  %v5016_v53 = vld [vmem:[%s21718_s11 + $0x170] sm:$0xff]  ;;  %v5019_v29 = vld [vmem:[%s21718_s11 + $0x188] sm:$0xff] }
 0x8c2   :  { %8755 = vmatprep.mubr.msk.f32.mxu0 %vm420_vm12, %v1069_v50  ;;  %11384 = vmatpush1.bf16.msra.mxu1 %v11383_v16  ;;  %v5025_v16 = vld [vmem:[%s21718_s11 + $0x1b8] sm:$0xff]  ;;  %v11363_v24 = vpack.c.bf16 %v5014_v51, %v5010_v25  ;;  %v11403_v8 = vpack.c.bf16 %v5016_v53, %v5012_v15  ;;  %v11365_v58 = vpack.c.bf16 %v5023_v62, %v5019_v29  ;;  %v5026_v56 = vld [vmem:[%s21718_s11 + $0x1c0] sm:$0xff]  ;;  %v8432_v51 = vld [vmem:[%s21719_s14 + $0x8] sm:$0xff] }
 0x8c3   :  { %8756 = vmatprep.mubr.msk.f32.mxu1 %vm420_vm12, %v1069_v50  ;;  %11346 = vmatprep.subr.bf16.mxu0 %v11345_v27  ;;  %v5018_v27 = vld [vmem:[%s21718_s11 + $0x180] sm:$0xff]  ;;  %v11405_v35 = vpack.c.bf16 %v5025_v16, %v5021_v43  ;;  %v5024_v50 = vld [vmem:[%s21718_s11 + $0x1b0] sm:$0xff]  ;;  %v8434_v43 = vld [vmem:[%s21719_s14 + $0x18] sm:$0xff] }
 0x8c4   :  { %11386 = vmatprep.subr.bf16.mxu1 %v11385_v7  ;;  %v5027_v7 = vld [vmem:[%s21718_s11 + $0x1c8] sm:$0xff]  ;;  %v8431_v25 = vld [vmem:[%s21719_s14] sm:$0xff]  ;;  %v8449_v15 = vld [vmem:[%s21719_s14 + $0x90] sm:$0xff] }
 0x8c5   :  { %11348 = vmatpush1.bf16.msra.mxu0 %v11347_v12  ;;  %v5033_v12 = vld [vmem:[%s21718_s11 + $0x1f8] sm:$0xff]  ;;  %v11369_v14 = vpack.c.bf16 %v5031_v48, %v5027_v7  ;;  %v8433_v62 = vld [vmem:[%s21719_s14 + $0x10] sm:$0xff]  ;;  %v8451_v16 = vld [vmem:[%s21719_s14 + $0xa0] sm:$0xff] }
 0x8c6   :  { %11388 = vmatpush1.bf16.msra.mxu1 %v11387_v30  ;;  %11350 = vmatprep.subr.bf16.mxu0 %v11349_v1  ;;  %v11367_v30 = vpack.c.bf16 %v5022_v32, %v5018_v27  ;;  %v11407_v1 = vpack.c.bf16 %v5024_v50, %v5020_v40  ;;  %v11409_v0 = vpack.c.bf16 %v5033_v12, %v5029_v6  ;;  %v8435_v27 = vld [vmem:[%s21719_s14 + $0x20] sm:$0xff]  ;;  %v8436_v32 = vld [vmem:[%s21719_s14 + $0x28] sm:$0xff]  ;;  %v8453_v40 = vld [vmem:[%s21719_s14 + $0xb0] sm:$0xff] }
 0x8c7   :  { %11390 = vmatprep.subr.bf16.mxu1 %v11389_v4  ;;  %v5028_v4 = vld [vmem:[%s21718_s11 + $0x1d0] sm:$0xff]  ;;  %v11431_v50 = vpack.c.bf16 %v8436_v32, %v8435_v27  ;;  %v8438_v6 = vld [vmem:[%s21719_s14 + $0x38] sm:$0xff]  ;;  %v8455_v12 = vld [vmem:[%s21719_s14 + $0xc0] sm:$0xff] }
 0x8c8   :  { %v8437_v48 = vld [vmem:[%s21719_s14 + $0x30] sm:$0xff] }
 0x8c9   :  { %11352 = vmatpush1.bf16.msra.mxu0 %v11351_v41  ;;  %v5041_v41 = vld [vmem:[%s21718_s11 + $0x238] sm:$0xff]  ;;  %v8473_v32 = vld [vmem:[%s21719_s14 + $0x150] sm:$0xff] }
 0x8ca   :  { %11392 = vmatpush1.bf16.msra.mxu1 %v11391_v20  ;;  %11354 = vmatprep.subr.bf16.mxu0 %v11353_v2  ;;  %v11371_v20 = vpack.c.bf16 %v5030_v19, %v5026_v56  ;;  %v11411_v2 = vpack.c.bf16 %v5032_v45, %v5028_v4  ;;  %v11413_v57 = vpack.c.bf16 %v5041_v41, %v5037_v10  ;;  %v8439_v56 = vld [vmem:[%s21719_s14 + $0x40] sm:$0xff]  ;;  %v8440_v19 = vld [vmem:[%s21719_s14 + $0x48] sm:$0xff]  ;;  %v8457_v4 = vld [vmem:[%s21719_s14 + $0xd0] sm:$0xff] }
 0x8cb   :  { %11394 = vmatprep.subr.bf16.mxu1 %v11393_v49  ;;  %v5036_v49 = vld [vmem:[%s21718_s11 + $0x210] sm:$0xff]  ;;  %v11439_v45 = vpack.c.bf16 %v8440_v19, %v8439_v56  ;;  %v8442_v10 = vld [vmem:[%s21719_s14 + $0x58] sm:$0xff]  ;;  %v8459_v41 = vld [vmem:[%s21719_s14 + $0xe0] sm:$0xff] }
 0x8cc   :  { %v11415_v5 = vpack.c.bf16 %v5040_v47, %v5036_v49  ;;  %v8462_v47 = vld [vmem:[%s21719_s14 + $0xf8] sm:$0xff]  ;;  %v8480_v56 = vld [vmem:[%s21719_s14 + $0x188] sm:$0xff] }
 0x8cd   :  { %11356 = vmatpush1.bf16.msra.mxu0 %v11355_v36  ;;  %v5049_v36 = vld [vmem:[%s21718_s11 + $0x278] sm:$0xff] }
 0x8ce   :  { %11396 = vmatpush1.bf16.msra.mxu1 %v11395_v59  ;;  %11358 = vmatprep.subr.bf16.mxu0 %v11357_v52  ;;  %v11375_v59 = vpack.c.bf16 %v5038_v17, %v5034_v28  ;;  %v774_v52 = vrot.slane %v21270_v54, %v22023_v11  ;;  %v11417_v61 = vpack.c.bf16 %v5049_v36, %v5045_v38  ;;  %v5048_v54 = vld [vmem:[%s21718_s11 + $0x270] sm:$0xff]  ;;  %v8443_v28 = vld [vmem:[%s21719_s14 + $0x60] sm:$0xff]  ;;  %v8444_v17 = vld [vmem:[%s21719_s14 + $0x68] sm:$0xff] }
 0x8cf   :  { %11398 = vmatprep.subr.bf16.mxu1 %v11397_v21  ;;  %v5046_v21 = vld [vmem:[%s21718_s11 + $0x260] sm:$0xff]  ;;  %v11447_v49 = vpack.c.bf16 %v8444_v17, %v8443_v28  ;;  %v8446_v38 = vld [vmem:[%s21719_s14 + $0x78] sm:$0xff] }
 0x8d0   :  { %v11379_v13 = vpack.c.bf16 %v5046_v21, %v5042_v22  ;;  %v11451_v36 = vpack.c.bf16 %v8446_v38, %v8445_v23  ;;  %v22026_v22 = vld [vmem:[#allocation30_spill] sm:$0xff] }
 0x8d1   :  { %11360 = vmatpush1.bf16.msra.mxu0 %v11359_v33  ;;  %v11480_v33 = vadd.f32 %v16344_v34, %v774_v52  ;;  %v8450_v34 = vld [vmem:[%s21719_s14 + $0x98] sm:$0xff]  ;;  %v8401_v52 = vld [vmem:[%s21720_s13] sm:$0xf] }
 0x8d2   :  { %11400 = vmatpush1.bf16.msra.mxu1 %v11399_v31  ;;  %11362 = vmatprep.subr.bf16.mxu0 %v11361_v46  ;;  %v11419_v31 = vpack.c.bf16 %v5048_v54, %v5044_v60  ;;  %v11421_v46 = vpack.c.bf16 %v8448_v18, %v8447_v39  ;;  %v11425_v29 = vpack.c.bf16 %v8450_v34, %v8449_v15  ;;  %v8463_v18 = vld [vmem:[%s21719_s14 + $0x100] sm:$0xff]  ;;  %v8466_v15 = vld [vmem:[%s21719_s14 + $0x118] sm:$0xff] }
 0x8d3   :  { %11402 = vmatprep.subr.bf16.mxu1 %v11401_v55  ;;  %v11423_v55 = vpack.c.bf16 %v8432_v51, %v8431_v25  ;;  %v1068_v53 = vmax.f32 %v11480_v33, 0.0  ;;  %v8418_v21 = vrot.slane %v8401_v52, %v22026_v22  ;;  %v8465_v51 = vld [vmem:[%s21719_s14 + $0x110] sm:$0xff] }
 0x8d5   :  { %11364 = vmatpush1.bf16.msra.mxu0 %v11363_v24  ;;  %v8452_v24 = vld [vmem:[%s21719_s14 + $0xa8] sm:$0xff] }
 0x8d6   :  { %11404 = vmatpush1.bf16.msra.mxu1 %v11403_v8  ;;  %11366 = vmatprep.subr.bf16.mxu0 %v11365_v58  ;;  %v11427_v8 = vpack.c.bf16 %v8434_v43, %v8433_v62  ;;  %v11429_v58 = vpack.c.bf16 %v8452_v24, %v8451_v16  ;;  %v8469_v43 = vld [vmem:[%s21719_s14 + $0x130] sm:$0xff]  ;;  %v8470_v16 = vld [vmem:[%s21719_s14 + $0x138] sm:$0xff] }
 0x8d7   :  { %11406 = vmatprep.subr.bf16.mxu1 %v11405_v35  ;;  %v8454_v35 = vld [vmem:[%s21719_s14 + $0xb8] sm:$0xff]  ;;  %v11463_v24 = vpack.c.bf16 %v8470_v16, %v8469_v43 }
 0x8d8   :  { %v11433_v7 = vpack.c.bf16 %v8454_v35, %v8453_v40  ;;  %v8474_v40 = vld [vmem:[%s21719_s14 + $0x158] sm:$0xff] }
 0x8d9   :  { %11368 = vmatpush1.bf16.msra.mxu0 %v11367_v30  ;;  %v8456_v30 = vld [vmem:[%s21719_s14 + $0xc8] sm:$0xff]  ;;  %v11469_v35 = vpack.c.bf16 %v8474_v40, %v8473_v32 }
 0x8da   :  { %11408 = vmatpush1.bf16.msra.mxu1 %v11407_v1  ;;  %11370 = vmatprep.subr.bf16.mxu0 %v11369_v14  ;;  %v11435_v1 = vpack.c.bf16 %v8438_v6, %v8437_v48  ;;  %v11437_v14 = vpack.c.bf16 %v8456_v30, %v8455_v12  ;;  %v8477_v6 = vld [vmem:[%s21719_s14 + $0x170] sm:$0xff]  ;;  %v8478_v12 = vld [vmem:[%s21719_s14 + $0x178] sm:$0xff] }
 0x8db   :  { %11410 = vmatprep.subr.bf16.mxu1 %v11409_v0  ;;  %v8458_v0 = vld [vmem:[%s21719_s14 + $0xd8] sm:$0xff]  ;;  %v11475_v30 = vpack.c.bf16 %v8478_v12, %v8477_v6 }
 0x8dc   :  { %v11441_v9 = vpack.c.bf16 %v8458_v0, %v8457_v4 }
 0x8dd   :  { %11372 = vmatpush1.bf16.msra.mxu0 %v11371_v20  ;;  %v8460_v20 = vld [vmem:[%s21719_s14 + $0xe8] sm:$0xff] }
 0x8de   :  { %11412 = vmatpush1.bf16.msra.mxu1 %v11411_v2  ;;  %11374 = vmatprep.subr.bf16.mxu0 %v11373_v44  ;;  %v11443_v2 = vpack.c.bf16 %v8442_v10, %v8441_v3  ;;  %v11445_v44 = vpack.c.bf16 %v8460_v20, %v8459_v41  ;;  %v8757_v3 = vld [vmem:[%s21721_s15] ss:$0 sm:$0xff] }
 0x8df   :  { %11414 = vmatprep.subr.bf16.mxu1 %v11413_v57  ;;  %v8461_v57 = vld [vmem:[%s21719_s14 + $0xf0] sm:$0xff] }
 0x8e0   :  { %v11449_v26 = vpack.c.bf16 %v8462_v47, %v8461_v57 }
 0x8e1   :  { %11376 = vmatpush1.bf16.msra.mxu0 %v11375_v59  ;;  %v22025_v59 = vmov 0.0|0.0  }
 0x8e2   :  { %11416 = vmatpush1.bf16.msra.mxu1 %v11415_v5  ;;  %11378 = vmatprep.subr.bf16.mxu0 %v11377_v37  ;;  %v8406_v5 = vrot.slane %v8401_v52, %v22023_v11  ;;  %v8410_v37 = vrot.slane %v8401_v52, %v22024_v63 }
 0x8e3   :  { %11418 = vmatprep.subr.bf16.mxu1 %v11417_v61 }
 0x8e5   :  { %11380 = vmatpush1.bf16.msra.mxu0 %v11379_v13  ;;  %v8464_v13 = vld [vmem:[%s21719_s14 + $0x108] sm:$0xff] }
 0x8e6   :  { %11420 = vmatpush1.bf16.msra.mxu1 %v11419_v31  ;;  %11422 = vmatprep.subr.bf16.mxu0 %v11421_v46  ;;  %v11454_v25 = vpack.c.bf16 %v8464_v13, %v8463_v18 }
 0x8e8   :  { %8324 = vmatmul.mubr.f32.vlgmr.msra.gmra.mrb[98].mxu0 %v1068_v53 }
 0x8e9   :  { %8395 = vmatmul.mubr.f32.vlgmr.msra.gmra.mrb[122].mxu1 %v1068_v53  ;;  %11424 = vmatpush3.bf16.msra.mxu0 %v11423_v55  ;;  %v11457_v55 = vpack.c.bf16 %v8466_v15, %v8465_v51  ;;  %v8467_v53 = vld [vmem:[%s21719_s14 + $0x120] sm:$0xff] }
 0x8ea   :  { %11426 = vmatprep.subr.bf16.mxu0 %v11425_v29  ;;  %v8468_v29 = vld [vmem:[%s21719_s14 + $0x128] sm:$0xff] }
 0x8eb   :  { %v11460_v62 = vpack.c.bf16 %v8468_v29, %v8467_v53 }
 0x8ed   :  { %11428 = vmatpush3.bf16.msra.mxu0 %v11427_v8  ;;  %v8471_v8 = vld [vmem:[%s21719_s14 + $0x140] sm:$0xff] }
 0x8ee   :  { %11430 = vmatprep.subr.bf16.mxu0 %v11429_v58  ;;  %v8472_v58 = vld [vmem:[%s21719_s14 + $0x148] sm:$0xff] }
 0x8ef   :  { %v11466_v27 = vpack.c.bf16 %v8472_v58, %v8471_v8 }
 0x8f1   :  { %11432 = vmatpush3.bf16.msra.mxu0 %v11431_v50  ;;  %v8475_v50 = vld [vmem:[%s21719_s14 + $0x160] sm:$0xff] }
 0x8f2   :  { %11434 = vmatprep.subr.bf16.mxu0 %v11433_v7  ;;  %v8476_v7 = vld [vmem:[%s21719_s14 + $0x168] sm:$0xff] }
 0x8f3   :  { %v11472_v48 = vpack.c.bf16 %v8476_v7, %v8475_v50 }
 0x8f5   :  { %11436 = vmatpush3.bf16.msra.mxu0 %v11435_v1  ;;  %v8414_v1 = vrot.slane %v8401_v52, %v22022_v42 }
 0x8f6   :  { %11438 = vmatprep.subr.bf16.mxu0 %v11437_v14  ;;  %v8479_v14 = vld [vmem:[%s21719_s14 + $0x180] sm:$0xff] }
 0x8f7   :  { %v11478_v19 = vpack.c.bf16 %v8480_v56, %v8479_v14 }
 0x8f9   :  { %11440 = vmatpush3.bf16.msra.mxu0 %v11439_v45 }
 0x8fa   :  { %11442 = vmatprep.subr.bf16.mxu0 %v11441_v9 }
 0x8fd   :  { %11444 = vmatpush3.bf16.msra.mxu0 %v11443_v2 }
 0x8fe   :  { %11446 = vmatprep.subr.bf16.mxu0 %v11445_v44 }
 0x901   :  { %11448 = vmatpush3.bf16.msra.mxu0 %v11447_v49 }
 0x902   :  { %11450 = vmatprep.subr.bf16.mxu0 %v11449_v26 }
 0x905   :  { %11452 = vmatpush3.bf16.msra.mxu0 %v11451_v36 }
 0x906   :  { %11453 = vmatprep.subr.bf16.mxu0 %v22025_v59 }
 0x9bb   :  { %v8325_v60 = vpop.f32.mrb[98].mxu0 }
 0x9bc   :  { %v8423_v61 = vadd.f32 %v8406_v5, %v8325_v60  ;;  %v8396_v54 = vpop.f32.mrb[122].mxu1  ;;  %v8327_v39 = vpop.f32.mrb[99].mxu0 }
 0x9bd   :  { %v8424_v33 = vadd.f32 %v8410_v37, %v8327_v39  ;;  %v8398_v31 = vpop.f32.mrb[123].mxu1  ;;  %v8425_v4 = vadd.f32 %v8414_v1, %v8396_v54 }
 0x9be   :  { %v8426_v46 = vadd.f32 %v8418_v21, %v8398_v31  ;;  %v8427_v63 = vmax.f32 %v8423_v61, 0.0 }
 0x9bf   :  { %v8428_v11 = vmax.f32 %v8424_v33, 0.0  ;;  %v8429_v0 = vmax.f32 %v8425_v4, 0.0 }
 0x9c0   :  { %v8430_v34 = vmax.f32 %v8426_v46, 0.0 }
 0x9c1   :  { %8556 = vmatprep.mubr.f32.mxu0 %v8428_v11 }
 0x9c2   :  { %8557 = vmatmul.mubr.f32.vlgmr.msra.gmra.mrb[100].mxu0 %v8427_v63 }
 0x9c3   :  { %11455 = vmatpush1.bf16.msra.mxu0 %v11454_v25  ;;  %8758 = vmatprep.mubr.msk.f32.mxu0 %vm8488_vm3, %v8430_v34 }
 0x9c4   :  { %11456 = vmatprep.subr.bf16.mxu0 %v22025_v59 }
 0x9c7   :  { %11458 = vmatpush1.bf16.msra.mxu0 %v11457_v55 }
 0x9c8   :  { %11459 = vmatprep.subr.bf16.mxu0 %v22025_v59 }
 0x9cb   :  { %11461 = vmatpush1.bf16.msra.mxu0 %v11460_v62 }
 0x9cc   :  { %11462 = vmatprep.subr.bf16.mxu0 %v22025_v59 }
 0x9cf   :  { %11464 = vmatpush1.bf16.msra.mxu0 %v11463_v24 }
 0x9d0   :  { %11465 = vmatprep.subr.bf16.mxu0 %v22025_v59 }
 0x9d3   :  { %11467 = vmatpush1.bf16.msra.mxu0 %v11466_v27 }
 0x9d4   :  { %11468 = vmatprep.subr.bf16.mxu0 %v22025_v59 }
 0x9d7   :  { %11470 = vmatpush1.bf16.msra.mxu0 %v11469_v35 }
 0x9d8   :  { %11471 = vmatprep.subr.bf16.mxu0 %v22025_v59 }
 0x9db   :  { %11473 = vmatpush1.bf16.msra.mxu0 %v11472_v48 }
 0x9dc   :  { %11474 = vmatprep.subr.bf16.mxu0 %v22025_v59 }
 0x9df   :  { %11476 = vmatpush1.bf16.msra.mxu0 %v11475_v30 }
 0x9e0   :  { %11477 = vmatprep.subr.bf16.mxu0 %v22025_v59 }
 0x9e3   :  { %11479 = vmatpush1.bf16.msra.mxu0 %v11478_v19 }
 0x9e6   :  { %8627 = vmatmul.mubr.f32.vlgmr.msra.gmra.mrb[102].mxu0 %v8429_v0 }
 0xa95   :  { %v9062_v45 = vpop.f32.mrb[100].mxu0 }
 0xa96   :  { %v9063_v42 = vpop.f32.mrb[101].mxu0 }
 0xa97   :  { %v9064_v9 = vadd.f32 %v9063_v42, %v9062_v45 }
 0xa99   :  { %v8559_v10 = vadd.f32 %v9064_v9, %v8757_v3 }
 0xab9   :  { %v8628_v41 = vpop.f32.mrb[102].mxu0 }
 0xaba   :  { %v8629_v20 = vadd.f32 %v8628_v41, %v8559_v10  ;;  %v8630_v2 = vpop.f32.mrb[103].mxu0 }
 0xabc   :  { %8633 = vst.msk [vmem:[%s21722_s16] sm:$0xff] %vm8632_vm5, %v8629_v20 }

</bundles_post_ra>
